<compile_context>
chip_gen: v6e
topology: v6e:2x2x1
jax: 0.10.0
libtpu: 0.0.40
codegen_flags: <defaults>
</compile_context>

<pallas_src>
import functools

import jax
import jax.numpy as jnp
from jax.experimental import pallas as pl
from jax.experimental.pallas import tpu as pltpu

_VMEM_LIMIT = 32 * 1024 * 1024


# ----------------------------------------------------------------------------
# Kernels
# ----------------------------------------------------------------------------
def block1_kernel(p_ref, w_ref, b_ref, o_ref):
    """Block 1 for one sample: conv-as-matmul + InstanceNorm + LeakyReLU(0.2).

    p_ref: (1, S1, Kp)   bf16 4x4 patches (K padded to 128 lanes)
    w_ref: (Kp, 256)     bf16 conv weight (zero-padded rows)
    b_ref: (1, 256)      f32 conv bias
    o_ref: (1, S1, 256)  bf16 output (feeds block-2 patches)
    """
    x = jnp.dot(p_ref[0], w_ref[...], preferred_element_type=jnp.float32)
    x = x + b_ref[...]
    # InstanceNorm2d: biased variance over spatial positions, eps=1e-5,
    # single-pass stats (E[x^2] - mean^2).
    mean = jnp.mean(x, axis=0, keepdims=True)
    var = jnp.mean(x * x, axis=0, keepdims=True) - mean * mean
    xn = (x - mean) * jax.lax.rsqrt(var + 1e-5)
    y = jnp.where(xn > 0, xn, 0.2 * xn)
    o_ref[0] = y.astype(o_ref.dtype)


def block2_head_kernel(p_ref, w_ref, b_ref, w3_ref, o_ref, *, nt):
    """Block 2 + fused head for a tile of `nt` samples.

    p_ref : (nt, S2, 4096) bf16 4x4 patches of block-1 output, feats (kh,kw,c)
    w_ref : (4096, 512)    bf16 permuted conv weight
    b_ref : (1, 512)       f32 conv bias
    w3_ref: (1, 512)       f32 head (1x1 conv) weight
    o_ref : (nt, S2, 1)    f32 sigmoid output
    """
    _, s2, k2 = p_ref.shape
    if nt == 1:
        p = p_ref[0]                                   # (S2, K2)
    else:
        # tile-aligned merge (wrapper guarantees s2 % 8 == 0 when nt > 1)
        p = p_ref[...].reshape(nt * s2, k2)            # (nt*S2, K2)
    x = jnp.dot(p, w_ref[...], preferred_element_type=jnp.float32)
    x = (x + b_ref[...]).reshape(nt, s2, -1)           # (nt, S2, 512) f32
    # InstanceNorm2d per (sample, channel) over the S2 spatial positions.
    mean = jnp.mean(x, axis=1, keepdims=True)
    var = jnp.mean(x * x, axis=1, keepdims=True) - mean * mean
    xn = (x - mean) * jax.lax.rsqrt(var + 1e-5)
    y = jnp.where(xn > 0, xn, 0.2 * xn)                # LeakyReLU(0.2)
    # Head: 1x1 conv (bias-free) as a VPU lane reduction + sigmoid.
    logits = jnp.sum(y * w3_ref[...], axis=-1, keepdims=True)   # (nt, S2, 1)
    o_ref[...] = jax.nn.sigmoid(logits)


# ----------------------------------------------------------------------------
# pallas_call wrappers
# ----------------------------------------------------------------------------
def _block1(patches, w_mat, bias):
    """patches: (N, S1, Kp) bf16, w_mat: (Kp, 256) bf16, bias: (1, 256) f32."""
    n, s, k = patches.shape
    cout = w_mat.shape[1]
    # TODO(synk): for very large images (H >= 512, v7x 64 MiB VMEM) tile S1 and
    # accumulate sum / sum-of-squares in VMEM scratch instead of whole-sample
    # blocks.
    return pl.pallas_call(
        block1_kernel,
        out_shape=jax.ShapeDtypeStruct((n, s, cout), jnp.bfloat16),
        grid_spec=pltpu.PrefetchScalarGridSpec(
            num_scalar_prefetch=0,
            grid=(n,),
            in_specs=[
                pl.BlockSpec((1, s, k), lambda i: (i, 0, 0)),
                pl.BlockSpec((k, cout), lambda i: (0, 0)),
                pl.BlockSpec((1, cout), lambda i: (0, 0)),
            ],
            out_specs=pl.BlockSpec((1, s, cout), lambda i: (i, 0, 0)),
        ),
        compiler_params=pltpu.CompilerParams(
            dimension_semantics=("parallel",),
            vmem_limit_bytes=_VMEM_LIMIT),
    )(patches, w_mat, bias)


def _block2_head(patches, w_mat, bias, w3_row):
    """patches: (N, S2, K2) bf16 -> (N, S2, 1) f32 (block2 + head fused)."""
    n, s2, k = patches.shape
    cout = w_mat.shape[1]
    # Batch samples into the matmul M dimension (S2 is tiny for typical
    # discriminator inputs): target ~128 rows.  The in-kernel
    # (nt, S2, K) -> (nt*S2, K) merge is tile-aligned only when S2 % 8 == 0;
    # otherwise fall back to one sample per grid step.
    if s2 % 8 == 0:
        nt = min(n, pl.cdiv(128, s2))
    else:
        nt = 1
    while n % nt:
        nt -= 1
    kernel = functools.partial(block2_head_kernel, nt=nt)
    return pl.pallas_call(
        kernel,
        out_shape=jax.ShapeDtypeStruct((n, s2, 1), jnp.float32),
        grid_spec=pltpu.PrefetchScalarGridSpec(
            num_scalar_prefetch=0,
            grid=(n // nt,),
            in_specs=[
                pl.BlockSpec((nt, s2, k), lambda i: (i, 0, 0)),
                pl.BlockSpec((k, cout), lambda i: (0, 0)),
                pl.BlockSpec((1, cout), lambda i: (0, 0)),
                pl.BlockSpec((1, cout), lambda i: (0, 0)),
            ],
            out_specs=pl.BlockSpec((nt, s2, 1), lambda i: (i, 0, 0)),
        ),
        compiler_params=pltpu.CompilerParams(
            dimension_semantics=("parallel",),
            vmem_limit_bytes=_VMEM_LIMIT),
    )(patches, w_mat, bias, w3_row)


# ----------------------------------------------------------------------------
# Forward pass
# ----------------------------------------------------------------------------
@jax.jit
def discriminator_forward(img, params):
    """img: (N, C, H, W) float32 NCHW -> (N, 1, H//16, W//16) float32."""
    w1, b1, w2, b2, w3 = params
    n, c, h, w = img.shape
    ho, wo = h // 16, w // 16
    s1 = ho * wo * 16
    s2 = ho * wo
    c1 = w1.shape[0]            # 256
    c2 = w2.shape[0]            # 512

    # ---- Block-1 patches, rows ordered (h2, w2, kh, kw) so block-2 patches
    #      are a pure (free) reshape of block-1's output.  Features (c, i, j)
    #      match the PyTorch OIHW weight flattening.
    k1 = c * 16
    k1p = max(128, ((k1 + 127) // 128) * 128)            # pad K to 128 lanes
    p1 = img.reshape(n, c, ho, 4, 4, wo, 4, 4)
    p1 = p1.transpose(0, 2, 5, 3, 6, 1, 4, 7)             # (N,ho,wo,kh,kw,C,4,4)
    p1 = p1.reshape(n, s1, k1)
    p1 = jnp.pad(p1, ((0, 0), (0, 0), (0, k1p - k1))).astype(jnp.bfloat16)
    w1_mat = w1.reshape(c1, k1).T                          # rows (c, i, j)
    w1_mat = jnp.pad(w1_mat, ((0, k1p - k1), (0, 0))).astype(jnp.bfloat16)

    y1 = _block1(p1, w1_mat, b1.reshape(1, c1).astype(jnp.float32))
    # y1: (N, S1, 256) bf16 with rows ordered (h2, w2, kh, kw)

    # ---- Block-2 patches: free reshape; features ordered (kh, kw, cin).
    p2 = y1.reshape(n, s2, 16 * c1)
    w2_mat = w2.transpose(2, 3, 1, 0).reshape(16 * c1, c2).astype(jnp.bfloat16)
    b2_row = b2.reshape(1, c2).astype(jnp.float32)
    w3_row = w3.reshape(1, c2).astype(jnp.float32)

    out = _block2_head(p2, w2_mat, b2_row, w3_row)         # (N, S2, 1)
    return out.reshape(n, ho, wo, 1).transpose(0, 3, 1, 2)  # (N, 1, ho, wo)


def init_params(key, in_channels=3):
    k1, k2, k3, k4, k5 = jax.random.split(key, 5)
    scale = 0.05
    w1 = scale * jax.random.normal(k1, (256, in_channels, 4, 4), jnp.float32)
    b1 = scale * jax.random.normal(k2, (256,), jnp.float32)
    w2 = scale * jax.random.normal(k3, (512, 256, 4, 4), jnp.float32)
    b2 = scale * jax.random.normal(k4, (512,), jnp.float32)
    w3 = scale * jax.random.normal(k5, (1, 512, 1, 1), jnp.float32)
    return (w1, b1, w2, b2, w3)


# ----------------------------------------------------------------------------
# Pure-JAX f32 reference (for sanity check)
# ----------------------------------------------------------------------------
def _reference_forward(img, params):
    w1, b1, w2, b2, w3 = params

    def block(x, w, b):
        y = jax.lax.conv_general_dilated(
            x, w, window_strides=(4, 4), padding="VALID",
            dimension_numbers=("NCHW", "OIHW", "NCHW"))
        y = y + b[None, :, None, None]
        mean = jnp.mean(y, axis=(2, 3), keepdims=True)
        var = jnp.mean((y - mean) ** 2, axis=(2, 3), keepdims=True)
        yn = (y - mean) * jax.lax.rsqrt(var + 1e-5)
        return jnp.where(yn > 0, yn, 0.2 * yn)

    y = block(img, w1, b1)
    y = block(y, w2, b2)
    y = jax.lax.conv_general_dilated(
        y, w3, window_strides=(1, 1), padding="VALID",
        dimension_numbers=("NCHW", "OIHW", "NCHW"))
    return jax.nn.sigmoid(y)


if __name__ == "__main__":
    key = jax.random.PRNGKey(0)
    k_img, k_par = jax.random.split(key)

    # 64x64 input: 64 -> 16 -> 4 spatial; batch 2, 3 channels.
    img = jax.random.normal(k_img, (2, 3, 64, 64), jnp.float32)
    params = init_params(k_par, in_channels=3)

    out = jax.block_until_ready(discriminator_forward(img, params))
    assert out.shape == (2, 1, 4, 4), out.shape

    ref = jax.block_until_ready(_reference_forward(img, params))
    err = float(jnp.max(jnp.abs(out - ref)))
    # bf16 matmul operands + single-pass variance => looser tolerance than f32.
    assert err < 5e-2, err

    print("KERNEL_OK")
</pallas_src>

<mosaic_0001>
module attributes {stable_mosaic.version = 11 : i64} {
  func.func @block1_kernel(%arg0: i32, %arg1: memref<1x256x128xbf16, #tpu.memory_space<vmem>>, %arg2: memref<128x256xbf16, #tpu.memory_space<vmem>>, %arg3: memref<1x256xf32, #tpu.memory_space<vmem>>, %arg4: memref<1x256x256xbf16, #tpu.memory_space<vmem>>) attributes {dimension_semantics = [#tpu.dimension_semantics<parallel>], iteration_bounds = array<i64: 2>, scalar_prefetch = 0 : i64, scratch_operands = 0 : i64, tpu.core_type = #tpu.core_type<tc>, window_params = [{transform_indices = @transform_0, window_bounds = array<i64: 1, 256, 128>}, {pipeline_mode = #tpu.pipeline_mode<synchronous>, transform_indices = @transform_1, window_bounds = array<i64: 128, 256>}, {pipeline_mode = #tpu.pipeline_mode<synchronous>, transform_indices = @transform_2, window_bounds = array<i64: 1, 256>}, {transform_indices = @transform_3, window_bounds = array<i64: 1, 256, 256>}]} {
    %c0 = arith.constant 0 : index
    %c0_0 = arith.constant 0 : index
    %c0_1 = arith.constant 0 : index
    %0 = vector.load %arg1[%c0, %c0_0, %c0_1] : memref<1x256x128xbf16, #tpu.memory_space<vmem>>, vector<1x256x128xbf16>
    %1 = vector.shape_cast %0 : vector<1x256x128xbf16> to vector<256x128xbf16>
    %c0_2 = arith.constant 0 : index
    %c0_3 = arith.constant 0 : index
    %2 = vector.load %arg2[%c0_2, %c0_3] : memref<128x256xbf16, #tpu.memory_space<vmem>>, vector<128x256xbf16>
    %cst = arith.constant dense<0.000000e+00> : vector<256x256xf32>
    %3 = tpu.matmul %1, %2, %cst {dimension_numbers = #tpu.dot_dimension_numbers<[1], [0], [0], [1], [0, 0, 1, 1], [], []>} : vector<256x128xbf16>, vector<128x256xbf16>, vector<256x256xf32> -> vector<256x256xf32>
    %c0_4 = arith.constant 0 : index
    %c0_5 = arith.constant 0 : index
    %4 = vector.load %arg3[%c0_4, %c0_5] : memref<1x256xf32, #tpu.memory_space<vmem>>, vector<1x256xf32>
    %5 = vector.broadcast %4 : vector<1x256xf32> to vector<256x256xf32>
    %6 = arith.addf %3, %5 : vector<256x256xf32>
    %cst_6 = arith.constant dense<0.000000e+00> : vector<256xf32>
    %7 = vector.multi_reduction <add>, %6, %cst_6 [0] : vector<256x256xf32> to vector<256xf32>
    %8 = vector.shape_cast %7 : vector<256xf32> to vector<1x256xf32>
    %cst_7 = arith.constant 2.560000e+02 : f32
    %9 = vector.broadcast %cst_7 : f32 to vector<1x256xf32>
    %10 = arith.divf %8, %9 : vector<1x256xf32>
    %11 = arith.mulf %6, %6 : vector<256x256xf32>
    %cst_8 = arith.constant dense<0.000000e+00> : vector<256xf32>
    %12 = vector.multi_reduction <add>, %11, %cst_8 [0] : vector<256x256xf32> to vector<256xf32>
    %13 = vector.shape_cast %12 : vector<256xf32> to vector<1x256xf32>
    %cst_9 = arith.constant 2.560000e+02 : f32
    %14 = vector.broadcast %cst_9 : f32 to vector<1x256xf32>
    %15 = arith.divf %13, %14 : vector<1x256xf32>
    %16 = arith.mulf %10, %10 : vector<1x256xf32>
    %17 = arith.subf %15, %16 : vector<1x256xf32>
    %18 = vector.broadcast %10 : vector<1x256xf32> to vector<256x256xf32>
    %19 = arith.subf %6, %18 : vector<256x256xf32>
    %cst_10 = arith.constant 9.99999974E-6 : f32
    %20 = vector.broadcast %cst_10 : f32 to vector<1x256xf32>
    %21 = arith.addf %17, %20 : vector<1x256xf32>
    %22 = math.rsqrt %21 : vector<1x256xf32>
    %23 = vector.broadcast %22 : vector<1x256xf32> to vector<256x256xf32>
    %24 = arith.mulf %19, %23 : vector<256x256xf32>
    %cst_11 = arith.constant 0.000000e+00 : f32
    %25 = vector.broadcast %cst_11 : f32 to vector<256x256xf32>
    %26 = arith.cmpf ogt, %24, %25 : vector<256x256xf32>
    %cst_12 = arith.constant 2.000000e-01 : f32
    %27 = vector.broadcast %cst_12 : f32 to vector<256x256xf32>
    %28 = arith.mulf %27, %24 : vector<256x256xf32>
    %29 = arith.select %26, %24, %28 : vector<256x256xi1>, vector<256x256xf32>
    %30 = arith.truncf %29 : vector<256x256xf32> to vector<256x256xbf16>
    %c0_13 = arith.constant 0 : index
    %c0_14 = arith.constant 0 : index
    %c0_15 = arith.constant 0 : index
    %31 = vector.load %arg4[%c0_13, %c0_14, %c0_15] : memref<1x256x256xbf16, #tpu.memory_space<vmem>>, vector<1x256x256xbf16>
    %32 = vector.shape_cast %31 : vector<1x256x256xbf16> to vector<256x256xbf16>
    %33 = vector.shape_cast %30 : vector<256x256xbf16> to vector<1x256x256xbf16>
    tpu.vector_store %arg4[%c0_13, %c0_14, %c0_15], %33 {strides = array<i32>} : memref<1x256x256xbf16, #tpu.memory_space<vmem>>, vector<1x256x256xbf16>,
    return
  }
  func.func @transform_0(%arg0: i32) -> (i32, i32, i32) {
    %c0_i32 = arith.constant 0 : i32
    %c0_i32_0 = arith.constant 0 : i32
    %c0_i32_1 = arith.constant 0 : i32
    return %arg0, %c0_i32, %c0_i32_0 : i32, i32, i32
  }
  func.func @transform_1(%arg0: i32) -> (i32, i32) {
    %c0_i32 = arith.constant 0 : i32
    %c0_i32_0 = arith.constant 0 : i32
    %c0_i32_1 = arith.constant 0 : i32
    return %c0_i32, %c0_i32_0 : i32, i32
  }
  func.func @transform_2(%arg0: i32) -> (i32, i32) {
    %c0_i32 = arith.constant 0 : i32
    %c0_i32_0 = arith.constant 0 : i32
    %c0_i32_1 = arith.constant 0 : i32
    return %c0_i32, %c0_i32_0 : i32, i32
  }
  func.func @transform_3(%arg0: i32) -> (i32, i32, i32) {
    %c0_i32 = arith.constant 0 : i32
    %c0_i32_0 = arith.constant 0 : i32
    %c0_i32_1 = arith.constant 0 : i32
    return %arg0, %c0_i32, %c0_i32_0 : i32, i32, i32
  }
}

module attributes {stable_mosaic.version = 11 : i64} {
  func.func @block2_head_kernel(%arg0: i32, %arg1: memref<2x16x4096xbf16, #tpu.memory_space<vmem>>, %arg2: memref<4096x512xbf16, #tpu.memory_space<vmem>>, %arg3: memref<1x512xf32, #tpu.memory_space<vmem>>, %arg4: memref<1x512xf32, #tpu.memory_space<vmem>>, %arg5: memref<2x16x1xf32, #tpu.memory_space<vmem>>) attributes {dimension_semantics = [#tpu.dimension_semantics<parallel>], iteration_bounds = array<i64: 1>, scalar_prefetch = 0 : i64, scratch_operands = 0 : i64, tpu.core_type = #tpu.core_type<tc>, window_params = [{transform_indices = @transform_0, window_bounds = array<i64: 2, 16, 4096>}, {pipeline_mode = #tpu.pipeline_mode<synchronous>, transform_indices = @transform_1, window_bounds = array<i64: 4096, 512>}, {pipeline_mode = #tpu.pipeline_mode<synchronous>, transform_indices = @transform_2, window_bounds = array<i64: 1, 512>}, {pipeline_mode = #tpu.pipeline_mode<synchronous>, transform_indices = @transform_3, window_bounds = array<i64: 1, 512>}, {transform_indices = @transform_4, window_bounds = array<i64: 2, 16, 1>}]} {
    %c0 = arith.constant 0 : index
    %c0_0 = arith.constant 0 : index
    %c0_1 = arith.constant 0 : index
    %0 = vector.load %arg1[%c0, %c0_0, %c0_1] : memref<2x16x4096xbf16, #tpu.memory_space<vmem>>, vector<2x16x4096xbf16>
    %1 = vector.shape_cast %0 : vector<2x16x4096xbf16> to vector<32x4096xbf16>
    %c0_2 = arith.constant 0 : index
    %c0_3 = arith.constant 0 : index
    %2 = vector.load %arg2[%c0_2, %c0_3] : memref<4096x512xbf16, #tpu.memory_space<vmem>>, vector<4096x512xbf16>
    %cst = arith.constant dense<0.000000e+00> : vector<32x512xf32>
    %3 = tpu.matmul %1, %2, %cst {dimension_numbers = #tpu.dot_dimension_numbers<[1], [0], [0], [1], [0, 0, 1, 1], [], []>} : vector<32x4096xbf16>, vector<4096x512xbf16>, vector<32x512xf32> -> vector<32x512xf32>
    %c0_4 = arith.constant 0 : index
    %c0_5 = arith.constant 0 : index
    %4 = vector.load %arg3[%c0_4, %c0_5] : memref<1x512xf32, #tpu.memory_space<vmem>>, vector<1x512xf32>
    %5 = vector.broadcast %4 : vector<1x512xf32> to vector<32x512xf32>
    %6 = arith.addf %3, %5 : vector<32x512xf32>
    %7 = vector.shape_cast %6 : vector<32x512xf32> to vector<2x16x512xf32>
    %cst_6 = arith.constant dense<0.000000e+00> : vector<2x512xf32>
    %8 = vector.multi_reduction <add>, %7, %cst_6 [1] : vector<2x16x512xf32> to vector<2x512xf32>
    %9 = vector.shape_cast %8 : vector<2x512xf32> to vector<2x1x512xf32>
    %cst_7 = arith.constant 1.600000e+01 : f32
    %10 = vector.broadcast %cst_7 : f32 to vector<2x1x512xf32>
    %11 = arith.divf %9, %10 : vector<2x1x512xf32>
    %12 = arith.mulf %7, %7 : vector<2x16x512xf32>
    %cst_8 = arith.constant dense<0.000000e+00> : vector<2x512xf32>
    %13 = vector.multi_reduction <add>, %12, %cst_8 [1] : vector<2x16x512xf32> to vector<2x512xf32>
    %14 = vector.shape_cast %13 : vector<2x512xf32> to vector<2x1x512xf32>
    %cst_9 = arith.constant 1.600000e+01 : f32
    %15 = vector.broadcast %cst_9 : f32 to vector<2x1x512xf32>
    %16 = arith.divf %14, %15 : vector<2x1x512xf32>
    %17 = arith.mulf %11, %11 : vector<2x1x512xf32>
    %18 = arith.subf %16, %17 : vector<2x1x512xf32>
    %19 = vector.broadcast %11 : vector<2x1x512xf32> to vector<2x16x512xf32>
    %20 = arith.subf %7, %19 : vector<2x16x512xf32>
    %cst_10 = arith.constant 9.99999974E-6 : f32
    %21 = vector.broadcast %cst_10 : f32 to vector<2x1x512xf32>
    %22 = arith.addf %18, %21 : vector<2x1x512xf32>
    %23 = math.rsqrt %22 : vector<2x1x512xf32>
    %24 = vector.broadcast %23 : vector<2x1x512xf32> to vector<2x16x512xf32>
    %25 = arith.mulf %20, %24 : vector<2x16x512xf32>
    %cst_11 = arith.constant 0.000000e+00 : f32
    %26 = vector.broadcast %cst_11 : f32 to vector<2x16x512xf32>
    %27 = arith.cmpf ogt, %25, %26 : vector<2x16x512xf32>
    %cst_12 = arith.constant 2.000000e-01 : f32
    %28 = vector.broadcast %cst_12 : f32 to vector<2x16x512xf32>
    %29 = arith.mulf %28, %25 : vector<2x16x512xf32>
    %30 = arith.select %27, %25, %29 : vector<2x16x512xi1>, vector<2x16x512xf32>
    %c0_13 = arith.constant 0 : index
    %c0_14 = arith.constant 0 : index
    %31 = vector.load %arg4[%c0_13, %c0_14] : memref<1x512xf32, #tpu.memory_space<vmem>>, vector<1x512xf32>
    %32 = vector.shape_cast %31 : vector<1x512xf32> to vector<1x1x512xf32>
    %33 = vector.broadcast %32 : vector<1x1x512xf32> to vector<2x16x512xf32>
    %34 = arith.mulf %30, %33 : vector<2x16x512xf32>
    %cst_15 = arith.constant dense<0.000000e+00> : vector<2x16xf32>
    %35 = vector.multi_reduction <add>, %34, %cst_15 [2] : vector<2x16x512xf32> to vector<2x16xf32>
    %36 = vector.shape_cast %35 : vector<2x16xf32> to vector<2x16x1xf32>
    %37 = arith.negf %36 : vector<2x16x1xf32>
    %38 = math.exp %37 : vector<2x16x1xf32>
    %cst_16 = arith.constant 1.000000e+00 : f32
    %39 = vector.broadcast %cst_16 : f32 to vector<2x16x1xf32>
    %40 = arith.addf %39, %38 : vector<2x16x1xf32>
    %41 = arith.divf %39, %40 : vector<2x16x1xf32>
    %c0_17 = arith.constant 0 : index
    %c0_18 = arith.constant 0 : index
    %c0_19 = arith.constant 0 : index
    %42 = vector.load %arg5[%c0_17, %c0_18, %c0_19] : memref<2x16x1xf32, #tpu.memory_space<vmem>>, vector<2x16x1xf32>
    tpu.vector_store %arg5[%c0_17, %c0_18, %c0_19], %41 {strides = array<i32>} : memref<2x16x1xf32, #tpu.memory_space<vmem>>, vector<2x16x1xf32>,
    return
  }
  func.func @transform_0(%arg0: i32) -> (i32, i32, i32) {
    %c0_i32 = arith.constant 0 : i32
    %c0_i32_0 = arith.constant 0 : i32
    %c0_i32_1 = arith.constant 0 : i32
    return %arg0, %c0_i32, %c0_i32_0 : i32, i32, i32
  }
  func.func @transform_1(%arg0: i32) -> (i32, i32) {
    %c0_i32 = arith.constant 0 : i32
    %c0_i32_0 = arith.constant 0 : i32
    %c0_i32_1 = arith.constant 0 : i32
    return %c0_i32, %c0_i32_0 : i32, i32
  }
  func.func @transform_2(%arg0: i32) -> (i32, i32) {
    %c0_i32 = arith.constant 0 : i32
    %c0_i32_0 = arith.constant 0 : i32
    %c0_i32_1 = arith.constant 0 : i32
    return %c0_i32, %c0_i32_0 : i32, i32
  }
  func.func @transform_3(%arg0: i32) -> (i32, i32) {
    %c0_i32 = arith.constant 0 : i32
    %c0_i32_0 = arith.constant 0 : i32
    %c0_i32_1 = arith.constant 0 : i32
    return %c0_i32, %c0_i32_0 : i32, i32
  }
  func.func @transform_4(%arg0: i32) -> (i32, i32, i32) {
    %c0_i32 = arith.constant 0 : i32
    %c0_i32_0 = arith.constant 0 : i32
    %c0_i32_1 = arith.constant 0 : i32
    return %arg0, %c0_i32, %c0_i32_0 : i32, i32, i32
  }
}

</mosaic_0001>

<bundles_post_ra>
// kernel: discriminator_forward.2
= control target key start
LH: loop header
LB: loop body
LE: loop exit
PB: predicated region body
PF: predicated region fallthrough
CT: control target
= control target key end

     0   :  { %s1632_s12 = smov 0   ;;  %s3198_s0 = inlined_call_operand.vmem [shape: bf16[2,256,128], index: 0, kind: input, shape index: {}]   ;;  %s3199_s1 = inlined_call_operand.vmem [shape: bf16[128,256], index: 1, kind: input, shape index: {}]   ;;  %s3200_s2 = inlined_call_operand.vmem [shape: f32[1,256], index: 2, kind: input, shape index: {}]   ;;  %s3201_s3 = inlined_call_operand.vmem [shape: bf16[2,256,256], index: 3, kind: output, shape index: {}]  }
   0x1 LB: > { %s1425_s13 = sadd.s32 4294967295, %s1609_s12   ;;  %p1429_p0 = scmp.ge.s32.totalorder %s1609_s12, 1  ;;  %s1609_s12 = sphi %s1632_s12, %s13_s12  }
   0x2   : > { %p137_p1 = scmp.lt.s32.totalorder %s1609_s12, 3 }
   0x4   : > { %p138_p2 = pnand %p1429_p0, %p137_p1 }
   0x6   : > { %141 = sbr.rel (%p138_p2) target bundleno = 459 (0x1cb), region = 32 }
   0xb   : > { %v1559_v0 = vld [vmem:[%s3199_s1 + $0x74] ss:$8 sps:$4 sm:$0xff]   ;;  %p161_p3 = scmp.lt.s32.totalorder %s1425_s13, 1  ;;  %v1561_v1 = vld [vmem:[%s3199_s1 + $0x70] ss:$8 sps:$4 sm:$0xff]   ;;  %v1611_v2 = vmov 0   ;;  %v222_v47 = vlaneseq }
   0xc   : > { %440 = vmatprep.mubr.bf16.mxu0 %v1611_v2  ;;  %520 = vmatprep.mubr.bf16.mxu1 %v1611_v2  ;;  %v1562_v3 = vld [vmem:[%s3199_s1 + $0x64] ss:$8 sps:$4 sm:$0xff]   ;;  %v1564_v4 = vld [vmem:[%s3199_s1 + $0x60] ss:$8 sps:$4 sm:$0xff]   ;;  %v1565_v5 = vld [vmem:[%s3199_s1 + $0x54] ss:$8 sps:$4 sm:$0xff]  }
   0xd   : > { %408 = vmatprep.subr.bf16.mxu0 %v1559_v0  ;;  %1534 = vmatprep.subr.bf16.mxu1 %v1559_v0  ;;  %s3491_s13 = smov (!%p161_p3, %s1425_s13), 1  ;;  %v1567_v6 = vld [vmem:[%s3199_s1 + $0x50] ss:$8 sps:$4 sm:$0xff]   ;;  %v1568_v7 = vld [vmem:[%s3199_s1 + $0x44] ss:$8 sps:$4 sm:$0xff]   ;;  %v223_v52 = vshrl.u32 %v222_v47, 7 }
   0xe   : > { %409 = vmatpush1.bf16.msra.mxu0 %v1561_v1  ;;  %1542 = vmatpush1.bf16.msra.mxu1 %v1561_v1  ;;  %s1500_s24 = sshll.u32 %s3491_s13, 7  ;;  %v1570_v8 = vld [vmem:[%s3199_s1 + $0x40] ss:$8 sps:$4 sm:$0xff]   ;;  %v1571_v9 = vld [vmem:[%s3199_s1 + $0x34] ss:$8 sps:$4 sm:$0xff]   ;;  %s1501_s27 = sshll.u32 %s3491_s13, 8 }
   0xf   : > { %410 = vmatprep.subr.bf16.mxu0 %v1562_v3  ;;  %1535 = vmatprep.subr.bf16.mxu1 %v1562_v3  ;;  %s1669_s4 = scalar_lea.vmem %s3198_s0, %s1500_s24  ;;  %v1573_v10 = vld [vmem:[%s3199_s1 + $0x30] ss:$8 sps:$4 sm:$0xff]   ;;  %v1574_v11 = vld [vmem:[%s3199_s1 + $0x24] ss:$8 sps:$4 sm:$0xff]   ;;  %v1576_v12 = vld [vmem:[%s3199_s1 + $0x20] ss:$8 sps:$4 sm:$0xff]   ;;  %s3082_s29 = scalar_lea.vmem %s3201_s3, %s1501_s27 }
  0x10   : > { %v1577_v13 = vld [vmem:[%s3199_s1 + $0x14] ss:$8 sps:$4 sm:$0xff]   ;;  %v1579_v14 = vld [vmem:[%s3199_s1 + $0x10] ss:$8 sps:$4 sm:$0xff]   ;;  %v1580_v15 = vld [vmem:[%s3199_s1 + $0x4] ss:$8 sps:$4 sm:$0xff]  }
  0x11   : > { %v1582_v16 = vld [vmem:[%s3199_s1] ss:$8 sps:$4 sm:$0xff]   ;;  %v1585_v21 = vld [vmem:[%s1669_s4 + $0x10] sm:$0xff]   ;;  %v1586_v23 = vld [vmem:[%s1669_s4 + $0x18] sm:$0xff]   ;;  %v224_v57 = vsub.s32 0, %v223_v52  ;;  %v228_v59 = vsub.s32 1, %v223_v52 }
  0x12   : > { %411 = vmatpush1.bf16.msra.mxu0 %v1564_v4  ;;  %1543 = vmatpush1.bf16.msra.mxu1 %v1564_v4  ;;  %v1583_v17 = vld [vmem:[%s1669_s4] sm:$0xff]   ;;  %v1584_v19 = vld [vmem:[%s1669_s4 + $0x8] sm:$0xff]   ;;  %v1591_v22 = vld [vmem:[%s1669_s4 + $0x50] sm:$0xff]  }
  0x13   : > { %412 = vmatprep.subr.bf16.mxu0 %v1565_v5  ;;  %1536 = vmatprep.subr.bf16.mxu1 %v1565_v5  ;;  %v1587_v18 = vld [vmem:[%s1669_s4 + $0x40] sm:$0xff]   ;;  %v1589_v20 = vld [vmem:[%s1669_s4 + $0x48] sm:$0xff]   ;;  %v1593_v24 = vld [vmem:[%s1669_s4 + $0x58] sm:$0xff]  }
  0x14   : > { %v1588_v25 = vld [vmem:[%s1669_s4 + $0x20] sm:$0xff]   ;;  %v1590_v27 = vld [vmem:[%s1669_s4 + $0x28] sm:$0xff]   ;;  %v1592_v29 = vld [vmem:[%s1669_s4 + $0x30] sm:$0xff]  }
  0x15   : > { %v1595_v26 = vld [vmem:[%s1669_s4 + $0x60] sm:$0xff]   ;;  %v1596_v28 = vld [vmem:[%s1669_s4 + $0x68] sm:$0xff]   ;;  %v1597_v30 = vld [vmem:[%s1669_s4 + $0x70] sm:$0xff]  }
  0x16   : > { %413 = vmatpush1.bf16.msra.mxu0 %v1567_v6  ;;  %1544 = vmatpush1.bf16.msra.mxu1 %v1567_v6  ;;  %v1594_v31 = vld [vmem:[%s1669_s4 + $0x38] sm:$0xff]   ;;  %v220_v58 = vld [vmem:[%s3200_s2] sm:$0x3] }
  0x17   : > { %414 = vmatprep.subr.bf16.mxu0 %v1568_v7  ;;  %1537 = vmatprep.subr.bf16.mxu1 %v1568_v7  ;;  %v1598_v32 = vld [vmem:[%s1669_s4 + $0x78] sm:$0xff]   ;;  %v1757_v0 = vrot.slane %v220_v58, %v224_v57  ;;  %v1759_v1 = vrot.slane %v220_v58, %v228_v59 }
  0x1a   : > { %415 = vmatpush1.bf16.msra.mxu0 %v1570_v8  ;;  %1545 = vmatpush1.bf16.msra.mxu1 %v1570_v8 }
  0x1b   : > { %416 = vmatprep.subr.bf16.mxu0 %v1571_v9  ;;  %1538 = vmatprep.subr.bf16.mxu1 %v1571_v9 }
  0x1e   : > { %417 = vmatpush1.bf16.msra.mxu0 %v1573_v10  ;;  %1546 = vmatpush1.bf16.msra.mxu1 %v1573_v10 }
  0x1f   : > { %418 = vmatprep.subr.bf16.mxu0 %v1574_v11  ;;  %1539 = vmatprep.subr.bf16.mxu1 %v1574_v11 }
  0x22   : > { %419 = vmatpush1.bf16.msra.mxu0 %v1576_v12  ;;  %1547 = vmatpush1.bf16.msra.mxu1 %v1576_v12 }
  0x23   : > { %420 = vmatprep.subr.bf16.mxu0 %v1577_v13  ;;  %1540 = vmatprep.subr.bf16.mxu1 %v1577_v13 }
  0x26   : > { %421 = vmatpush1.bf16.msra.mxu0 %v1579_v14  ;;  %1548 = vmatpush1.bf16.msra.mxu1 %v1579_v14 }
  0x27   : > { %422 = vmatprep.subr.bf16.mxu0 %v1580_v15  ;;  %1541 = vmatprep.subr.bf16.mxu1 %v1580_v15 }
  0x2a   : > { %423 = vmatpush1.bf16.msra.mxu0 %v1582_v16  ;;  %1549 = vmatpush1.bf16.msra.mxu1 %v1582_v16 }
  0x2d   : > { %441 = vmatmul.mubr.bf16.vlgmr.msra.gmra.mxu0 %v1583_v17  ;;  %521 = vmatmul.mubr.bf16.vlgmr.msra.gmra.mxu1 %v1587_v18 }
  0x2e   : > { %450 = vmatprep.mubr.bf16.mxu0 %v1611_v2  ;;  %530 = vmatprep.mubr.bf16.mxu1 %v1611_v2 }
  0x35   : > { %451 = vmatmul.mubr.bf16.gmra.mxu0 %v1584_v19  ;;  %531 = vmatmul.mubr.bf16.gmra.mxu1 %v1589_v20 }
  0x36   : > { %460 = vmatprep.mubr.bf16.mxu0 %v1611_v2  ;;  %540 = vmatprep.mubr.bf16.mxu1 %v1611_v2 }
  0x3d   : > { %461 = vmatmul.mubr.bf16.gmra.mxu0 %v1585_v21  ;;  %541 = vmatmul.mubr.bf16.gmra.mxu1 %v1591_v22 }
  0x3e   : > { %470 = vmatprep.mubr.bf16.mxu0 %v1611_v2  ;;  %550 = vmatprep.mubr.bf16.mxu1 %v1611_v2 }
  0x45   : > { %471 = vmatmul.mubr.bf16.gmra.mxu0 %v1586_v23  ;;  %551 = vmatmul.mubr.bf16.gmra.mxu1 %v1593_v24 }
  0x46   : > { %480 = vmatprep.mubr.bf16.mxu0 %v1611_v2  ;;  %560 = vmatprep.mubr.bf16.mxu1 %v1611_v2 }
  0x4d   : > { %481 = vmatmul.mubr.bf16.gmra.mxu0 %v1588_v25  ;;  %561 = vmatmul.mubr.bf16.gmra.mxu1 %v1595_v26 }
  0x4e   : > { %490 = vmatprep.mubr.bf16.mxu0 %v1611_v2  ;;  %570 = vmatprep.mubr.bf16.mxu1 %v1611_v2 }
  0x55   : > { %491 = vmatmul.mubr.bf16.gmra.mxu0 %v1590_v27  ;;  %571 = vmatmul.mubr.bf16.gmra.mxu1 %v1596_v28 }
  0x56   : > { %500 = vmatprep.mubr.bf16.mxu0 %v1611_v2  ;;  %580 = vmatprep.mubr.bf16.mxu1 %v1611_v2 }
  0x5d   : > { %501 = vmatmul.mubr.bf16.gmra.mxu0 %v1592_v29  ;;  %581 = vmatmul.mubr.bf16.gmra.mxu1 %v1597_v30 }
  0x5e   : > { %510 = vmatprep.mubr.bf16.mxu0 %v1611_v2  ;;  %590 = vmatprep.mubr.bf16.mxu1 %v1611_v2 }
  0x65   : > { %511 = vmatmul.mubr.bf16.gmra.mxu0 %v1594_v31  ;;  %591 = vmatmul.mubr.bf16.gmra.mxu1 %v1598_v32 }
  0xed   : > { %v442_v33 = vpop.f32.mrf.mxu0  ;;  %v1728_v34 = vpop.f32.mrf.mxu1 }
  0xee   : > { %v1772_v8 = vadd.f32 %v442_v33, %v1757_v0 }
  0xef   : > { %v444_v35 = vpop.f32.mrf.mxu0  ;;  %v1730_v36 = vpop.f32.mrf.mxu1 }
  0xf0   : > { %v1778_v10 = vadd.f32 %v444_v35, %v1759_v1  ;;  %v678_v20 = vmul.f32 %v1772_v8, %v1772_v8 }
  0xf1   : > { %v446_v37 = vpop.f32.mrf.mxu0  ;;  %v1732_v38 = vpop.f32.mrf.mxu1 }
  0xf2   : > { %v1764_v4 = vadd.f32 %v446_v37, %v1757_v0  ;;  %v679_v23 = vmul.f32 %v1778_v10, %v1778_v10 }
  0xf3   : > { %v448_v39 = vpop.f32.mrf.mxu0  ;;  %v1734_v40 = vpop.f32.mrf.mxu1 }
  0xf4   : > { %v1767_v5 = vadd.f32 %v448_v39, %v1759_v1  ;;  %v680_v14 = vmul.f32 %v1764_v4, %v1764_v4  ;;  %v601_v24 = vadd.f32 %v1764_v4, %v1772_v8 }
  0xf5   : > { %v452_v41 = vpop.f32.mrf.mxu0  ;;  %v1736_v42 = vpop.f32.mrf.mxu1 }
  0xf6   : > { %v1775_v9 = vadd.f32 %v452_v41, %v1757_v0  ;;  %v681_v16 = vmul.f32 %v1767_v5, %v1767_v5  ;;  %v742_v28 = vadd.f32 %v680_v14, %v678_v20  ;;  %v638_v29 = vadd.f32 %v1767_v5, %v1778_v10 }
  0xf7   : > { %v454_v43 = vpop.f32.mrf.mxu0  ;;  %v1738_v44 = vpop.f32.mrf.mxu1 }
  0xf8   : > { %v1781_v11 = vadd.f32 %v454_v43, %v1759_v1  ;;  %v682_v21 = vmul.f32 %v1775_v9, %v1775_v9  ;;  %v779_v33 = vadd.f32 %v681_v16, %v679_v23  ;;  %v602_v35 = vadd.f32 %v601_v24, %v1775_v9 }
  0xf9   : > { %v456_v45 = vpop.f32.mrf.mxu0  ;;  %v1740_v46 = vpop.f32.mrf.mxu1 }
  0xfa   : > { %v1788_v15 = vadd.f32 %v456_v45, %v1757_v0  ;;  %v683_v25 = vmul.f32 %v1781_v11, %v1781_v11  ;;  %v743_v43 = vadd.f32 %v742_v28, %v682_v21 }
  0xfb   : > { %v458_v48 = vpop.f32.mrf.mxu0  ;;  %v1742_v49 = vpop.f32.mrf.mxu1 }
  0xfc   : > { %v1793_v17 = vadd.f32 %v458_v48, %v1759_v1  ;;  %v684_v30 = vmul.f32 %v1788_v15, %v1788_v15  ;;  %v639_v48 = vadd.f32 %v638_v29, %v1781_v11  ;;  %v603_v52 = vadd.f32 %v602_v35, %v1788_v15 }
  0xfd   : > { %v462_v50 = vpop.f32.mrf.mxu0  ;;  %v1744_v51 = vpop.f32.mrf.mxu1 }
  0xfe   : > { %3259 = vst [vmem:[#allocation2_spill] sm:$0xff] %v1793_v17  ;;  %v1802_v22 = vadd.f32 %v462_v50, %v1757_v0  ;;  %v685_v37 = vmul.f32 %v1793_v17, %v1793_v17  ;;  %v780_v50 = vadd.f32 %v779_v33, %v683_v25  ;;  %v744_v57 = vadd.f32 %v743_v43, %v684_v30 }
  0xff   : > { %v464_v53 = vpop.f32.mrf.mxu0  ;;  %v1746_v54 = vpop.f32.mrf.mxu1  ;;  %v640_v14 = vadd.f32 %v639_v48, %v1793_v17 }
 0x100   : > { %v1811_v26 = vadd.f32 %v464_v53, %v1759_v1  ;;  %v686_v45 = vmul.f32 %v1802_v22, %v1802_v22  ;;  %v781_v16 = vadd.f32 %v780_v50, %v685_v37  ;;  %v604_v20 = vadd.f32 %v603_v52, %v1802_v22 }
 0x101   : > { %v466_v55 = vpop.f32.mrf.mxu0  ;;  %v1748_v56 = vpop.f32.mrf.mxu1 }
 0x102   : > { %3260 = vst [vmem:[#allocation3_spill] sm:$0xff] %v1811_v26  ;;  %v1818_v31 = vadd.f32 %v466_v55, %v1757_v0  ;;  %v687_v53 = vmul.f32 %v1811_v26, %v1811_v26  ;;  %v745_v24 = vadd.f32 %v744_v57, %v686_v45  ;;  %v641_v28 = vadd.f32 %v640_v14, %v1811_v26 }
 0x103   : > { %v468_v60 = vpop.f32.mrf.mxu0  ;;  %v1753_v61 = vpop.f32.mrf.mxu1 }
 0x104   : > { %v1826_v39 = vadd.f32 %v468_v60, %v1759_v1  ;;  %v688_v58 = vmul.f32 %v1818_v31, %v1818_v31  ;;  %v782_v29 = vadd.f32 %v781_v16, %v687_v53  ;;  %v605_v30 = vadd.f32 %v604_v20, %v1818_v31 }
 0x105   : > { %v472_v62 = vpop.f32.mrf.mxu0  ;;  %v1755_v63 = vpop.f32.mrf.mxu1 }
 0x106   : > { %3261 = vst [vmem:[#allocation4_spill] sm:$0xff] %v1826_v39  ;;  %v1831_v47 = vadd.f32 %v472_v62, %v1757_v0  ;;  %v689_v21 = vmul.f32 %v1826_v39, %v1826_v39  ;;  %v746_v35 = vadd.f32 %v745_v24, %v688_v58 }
 0x107   : > { %v474_v2 = vpop.f32.mrf.mxu0  ;;  %v1761_v3 = vpop.f32.mrf.mxu1 }
 0x108   : > { %v1840_v59 = vadd.f32 %v474_v2, %v1759_v1  ;;  %v690_v25 = vmul.f32 %v1831_v47, %v1831_v47  ;;  %v783_v48 = vadd.f32 %v782_v29, %v689_v21  ;;  %v606_v53 = vadd.f32 %v605_v30, %v1831_v47 }
 0x109   : > { %v476_v6 = vpop.f32.mrf.mxu0  ;;  %v1769_v7 = vpop.f32.mrf.mxu1 }
 0x10a   : > { %3262 = vst [vmem:[#allocation5_spill] sm:$0xff] %v1840_v59  ;;  %v1843_v60 = vadd.f32 %v476_v6, %v1757_v0  ;;  %v691_v37 = vmul.f32 %v1840_v59, %v1840_v59  ;;  %v747_v57 = vadd.f32 %v746_v35, %v690_v25 }
 0x10b   : > { %v478_v12 = vpop.f32.mrf.mxu0  ;;  %v1783_v13 = vpop.f32.mrf.mxu1 }
 0x10c   : > { %v1854_v2 = vadd.f32 %v478_v12, %v1759_v1  ;;  %v692_v43 = vmul.f32 %v1843_v60, %v1843_v60  ;;  %v784_v21 = vadd.f32 %v783_v48, %v691_v37  ;;  %v607_v24 = vadd.f32 %v606_v53, %v1843_v60 }
 0x10d   : > { %v482_v18 = vpop.f32.mrf.mxu0  ;;  %v1795_v19 = vpop.f32.mrf.mxu1 }
 0x10e   : > { %3263 = vst [vmem:[#allocation6_spill] sm:$0xff] %v1854_v2  ;;  %v1857_v6 = vadd.f32 %v482_v18, %v1757_v0  ;;  %v642_v18 = vadd.f32 %v641_v28, %v1826_v39  ;;  %v693_v58 = vmul.f32 %v1854_v2, %v1854_v2  ;;  %v748_v28 = vadd.f32 %v747_v57, %v692_v43 }
 0x10f   : > { %v484_v27 = vpop.f32.mrf.mxu0  ;;  %v1820_v32 = vpop.f32.mrf.mxu1 }
 0x110   : > { %v1866_v45 = vadd.f32 %v484_v27, %v1759_v1  ;;  %v694_v14 = vmul.f32 %v1857_v6, %v1857_v6  ;;  %v643_v27 = vadd.f32 %v642_v18, %v1840_v59  ;;  %v785_v18 = vadd.f32 %v784_v21, %v693_v58 }
 0x111   : > { %v486_v41 = vpop.f32.mrf.mxu0  ;;  %v1845_v62 = vpop.f32.mrf.mxu1  ;;  %v608_v43 = vadd.f32 %v607_v24, %v1857_v6 }
 0x112   : > { %3264 = vst [vmem:[#allocation7_spill] sm:$0xff] %v1866_v45  ;;  %v1872_v50 = vadd.f32 %v486_v41, %v1757_v0  ;;  %v695_v25 = vmul.f32 %v1866_v45, %v1866_v45  ;;  %v644_v37 = vadd.f32 %v643_v27, %v1854_v2  ;;  %v749_v48 = vadd.f32 %v748_v28, %v694_v14 }
 0x113   : > { %v488_v55 = vpop.f32.mrf.mxu0  ;;  %v1868_v12 = vpop.f32.mrf.mxu1 }
 0x114   : > { %v1881_v16 = vadd.f32 %v488_v55, %v1759_v1  ;;  %v696_v30 = vmul.f32 %v1872_v50, %v1872_v50  ;;  %v645_v39 = vadd.f32 %v644_v37, %v1866_v45  ;;  %v786_v27 = vadd.f32 %v785_v18, %v695_v25 }
 0x115   : > { %v492_v23 = vpop.f32.mrf.mxu0  ;;  %v1889_v29 = vpop.f32.mrf.mxu1  ;;  %v609_v58 = vadd.f32 %v608_v43, %v1872_v50 }
 0x116   : > { %3265 = vst [vmem:[#allocation8_spill] sm:$0xff] %v1881_v16  ;;  %v1884_v20 = vadd.f32 %v492_v23, %v1757_v0  ;;  %v697_v53 = vmul.f32 %v1881_v16, %v1881_v16  ;;  %v750_v14 = vadd.f32 %v749_v48, %v696_v30  ;;  %v646_v2 = vadd.f32 %v645_v39, %v1881_v16 }
 0x117   : > { %v494_v33 = vpop.f32.mrf.mxu0  ;;  %v1913_v21 = vpop.f32.mrf.mxu1 }
 0x118   : > { %v1894_v35 = vadd.f32 %v494_v33, %v1759_v1  ;;  %v698_v57 = vmul.f32 %v1884_v20, %v1884_v20  ;;  %v610_v37 = vadd.f32 %v609_v58, %v1884_v20  ;;  %v787_v18 = vadd.f32 %v786_v27, %v697_v53 }
 0x119   : > { %v496_v52 = vpop.f32.mrf.mxu0  ;;  %v1936_v58 = vpop.f32.mrf.mxu1 }
 0x11a   : > { %3266 = vst [vmem:[#allocation9_spill] sm:$0xff] %v1894_v35  ;;  %v1897_v55 = vadd.f32 %v496_v52, %v1757_v0  ;;  %v699_v24 = vmul.f32 %v1894_v35, %v1894_v35  ;;  %v751_v43 = vadd.f32 %v750_v14, %v698_v57 }
 0x11b   : > { %v498_v41 = vpop.f32.mrf.mxu0 }
 0x11c   : > { %v1906_v59 = vadd.f32 %v498_v41, %v1759_v1  ;;  %v700_v28 = vmul.f32 %v1897_v55, %v1897_v55  ;;  %v611_v26 = vadd.f32 %v610_v37, %v1897_v55 }
 0x11d   : > { %v502_v23 = vpop.f32.mrf.mxu0 }
 0x11e   : > { %3267 = vst [vmem:[#allocation10_spill] sm:$0xff] %v1906_v59  ;;  %v1909_v33 = vadd.f32 %v502_v23, %v1757_v0  ;;  %v701_v30 = vmul.f32 %v1906_v59, %v1906_v59  ;;  %v752_v16 = vadd.f32 %v751_v43, %v700_v28 }
 0x11f   : > { %v504_v52 = vpop.f32.mrf.mxu0 }
 0x120   : > { %v1920_v41 = vadd.f32 %v504_v52, %v1759_v1  ;;  %v702_v48 = vmul.f32 %v1909_v33, %v1909_v33  ;;  %v647_v52 = vadd.f32 %v646_v2, %v1894_v35  ;;  %v612_v2 = vadd.f32 %v611_v26, %v1909_v33  ;;  %v1956_v26 = vpop.f32.mrf.mxu1 }
 0x121   : > { %v506_v23 = vpop.f32.mrf.mxu0 }
 0x122   : > { %3268 = vst [vmem:[#allocation11_spill] sm:$0xff] %v1920_v41  ;;  %v1925_v25 = vadd.f32 %v506_v23, %v1757_v0  ;;  %v788_v23 = vadd.f32 %v787_v18, %v699_v24  ;;  %v703_v53 = vmul.f32 %v1920_v41, %v1920_v41  ;;  %v648_v14 = vadd.f32 %v647_v52, %v1906_v59 }
 0x123   : > { %v508_v45 = vpop.f32.mrf.mxu0  ;;  %v753_v35 = vadd.f32 %v752_v16, %v702_v48 }
 0x124   : > { %v1934_v39 = vadd.f32 %v508_v45, %v1759_v1  ;;  %v704_v57 = vmul.f32 %v1925_v25, %v1925_v25  ;;  %v789_v45 = vadd.f32 %v788_v23, %v701_v30  ;;  %v649_v18 = vadd.f32 %v648_v14, %v1920_v41 }
 0x125   : > { %v512_v27 = vpop.f32.mrf.mxu0  ;;  %v613_v43 = vadd.f32 %v612_v2, %v1925_v25  ;;  %v1960_v30 = vadd.f32 %v1728_v34, %v1757_v0  ;;  %v1975_v34 = vadd.f32 %v1732_v38, %v1757_v0  ;;  %v1990_v38 = vadd.f32 %v1734_v40, %v1759_v1 }
 0x126   : > { %3269 = vst [vmem:[#allocation12_spill] sm:$0xff] %v1934_v39  ;;  %v1945_v37 = vadd.f32 %v512_v27, %v1757_v0  ;;  %v705_v24 = vmul.f32 %v1934_v39, %v1934_v39  ;;  %v790_v16 = vadd.f32 %v789_v45, %v703_v53  ;;  %v754_v48 = vadd.f32 %v753_v35, %v704_v57 }
 0x127   : > { %v514_v28 = vpop.f32.mrf.mxu0  ;;  %v650_v27 = vadd.f32 %v649_v18, %v1934_v39  ;;  %v1984_v39 = vpop.f32.mrf.mxu1  ;;  %3273 = vst [vmem:[#allocation16_spill] sm:$0xff] %v1990_v38  ;;  %v712_v40 = vmul.f32 %v1975_v34, %v1975_v34 }
 0x128   : > { %v706_v17 = vmul.f32 %v1945_v37, %v1945_v37  ;;  %v1954_v52 = vadd.f32 %v514_v28, %v1759_v1  ;;  %v614_v14 = vadd.f32 %v613_v43, %v1945_v37  ;;  %v1971_v28 = vadd.f32 %v1730_v36, %v1759_v1 }
 0x129   : > { %v516_v23 = vpop.f32.mrf.mxu0  ;;  %v791_v35 = vadd.f32 %v790_v16, %v705_v24  ;;  %v710_v36 = vmul.f32 %v1960_v30, %v1960_v30 }
 0x12a   : > { %3270 = vst [vmem:[#allocation13_spill] sm:$0xff] %v1954_v52  ;;  %v707_v2 = vmul.f32 %v1954_v52, %v1954_v52  ;;  %v1967_v41 = vadd.f32 %v516_v23, %v1757_v0  ;;  %3271 = vst [vmem:[#allocation14_spill] sm:$0xff] %v1971_v28  ;;  %v755_v53 = vadd.f32 %v754_v48, %v706_v17 }
 0x12b   : > { %v518_v57 = vpop.f32.mrf.mxu0  ;;  %v651_v45 = vadd.f32 %v650_v27, %v1954_v52  ;;  %v1994_v17 = vadd.f32 %v1736_v42, %v1757_v0  ;;  %v2006_v52 = vadd.f32 %v1738_v44, %v1759_v1  ;;  %v2010_v42 = vadd.f32 %v1740_v46, %v1757_v0 }
 0x12c   : > { %v615_v18 = vadd.f32 %v614_v14, %v1967_v41  ;;  %v708_v43 = vmul.f32 %v1967_v41, %v1967_v41  ;;  %v1982_v23 = vadd.f32 %v518_v57, %v1759_v1  ;;  %v792_v24 = vadd.f32 %v791_v35, %v707_v2 }
 0x12d   : > { %v711_v57 = vmul.f32 %v1971_v28, %v1971_v28  ;;  %3274 = vst [vmem:[#allocation17_spill] sm:$0xff] %v2006_v52  ;;  %v2022_v44 = vadd.f32 %v1742_v49, %v1759_v1  ;;  %v2026_v46 = vadd.f32 %v1744_v51, %v1757_v0  ;;  %v2036_v49 = vadd.f32 %v1746_v54, %v1759_v1 }
 0x12e   : > { %3272 = vst [vmem:[#allocation15_spill] sm:$0xff] %v1982_v23  ;;  %v616_v16 = vadd.f32 %v615_v18, %v1960_v30  ;;  %v756_v48 = vadd.f32 %v755_v53, %v708_v43  ;;  %v652_v27 = vadd.f32 %v651_v45, %v1982_v23  ;;  %v709_v14 = vmul.f32 %v1982_v23, %v1982_v23  ;;  %v2014_v18 = vpop.f32.mrf.mxu1 }
 0x12f   : > { %v713_v43 = vmul.f32 %v1990_v38, %v1990_v38  ;;  %v714_v23 = vmul.f32 %v1994_v17, %v1994_v17  ;;  %3275 = vst [vmem:[#allocation18_spill] sm:$0xff] %v2022_v44  ;;  %3276 = vst [vmem:[#allocation19_spill] sm:$0xff] %v2036_v49  ;;  %v2040_v51 = vadd.f32 %v1748_v56, %v1757_v0 }
 0x130   : > { %v617_v2 = vadd.f32 %v616_v16, %v1975_v34  ;;  %v757_v35 = vadd.f32 %v756_v48, %v710_v36  ;;  %v653_v53 = vadd.f32 %v652_v27, %v1971_v28  ;;  %v793_v45 = vadd.f32 %v792_v24, %v709_v14 }
 0x131   : > { %v715_v27 = vmul.f32 %v2006_v52, %v2006_v52  ;;  %v716_v14 = vmul.f32 %v2010_v42, %v2010_v42  ;;  %v2052_v54 = vadd.f32 %v1753_v61, %v1759_v1  ;;  %v2056_v56 = vadd.f32 %v1755_v63, %v1757_v0 }
 0x132   : > { %v618_v36 = vadd.f32 %v617_v2, %v1994_v17  ;;  %v758_v16 = vadd.f32 %v757_v35, %v712_v40  ;;  %v654_v24 = vadd.f32 %v653_v53, %v1990_v38  ;;  %v794_v48 = vadd.f32 %v793_v45, %v711_v57  ;;  %v2044_v53 = vpop.f32.mrf.mxu1 }
 0x133   : > { %v717_v45 = vmul.f32 %v2022_v44, %v2022_v44  ;;  %v718_v38 = vmul.f32 %v2026_v46, %v2026_v46  ;;  %3277 = vst [vmem:[#allocation20_spill] sm:$0xff] %v2052_v54  ;;  %v2066_v61 = vadd.f32 %v1761_v3, %v1759_v1  ;;  %v2070_v63 = vadd.f32 %v1769_v7, %v1757_v0 }
 0x134   : > { %v619_v2 = vadd.f32 %v618_v36, %v2010_v42  ;;  %v759_v40 = vadd.f32 %v758_v16, %v714_v23  ;;  %v655_v35 = vadd.f32 %v654_v24, %v2006_v52  ;;  %v795_v57 = vadd.f32 %v794_v48, %v713_v43 }
 0x135   : > { %v719_v24 = vmul.f32 %v2036_v49, %v2036_v49  ;;  %v720_v48 = vmul.f32 %v2040_v51, %v2040_v51  ;;  %3278 = vst [vmem:[#allocation21_spill] sm:$0xff] %v2066_v61  ;;  %v2080_v3 = vadd.f32 %v1783_v13, %v1759_v1  ;;  %v2084_v7 = vadd.f32 %v1795_v19, %v1757_v0 }
 0x136   : > { %v760_v23 = vadd.f32 %v759_v40, %v716_v14  ;;  %v656_v36 = vadd.f32 %v655_v35, %v2022_v44  ;;  %v796_v43 = vadd.f32 %v795_v57, %v715_v27  ;;  %v620_v16 = vadd.f32 %v619_v2, %v2026_v46  ;;  %v588_v35 = vpop.f32.mrf.mxu1 }
 0x137   : > { %v721_v57 = vmul.f32 %v2052_v54, %v2052_v54  ;;  %v722_v44 = vmul.f32 %v2056_v56, %v2056_v56  ;;  %3279 = vst [vmem:[#allocation22_spill] sm:$0xff] %v2080_v3  ;;  %v2094_v13 = vadd.f32 %v1820_v32, %v1759_v1  ;;  %v2098_v19 = vadd.f32 %v1845_v62, %v1757_v0 }
 0x138   : > { %v797_v14 = vadd.f32 %v796_v43, %v717_v45  ;;  %v621_v40 = vadd.f32 %v620_v16, %v2040_v51  ;;  %v761_v27 = vadd.f32 %v760_v23, %v718_v38  ;;  %v657_v2 = vadd.f32 %v656_v36, %v2036_v49 }
 0x139   : > { %v723_v43 = vmul.f32 %v2066_v61, %v2066_v61  ;;  %v724_v16 = vmul.f32 %v2070_v63, %v2070_v63  ;;  %3280 = vst [vmem:[#allocation23_spill] sm:$0xff] %v2094_v13  ;;  %v2108_v32 = vadd.f32 %v1868_v12, %v1759_v1  ;;  %v2112_v62 = vadd.f32 %v1889_v29, %v1757_v0 }
 0x13a   : > { %v622_v45 = vadd.f32 %v621_v40, %v2056_v56  ;;  %v762_v38 = vadd.f32 %v761_v27, %v720_v48  ;;  %v658_v23 = vadd.f32 %v657_v2, %v2052_v54  ;;  %v798_v36 = vadd.f32 %v797_v14, %v719_v24  ;;  %v592_v14 = vpop.f32.mrf.mxu1 }
 0x13b   : > { %v725_v2 = vmul.f32 %v2080_v3, %v2080_v3  ;;  %v726_v54 = vmul.f32 %v2084_v7, %v2084_v7  ;;  %3281 = vst [vmem:[#allocation24_spill] sm:$0xff] %v2108_v32  ;;  %v2122_v12 = vadd.f32 %v1913_v21, %v1759_v1  ;;  %v2126_v29 = vadd.f32 %v1936_v58, %v1757_v0 }
 0x13c   : > { %v623_v40 = vadd.f32 %v622_v45, %v2070_v63  ;;  %v763_v48 = vadd.f32 %v762_v38, %v722_v44  ;;  %v659_v27 = vadd.f32 %v658_v23, %v2066_v61  ;;  %v799_v24 = vadd.f32 %v798_v36, %v721_v57 }
 0x13d   : > { %v727_v23 = vmul.f32 %v2094_v13, %v2094_v13  ;;  %v728_v36 = vmul.f32 %v2098_v19, %v2098_v19  ;;  %3282 = vst [vmem:[#allocation25_spill] sm:$0xff] %v2122_v12  ;;  %v2136_v21 = vadd.f32 %v1956_v26, %v1759_v1  ;;  %v2140_v58 = vadd.f32 %v1984_v39, %v1757_v0 }
 0x13e   : > { %v624_v44 = vadd.f32 %v623_v40, %v2084_v7  ;;  %v764_v45 = vadd.f32 %v763_v48, %v724_v16  ;;  %v660_v57 = vadd.f32 %v659_v27, %v2080_v3  ;;  %v800_v38 = vadd.f32 %v799_v24, %v723_v43  ;;  %v594_v27 = vpop.f32.mrf.mxu1 }
 0x13f   : > { %v729_v24 = vmul.f32 %v2108_v32, %v2108_v32  ;;  %v730_v3 = vmul.f32 %v2112_v62, %v2112_v62  ;;  %3283 = vst [vmem:[#allocation26_spill] sm:$0xff] %v2136_v21  ;;  %v2150_v26 = vadd.f32 %v2014_v18, %v1759_v1  ;;  %v2154_v39 = vadd.f32 %v2044_v53, %v1757_v0 }
 0x140   : > { %v625_v40 = vadd.f32 %v624_v44, %v2098_v19  ;;  %v765_v16 = vadd.f32 %v764_v45, %v726_v54  ;;  %v661_v48 = vadd.f32 %v660_v57, %v2094_v13  ;;  %v801_v43 = vadd.f32 %v800_v38, %v725_v2 }
 0x141   : > { %v731_v57 = vmul.f32 %v2122_v12, %v2122_v12  ;;  %v732_v38 = vmul.f32 %v2126_v29, %v2126_v29  ;;  %3284 = vst [vmem:[#allocation27_spill] sm:$0xff] %v2150_v26  ;;  %v2163_v18 = vadd.f32 %v588_v35, %v1759_v1  ;;  %v2166_v13 = vadd.f32 %v592_v14, %v1757_v0 }
 0x142   : > { %v766_v44 = vadd.f32 %v765_v16, %v728_v36  ;;  %v662_v54 = vadd.f32 %v661_v48, %v2108_v32  ;;  %v802_v45 = vadd.f32 %v801_v43, %v727_v23  ;;  %v626_v2 = vadd.f32 %v625_v40, %v2112_v62  ;;  %v596_v48 = vpop.f32.mrf.mxu1 }
 0x143   : > { %v733_v43 = vmul.f32 %v2136_v21, %v2136_v21  ;;  %v734_v32 = vmul.f32 %v2140_v58, %v2140_v58  ;;  %3285 = vst [vmem:[#allocation28_spill] sm:$0xff] %v2163_v18  ;;  %v2178_v35 = vadd.f32 %v596_v48, %v1757_v0 }
 0x144   : > { %v803_v36 = vadd.f32 %v802_v45, %v729_v24  ;;  %v767_v16 = vadd.f32 %v766_v44, %v730_v3  ;;  %v663_v23 = vadd.f32 %v662_v54, %v2122_v12  ;;  %v627_v40 = vadd.f32 %v626_v2, %v2126_v29 }
 0x145   : > { %v735_v54 = vmul.f32 %v2150_v26, %v2150_v26  ;;  %v736_v45 = vmul.f32 %v2154_v39, %v2154_v39  ;;  %v2175_v2 = vadd.f32 %v594_v27, %v1759_v1  ;;  %v740_v48 = vmul.f32 %v2178_v35, %v2178_v35 }
 0x146   : > { %v804_v53 = vadd.f32 %v803_v36, %v731_v57  ;;  %v768_v24 = vadd.f32 %v767_v16, %v732_v38  ;;  %v664_v3 = vadd.f32 %v663_v23, %v2136_v21  ;;  %v628_v44 = vadd.f32 %v627_v40, %v2140_v58  ;;  %v598_v36 = vpop.f32.mrf.mxu1 }
 0x147   : > { %3286 = vst [vmem:[#allocation29_spill] sm:$0xff] %v2175_v2  ;;  %v737_v16 = vmul.f32 %v2163_v18, %v2163_v18  ;;  %v738_v23 = vmul.f32 %v2166_v13, %v2166_v13 }
 0x148   : > { %v805_v14 = vadd.f32 %v804_v53, %v733_v43  ;;  %v769_v12 = vadd.f32 %v768_v24, %v734_v32  ;;  %v665_v57 = vadd.f32 %v664_v3, %v2150_v26  ;;  %v629_v38 = vadd.f32 %v628_v44, %v2154_v39 }
 0x149   : > { %v739_v32 = vmul.f32 %v2175_v2, %v2175_v2  ;;  %v2193_v43 = vadd.f32 %v598_v36, %v1759_v1 }
 0x14a   : > { %v806_v40 = vadd.f32 %v805_v14, %v735_v54  ;;  %v770_v21 = vadd.f32 %v769_v12, %v736_v45  ;;  %v666_v27 = vadd.f32 %v665_v57, %v2163_v18  ;;  %v630_v0 = vadd.f32 %v629_v38, %v2166_v13 }
 0x14b   : > { %3287 = vst [vmem:[#allocation30_spill] sm:$0xff] %v2193_v43  ;;  %v741_v18 = vmul.f32 %v2193_v43, %v2193_v43 }
 0x14c   : > { %v807_v53 = vadd.f32 %v806_v40, %v737_v16  ;;  %v771_v24 = vadd.f32 %v770_v21, %v738_v23  ;;  %v667_v3 = vadd.f32 %v666_v27, %v2175_v2  ;;  %v631_v44 = vadd.f32 %v630_v0, %v2178_v35 }
 0x14e   : > { %v808_v12 = vadd.f32 %v807_v53, %v739_v32  ;;  %v632_v54 = vrot.slane %v631_v44, 4  ;;  %v772_v45 = vadd.f32 %v771_v24, %v740_v48  ;;  %v668_v14 = vadd.f32 %v667_v3, %v2193_v43 }
 0x150   : > { %v633_v57 = vadd.f32 %v632_v54, %v631_v44  ;;  %v773_v38 = vrot.slane %v772_v45, 4  ;;  %v669_v1 = vrot.slane %v668_v14, 4  ;;  %v809_v36 = vadd.f32 %v808_v12, %v741_v18 }
 0x152   : > { %v634_v26 = vrot.slane %v633_v57, 2  ;;  %v774_v61 = vadd.f32 %v773_v38, %v772_v45  ;;  %v670_v23 = vadd.f32 %v669_v1, %v668_v14  ;;  %v810_v40 = vrot.slane %v809_v36, 4 }
 0x154   : > { %v635_v16 = vadd.f32 %v634_v26, %v633_v57  ;;  %v775_v21 = vrot.slane %v774_v61, 2  ;;  %v671_v32 = vrot.slane %v670_v23, 2  ;;  %v811_v53 = vadd.f32 %v810_v40, %v809_v36 }
 0x156   : > { %v636_v27 = vrot.slane %v635_v16, 1  ;;  %v776_v0 = vadd.f32 %v775_v21, %v774_v61  ;;  %v672_v3 = vadd.f32 %v671_v32, %v670_v23  ;;  %v812_v44 = vrot.slane %v811_v53, 2 }
 0x158   : > { %v637_v48 = vadd.f32 %v636_v27, %v635_v16  ;;  %v777_v24 = vrot.slane %v776_v0, 1  ;;  %v673_v43 = vrot.slane %v672_v3, 1  ;;  %v813_v49 = vadd.f32 %v812_v44, %v811_v53  ;;  %v3288_v44 = vld [vmem:[#allocation2_spill] sm:$0xff] }
 0x15a   : > { %v2200_v54 = vmul.f32 0.00390625, %v637_v48  ;;  %v778_v2 = vadd.f32 %v777_v24, %v776_v0  ;;  %v674_v18 = vadd.f32 %v673_v43, %v672_v3  ;;  %v814_v12 = vrot.slane %v813_v49, 1 }
 0x15c   : > { %v816_v45 = vmul.f32 0.00390625, %v778_v2  ;;  %v818_v26 = vmul.f32 %v2200_v54, %v2200_v54  ;;  %v2204_v57 = vmul.f32 0.00390625, %v674_v18  ;;  %v815_v61 = vadd.f32 %v814_v12, %v813_v49 }
 0x15d   : > { %v3314_v52 = vsub.f32 %v1772_v8, %v2200_v54  ;;  %v3315_v36 = vsub.f32 %v1764_v4, %v2200_v54  ;;  %v3316_v1 = vsub.f32 %v1775_v9, %v2200_v54  ;;  %v3317_v32 = vsub.f32 %v1788_v15, %v2200_v54 }
 0x15e   : > { %v820_v14 = vsub.f32 %v816_v45, %v818_v26  ;;  %v817_v21 = vmul.f32 0.00390625, %v815_v61  ;;  %v819_v43 = vmul.f32 %v2204_v57, %v2204_v57  ;;  %v3289_v45 = vld [vmem:[#allocation3_spill] sm:$0xff]  ;;  %v3290_v26 = vld [vmem:[#allocation4_spill] sm:$0xff]  ;;  %v3318_v8 = vsub.f32 %v1802_v22, %v2200_v54 }
 0x15f   : > { %v3293_v61 = vld [vmem:[#allocation7_spill] sm:$0xff]  ;;  %v3319_v4 = vsub.f32 %v1818_v31, %v2200_v54  ;;  %v3320_v9 = vsub.f32 %v1831_v47, %v2200_v54  ;;  %v3321_v15 = vsub.f32 %v1843_v60, %v2200_v54  ;;  %v3322_v22 = vsub.f32 %v1857_v6, %v2200_v54 }
 0x160   : > { %v886_v38 = vadd.f32 1e-05, %v820_v14  ;;  %v821_v12 = vsub.f32 %v817_v21, %v819_v43  ;;  %v3291_v21 = vld [vmem:[#allocation5_spill] sm:$0xff]  ;;  %v3323_v31 = vsub.f32 %v1872_v50, %v2200_v54  ;;  %v3324_v47 = vsub.f32 %v1884_v20, %v2200_v54 }
 0x161   : > { %v3325_v60 = vsub.f32 %v1897_v55, %v2200_v54  ;;  %v3326_v6 = vsub.f32 %v1909_v33, %v2200_v54  ;;  %v3327_v50 = vsub.f32 %v1925_v25, %v2200_v54  ;;  %v3328_v20 = vsub.f32 %v1945_v37, %v2200_v54 }
 0x162   : > { %1599 = vrsqrt.f32 %v886_v38  ;;  %v887_v14 = vadd.f32 1e-05, %v821_v12  ;;  %v3292_v12 = vld [vmem:[#allocation6_spill] sm:$0xff]  ;;  %v3294_v38 = vld [vmem:[#allocation8_spill] sm:$0xff]  ;;  %v3329_v55 = vsub.f32 %v1967_v41, %v2200_v54  ;;  %v3330_v33 = vsub.f32 %v1960_v30, %v2200_v54 }
 0x163   : > { %v3331_v25 = vsub.f32 %v1975_v34, %v2200_v54  ;;  %v3332_v37 = vsub.f32 %v1994_v17, %v2200_v54  ;;  %v3333_v41 = vsub.f32 %v2010_v42, %v2200_v54  ;;  %v3334_v30 = vsub.f32 %v2026_v46, %v2200_v54 }
 0x164   : > { %1601 = vrsqrt.f32 %v887_v14  ;;  %v3335_v34 = vsub.f32 %v2040_v51, %v2200_v54  ;;  %v3336_v17 = vsub.f32 %v2056_v56, %v2200_v54  ;;  %v3337_v42 = vsub.f32 %v2070_v63, %v2200_v54 }
 0x165   : > { %v3338_v46 = vsub.f32 %v2084_v7, %v2200_v54  ;;  %v3339_v51 = vsub.f32 %v2098_v19, %v2200_v54  ;;  %v3340_v56 = vsub.f32 %v2112_v62, %v2200_v54  ;;  %v3341_v63 = vsub.f32 %v2126_v29, %v2200_v54 }
 0x166   : > { %v3342_v7 = vsub.f32 %v2140_v58, %v2200_v54  ;;  %v3343_v19 = vsub.f32 %v2154_v39, %v2200_v54  ;;  %v3344_v62 = vsub.f32 %v2166_v13, %v2200_v54  ;;  %v3345_v29 = vsub.f32 %v2178_v35, %v2200_v54 }
 0x167   : > { %v3346_v35 = vsub.f32 %v1778_v10, %v2204_v57  ;;  %v3348_v10 = vsub.f32 %v1767_v5, %v2204_v57 }
 0x16f   : > { %v1600_v40 = vpop.eup %1599 }
 0x170   : > { %v2339_v3 = vmul.f32 %v1600_v40, %v3314_v52  ;;  %v2344_v27 = vmul.f32 %v1600_v40, %v3315_v36  ;;  %v2349_v14 = vmul.f32 %v1600_v40, %v3316_v1  ;;  %v2354_v28 = vmul.f32 %v1600_v40, %v3317_v32 }
 0x171   : > { %v2359_v52 = vmul.f32 %v1600_v40, %v3318_v8  ;;  %v2364_v36 = vmul.f32 %v1600_v40, %v3319_v4  ;;  %v2369_v1 = vmul.f32 %v1600_v40, %v3320_v9  ;;  %v2374_v32 = vmul.f32 %v1600_v40, %v3321_v15  ;;  %v2496_v2 = vpop.eup %1601 }
 0x172   : > { %v2379_v8 = vmul.f32 %v1600_v40, %v3322_v22  ;;  %v2384_v4 = vmul.f32 %v1600_v40, %v3323_v31  ;;  %v2389_v9 = vmul.f32 %v1600_v40, %v3324_v47  ;;  %v2394_v15 = vmul.f32 %v1600_v40, %v3325_v60 }
 0x173   : > { %v2399_v22 = vmul.f32 %v1600_v40, %v3326_v6  ;;  %v2404_v31 = vmul.f32 %v1600_v40, %v3327_v50  ;;  %v2409_v47 = vmul.f32 %v1600_v40, %v3328_v20  ;;  %v2414_v60 = vmul.f32 %v1600_v40, %v3329_v55 }
 0x174   : > { %v2419_v6 = vmul.f32 %v1600_v40, %v3330_v33  ;;  %v2424_v50 = vmul.f32 %v1600_v40, %v3331_v25  ;;  %v2429_v20 = vmul.f32 %v1600_v40, %v3332_v37  ;;  %v2434_v55 = vmul.f32 %v1600_v40, %v3333_v41 }
 0x175   : > { %v2439_v33 = vmul.f32 %v1600_v40, %v3334_v30  ;;  %v2444_v25 = vmul.f32 %v1600_v40, %v3335_v34  ;;  %v2449_v37 = vmul.f32 %v1600_v40, %v3336_v17  ;;  %v2454_v41 = vmul.f32 %v1600_v40, %v3337_v42 }
 0x176   : > { %v2459_v30 = vmul.f32 %v1600_v40, %v3338_v46  ;;  %v2464_v34 = vmul.f32 %v1600_v40, %v3339_v51  ;;  %v2469_v17 = vmul.f32 %v1600_v40, %v3340_v56  ;;  %v2474_v42 = vmul.f32 %v1600_v40, %v3341_v63 }
 0x177   : > { %v2479_v46 = vmul.f32 %v1600_v40, %v3342_v7  ;;  %v2484_v51 = vmul.f32 %v1600_v40, %v3343_v19  ;;  %v2489_v56 = vmul.f32 %v1600_v40, %v3344_v62  ;;  %v2494_v63 = vmul.f32 %v1600_v40, %v3345_v29 }
 0x178   : > { %vm954_vm0 = vcmp.gt.f32.partialorder %v2339_v3, 0.0  ;;  %vm956_vm1 = vcmp.gt.f32.partialorder %v2344_v27, 0.0  ;;  %vm958_vm2 = vcmp.gt.f32.partialorder %v2349_v14, 0.0  ;;  %vm960_vm3 = vcmp.gt.f32.partialorder %v2354_v28, 0.0 }
 0x179   : > { %vm962_vm4 = vcmp.gt.f32.partialorder %v2359_v52, 0.0  ;;  %vm964_vm5 = vcmp.gt.f32.partialorder %v2364_v36, 0.0  ;;  %vm966_vm6 = vcmp.gt.f32.partialorder %v2369_v1, 0.0  ;;  %v1018_v13 = vmul.f32 0.2, %v2339_v3 }
 0x17a   : > { %vm968_vm7 = vcmp.gt.f32.partialorder %v2374_v32, 0.0  ;;  %vm970_vm8 = vcmp.gt.f32.partialorder %v2379_v8, 0.0  ;;  %vm972_vm9 = vcmp.gt.f32.partialorder %v2384_v4, 0.0  ;;  %v1020_v58 = vmul.f32 0.2, %v2344_v27 }
 0x17b   : > { %vm978_vm12 = vcmp.gt.f32.partialorder %v2399_v22, 0.0  ;;  %v1022_v39 = vmul.f32 0.2, %v2349_v14  ;;  %v2519_v54 = vmul.f32 %v2496_v2, %v3346_v35  ;;  %v1024_v40 = vmul.f32 0.2, %v2354_v28 }
 0x17c   : > { %v1026_v7 = vmul.f32 0.2, %v2359_v52  ;;  %v1028_v19 = vmul.f32 0.2, %v2364_v36  ;;  %v2532_v62 = vmul.f32 %v2496_v2, %v3348_v10  ;;  %vm996_vm11 = vcmp.gt.f32.partialorder %v2444_v25, 0.0 }
 0x17d   : > { %3347 = vst [vmem:[#allocation2_spill] sm:$0xff] %v2519_v54  ;;  %v1030_v29 = vmul.f32 0.2, %v2369_v1  ;;  %v1032_v35 = vmul.f32 0.2, %v2374_v32  ;;  %v2544_v5 = vsel %vm954_vm0, %v2339_v3, %v1018_v13  ;;  %vm1004_vm10 = vcmp.gt.f32.partialorder %v2464_v34, 0.0 }
 0x17e   : > { %3349 = vst [vmem:[#allocation3_spill] sm:$0xff] %v2532_v62  ;;  %v1034_v0 = vmul.f32 0.2, %v2379_v8  ;;  %3350 = vst [vmem:[#allocation4_spill] sm:$0xff] %v2544_v5  ;;  %v1036_v10 = vmul.f32 0.2, %v2384_v4  ;;  %v2556_v53 = vsel %vm956_vm1, %v2344_v27, %v1020_v58  ;;  %v2568_v49 = vsel %vm958_vm2, %v2349_v14, %v1022_v39 }
 0x17f   : > { %v1038_v62 = vmul.f32 0.2, %v2389_v9  ;;  %v1040_v54 = vmul.f32 0.2, %v2394_v15  ;;  %3351 = vst [vmem:[#allocation5_spill] sm:$0xff] %v2556_v53  ;;  %vm1008_vm13 = vcmp.gt.f32.partialorder %v2474_v42, 0.0  ;;  %v2578_v23 = vsel %vm960_vm3, %v2354_v28, %v1024_v40 }
 0x180   : > { %vm1010_vm14 = vcmp.gt.f32.partialorder %v2479_v46, 0.0  ;;  %vm1012_vm15 = vcmp.gt.f32.partialorder %v2484_v51, 0.0  ;;  %v1042_v3 = vmul.f32 0.2, %v2399_v22  ;;  %v1044_v13 = vmul.f32 0.2, %v2404_v31 }
 0x181   : > { %v1046_v5 = vmul.f32 0.2, %v2409_v47  ;;  %3352 = vst [vmem:[#allocation6_spill] sm:$0xff] %v2568_v49  ;;  %vm1014_vm1 = vcmp.gt.f32.partialorder %v2489_v56, 0.0  ;;  %vm1016_vm0 = vcmp.gt.f32.partialorder %v2494_v63, 0.0  ;;  %3353 = vst [vmem:[#allocation7_spill] sm:$0xff] %v2578_v23  ;;  %v2586_v49 = vsel %vm962_vm4, %v2359_v52, %v1026_v7 }
 0x182   : > { %v1048_v27 = vmul.f32 0.2, %v2414_v60  ;;  %v1050_v58 = vmul.f32 0.2, %v2419_v6  ;;  %v1052_v53 = vmul.f32 0.2, %v2424_v50  ;;  %v2594_v28 = vsel %vm964_vm5, %v2364_v36, %v1028_v19 }
 0x183   : > { %v1054_v16 = vmul.f32 0.2, %v2429_v20  ;;  %v1056_v14 = vmul.f32 0.2, %v2434_v55  ;;  %v1058_v39 = vmul.f32 0.2, %v2439_v33  ;;  %v2602_v52 = vsel %vm966_vm6, %v2369_v1, %v1030_v29 }
 0x184   : > { %3354 = vst [vmem:[#allocation8_spill] sm:$0xff] %v2586_v49  ;;  %v1060_v43 = vmul.f32 0.2, %v2444_v25  ;;  %v1062_v48 = vmul.f32 0.2, %v2449_v37  ;;  %3355 = vst [vmem:[#allocation31_spill] sm:$0xff] %v2594_v28  ;;  %v2610_v36 = vsel %vm968_vm7, %v2374_v32, %v1032_v35  ;;  %v2617_v1 = vsel %vm970_vm8, %v2379_v8, %v1034_v0 }
 0x185   : > { %v1064_v24 = vmul.f32 0.2, %v2454_v41  ;;  %v1066_v40 = vmul.f32 0.2, %v2459_v30  ;;  %v1068_v23 = vmul.f32 0.2, %v2464_v34  ;;  %v2622_v29 = vsel %vm972_vm9, %v2384_v4, %v1036_v10 }
 0x186   : > { %v1070_v59 = vmul.f32 0.2, %v2469_v17  ;;  %3356 = vst [vmem:[#allocation32_spill] sm:$0xff] %v2602_v52  ;;  %v1072_v7 = vmul.f32 0.2, %v2474_v42  ;;  %vm3357_vm2 = vcmp.gt.f32.partialorder %v2389_v9, 0.0  ;;  %v2637_v0 = vsel %vm978_vm12, %v2399_v22, %v1042_v3 }
 0x187   : > { %v1074_v49 = vmul.f32 0.2, %v2479_v46  ;;  %v1076_v18 = vmul.f32 0.2, %v2484_v51  ;;  %v1078_v19 = vmul.f32 0.2, %v2489_v56  ;;  %v2627_v52 = vsel %vm3357_vm2, %v2389_v9, %v1038_v62 }
 0x188   : > { %v1080_v28 = vmul.f32 0.2, %v2494_v63  ;;  %3358 = vst [vmem:[#allocation33_spill] sm:$0xff] %v2627_v52  ;;  %vm3359_vm3 = vcmp.gt.f32.partialorder %v2394_v15, 0.0  ;;  %3361 = vst [vmem:[#allocation35_spill] sm:$0xff] %v2637_v0  ;;  %vm3362_vm4 = vcmp.gt.f32.partialorder %v2404_v31, 0.0 }
 0x189   : > { %v2632_v32 = vsel %vm3359_vm3, %v2394_v15, %v1040_v54  ;;  %v2642_v8 = vsel %vm3362_vm4, %v2404_v31, %v1044_v13  ;;  %vm3364_vm5 = vcmp.gt.f32.partialorder %v2409_v47, 0.0  ;;  %vm3366_vm6 = vcmp.gt.f32.partialorder %v2414_v60, 0.0  ;;  %v3405_v62 = vld [vmem:[#allocation11_spill] sm:$0xff]  ;;  %v3409_v13 = vld [vmem:[#allocation13_spill] sm:$0xff] }
 0x18a   : > { %3360 = vst [vmem:[#allocation34_spill] sm:$0xff] %v2632_v32  ;;  %3363 = vst [vmem:[#allocation36_spill] sm:$0xff] %v2642_v8  ;;  %v2647_v4 = vsel %vm3364_vm5, %v2409_v47, %v1046_v5  ;;  %v2652_v9 = vsel %vm3366_vm6, %v2414_v60, %v1048_v27  ;;  %vm3368_vm7 = vcmp.gt.f32.partialorder %v2419_v6, 0.0  ;;  %vm3370_vm8 = vcmp.gt.f32.partialorder %v2424_v50, 0.0  ;;  %v3407_v5 = vld [vmem:[#allocation12_spill] sm:$0xff] }
 0x18b   : > { %3365 = vst [vmem:[#allocation37_spill] sm:$0xff] %v2647_v4  ;;  %3367 = vst [vmem:[#allocation38_spill] sm:$0xff] %v2652_v9  ;;  %v2657_v15 = vsel %vm3368_vm7, %v2419_v6, %v1050_v58  ;;  %v2662_v22 = vsel %vm3370_vm8, %v2424_v50, %v1052_v53  ;;  %vm3372_vm9 = vcmp.gt.f32.partialorder %v2429_v20, 0.0  ;;  %vm3374_vm12 = vcmp.gt.f32.partialorder %v2434_v55, 0.0 }
 0x18c   : > { %3369 = vst [vmem:[#allocation39_spill] sm:$0xff] %v2657_v15  ;;  %3371 = vst [vmem:[#allocation40_spill] sm:$0xff] %v2662_v22  ;;  %v2667_v31 = vsel %vm3372_vm9, %v2429_v20, %v1054_v16  ;;  %v2672_v47 = vsel %vm3374_vm12, %v2434_v55, %v1056_v14  ;;  %vm3376_vm2 = vcmp.gt.f32.partialorder %v2439_v33, 0.0  ;;  %v2682_v53 = vsel %vm996_vm11, %v2444_v25, %v1060_v43  ;;  %v3411_v14 = vld [vmem:[#allocation15_spill] sm:$0xff] }
 0x18d   : > { %3373 = vst [vmem:[#allocation41_spill] sm:$0xff] %v2667_v31  ;;  %3375 = vst [vmem:[#allocation42_spill] sm:$0xff] %v2672_v47  ;;  %v2677_v60 = vsel %vm3376_vm2, %v2439_v33, %v1058_v39  ;;  %vm3379_vm3 = vcmp.gt.f32.partialorder %v2449_v37, 0.0  ;;  %vm3381_vm4 = vcmp.gt.f32.partialorder %v2454_v41, 0.0  ;;  %vm3383_vm5 = vcmp.gt.f32.partialorder %v2459_v30, 0.0 }
 0x18e   : > { %3377 = vst [vmem:[#allocation43_spill] sm:$0xff] %v2677_v60  ;;  %3378 = vst [vmem:[#allocation44_spill] sm:$0xff] %v2682_v53  ;;  %v2687_v16 = vsel %vm3379_vm3, %v2449_v37, %v1062_v48  ;;  %v2692_v6 = vsel %vm3381_vm4, %v2454_v41, %v1064_v24  ;;  %v2697_v50 = vsel %vm3383_vm5, %v2459_v30, %v1066_v40  ;;  %vm3386_vm11 = vcmp.gt.f32.partialorder %v2469_v17, 0.0  ;;  %v3413_v40 = vld [vmem:[#allocation14_spill] sm:$0xff] }
 0x18f   : > { %3380 = vst [vmem:[#allocation45_spill] sm:$0xff] %v2687_v16  ;;  %3382 = vst [vmem:[#allocation46_spill] sm:$0xff] %v2692_v6  ;;  %v2702_v43 = vsel %vm1004_vm10, %v2464_v34, %v1068_v23  ;;  %v2707_v48 = vsel %vm3386_vm11, %v2469_v17, %v1070_v59  ;;  %v2712_v24 = vsel %vm1008_vm13, %v2474_v42, %v1072_v7 }
 0x190   : > { %3384 = vst [vmem:[#allocation47_spill] sm:$0xff] %v2697_v50  ;;  %3385 = vst [vmem:[#allocation48_spill] sm:$0xff] %v2702_v43  ;;  %v2717_v20 = vsel %vm1010_vm14, %v2479_v46, %v1074_v49  ;;  %v2722_v23 = vsel %vm1012_vm15, %v2484_v51, %v1076_v18  ;;  %v2727_v59 = vsel %vm1014_vm1, %v2489_v56, %v1078_v19  ;;  %v3401_v51 = vld [vmem:[#allocation9_spill] sm:$0xff] }
 0x191   : > { %3387 = vst [vmem:[#allocation49_spill] sm:$0xff] %v2707_v48  ;;  %3388 = vst [vmem:[#allocation50_spill] sm:$0xff] %v2712_v24  ;;  %v2732_v55 = vsel %vm1016_vm0, %v2494_v63, %v1080_v28  ;;  %v3393_v33 = vsub.f32 %v1781_v11, %v2204_v57  ;;  %v3394_v18 = vsub.f32 %v3288_v44, %v2204_v57  ;;  %v3403_v63 = vld [vmem:[#allocation10_spill] sm:$0xff] }
 0x192   : > { %3389 = vst [vmem:[#allocation51_spill] sm:$0xff] %v2717_v20  ;;  %3390 = vst [vmem:[#allocation52_spill] sm:$0xff] %v2722_v23  ;;  %v3395_v37 = vsub.f32 %v3289_v45, %v2204_v57  ;;  %v3396_v30 = vsub.f32 %v3290_v26, %v2204_v57  ;;  %v3397_v34 = vsub.f32 %v3291_v21, %v2204_v57 }
 0x193   : > { %3391 = vst [vmem:[#allocation53_spill] sm:$0xff] %v2727_v59  ;;  %3392 = vst [vmem:[#allocation54_spill] sm:$0xff] %v2732_v55  ;;  %v2738_v49 = vmul.f32 %v2496_v2, %v3393_v33  ;;  %v2744_v25 = vmul.f32 %v2496_v2, %v3394_v18  ;;  %v3398_v17 = vsub.f32 %v3292_v12, %v2204_v57  ;;  %v3415_v33 = vld [vmem:[#allocation16_spill] sm:$0xff] }
 0x194   : > { %v2750_v41 = vmul.f32 %v2496_v2, %v3395_v37  ;;  %v2756_v11 = vmul.f32 %v2496_v2, %v3396_v30  ;;  %v2762_v44 = vmul.f32 %v2496_v2, %v3397_v34  ;;  %v3399_v42 = vsub.f32 %v3293_v61, %v2204_v57  ;;  %v3417_v30 = vld [vmem:[#allocation17_spill] sm:$0xff] }
 0x195   : > { %v2768_v45 = vmul.f32 %v2496_v2, %v3398_v17  ;;  %v3400_v46 = vsub.f32 %v3294_v38, %v2204_v57  ;;  %v3402_v56 = vsub.f32 %v3401_v51, %v2204_v57  ;;  %v3404_v54 = vsub.f32 %v3403_v63, %v2204_v57 }
 0x196   : > { %v2774_v26 = vmul.f32 %v2496_v2, %v3399_v42  ;;  %v3406_v35 = vsub.f32 %v3405_v62, %v2204_v57  ;;  %v3408_v10 = vsub.f32 %v3407_v5, %v2204_v57  ;;  %v3410_v27 = vsub.f32 %v3409_v13, %v2204_v57  ;;  %v3419_v42 = vld [vmem:[#allocation18_spill] sm:$0xff]  ;;  %v3423_v62 = vld [vmem:[#allocation20_spill] sm:$0xff] }
 0x197   : > { %v2780_v21 = vmul.f32 %v2496_v2, %v3400_v46  ;;  %v2786_v12 = vmul.f32 %v2496_v2, %v3402_v56  ;;  %v2792_v61 = vmul.f32 %v2496_v2, %v3404_v54  ;;  %v3412_v39 = vsub.f32 %v3411_v14, %v2204_v57  ;;  %v3421_v56 = vld [vmem:[#allocation19_spill] sm:$0xff]  ;;  %v3427_v14 = vld [vmem:[#allocation22_spill] sm:$0xff] }
 0x198   : > { %v2798_v38 = vmul.f32 %v2496_v2, %v3406_v35  ;;  %v2804_v3 = vmul.f32 %v2496_v2, %v3408_v10  ;;  %v2810_v58 = vmul.f32 %v2496_v2, %v3410_v27  ;;  %v3414_v7 = vsub.f32 %v3413_v40, %v2204_v57  ;;  %v3425_v10 = vld [vmem:[#allocation21_spill] sm:$0xff] }
 0x199   : > { %v2816_v28 = vmul.f32 %v2496_v2, %v3412_v39  ;;  %v3416_v18 = vsub.f32 %v3415_v33, %v2204_v57  ;;  %v3418_v34 = vsub.f32 %v3417_v30, %v2204_v57  ;;  %v3420_v46 = vsub.f32 %v3419_v42, %v2204_v57  ;;  %v3431_v30 = vld [vmem:[#allocation24_spill] sm:$0xff] }
 0x19a   : > { %v2822_v19 = vmul.f32 %v2496_v2, %v3414_v7  ;;  %v3422_v63 = vsub.f32 %v3421_v56, %v2204_v57  ;;  %v3424_v35 = vsub.f32 %v3423_v62, %v2204_v57  ;;  %v3426_v13 = vsub.f32 %v3425_v10, %v2204_v57  ;;  %v3429_v7 = vld [vmem:[#allocation23_spill] sm:$0xff]  ;;  %v3435_v62 = vld [vmem:[#allocation26_spill] sm:$0xff] }
 0x19b   : > { %v2828_v37 = vmul.f32 %v2496_v2, %v3416_v18  ;;  %v2834_v17 = vmul.f32 %v2496_v2, %v3418_v34  ;;  %v2840_v51 = vmul.f32 %v2496_v2, %v3420_v46  ;;  %v3428_v39 = vsub.f32 %v3427_v14, %v2204_v57  ;;  %v3433_v46 = vld [vmem:[#allocation25_spill] sm:$0xff] }
 0x19c   : > { %v2846_v54 = vmul.f32 %v2496_v2, %v3422_v63  ;;  %v2852_v5 = vmul.f32 %v2496_v2, %v3424_v35  ;;  %v2858_v27 = vmul.f32 %v2496_v2, %v3426_v13  ;;  %v3430_v33 = vsub.f32 %v3429_v7, %v2204_v57  ;;  %v3437_v13 = vld [vmem:[#allocation27_spill] sm:$0xff]  ;;  %v3439_v7 = vld [vmem:[#allocation28_spill] sm:$0xff] }
 0x19d   : > { %v2864_v40 = vmul.f32 %v2496_v2, %v3428_v39  ;;  %v3432_v34 = vsub.f32 %v3431_v30, %v2204_v57  ;;  %v3434_v56 = vsub.f32 %v3433_v46, %v2204_v57  ;;  %v3436_v35 = vsub.f32 %v3435_v62, %v2204_v57  ;;  %v3442_v46 = vld [vmem:[#allocation3_spill] sm:$0xff] }
 0x19e   : > { %v2870_v18 = vmul.f32 %v2496_v2, %v3430_v33  ;;  %v3438_v14 = vsub.f32 %v3437_v13, %v2204_v57  ;;  %v3440_v33 = vsub.f32 %v3439_v7, %v2204_v57  ;;  %vm957_vm13 = vcmp.gt.f32.partialorder %v3442_v46, 0.0 }
 0x19f   : > { %v2876_v42 = vmul.f32 %v2496_v2, %v3432_v34  ;;  %v2882_v63 = vmul.f32 %v2496_v2, %v3434_v56  ;;  %v2888_v10 = vmul.f32 %v2496_v2, %v3436_v35  ;;  %v3441_v34 = vld [vmem:[#allocation2_spill] sm:$0xff]  ;;  %vm959_vm14 = vcmp.gt.f32.partialorder %v2738_v49, 0.0  ;;  %v3443_v56 = vld [vmem:[#allocation29_spill] sm:$0xff] }
 0x1a0   : > { %v2894_v39 = vmul.f32 %v2496_v2, %v3438_v14  ;;  %v2900_v30 = vmul.f32 %v2496_v2, %v3440_v33  ;;  %vm955_vm10 = vcmp.gt.f32.partialorder %v3441_v34, 0.0  ;;  %vm961_vm15 = vcmp.gt.f32.partialorder %v2744_v25, 0.0  ;;  %v3445_v33 = vld [vmem:[#allocation30_spill] sm:$0xff] }
 0x1a1   : > { %vm963_vm0 = vcmp.gt.f32.partialorder %v2750_v41, 0.0  ;;  %vm965_vm1 = vcmp.gt.f32.partialorder %v2756_v11, 0.0  ;;  %vm967_vm6 = vcmp.gt.f32.partialorder %v2762_v44, 0.0  ;;  %vm969_vm7 = vcmp.gt.f32.partialorder %v2768_v45, 0.0 }
 0x1a2   : > { %vm971_vm8 = vcmp.gt.f32.partialorder %v2774_v26, 0.0  ;;  %v3444_v62 = vsub.f32 %v3443_v56, %v2204_v57  ;;  %v1019_v13 = vmul.f32 0.2, %v3441_v34  ;;  %v1021_v14 = vmul.f32 0.2, %v3442_v46 }
 0x1a3   : > { %v1023_v7 = vmul.f32 0.2, %v2738_v49  ;;  %v3446_v56 = vsub.f32 %v3445_v33, %v2204_v57  ;;  %vm985_vm11 = vcmp.gt.f32.partialorder %v2816_v28, 0.0  ;;  %vm987_vm3 = vcmp.gt.f32.partialorder %v2822_v19, 0.0 }
 0x1a4   : > { %v2916_v35 = vmul.f32 %v2496_v2, %v3444_v62  ;;  %v1025_v55 = vmul.f32 0.2, %v2744_v25  ;;  %v1027_v59 = vmul.f32 0.2, %v2750_v41  ;;  %v1029_v23 = vmul.f32 0.2, %v2756_v11 }
 0x1a5   : > { %v2929_v62 = vmul.f32 %v2496_v2, %v3446_v56  ;;  %vm997_vm5 = vcmp.gt.f32.partialorder %v2852_v5, 0.0  ;;  %v1031_v57 = vmul.f32 0.2, %v2762_v44  ;;  %v1033_v2 = vmul.f32 0.2, %v2768_v45 }
 0x1a6   : > { %v1035_v33 = vmul.f32 0.2, %v2774_v26  ;;  %v2948_v56 = vsel %vm955_vm10, %v3441_v34, %v1019_v13  ;;  %vm1005_vm9 = vcmp.gt.f32.partialorder %v2876_v42, 0.0  ;;  %v1037_v20 = vmul.f32 0.2, %v2780_v21 }
 0x1a7   : > { %v1039_v24 = vmul.f32 0.2, %v2786_v12  ;;  %v1041_v48 = vmul.f32 0.2, %v2792_v61  ;;  %v2960_v43 = vsel %vm957_vm13, %v3442_v46, %v1021_v14  ;;  %vm1009_vm4 = vcmp.gt.f32.partialorder %v2888_v10, 0.0 }
 0x1a8   : > { %vm1011_vm2 = vcmp.gt.f32.partialorder %v2894_v39, 0.0  ;;  %vm1013_vm12 = vcmp.gt.f32.partialorder %v2900_v30, 0.0  ;;  %v1043_v34 = vmul.f32 0.2, %v2798_v38  ;;  %v1045_v13 = vmul.f32 0.2, %v2804_v3 }
 0x1a9   : > { %v1047_v50 = vmul.f32 0.2, %v2810_v58  ;;  %v2972_v6 = vsel %vm959_vm14, %v2738_v49, %v1023_v7  ;;  %vm1015_vm13 = vcmp.gt.f32.partialorder %v2916_v35, 0.0  ;;  %vm1017_vm10 = vcmp.gt.f32.partialorder %v2929_v62, 0.0 }
 0x1aa   : > { %v1049_v46 = vmul.f32 0.2, %v2816_v28  ;;  %v1051_v14 = vmul.f32 0.2, %v2822_v19  ;;  %v1053_v16 = vmul.f32 0.2, %v2828_v37  ;;  %v1089_v53 = vsel %vm961_vm15, %v2744_v25, %v1025_v55 }
 0x1ab   : > { %v1055_v60 = vmul.f32 0.2, %v2834_v17  ;;  %v1057_v47 = vmul.f32 0.2, %v2840_v51  ;;  %v1059_v49 = vmul.f32 0.2, %v2846_v54  ;;  %v1091_v7 = vsel %vm963_vm0, %v2750_v41, %v1027_v59 }
 0x1ac   : > { %v1061_v31 = vmul.f32 0.2, %v2852_v5  ;;  %v1063_v22 = vmul.f32 0.2, %v2858_v27  ;;  %v1065_v15 = vmul.f32 0.2, %v2864_v40  ;;  %v1093_v55 = vsel %vm965_vm1, %v2756_v11, %v1029_v23 }
 0x1ad   : > { %v1067_v25 = vmul.f32 0.2, %v2870_v18  ;;  %v1069_v9 = vmul.f32 0.2, %v2876_v42  ;;  %v1071_v4 = vmul.f32 0.2, %v2882_v63  ;;  %v1095_v59 = vsel %vm967_vm6, %v2762_v44, %v1031_v57 }
 0x1ae   : > { %v1073_v41 = vmul.f32 0.2, %v2888_v10  ;;  %v1075_v8 = vmul.f32 0.2, %v2894_v39  ;;  %v1077_v0 = vmul.f32 0.2, %v2900_v30  ;;  %v1097_v23 = vsel %vm969_vm7, %v2768_v45, %v1033_v2 }
 0x1af   : > { %v1079_v11 = vmul.f32 0.2, %v2916_v35  ;;  %v1081_v32 = vmul.f32 0.2, %v2929_v62  ;;  %v1099_v52 = vsel %vm971_vm8, %v2774_v26, %v1035_v33  ;;  %vm3447_vm14 = vcmp.gt.f32.partialorder %v2780_v21, 0.0  ;;  %v3471_v33 = vld [vmem:[#allocation36_spill] sm:$0xff] }
 0x1b0   : > { %v1101_v44 = vsel %vm3447_vm14, %v2780_v21, %v1037_v20  ;;  %vm3448_vm15 = vcmp.gt.f32.partialorder %v2786_v12, 0.0  ;;  %vm3449_vm0 = vcmp.gt.f32.partialorder %v2792_v61, 0.0  ;;  %vm3450_vm1 = vcmp.gt.f32.partialorder %v2798_v38, 0.0 }
 0x1b1   : > { %v1103_v57 = vsel %vm3448_vm15, %v2786_v12, %v1039_v24  ;;  %v1105_v45 = vsel %vm3449_vm0, %v2792_v61, %v1041_v48  ;;  %v1107_v2 = vsel %vm3450_vm1, %v2798_v38, %v1043_v34  ;;  %vm3451_vm6 = vcmp.gt.f32.partialorder %v2804_v3, 0.0  ;;  %v3474_v34 = vld [vmem:[#allocation39_spill] sm:$0xff] }
 0x1b2   : > { %v1109_v26 = vsel %vm3451_vm6, %v2804_v3, %v1045_v13  ;;  %vm3452_vm7 = vcmp.gt.f32.partialorder %v2810_v58, 0.0  ;;  %v1113_v24 = vsel %vm985_vm11, %v2816_v28, %v1049_v46  ;;  %v1115_v48 = vsel %vm987_vm3, %v2822_v19, %v1051_v14  ;;  %v3461_v28 = vld [vmem:[#allocation4_spill] sm:$0xff] }
 0x1b3   : > { %v1111_v20 = vsel %vm3452_vm7, %v2810_v58, %v1047_v50  ;;  %vm3453_vm8 = vcmp.gt.f32.partialorder %v2828_v37, 0.0  ;;  %vm3454_vm14 = vcmp.gt.f32.partialorder %v2834_v17, 0.0  ;;  %vm3455_vm15 = vcmp.gt.f32.partialorder %v2840_v51, 0.0  ;;  %v3475_v46 = vld [vmem:[#allocation40_spill] sm:$0xff] }
 0x1b4   : > { %v1117_v21 = vsel %vm3453_vm8, %v2828_v37, %v1053_v16  ;;  %v3042_v12 = vsel %vm3454_vm14, %v2834_v17, %v1055_v60  ;;  %v3047_v50 = vsel %vm3455_vm15, %v2840_v51, %v1057_v47  ;;  %vm3456_vm11 = vcmp.gt.f32.partialorder %v2846_v54, 0.0  ;;  %v3463_v17 = vld [vmem:[#allocation6_spill] sm:$0xff]  ;;  %v3464_v51 = vld [vmem:[#allocation7_spill] sm:$0xff] }
 0x1b5   : > { %v3052_v61 = vsel %vm3456_vm11, %v2846_v54, %v1059_v49  ;;  %v3057_v38 = vsel %vm997_vm5, %v2852_v5, %v1061_v31  ;;  %vm3457_vm3 = vcmp.gt.f32.partialorder %v2858_v27, 0.0  ;;  %vm3458_vm0 = vcmp.gt.f32.partialorder %v2864_v40, 0.0  ;;  %v3465_v5 = vld [vmem:[#allocation8_spill] sm:$0xff]  ;;  %v3476_v49 = vld [vmem:[#allocation41_spill] sm:$0xff] }
 0x1b6   : > { %v3062_v60 = vsel %vm3457_vm3, %v2858_v27, %v1063_v22  ;;  %v3067_v47 = vsel %vm3458_vm0, %v2864_v40, %v1065_v15  ;;  %vm3459_vm1 = vcmp.gt.f32.partialorder %v2870_v18, 0.0  ;;  %v3077_v31 = vsel %vm1005_vm9, %v2876_v42, %v1069_v9  ;;  %v3466_v40 = vld [vmem:[#allocation31_spill] sm:$0xff] }
 0x1b7   : > { %v3072_v16 = vsel %vm3459_vm1, %v2870_v18, %v1067_v25  ;;  %vm3460_vm5 = vcmp.gt.f32.partialorder %v2882_v63, 0.0  ;;  %v3092_v22 = vsel %vm1009_vm4, %v2888_v10, %v1073_v41  ;;  %v3097_v9 = vsel %vm1011_vm2, %v2894_v39, %v1075_v8  ;;  %v3462_v8 = vld [vmem:[#allocation5_spill] sm:$0xff]  ;;  %v3467_v18 = vld [vmem:[#allocation32_spill] sm:$0xff]  ;;  %v3469_v39 = vld [vmem:[#allocation34_spill] sm:$0xff] }
 0x1b8   : > { %v3087_v15 = vsel %vm3460_vm5, %v2882_v63, %v1071_v4  ;;  %v3102_v3 = vsel %vm1013_vm12, %v2900_v30, %v1077_v0  ;;  %v3107_v4 = vsel %vm1015_vm13, %v2916_v35, %v1079_v11  ;;  %v3112_v58 = vsel %vm1017_vm10, %v2929_v62, %v1081_v32  ;;  %v3470_v35 = vld [vmem:[#allocation35_spill] sm:$0xff] }
 0x1b9   : > { %v1502_v19 = vpack.c.bf16 %v2948_v56, %v3461_v28  ;;  %v1503_v37 = vpack.c.bf16 %v2960_v43, %v3462_v8  ;;  %v1504_v0 = vpack.c.bf16 %v2972_v6, %v3463_v17  ;;  %v1505_v54 = vpack.c.bf16 %v1089_v53, %v3464_v51  ;;  %v3468_v6 = vld [vmem:[#allocation33_spill] sm:$0xff]  ;;  %v3489_v28 = vld [vmem:[#allocation54_spill] sm:$0xff] }
 0x1ba   : > { %v1506_v27 = vpack.c.bf16 %v1091_v7, %v3465_v5  ;;  %v1507_v32 = vpack.c.bf16 %v1093_v55, %v3466_v40  ;;  %v1508_v42 = vpack.c.bf16 %v1095_v59, %v3467_v18  ;;  %v1509_v63 = vpack.c.bf16 %v1097_v23, %v2610_v36  ;;  %v3477_v55 = vld [vmem:[#allocation42_spill] sm:$0xff]  ;;  %v3478_v59 = vld [vmem:[#allocation43_spill] sm:$0xff]  ;;  %v3479_v23 = vld [vmem:[#allocation44_spill] sm:$0xff] }
 0x1bb   : > { %v1510_v10 = vpack.c.bf16 %v1099_v52, %v2617_v1  ;;  %v1511_v43 = vpack.c.bf16 %v1101_v44, %v2622_v29  ;;  %1338 = vst [vmem:[%s3082_s29] sm:$0xff] %v1502_v19  ;;  %1339 = vst [vmem:[%s3082_s29 + $0x8] sm:$0xff] %v1503_v37  ;;  %v1512_v53 = vpack.c.bf16 %v1103_v57, %v3468_v6  ;;  %v3472_v52 = vld [vmem:[#allocation37_spill] sm:$0xff]  ;;  %v3473_v1 = vld [vmem:[#allocation38_spill] sm:$0xff] }
 0x1bc   : > { %v1513_v30 = vpack.c.bf16 %v1105_v45, %v3469_v39  ;;  %v1514_v62 = vpack.c.bf16 %v1107_v2, %v3470_v35  ;;  %v1515_v56 = vpack.c.bf16 %v1109_v26, %v3471_v33  ;;  %1340 = vst [vmem:[%s3082_s29 + $0x10] sm:$0xff] %v1504_v0  ;;  %1341 = vst [vmem:[%s3082_s29 + $0x18] sm:$0xff] %v1505_v54  ;;  %v3480_v44 = vld [vmem:[#allocation45_spill] sm:$0xff]  ;;  %v3481_v45 = vld [vmem:[#allocation46_spill] sm:$0xff] }
 0x1bd   : > { %1342 = vst [vmem:[%s3082_s29 + $0x20] sm:$0xff] %v1506_v27  ;;  %1343 = vst [vmem:[%s3082_s29 + $0x28] sm:$0xff] %v1507_v32  ;;  %v1516_v36 = vpack.c.bf16 %v1111_v20, %v3472_v52  ;;  %v1517_v29 = vpack.c.bf16 %v1113_v24, %v3473_v1  ;;  %v1518_v13 = vpack.c.bf16 %v1115_v48, %v3474_v34  ;;  %v3482_v26 = vld [vmem:[#allocation47_spill] sm:$0xff]  ;;  %v3483_v24 = vld [vmem:[#allocation48_spill] sm:$0xff] }
 0x1be   : > { %v1519_v14 = vpack.c.bf16 %v1117_v21, %v3475_v46  ;;  %1344 = vst [vmem:[%s3082_s29 + $0x30] sm:$0xff] %v1508_v42  ;;  %1345 = vst [vmem:[%s3082_s29 + $0x38] sm:$0xff] %v1509_v63  ;;  %v1520_v7 = vpack.c.bf16 %v3042_v12, %v3476_v49  ;;  %v1521_v25 = vpack.c.bf16 %v3047_v50, %v3477_v55  ;;  %v3484_v21 = vld [vmem:[#allocation49_spill] sm:$0xff]  ;;  %v3485_v50 = vld [vmem:[#allocation50_spill] sm:$0xff] }
 0x1bf   : > { %1346 = vst [vmem:[%s3082_s29 + $0x40] sm:$0xff] %v1510_v10  ;;  %1347 = vst [vmem:[%s3082_s29 + $0x48] sm:$0xff] %v1511_v43  ;;  %v1522_v41 = vpack.c.bf16 %v3052_v61, %v3478_v59  ;;  %v1523_v11 = vpack.c.bf16 %v3057_v38, %v3479_v23  ;;  %v1524_v57 = vpack.c.bf16 %v3062_v60, %v3480_v44  ;;  %v3486_v38 = vld [vmem:[#allocation51_spill] sm:$0xff] }
 0x1c0   : > { %1348 = vst [vmem:[%s3082_s29 + $0x50] sm:$0xff] %v1512_v53  ;;  %1349 = vst [vmem:[%s3082_s29 + $0x58] sm:$0xff] %v1513_v30  ;;  %v1525_v2 = vpack.c.bf16 %v3067_v47, %v3481_v45  ;;  %v1526_v20 = vpack.c.bf16 %v3072_v16, %v3482_v26  ;;  %v1527_v48 = vpack.c.bf16 %v3077_v31, %v3483_v24  ;;  %v3487_v47 = vld [vmem:[#allocation52_spill] sm:$0xff]  ;;  %v3488_v31 = vld [vmem:[#allocation53_spill] sm:$0xff] }
 0x1c1   : > { %1350 = vst [vmem:[%s3082_s29 + $0x60] sm:$0xff] %v1514_v62  ;;  %1351 = vst [vmem:[%s3082_s29 + $0x68] sm:$0xff] %v1515_v56  ;;  %v1528_v12 = vpack.c.bf16 %v3087_v15, %v3484_v21  ;;  %v1529_v61 = vpack.c.bf16 %v3092_v22, %v3485_v50  ;;  %v1530_v60 = vpack.c.bf16 %v3097_v9, %v3486_v38 }
 0x1c2   : > { %1352 = vst [vmem:[%s3082_s29 + $0x70] sm:$0xff] %v1516_v36  ;;  %1353 = vst [vmem:[%s3082_s29 + $0x78] sm:$0xff] %v1517_v29  ;;  %v1531_v16 = vpack.c.bf16 %v3102_v3, %v3487_v47  ;;  %v1532_v15 = vpack.c.bf16 %v3107_v4, %v3488_v31  ;;  %v1533_v19 = vpack.c.bf16 %v3112_v58, %v3489_v28 }
 0x1c3   : > { %1354 = vst [vmem:[%s3082_s29 + $0x80] sm:$0xff] %v1518_v13  ;;  %1355 = vst [vmem:[%s3082_s29 + $0x88] sm:$0xff] %v1519_v14 }
 0x1c4   : > { %1356 = vst [vmem:[%s3082_s29 + $0x90] sm:$0xff] %v1520_v7  ;;  %1357 = vst [vmem:[%s3082_s29 + $0x98] sm:$0xff] %v1521_v25 }
 0x1c5   : > { %1358 = vst [vmem:[%s3082_s29 + $0xa0] sm:$0xff] %v1522_v41  ;;  %1359 = vst [vmem:[%s3082_s29 + $0xa8] sm:$0xff] %v1523_v11 }
 0x1c6   : > { %1360 = vst [vmem:[%s3082_s29 + $0xb0] sm:$0xff] %v1524_v57  ;;  %1361 = vst [vmem:[%s3082_s29 + $0xb8] sm:$0xff] %v1525_v2 }
 0x1c7   : > { %1362 = vst [vmem:[%s3082_s29 + $0xc0] sm:$0xff] %v1526_v20  ;;  %1363 = vst [vmem:[%s3082_s29 + $0xc8] sm:$0xff] %v1527_v48 }
 0x1c8   : > { %1364 = vst [vmem:[%s3082_s29 + $0xd0] sm:$0xff] %v1528_v12  ;;  %1365 = vst [vmem:[%s3082_s29 + $0xd8] sm:$0xff] %v1529_v61 }
 0x1c9   : > { %1366 = vst [vmem:[%s3082_s29 + $0xe0] sm:$0xff] %v1530_v60  ;;  %1367 = vst [vmem:[%s3082_s29 + $0xe8] sm:$0xff] %v1531_v16 }
 0x1ca   : > { %1368 = vst [vmem:[%s3082_s29 + $0xf0] sm:$0xff] %v1532_v15  ;;  %1369 = vst [vmem:[%s3082_s29 + $0xf8] sm:$0xff] %v1533_v19 }
 0x1cb PF: > { %s13_s12 = sadd.s32 1, %s1609_s12  }
 0x1cc   : > { %p10_p4 = scmp.ge.s32.totalorder %s13_s12, 4  }
 0x1ce   :  { %12 = sbr.rel (!%p10_p4) target bundleno = 1 (0x1), region = 62 }

// kernel: discriminator_forward.3
= control target key start
LH: loop header
LB: loop body
LE: loop exit
PB: predicated region body
PF: predicated region fallthrough
CT: control target
= control target key end

     0   :  { %s15538_s1 = inlined_call_operand.vmem [shape: bf16[4096,512], index: 1, kind: input, shape index: {}]   ;;  %s15539_s0 = inlined_call_operand.vmem [shape: bf16[2,16,4096], index: 0, kind: input, shape index: {}]   ;;  %s15540_s2 = inlined_call_operand.vmem [shape: f32[1,512], index: 2, kind: input, shape index: {}]   ;;  %s15541_s3 = inlined_call_operand.vmem [shape: f32[1,512], index: 3, kind: input, shape index: {}]   ;;  %s15542_s4 = inlined_call_operand.vmem [shape: f32[2,16,1], index: 4, kind: output, shape index: {}]  }
   0x1   :  { %v9703_v0 = vld [vmem:[%s15538_s1 + $0xe4] ss:$16 sps:$4 sm:$0xff]   ;;  %v9707_v2 = vld [vmem:[%s15538_s1 + $0xe0] ss:$16 sps:$4 sm:$0xff]   ;;  %v18_v50 = vld [vmem:[%s15539_s0 + $0x8] sm:$0xff] }
   0x2   :  { %v9705_v1 = vld [vmem:[%s15538_s1 + $0x2e4] ss:$16 sps:$4 sm:$0xff]   ;;  %6567 = vmatprep.subr.bf16.mxu0 %v9703_v0  ;;  %v9708_v3 = vld [vmem:[%s15538_s1 + $0x2e0] ss:$16 sps:$4 sm:$0xff]   ;;  %v34_v51 = vld [vmem:[%s15539_s0 + $0x88] sm:$0xff] }
   0x3   :  { %6620 = vmatprep.subr.bf16.mxu1 %v9705_v1  ;;  %v9709_v4 = vld [vmem:[%s15538_s1 + $0xc4] ss:$16 sps:$4 sm:$0xff]   ;;  %6568 = vmatpush1.bf16.msra.mxu0 %v9707_v2  ;;  %v9713_v6 = vld [vmem:[%s15538_s1 + $0xc0] ss:$16 sps:$4 sm:$0xff]   ;;  %v11462_v55 = vcombine.high %v18_v50, %v34_v51 }
   0x4   :  { %6621 = vmatpush1.bf16.msra.mxu1 %v9708_v3  ;;  %v9711_v5 = vld [vmem:[%s15538_s1 + $0x2c4] ss:$16 sps:$4 sm:$0xff]   ;;  %6569 = vmatprep.subr.bf16.mxu0 %v9709_v4  ;;  %v9714_v7 = vld [vmem:[%s15538_s1 + $0x2c0] ss:$16 sps:$4 sm:$0xff]  }
   0x5   :  { %6622 = vmatprep.subr.bf16.mxu1 %v9711_v5  ;;  %v9715_v8 = vld [vmem:[%s15538_s1 + $0xa4] ss:$16 sps:$4 sm:$0xff]   ;;  %v9719_v10 = vld [vmem:[%s15538_s1 + $0xa0] ss:$16 sps:$4 sm:$0xff]   ;;  %6652 = vmatprep.mubr.bf16.mxu1 %v11462_v55 }
   0x6   :  { %v9717_v9 = vld [vmem:[%s15538_s1 + $0x2a4] ss:$16 sps:$4 sm:$0xff]   ;;  %v9720_v11 = vld [vmem:[%s15538_s1 + $0x2a0] ss:$16 sps:$4 sm:$0xff]  }
   0x7   :  { %6570 = vmatpush1.bf16.msra.mxu0 %v9713_v6  ;;  %v9721_v12 = vld [vmem:[%s15538_s1 + $0x84] ss:$16 sps:$4 sm:$0xff]   ;;  %v9725_v14 = vld [vmem:[%s15538_s1 + $0x80] ss:$16 sps:$4 sm:$0xff]  }
   0x8   :  { %6623 = vmatpush1.bf16.msra.mxu1 %v9714_v7  ;;  %6571 = vmatprep.subr.bf16.mxu0 %v9715_v8  ;;  %v9723_v13 = vld [vmem:[%s15538_s1 + $0x284] ss:$16 sps:$4 sm:$0xff]   ;;  %v9726_v15 = vld [vmem:[%s15538_s1 + $0x280] ss:$16 sps:$4 sm:$0xff]  }
   0x9   :  { %6624 = vmatprep.subr.bf16.mxu1 %v9717_v9  ;;  %v9727_v16 = vld [vmem:[%s15538_s1 + $0x64] ss:$16 sps:$4 sm:$0xff]   ;;  %v9731_v18 = vld [vmem:[%s15538_s1 + $0x60] ss:$16 sps:$4 sm:$0xff]   ;;  %v11516_v9 = vcombine.low %v18_v50, %v34_v51  ;;  %v11650_v50 = vld [vmem:[%s15539_s0 + $0x98] sm:$0xff] }
   0xa   :  { %v9729_v17 = vld [vmem:[%s15538_s1 + $0x264] ss:$16 sps:$4 sm:$0xff]   ;;  %v9732_v19 = vld [vmem:[%s15538_s1 + $0x260] ss:$16 sps:$4 sm:$0xff]  }
   0xb   :  { %6572 = vmatpush1.bf16.msra.mxu0 %v9719_v10  ;;  %v9733_v20 = vld [vmem:[%s15538_s1 + $0x44] ss:$16 sps:$4 sm:$0xff]   ;;  %v9737_v22 = vld [vmem:[%s15538_s1 + $0x40] ss:$16 sps:$4 sm:$0xff]  }
   0xc   :  { %6625 = vmatpush1.bf16.msra.mxu1 %v9720_v11  ;;  %6573 = vmatprep.subr.bf16.mxu0 %v9721_v12  ;;  %v9735_v21 = vld [vmem:[%s15538_s1 + $0x244] ss:$16 sps:$4 sm:$0xff]   ;;  %v9738_v23 = vld [vmem:[%s15538_s1 + $0x240] ss:$16 sps:$4 sm:$0xff]  }
   0xd   :  { %6626 = vmatprep.subr.bf16.mxu1 %v9723_v13  ;;  %v9739_v24 = vld [vmem:[%s15538_s1 + $0x24] ss:$16 sps:$4 sm:$0xff]   ;;  %v9743_v26 = vld [vmem:[%s15538_s1 + $0x20] ss:$16 sps:$4 sm:$0xff]  }
   0xe   :  { %v9741_v25 = vld [vmem:[%s15538_s1 + $0x224] ss:$16 sps:$4 sm:$0xff]   ;;  %v9744_v27 = vld [vmem:[%s15538_s1 + $0x220] ss:$16 sps:$4 sm:$0xff]  }
   0xf   :  { %6574 = vmatpush1.bf16.msra.mxu0 %v9725_v14  ;;  %v9745_v28 = vld [vmem:[%s15538_s1 + $0x4] ss:$16 sps:$4 sm:$0xff]   ;;  %v9749_v30 = vld [vmem:[%s15538_s1] ss:$16 sps:$4 sm:$0xff]  }
  0x10   :  { %6627 = vmatpush1.bf16.msra.mxu1 %v9726_v15  ;;  %6575 = vmatprep.subr.bf16.mxu0 %v9727_v16  ;;  %v9747_v29 = vld [vmem:[%s15538_s1 + $0x204] ss:$16 sps:$4 sm:$0xff]   ;;  %v9750_v31 = vld [vmem:[%s15538_s1 + $0x200] ss:$16 sps:$4 sm:$0xff]  }
  0x11   :  { %6628 = vmatprep.subr.bf16.mxu1 %v9729_v17  ;;  %v9751_v32 = vld [vmem:[%s15538_s1 + $0x1e4] ss:$16 sps:$4 sm:$0xff]   ;;  %v9755_v34 = vld [vmem:[%s15538_s1 + $0x1e0] ss:$16 sps:$4 sm:$0xff]  }
  0x12   :  { %v9753_v33 = vld [vmem:[%s15538_s1 + $0x3e4] ss:$16 sps:$4 sm:$0xff]   ;;  %v9756_v35 = vld [vmem:[%s15538_s1 + $0x3e0] ss:$16 sps:$4 sm:$0xff]  }
  0x13   :  { %6576 = vmatpush1.bf16.msra.mxu0 %v9731_v18  ;;  %v9757_v36 = vld [vmem:[%s15538_s1 + $0x1c4] ss:$16 sps:$4 sm:$0xff]   ;;  %v9761_v38 = vld [vmem:[%s15538_s1 + $0x1c0] ss:$16 sps:$4 sm:$0xff]  }
  0x14   :  { %6629 = vmatpush1.bf16.msra.mxu1 %v9732_v19  ;;  %6577 = vmatprep.subr.bf16.mxu0 %v9733_v20  ;;  %v9759_v37 = vld [vmem:[%s15538_s1 + $0x3c4] ss:$16 sps:$4 sm:$0xff]   ;;  %v9762_v39 = vld [vmem:[%s15538_s1 + $0x3c0] ss:$16 sps:$4 sm:$0xff]  }
  0x15   :  { %6630 = vmatprep.subr.bf16.mxu1 %v9735_v21  ;;  %v9763_v40 = vld [vmem:[%s15538_s1 + $0x1a4] ss:$16 sps:$4 sm:$0xff]   ;;  %v9767_v42 = vld [vmem:[%s15538_s1 + $0x1a0] ss:$16 sps:$4 sm:$0xff]  }
  0x16   :  { %v9765_v41 = vld [vmem:[%s15538_s1 + $0x3a4] ss:$16 sps:$4 sm:$0xff]   ;;  %v9768_v43 = vld [vmem:[%s15538_s1 + $0x3a0] ss:$16 sps:$4 sm:$0xff]  }
  0x17   :  { %6578 = vmatpush1.bf16.msra.mxu0 %v9737_v22  ;;  %v9769_v44 = vld [vmem:[%s15538_s1 + $0x184] ss:$16 sps:$4 sm:$0xff]   ;;  %v9773_v46 = vld [vmem:[%s15538_s1 + $0x180] ss:$16 sps:$4 sm:$0xff]  }
  0x18   :  { %6631 = vmatpush1.bf16.msra.mxu1 %v9738_v23  ;;  %6579 = vmatprep.subr.bf16.mxu0 %v9739_v24  ;;  %v9771_v45 = vld [vmem:[%s15538_s1 + $0x384] ss:$16 sps:$4 sm:$0xff]   ;;  %v9774_v47 = vld [vmem:[%s15538_s1 + $0x380] ss:$16 sps:$4 sm:$0xff]  }
  0x19   :  { %6632 = vmatprep.subr.bf16.mxu1 %v9741_v25  ;;  %v17_v48 = vld [vmem:[%s15539_s0] sm:$0xff] }
  0x1a   :  { %v33_v49 = vld [vmem:[%s15539_s0 + $0x80] sm:$0xff] }
  0x1b   :  { %6580 = vmatpush1.bf16.msra.mxu0 %v9743_v26  ;;  %v9775_v52 = vld [vmem:[%s15538_s1 + $0x164] ss:$16 sps:$4 sm:$0xff]   ;;  %v11457_v53 = vcombine.high %v17_v48, %v33_v49  ;;  %v9779_v56 = vld [vmem:[%s15538_s1 + $0x160] ss:$16 sps:$4 sm:$0xff]   ;;  %v11514_v8 = vcombine.low %v17_v48, %v33_v49  ;;  %v11641_v48 = vld [vmem:[%s15539_s0 + $0x18] sm:$0xff] }
  0x1c   :  { %6633 = vmatpush1.bf16.msra.mxu1 %v9744_v27  ;;  %6581 = vmatprep.subr.bf16.mxu0 %v9745_v28  ;;  %v9777_v54 = vld [vmem:[%s15538_s1 + $0x364] ss:$16 sps:$4 sm:$0xff]   ;;  %v9780_v57 = vld [vmem:[%s15538_s1 + $0x360] ss:$16 sps:$4 sm:$0xff]   ;;  %v11654_v51 = vcombine.high %v11641_v48, %v11650_v50 }
  0x1d   :  { %6634 = vmatprep.subr.bf16.mxu1 %v9747_v29  ;;  %6599 = vmatprep.mubr.bf16.mxu0 %v11457_v53  ;;  %v9781_v58 = vld [vmem:[%s15538_s1 + $0x144] ss:$16 sps:$4 sm:$0xff]   ;;  %v9785_v60 = vld [vmem:[%s15538_s1 + $0x140] ss:$16 sps:$4 sm:$0xff]  }
  0x1e   :  { %v9783_v59 = vld [vmem:[%s15538_s1 + $0x344] ss:$16 sps:$4 sm:$0xff]   ;;  %v9786_v61 = vld [vmem:[%s15538_s1 + $0x340] ss:$16 sps:$4 sm:$0xff]  }
  0x1f   :  { %6582 = vmatpush1.bf16.msra.mxu0 %v9749_v30  ;;  %v9787_v62 = vld [vmem:[%s15538_s1 + $0x124] ss:$16 sps:$4 sm:$0xff]   ;;  %v9791_v0 = vld [vmem:[%s15538_s1 + $0x120] ss:$16 sps:$4 sm:$0xff]   ;;  %v50_v30 = vld [vmem:[%s15539_s0 + $0x108] sm:$0xff] }
  0x20   :  { %6635 = vmatpush1.bf16.msra.mxu1 %v9750_v31  ;;  %6583 = vmatprep.subr.bf16.mxu0 %v9751_v32  ;;  %v9789_v63 = vld [vmem:[%s15538_s1 + $0x324] ss:$16 sps:$4 sm:$0xff]   ;;  %v9792_v1 = vld [vmem:[%s15538_s1 + $0x320] ss:$16 sps:$4 sm:$0xff]   ;;  %v66_v31 = vld [vmem:[%s15539_s0 + $0x188] sm:$0xff] }
  0x21   :  { %6636 = vmatprep.subr.bf16.mxu1 %v9753_v33  ;;  %v9793_v2 = vld [vmem:[%s15538_s1 + $0x104] ss:$16 sps:$4 sm:$0xff]   ;;  %v9797_v4 = vld [vmem:[%s15538_s1 + $0x100] ss:$16 sps:$4 sm:$0xff]  }
  0x22   :  { %v9795_v3 = vld [vmem:[%s15538_s1 + $0x304] ss:$16 sps:$4 sm:$0xff]   ;;  %v9798_v5 = vld [vmem:[%s15538_s1 + $0x300] ss:$16 sps:$4 sm:$0xff]  }
  0x23   :  { %6584 = vmatpush2.bf16.msra.mxu0 %v9755_v34  ;;  %v9801_v6 = vld [vmem:[%s15538_s1 + $0x4e4] ss:$16 sps:$4 sm:$0xff]   ;;  %v9799_v10 = vld [vmem:[%s15538_s1 + $0x4e0] ss:$16 sps:$4 sm:$0xff]  }
  0x24   :  { %6637 = vmatpush2.bf16.msra.mxu1 %v9756_v35  ;;  %6585 = vmatprep.subr.bf16.mxu0 %v9757_v36  ;;  %v9804_v7 = vld [vmem:[%s15538_s1 + $0x6e4] ss:$16 sps:$4 sm:$0xff]   ;;  %v9802_v11 = vld [vmem:[%s15538_s1 + $0x6e0] ss:$16 sps:$4 sm:$0xff]   ;;  %v11593_v35 = vcombine.high %v50_v30, %v66_v31 }
  0x25   :  { %6638 = vmatprep.subr.bf16.mxu1 %v9759_v37  ;;  %v9807_v12 = vld [vmem:[%s15538_s1 + $0x4c4] ss:$16 sps:$4 sm:$0xff]   ;;  %v9805_v14 = vld [vmem:[%s15538_s1 + $0x4c0] ss:$16 sps:$4 sm:$0xff]   ;;  %v11598_v37 = vcombine.low %v50_v30, %v66_v31 }
  0x26   :  { %v9810_v13 = vld [vmem:[%s15538_s1 + $0x6c4] ss:$16 sps:$4 sm:$0xff]   ;;  %v9808_v15 = vld [vmem:[%s15538_s1 + $0x6c0] ss:$16 sps:$4 sm:$0xff]  }
  0x27   :  { %6586 = vmatpush2.bf16.msra.mxu0 %v9761_v38  ;;  %v9813_v16 = vld [vmem:[%s15538_s1 + $0x4a4] ss:$16 sps:$4 sm:$0xff]   ;;  %v9811_v18 = vld [vmem:[%s15538_s1 + $0x4a0] ss:$16 sps:$4 sm:$0xff]  }
  0x28   :  { %6639 = vmatpush2.bf16.msra.mxu1 %v9762_v39  ;;  %6587 = vmatprep.subr.bf16.mxu0 %v9763_v40  ;;  %v9816_v17 = vld [vmem:[%s15538_s1 + $0x6a4] ss:$16 sps:$4 sm:$0xff]   ;;  %v9814_v19 = vld [vmem:[%s15538_s1 + $0x6a0] ss:$16 sps:$4 sm:$0xff]  }
  0x29   :  { %6640 = vmatprep.subr.bf16.mxu1 %v9765_v41  ;;  %v9819_v20 = vld [vmem:[%s15538_s1 + $0x484] ss:$16 sps:$4 sm:$0xff]   ;;  %v9817_v22 = vld [vmem:[%s15538_s1 + $0x480] ss:$16 sps:$4 sm:$0xff]  }
  0x2a   :  { %v9822_v21 = vld [vmem:[%s15538_s1 + $0x684] ss:$16 sps:$4 sm:$0xff]   ;;  %v9820_v23 = vld [vmem:[%s15538_s1 + $0x680] ss:$16 sps:$4 sm:$0xff]  }
  0x2b   :  { %6588 = vmatpush2.bf16.msra.mxu0 %v9767_v42  ;;  %v9825_v24 = vld [vmem:[%s15538_s1 + $0x464] ss:$16 sps:$4 sm:$0xff]   ;;  %v9823_v26 = vld [vmem:[%s15538_s1 + $0x460] ss:$16 sps:$4 sm:$0xff]  }
  0x2c   :  { %6641 = vmatpush2.bf16.msra.mxu1 %v9768_v43  ;;  %6589 = vmatprep.subr.bf16.mxu0 %v9769_v44  ;;  %v9828_v25 = vld [vmem:[%s15538_s1 + $0x664] ss:$16 sps:$4 sm:$0xff]   ;;  %v9826_v27 = vld [vmem:[%s15538_s1 + $0x660] ss:$16 sps:$4 sm:$0xff]  }
  0x2d   :  { %6642 = vmatprep.subr.bf16.mxu1 %v9771_v45  ;;  %v49_v28 = vld [vmem:[%s15539_s0 + $0x100] sm:$0xff]  ;;  %v51_v30 = vld [vmem:[%s15539_s0 + $0x110] sm:$0xff] }
  0x2e   :  { %v65_v29 = vld [vmem:[%s15539_s0 + $0x180] sm:$0xff]  ;;  %v67_v31 = vld [vmem:[%s15539_s0 + $0x190] sm:$0xff] }
  0x2f   :  { %6590 = vmatpush2.bf16.msra.mxu0 %v9773_v46  ;;  %v9831_v32 = vld [vmem:[%s15538_s1 + $0x444] ss:$16 sps:$4 sm:$0xff]   ;;  %v11589_v33 = vcombine.high %v49_v28, %v65_v29  ;;  %v11591_v34 = vcombine.low %v49_v28, %v65_v29  ;;  %v9829_v38 = vld [vmem:[%s15538_s1 + $0x440] ss:$16 sps:$4 sm:$0xff]  }
  0x30   :  { %6643 = vmatpush2.bf16.msra.mxu1 %v9774_v47  ;;  %6591 = vmatprep.subr.bf16.mxu0 %v9775_v52  ;;  %v9834_v36 = vld [vmem:[%s15538_s1 + $0x644] ss:$16 sps:$4 sm:$0xff]   ;;  %v9832_v39 = vld [vmem:[%s15538_s1 + $0x640] ss:$16 sps:$4 sm:$0xff]  }
  0x31   :  { %6644 = vmatprep.subr.bf16.mxu1 %v9777_v54  ;;  %v9837_v40 = vld [vmem:[%s15538_s1 + $0x424] ss:$16 sps:$4 sm:$0xff]   ;;  %v9835_v42 = vld [vmem:[%s15538_s1 + $0x420] ss:$16 sps:$4 sm:$0xff]  }
  0x32   :  { %v9840_v41 = vld [vmem:[%s15538_s1 + $0x624] ss:$16 sps:$4 sm:$0xff]   ;;  %v9838_v43 = vld [vmem:[%s15538_s1 + $0x620] ss:$16 sps:$4 sm:$0xff]  }
  0x33   :  { %6592 = vmatpush2.bf16.msra.mxu0 %v9779_v56  ;;  %v9843_v44 = vld [vmem:[%s15538_s1 + $0x404] ss:$16 sps:$4 sm:$0xff]   ;;  %v9841_v52 = vld [vmem:[%s15538_s1 + $0x400] ss:$16 sps:$4 sm:$0xff]  }
  0x34   :  { %6645 = vmatpush2.bf16.msra.mxu1 %v9780_v57  ;;  %6593 = vmatprep.subr.bf16.mxu0 %v9781_v58  ;;  %v9846_v45 = vld [vmem:[%s15538_s1 + $0x604] ss:$16 sps:$4 sm:$0xff]   ;;  %v9844_v54 = vld [vmem:[%s15538_s1 + $0x600] ss:$16 sps:$4 sm:$0xff]  }
  0x35   :  { %6646 = vmatprep.subr.bf16.mxu1 %v9783_v59  ;;  %v11631_v46 = vld [vmem:[%s15539_s0 + $0x10] sm:$0xff] }
  0x36   :  { %v11636_v47 = vld [vmem:[%s15539_s0 + $0x90] sm:$0xff] }
  0x37   :  { %6594 = vmatpush2.bf16.msra.mxu0 %v9785_v60  ;;  %v11645_v49 = vcombine.high %v11631_v46, %v11636_v47  ;;  %v9849_v56 = vld [vmem:[%s15538_s1 + $0x5e4] ss:$16 sps:$4 sm:$0xff]   ;;  %v9847_v58 = vld [vmem:[%s15538_s1 + $0x5e0] ss:$16 sps:$4 sm:$0xff]  }
  0x38   :  { %6647 = vmatpush2.bf16.msra.mxu1 %v9786_v61  ;;  %6595 = vmatprep.subr.bf16.mxu0 %v9787_v62  ;;  %v9852_v57 = vld [vmem:[%s15538_s1 + $0x7e4] ss:$16 sps:$4 sm:$0xff]   ;;  %v9850_v59 = vld [vmem:[%s15538_s1 + $0x7e0] ss:$16 sps:$4 sm:$0xff]  }
  0x39   :  { %6648 = vmatprep.subr.bf16.mxu1 %v9789_v63  ;;  %v9855_v60 = vld [vmem:[%s15538_s1 + $0x5c4] ss:$16 sps:$4 sm:$0xff]   ;;  %v9853_v62 = vld [vmem:[%s15538_s1 + $0x5c0] ss:$16 sps:$4 sm:$0xff]  }
  0x3a   :  { %v9858_v61 = vld [vmem:[%s15538_s1 + $0x7c4] ss:$16 sps:$4 sm:$0xff]   ;;  %v9856_v63 = vld [vmem:[%s15538_s1 + $0x7c0] ss:$16 sps:$4 sm:$0xff]  }
  0x3b   :  { %6596 = vmatpush2.bf16.msra.mxu0 %v9791_v0  ;;  %v9861_v0 = vld [vmem:[%s15538_s1 + $0x5a4] ss:$16 sps:$4 sm:$0xff]   ;;  %v9895_v28 = vld [vmem:[%s15538_s1 + $0x8e0] ss:$16 sps:$4 sm:$0xff]  }
  0x3c   :  { %6649 = vmatpush2.bf16.msra.mxu1 %v9792_v1  ;;  %6597 = vmatprep.subr.bf16.mxu0 %v9793_v2  ;;  %v9864_v1 = vld [vmem:[%s15538_s1 + $0x7a4] ss:$16 sps:$4 sm:$0xff]   ;;  %v9859_v2 = vld [vmem:[%s15538_s1 + $0x5a0] ss:$16 sps:$4 sm:$0xff]  }
  0x3d   :  { %6650 = vmatprep.subr.bf16.mxu1 %v9795_v3  ;;  %v9862_v3 = vld [vmem:[%s15538_s1 + $0x7a0] ss:$16 sps:$4 sm:$0xff]  }
  0x3e   :  { %v9898_v29 = vld [vmem:[%s15538_s1 + $0xae0] ss:$16 sps:$4 sm:$0xff]  }
  0x3f   :  { %6598 = vmatpush2.bf16.msra.mxu0 %v9797_v4  ;;  %v9867_v4 = vld [vmem:[%s15538_s1 + $0x584] ss:$16 sps:$4 sm:$0xff]  }
  0x40   :  { %6651 = vmatpush2.bf16.msra.mxu1 %v9798_v5  ;;  %6673 = vmatprep.subr.bf16.mxu0 %v9801_v6  ;;  %v9870_v5 = vld [vmem:[%s15538_s1 + $0x784] ss:$16 sps:$4 sm:$0xff]   ;;  %v9865_v6 = vld [vmem:[%s15538_s1 + $0x580] ss:$16 sps:$4 sm:$0xff]  }
  0x41   :  { %6726 = vmatprep.subr.bf16.mxu1 %v9804_v7  ;;  %v9868_v7 = vld [vmem:[%s15538_s1 + $0x780] ss:$16 sps:$4 sm:$0xff]  }
  0x42   :  { %6600 = vmatmul.mubr.bf16.vlgmr.msra.gmra.mxu0 %v11514_v8 }
  0x43   :  { %6653 = vmatmul.mubr.bf16.vlgmr.msra.gmra.mxu1 %v11516_v9  ;;  %6674 = vmatpush1.bf16.msra.mxu0 %v9799_v10  ;;  %v9873_v10 = vld [vmem:[%s15538_s1 + $0x564] ss:$16 sps:$4 sm:$0xff]  }
  0x44   :  { %6727 = vmatpush1.bf16.msra.mxu1 %v9802_v11  ;;  %6675 = vmatprep.subr.bf16.mxu0 %v9807_v12  ;;  %v9876_v11 = vld [vmem:[%s15538_s1 + $0x764] ss:$16 sps:$4 sm:$0xff]   ;;  %v9871_v12 = vld [vmem:[%s15538_s1 + $0x560] ss:$16 sps:$4 sm:$0xff]  }
  0x45   :  { %6728 = vmatprep.subr.bf16.mxu1 %v9810_v13  ;;  %6609 = vmatprep.mubr.bf16.mxu0 %v11589_v33  ;;  %v9874_v13 = vld [vmem:[%s15538_s1 + $0x760] ss:$16 sps:$4 sm:$0xff]  }
  0x46   :  { %6662 = vmatprep.mubr.bf16.mxu1 %v11593_v35 }
  0x47   :  { %6676 = vmatpush1.bf16.msra.mxu0 %v9805_v14  ;;  %v9879_v14 = vld [vmem:[%s15538_s1 + $0x544] ss:$16 sps:$4 sm:$0xff]  }
  0x48   :  { %6729 = vmatpush1.bf16.msra.mxu1 %v9808_v15  ;;  %6677 = vmatprep.subr.bf16.mxu0 %v9813_v16  ;;  %v9882_v15 = vld [vmem:[%s15538_s1 + $0x744] ss:$16 sps:$4 sm:$0xff]   ;;  %v9877_v16 = vld [vmem:[%s15538_s1 + $0x540] ss:$16 sps:$4 sm:$0xff]  }
  0x49   :  { %6730 = vmatprep.subr.bf16.mxu1 %v9816_v17  ;;  %v9880_v17 = vld [vmem:[%s15538_s1 + $0x740] ss:$16 sps:$4 sm:$0xff]  }
  0x4a   :  { %6610 = vmatmul.mubr.bf16.gmra.mxu0 %v11591_v34 }
  0x4b   :  { %6678 = vmatpush1.bf16.msra.mxu0 %v9811_v18  ;;  %6663 = vmatmul.mubr.bf16.gmra.mxu1 %v11598_v37  ;;  %v9885_v18 = vld [vmem:[%s15538_s1 + $0x524] ss:$16 sps:$4 sm:$0xff]  }
  0x4c   :  { %6731 = vmatpush1.bf16.msra.mxu1 %v9814_v19  ;;  %6679 = vmatprep.subr.bf16.mxu0 %v9819_v20  ;;  %v9888_v19 = vld [vmem:[%s15538_s1 + $0x724] ss:$16 sps:$4 sm:$0xff]   ;;  %v9883_v20 = vld [vmem:[%s15538_s1 + $0x520] ss:$16 sps:$4 sm:$0xff]  }
  0x4d   :  { %6732 = vmatprep.subr.bf16.mxu1 %v9822_v21  ;;  %6705 = vmatprep.mubr.bf16.mxu0 %v11645_v49  ;;  %v9886_v21 = vld [vmem:[%s15538_s1 + $0x720] ss:$16 sps:$4 sm:$0xff]  }
  0x4e   :  { %6758 = vmatprep.mubr.bf16.mxu1 %v11654_v51 }
  0x4f   :  { %6680 = vmatpush1.bf16.msra.mxu0 %v9817_v22  ;;  %v9891_v22 = vld [vmem:[%s15538_s1 + $0x504] ss:$16 sps:$4 sm:$0xff]  }
  0x50   :  { %6733 = vmatpush1.bf16.msra.mxu1 %v9820_v23  ;;  %6681 = vmatprep.subr.bf16.mxu0 %v9825_v24  ;;  %v9894_v23 = vld [vmem:[%s15538_s1 + $0x704] ss:$16 sps:$4 sm:$0xff]   ;;  %v9889_v24 = vld [vmem:[%s15538_s1 + $0x500] ss:$16 sps:$4 sm:$0xff]  }
  0x51   :  { %6734 = vmatprep.subr.bf16.mxu1 %v9828_v25  ;;  %v9892_v25 = vld [vmem:[%s15538_s1 + $0x700] ss:$16 sps:$4 sm:$0xff]  }
  0x53   :  { %6682 = vmatpush1.bf16.msra.mxu0 %v9823_v26  ;;  %v9897_v26 = vld [vmem:[%s15538_s1 + $0x8e4] ss:$16 sps:$4 sm:$0xff]  }
  0x54   :  { %6735 = vmatpush1.bf16.msra.mxu1 %v9826_v27  ;;  %6683 = vmatprep.subr.bf16.mxu0 %v9831_v32  ;;  %v9900_v27 = vld [vmem:[%s15538_s1 + $0xae4] ss:$16 sps:$4 sm:$0xff]   ;;  %v11780_v32 = vcombine.low %v11631_v46, %v11636_v47 }
  0x55   :  { %6736 = vmatprep.subr.bf16.mxu1 %v9834_v36  ;;  %v11784_v36 = vcombine.low %v11641_v48, %v11650_v50  ;;  %v9909_v46 = vld [vmem:[%s15538_s1 + $0x8a4] ss:$16 sps:$4 sm:$0xff]   ;;  %v9907_v48 = vld [vmem:[%s15538_s1 + $0x8a0] ss:$16 sps:$4 sm:$0xff]  }
  0x56   :  { %v9912_v47 = vld [vmem:[%s15538_s1 + $0xaa4] ss:$16 sps:$4 sm:$0xff]   ;;  %v9910_v50 = vld [vmem:[%s15538_s1 + $0xaa0] ss:$16 sps:$4 sm:$0xff]  }
  0x57   :  { %6684 = vmatpush1.bf16.msra.mxu0 %v9829_v38  ;;  %v52_v38 = vld [vmem:[%s15539_s0 + $0x118] sm:$0xff] }
  0x58   :  { %6737 = vmatpush1.bf16.msra.mxu1 %v9832_v39  ;;  %6685 = vmatprep.subr.bf16.mxu0 %v9837_v40  ;;  %v68_v39 = vld [vmem:[%s15539_s0 + $0x198] sm:$0xff]  ;;  %v9903_v40 = vld [vmem:[%s15538_s1 + $0x8c4] ss:$16 sps:$4 sm:$0xff]  }
  0x59   :  { %6738 = vmatprep.subr.bf16.mxu1 %v9840_v41  ;;  %v9906_v41 = vld [vmem:[%s15538_s1 + $0xac4] ss:$16 sps:$4 sm:$0xff]  }
  0x5b   :  { %6686 = vmatpush1.bf16.msra.mxu0 %v9835_v42  ;;  %v11798_v42 = vcombine.high %v51_v30, %v67_v31 }
  0x5c   :  { %6739 = vmatpush1.bf16.msra.mxu1 %v9838_v43  ;;  %6687 = vmatprep.subr.bf16.mxu0 %v9843_v44  ;;  %v11800_v43 = vcombine.high %v52_v38, %v68_v39  ;;  %v9901_v44 = vld [vmem:[%s15538_s1 + $0x8c0] ss:$16 sps:$4 sm:$0xff]  }
  0x5d   :  { %6740 = vmatprep.subr.bf16.mxu1 %v9846_v45  ;;  %v9904_v45 = vld [vmem:[%s15538_s1 + $0xac0] ss:$16 sps:$4 sm:$0xff]  }
  0x5f   :  { %6688 = vmatpush1.bf16.msra.mxu0 %v9841_v52  ;;  %v11827_v52 = vld [vmem:[%s15539_s0 + $0x20] sm:$0xff] }
  0x60   :  { %6741 = vmatpush1.bf16.msra.mxu1 %v9844_v54  ;;  %6689 = vmatprep.subr.bf16.mxu0 %v9849_v56  ;;  %v11832_v54 = vld [vmem:[%s15539_s0 + $0xa0] sm:$0xff]  ;;  %v11834_v56 = vcombine.low %v51_v30, %v67_v31 }
  0x61   :  { %6742 = vmatprep.subr.bf16.mxu1 %v9852_v57  ;;  %v11836_v57 = vcombine.low %v52_v38, %v68_v39  ;;  %v9955_v30 = vld [vmem:[%s15538_s1 + $0x9a0] ss:$16 sps:$4 sm:$0xff]   ;;  %v9963_v38 = vld [vmem:[%s15538_s1 + $0x984] ss:$16 sps:$4 sm:$0xff]  }
  0x62   :  { %v9958_v31 = vld [vmem:[%s15538_s1 + $0xba0] ss:$16 sps:$4 sm:$0xff]   ;;  %v9966_v39 = vld [vmem:[%s15538_s1 + $0xb84] ss:$16 sps:$4 sm:$0xff]  }
  0x63   :  { %6690 = vmatpush2.bf16.msra.mxu0 %v9847_v58  ;;  %v11841_v58 = vld [vmem:[%s15539_s0 + $0x28] sm:$0xff] }
  0x64   :  { %6743 = vmatpush2.bf16.msra.mxu1 %v9850_v59  ;;  %6691 = vmatprep.subr.bf16.mxu0 %v9855_v60  ;;  %v11846_v59 = vld [vmem:[%s15539_s0 + $0xa8] sm:$0xff]  ;;  %v9915_v60 = vld [vmem:[%s15538_s1 + $0x884] ss:$16 sps:$4 sm:$0xff]  }
  0x65   :  { %6744 = vmatprep.subr.bf16.mxu1 %v9858_v61  ;;  %v9918_v61 = vld [vmem:[%s15538_s1 + $0xa84] ss:$16 sps:$4 sm:$0xff]  }
  0x67   :  { %6692 = vmatpush2.bf16.msra.mxu0 %v9853_v62  ;;  %v11856_v62 = vcombine.high %v11827_v52, %v11832_v54 }
  0x68   :  { %6745 = vmatpush2.bf16.msra.mxu1 %v9856_v63  ;;  %6693 = vmatprep.subr.bf16.mxu0 %v9861_v0  ;;  %v11860_v63 = vcombine.high %v11841_v58, %v11846_v59  ;;  %v9913_v0 = vld [vmem:[%s15538_s1 + $0x880] ss:$16 sps:$4 sm:$0xff]  }
  0x69   :  { %6746 = vmatprep.subr.bf16.mxu1 %v9864_v1  ;;  %v9916_v1 = vld [vmem:[%s15538_s1 + $0xa80] ss:$16 sps:$4 sm:$0xff]  }
  0x6b   :  { %6694 = vmatpush2.bf16.msra.mxu0 %v9859_v2  ;;  %v9921_v2 = vld [vmem:[%s15538_s1 + $0x864] ss:$16 sps:$4 sm:$0xff]  }
  0x6c   :  { %6747 = vmatpush2.bf16.msra.mxu1 %v9862_v3  ;;  %6695 = vmatprep.subr.bf16.mxu0 %v9867_v4  ;;  %v9924_v3 = vld [vmem:[%s15538_s1 + $0xa64] ss:$16 sps:$4 sm:$0xff]   ;;  %v9919_v4 = vld [vmem:[%s15538_s1 + $0x860] ss:$16 sps:$4 sm:$0xff]  }
  0x6d   :  { %6748 = vmatprep.subr.bf16.mxu1 %v9870_v5  ;;  %v9922_v5 = vld [vmem:[%s15538_s1 + $0xa60] ss:$16 sps:$4 sm:$0xff]  }
  0x6f   :  { %6696 = vmatpush2.bf16.msra.mxu0 %v9865_v6  ;;  %v9927_v6 = vld [vmem:[%s15538_s1 + $0x844] ss:$16 sps:$4 sm:$0xff]  }
  0x70   :  { %6749 = vmatpush2.bf16.msra.mxu1 %v9868_v7  ;;  %6697 = vmatprep.subr.bf16.mxu0 %v9873_v10  ;;  %v9930_v7 = vld [vmem:[%s15538_s1 + $0xa44] ss:$16 sps:$4 sm:$0xff]   ;;  %v9925_v10 = vld [vmem:[%s15538_s1 + $0x840] ss:$16 sps:$4 sm:$0xff]  }
  0x71   :  { %6750 = vmatprep.subr.bf16.mxu1 %v9876_v11  ;;  %v9928_v11 = vld [vmem:[%s15538_s1 + $0xa40] ss:$16 sps:$4 sm:$0xff]  }
  0x73   :  { %6698 = vmatpush2.bf16.msra.mxu0 %v9871_v12  ;;  %v9933_v12 = vld [vmem:[%s15538_s1 + $0x824] ss:$16 sps:$4 sm:$0xff]  }
  0x74   :  { %6751 = vmatpush2.bf16.msra.mxu1 %v9874_v13  ;;  %6699 = vmatprep.subr.bf16.mxu0 %v9879_v14  ;;  %v9936_v13 = vld [vmem:[%s15538_s1 + $0xa24] ss:$16 sps:$4 sm:$0xff]   ;;  %v9931_v14 = vld [vmem:[%s15538_s1 + $0x820] ss:$16 sps:$4 sm:$0xff]  }
  0x75   :  { %6752 = vmatprep.subr.bf16.mxu1 %v9882_v15  ;;  %v9934_v15 = vld [vmem:[%s15538_s1 + $0xa20] ss:$16 sps:$4 sm:$0xff]  }
  0x77   :  { %6700 = vmatpush2.bf16.msra.mxu0 %v9877_v16  ;;  %v9939_v16 = vld [vmem:[%s15538_s1 + $0x804] ss:$16 sps:$4 sm:$0xff]  }
  0x78   :  { %6753 = vmatpush2.bf16.msra.mxu1 %v9880_v17  ;;  %6701 = vmatprep.subr.bf16.mxu0 %v9885_v18  ;;  %v9942_v17 = vld [vmem:[%s15538_s1 + $0xa04] ss:$16 sps:$4 sm:$0xff]   ;;  %v9937_v18 = vld [vmem:[%s15538_s1 + $0x800] ss:$16 sps:$4 sm:$0xff]  }
  0x79   :  { %6754 = vmatprep.subr.bf16.mxu1 %v9888_v19  ;;  %v9940_v19 = vld [vmem:[%s15538_s1 + $0xa00] ss:$16 sps:$4 sm:$0xff]  }
  0x7b   :  { %6702 = vmatpush2.bf16.msra.mxu0 %v9883_v20  ;;  %v9945_v20 = vld [vmem:[%s15538_s1 + $0x9e4] ss:$16 sps:$4 sm:$0xff]  }
  0x7c   :  { %6755 = vmatpush2.bf16.msra.mxu1 %v9886_v21  ;;  %6703 = vmatprep.subr.bf16.mxu0 %v9891_v22  ;;  %v9948_v21 = vld [vmem:[%s15538_s1 + $0xbe4] ss:$16 sps:$4 sm:$0xff]   ;;  %v9943_v22 = vld [vmem:[%s15538_s1 + $0x9e0] ss:$16 sps:$4 sm:$0xff]  }
  0x7d   :  { %6756 = vmatprep.subr.bf16.mxu1 %v9894_v23  ;;  %v9946_v23 = vld [vmem:[%s15538_s1 + $0xbe0] ss:$16 sps:$4 sm:$0xff]  }
  0x7f   :  { %6704 = vmatpush2.bf16.msra.mxu0 %v9889_v24  ;;  %v9951_v24 = vld [vmem:[%s15538_s1 + $0x9c4] ss:$16 sps:$4 sm:$0xff]  }
  0x80   :  { %6757 = vmatpush2.bf16.msra.mxu1 %v9892_v25  ;;  %6779 = vmatprep.subr.bf16.mxu0 %v9897_v26  ;;  %v9954_v25 = vld [vmem:[%s15538_s1 + $0xbc4] ss:$16 sps:$4 sm:$0xff]   ;;  %v9949_v26 = vld [vmem:[%s15538_s1 + $0x9c0] ss:$16 sps:$4 sm:$0xff]  }
  0x81   :  { %6832 = vmatprep.subr.bf16.mxu1 %v9900_v27  ;;  %v9952_v27 = vld [vmem:[%s15538_s1 + $0xbc0] ss:$16 sps:$4 sm:$0xff]  }
  0x82   :  { %6706 = vmatmul.mubr.bf16.vlgmr.msra.gmra.mxu0 %v11780_v32 }
  0x83   :  { %6759 = vmatmul.mubr.bf16.vlgmr.msra.gmra.mxu1 %v11784_v36  ;;  %6780 = vmatpush1.bf16.msra.mxu0 %v9895_v28  ;;  %v9957_v28 = vld [vmem:[%s15538_s1 + $0x9a4] ss:$16 sps:$4 sm:$0xff]  }
  0x84   :  { %6833 = vmatpush1.bf16.msra.mxu1 %v9898_v29  ;;  %6781 = vmatprep.subr.bf16.mxu0 %v9903_v40  ;;  %v9960_v29 = vld [vmem:[%s15538_s1 + $0xba4] ss:$16 sps:$4 sm:$0xff]   ;;  %v9961_v40 = vld [vmem:[%s15538_s1 + $0x980] ss:$16 sps:$4 sm:$0xff]  }
  0x85   :  { %6834 = vmatprep.subr.bf16.mxu1 %v9906_v41  ;;  %6715 = vmatprep.mubr.bf16.mxu0 %v11798_v42  ;;  %v9964_v41 = vld [vmem:[%s15538_s1 + $0xb80] ss:$16 sps:$4 sm:$0xff]  }
  0x86   :  { %6768 = vmatprep.mubr.bf16.mxu1 %v11800_v43 }
  0x87   :  { %6782 = vmatpush1.bf16.msra.mxu0 %v9901_v44  ;;  %v9969_v44 = vld [vmem:[%s15538_s1 + $0x964] ss:$16 sps:$4 sm:$0xff]  }
  0x88   :  { %6835 = vmatpush1.bf16.msra.mxu1 %v9904_v45  ;;  %6783 = vmatprep.subr.bf16.mxu0 %v9909_v46  ;;  %v9972_v45 = vld [vmem:[%s15538_s1 + $0xb64] ss:$16 sps:$4 sm:$0xff]   ;;  %v9967_v46 = vld [vmem:[%s15538_s1 + $0x960] ss:$16 sps:$4 sm:$0xff]  }
  0x89   :  { %6836 = vmatprep.subr.bf16.mxu1 %v9912_v47  ;;  %v9970_v47 = vld [vmem:[%s15538_s1 + $0xb60] ss:$16 sps:$4 sm:$0xff]  }
  0x8a   :  { %6716 = vmatmul.mubr.bf16.gmra.mxu0 %v11834_v56 }
  0x8b   :  { %6769 = vmatmul.mubr.bf16.gmra.mxu1 %v11836_v57  ;;  %6784 = vmatpush1.bf16.msra.mxu0 %v9907_v48  ;;  %v9975_v48 = vld [vmem:[%s15538_s1 + $0x944] ss:$16 sps:$4 sm:$0xff]  }
  0x8c   :  { %6837 = vmatpush1.bf16.msra.mxu1 %v9910_v50  ;;  %6785 = vmatprep.subr.bf16.mxu0 %v9915_v60  ;;  %v9978_v50 = vld [vmem:[%s15538_s1 + $0xb44] ss:$16 sps:$4 sm:$0xff]   ;;  %v9973_v60 = vld [vmem:[%s15538_s1 + $0x940] ss:$16 sps:$4 sm:$0xff]  }
  0x8d   :  { %6838 = vmatprep.subr.bf16.mxu1 %v9918_v61  ;;  %6811 = vmatprep.mubr.bf16.mxu0 %v11856_v62  ;;  %v9976_v61 = vld [vmem:[%s15538_s1 + $0xb40] ss:$16 sps:$4 sm:$0xff]  }
  0x8e   :  { %6864 = vmatprep.mubr.bf16.mxu1 %v11860_v63 }
  0x8f   :  { %6786 = vmatpush1.bf16.msra.mxu0 %v9913_v0  ;;  %v9981_v0 = vld [vmem:[%s15538_s1 + $0x924] ss:$16 sps:$4 sm:$0xff]  }
  0x90   :  { %6839 = vmatpush1.bf16.msra.mxu1 %v9916_v1  ;;  %6787 = vmatprep.subr.bf16.mxu0 %v9921_v2  ;;  %v9984_v1 = vld [vmem:[%s15538_s1 + $0xb24] ss:$16 sps:$4 sm:$0xff]   ;;  %v9979_v2 = vld [vmem:[%s15538_s1 + $0x920] ss:$16 sps:$4 sm:$0xff]  }
  0x91   :  { %6840 = vmatprep.subr.bf16.mxu1 %v9924_v3  ;;  %v9982_v3 = vld [vmem:[%s15538_s1 + $0xb20] ss:$16 sps:$4 sm:$0xff]  }
  0x93   :  { %6788 = vmatpush1.bf16.msra.mxu0 %v9919_v4  ;;  %v9987_v4 = vld [vmem:[%s15538_s1 + $0x904] ss:$16 sps:$4 sm:$0xff]  }
  0x94   :  { %6841 = vmatpush1.bf16.msra.mxu1 %v9922_v5  ;;  %6789 = vmatprep.subr.bf16.mxu0 %v9927_v6  ;;  %v9990_v5 = vld [vmem:[%s15538_s1 + $0xb04] ss:$16 sps:$4 sm:$0xff]   ;;  %v9985_v6 = vld [vmem:[%s15538_s1 + $0x900] ss:$16 sps:$4 sm:$0xff]  }
  0x95   :  { %6842 = vmatprep.subr.bf16.mxu1 %v9930_v7  ;;  %v9988_v7 = vld [vmem:[%s15538_s1 + $0xb00] ss:$16 sps:$4 sm:$0xff]  }
  0x97   :  { %6790 = vmatpush1.bf16.msra.mxu0 %v9925_v10  ;;  %v9993_v10 = vld [vmem:[%s15538_s1 + $0xce4] ss:$16 sps:$4 sm:$0xff]  }
  0x98   :  { %6843 = vmatpush1.bf16.msra.mxu1 %v9928_v11  ;;  %6791 = vmatprep.subr.bf16.mxu0 %v9933_v12  ;;  %v9996_v11 = vld [vmem:[%s15538_s1 + $0xee4] ss:$16 sps:$4 sm:$0xff]  }
  0x99   :  { %6844 = vmatprep.subr.bf16.mxu1 %v9936_v13  ;;  %v53_v12 = vld [vmem:[%s15539_s0 + $0x120] sm:$0xff] }
  0x9a   :  { %v9991_v13 = vld [vmem:[%s15538_s1 + $0xce0] ss:$16 sps:$4 sm:$0xff]  }
  0x9b   :  { %6792 = vmatpush1.bf16.msra.mxu0 %v9931_v14  ;;  %v69_v14 = vld [vmem:[%s15539_s0 + $0x1a0] sm:$0xff] }
  0x9c   :  { %6845 = vmatpush1.bf16.msra.mxu1 %v9934_v15  ;;  %6793 = vmatprep.subr.bf16.mxu0 %v9939_v16  ;;  %v54_v15 = vld [vmem:[%s15539_s0 + $0x128] sm:$0xff]  ;;  %v12036_v16 = vcombine.low %v11827_v52, %v11832_v54  ;;  %v9999_v52 = vld [vmem:[%s15538_s1 + $0xcc4] ss:$16 sps:$4 sm:$0xff]  }
  0x9d   :  { %6846 = vmatprep.subr.bf16.mxu1 %v9942_v17  ;;  %v12040_v17 = vcombine.low %v11841_v58, %v11846_v59  ;;  %v10002_v54 = vld [vmem:[%s15538_s1 + $0xec4] ss:$16 sps:$4 sm:$0xff]   ;;  %v9997_v58 = vld [vmem:[%s15538_s1 + $0xcc0] ss:$16 sps:$4 sm:$0xff]   ;;  %v12057_v59 = vcombine.high %v53_v12, %v69_v14 }
  0x9f   :  { %6794 = vmatpush1.bf16.msra.mxu0 %v9937_v18  ;;  %v70_v18 = vld [vmem:[%s15539_s0 + $0x1a8] sm:$0xff] }
  0xa0   :  { %6847 = vmatpush1.bf16.msra.mxu1 %v9940_v19  ;;  %6795 = vmatprep.subr.bf16.mxu0 %v9945_v20  ;;  %v9994_v19 = vld [vmem:[%s15538_s1 + $0xee0] ss:$16 sps:$4 sm:$0xff]   ;;  %v12059_v20 = vcombine.high %v54_v15, %v70_v18 }
  0xa1   :  { %6848 = vmatprep.subr.bf16.mxu1 %v9948_v21  ;;  %v10000_v21 = vld [vmem:[%s15538_s1 + $0xec0] ss:$16 sps:$4 sm:$0xff]  }
  0xa3   :  { %6796 = vmatpush2.bf16.msra.mxu0 %v9943_v22  ;;  %v10005_v22 = vld [vmem:[%s15538_s1 + $0xca4] ss:$16 sps:$4 sm:$0xff]  }
  0xa4   :  { %6849 = vmatpush2.bf16.msra.mxu1 %v9946_v23  ;;  %6797 = vmatprep.subr.bf16.mxu0 %v9951_v24  ;;  %v10008_v23 = vld [vmem:[%s15538_s1 + $0xea4] ss:$16 sps:$4 sm:$0xff]  }
  0xa5   :  { %6850 = vmatprep.subr.bf16.mxu1 %v9954_v25  ;;  %v12075_v24 = vld [vmem:[%s15539_s0 + $0x30] sm:$0xff] }
  0xa6   :  { %v10003_v25 = vld [vmem:[%s15538_s1 + $0xca0] ss:$16 sps:$4 sm:$0xff]  }
  0xa7   :  { %6798 = vmatpush2.bf16.msra.mxu0 %v9949_v26  ;;  %v12085_v26 = vld [vmem:[%s15539_s0 + $0xb0] sm:$0xff] }
  0xa8   :  { %6851 = vmatpush2.bf16.msra.mxu1 %v9952_v27  ;;  %6799 = vmatprep.subr.bf16.mxu0 %v9957_v28  ;;  %v12090_v27 = vld [vmem:[%s15539_s0 + $0x38] sm:$0xff]  ;;  %v12092_v28 = vcombine.low %v53_v12, %v69_v14  ;;  %v10041_v12 = vld [vmem:[%s15538_s1 + $0xde4] ss:$16 sps:$4 sm:$0xff]   ;;  %v10039_v14 = vld [vmem:[%s15538_s1 + $0xde0] ss:$16 sps:$4 sm:$0xff]  }
  0xa9   :  { %6852 = vmatprep.subr.bf16.mxu1 %v9960_v29  ;;  %v12094_v29 = vcombine.low %v54_v15, %v70_v18  ;;  %v10042_v15 = vld [vmem:[%s15538_s1 + $0xfe0] ss:$16 sps:$4 sm:$0xff]   ;;  %v10047_v18 = vld [vmem:[%s15538_s1 + $0xdc4] ss:$16 sps:$4 sm:$0xff]  }
  0xab   :  { %6800 = vmatpush2.bf16.msra.mxu0 %v9955_v30  ;;  %v12099_v30 = vld [vmem:[%s15539_s0 + $0xb8] sm:$0xff] }
  0xac   :  { %6853 = vmatpush2.bf16.msra.mxu1 %v9958_v31  ;;  %6801 = vmatprep.subr.bf16.mxu0 %v9963_v38  ;;  %v10006_v31 = vld [vmem:[%s15538_s1 + $0xea0] ss:$16 sps:$4 sm:$0xff]   ;;  %v10011_v38 = vld [vmem:[%s15538_s1 + $0xc84] ss:$16 sps:$4 sm:$0xff]  }
  0xad   :  { %6854 = vmatprep.subr.bf16.mxu1 %v9966_v39  ;;  %v10014_v39 = vld [vmem:[%s15538_s1 + $0xe84] ss:$16 sps:$4 sm:$0xff]  }
  0xaf   :  { %6802 = vmatpush2.bf16.msra.mxu0 %v9961_v40  ;;  %v12112_v40 = vcombine.high %v12075_v24, %v12085_v26 }
  0xb0   :  { %6855 = vmatpush2.bf16.msra.mxu1 %v9964_v41  ;;  %6803 = vmatprep.subr.bf16.mxu0 %v9969_v44  ;;  %v12116_v41 = vcombine.high %v12090_v27, %v12099_v30  ;;  %v10009_v44 = vld [vmem:[%s15538_s1 + $0xc80] ss:$16 sps:$4 sm:$0xff]  }
  0xb1   :  { %6856 = vmatprep.subr.bf16.mxu1 %v9972_v45  ;;  %v10012_v45 = vld [vmem:[%s15538_s1 + $0xe80] ss:$16 sps:$4 sm:$0xff]  }
  0xb3   :  { %6804 = vmatpush2.bf16.msra.mxu0 %v9967_v46  ;;  %v10017_v46 = vld [vmem:[%s15538_s1 + $0xc64] ss:$16 sps:$4 sm:$0xff]  }
  0xb4   :  { %6857 = vmatpush2.bf16.msra.mxu1 %v9970_v47  ;;  %6805 = vmatprep.subr.bf16.mxu0 %v9975_v48  ;;  %v10020_v47 = vld [vmem:[%s15538_s1 + $0xe64] ss:$16 sps:$4 sm:$0xff]   ;;  %v10015_v48 = vld [vmem:[%s15538_s1 + $0xc60] ss:$16 sps:$4 sm:$0xff]  }
  0xb5   :  { %6858 = vmatprep.subr.bf16.mxu1 %v9978_v50  ;;  %v10018_v50 = vld [vmem:[%s15538_s1 + $0xe60] ss:$16 sps:$4 sm:$0xff]  }
  0xb7   :  { %6806 = vmatpush2.bf16.msra.mxu0 %v9973_v60  ;;  %v10023_v60 = vld [vmem:[%s15538_s1 + $0xc44] ss:$16 sps:$4 sm:$0xff]  }
  0xb8   :  { %6859 = vmatpush2.bf16.msra.mxu1 %v9976_v61  ;;  %6807 = vmatprep.subr.bf16.mxu0 %v9981_v0  ;;  %v10026_v61 = vld [vmem:[%s15538_s1 + $0xe44] ss:$16 sps:$4 sm:$0xff]   ;;  %v10021_v0 = vld [vmem:[%s15538_s1 + $0xc40] ss:$16 sps:$4 sm:$0xff]  }
  0xb9   :  { %6860 = vmatprep.subr.bf16.mxu1 %v9984_v1  ;;  %v10024_v1 = vld [vmem:[%s15538_s1 + $0xe40] ss:$16 sps:$4 sm:$0xff]  }
  0xbb   :  { %6808 = vmatpush2.bf16.msra.mxu0 %v9979_v2  ;;  %v10029_v2 = vld [vmem:[%s15538_s1 + $0xc24] ss:$16 sps:$4 sm:$0xff]  }
  0xbc   :  { %6861 = vmatpush2.bf16.msra.mxu1 %v9982_v3  ;;  %6809 = vmatprep.subr.bf16.mxu0 %v9987_v4  ;;  %v10032_v3 = vld [vmem:[%s15538_s1 + $0xe24] ss:$16 sps:$4 sm:$0xff]   ;;  %v10027_v4 = vld [vmem:[%s15538_s1 + $0xc20] ss:$16 sps:$4 sm:$0xff]  }
  0xbd   :  { %6862 = vmatprep.subr.bf16.mxu1 %v9990_v5  ;;  %v10030_v5 = vld [vmem:[%s15538_s1 + $0xe20] ss:$16 sps:$4 sm:$0xff]  }
  0xbf   :  { %6810 = vmatpush2.bf16.msra.mxu0 %v9985_v6  ;;  %v10035_v6 = vld [vmem:[%s15538_s1 + $0xc04] ss:$16 sps:$4 sm:$0xff]  }
  0xc0   :  { %6863 = vmatpush2.bf16.msra.mxu1 %v9988_v7  ;;  %6885 = vmatprep.subr.bf16.mxu0 %v9993_v10  ;;  %v10038_v7 = vld [vmem:[%s15538_s1 + $0xe04] ss:$16 sps:$4 sm:$0xff]   ;;  %v10033_v10 = vld [vmem:[%s15538_s1 + $0xc00] ss:$16 sps:$4 sm:$0xff]  }
  0xc1   :  { %6938 = vmatprep.subr.bf16.mxu1 %v9996_v11  ;;  %v10036_v11 = vld [vmem:[%s15538_s1 + $0xe00] ss:$16 sps:$4 sm:$0xff]  }
  0xc2   :  { %6812 = vmatmul.mubr.bf16.vlgmr.msra.gmra.mxu0 %v12036_v16 }
  0xc3   :  { %6865 = vmatmul.mubr.bf16.vlgmr.msra.gmra.mxu1 %v12040_v17  ;;  %6886 = vmatpush1.bf16.msra.mxu0 %v9991_v13  ;;  %v10044_v13 = vld [vmem:[%s15538_s1 + $0xfe4] ss:$16 sps:$4 sm:$0xff]  }
  0xc4   :  { %6939 = vmatpush1.bf16.msra.mxu1 %v9994_v19  ;;  %6887 = vmatprep.subr.bf16.mxu0 %v9999_v52  ;;  %v10050_v19 = vld [vmem:[%s15538_s1 + $0xfc4] ss:$16 sps:$4 sm:$0xff]   ;;  %v10045_v52 = vld [vmem:[%s15538_s1 + $0xdc0] ss:$16 sps:$4 sm:$0xff]  }
  0xc5   :  { %6940 = vmatprep.subr.bf16.mxu1 %v10002_v54  ;;  %6821 = vmatprep.mubr.bf16.mxu0 %v12057_v59  ;;  %v10048_v54 = vld [vmem:[%s15538_s1 + $0xfc0] ss:$16 sps:$4 sm:$0xff]  }
  0xc6   :  { %6874 = vmatprep.mubr.bf16.mxu1 %v12059_v20 }
  0xc7   :  { %6888 = vmatpush1.bf16.msra.mxu0 %v9997_v58  ;;  %v10053_v58 = vld [vmem:[%s15538_s1 + $0xda4] ss:$16 sps:$4 sm:$0xff]  }
  0xc8   :  { %6941 = vmatpush1.bf16.msra.mxu1 %v10000_v21  ;;  %6889 = vmatprep.subr.bf16.mxu0 %v10005_v22  ;;  %v10056_v21 = vld [vmem:[%s15538_s1 + $0xfa4] ss:$16 sps:$4 sm:$0xff]   ;;  %v10051_v22 = vld [vmem:[%s15538_s1 + $0xda0] ss:$16 sps:$4 sm:$0xff]  }
  0xc9   :  { %6942 = vmatprep.subr.bf16.mxu1 %v10008_v23  ;;  %v10054_v23 = vld [vmem:[%s15538_s1 + $0xfa0] ss:$16 sps:$4 sm:$0xff]  }
  0xca   :  { %6822 = vmatmul.mubr.bf16.gmra.mxu0 %v12092_v28 }
  0xcb   :  { %6875 = vmatmul.mubr.bf16.gmra.mxu1 %v12094_v29  ;;  %6890 = vmatpush1.bf16.msra.mxu0 %v10003_v25  ;;  %v10059_v25 = vld [vmem:[%s15538_s1 + $0xd84] ss:$16 sps:$4 sm:$0xff]  }
  0xcc   :  { %6943 = vmatpush1.bf16.msra.mxu1 %v10006_v31  ;;  %6891 = vmatprep.subr.bf16.mxu0 %v10011_v38  ;;  %v10062_v31 = vld [vmem:[%s15538_s1 + $0xf84] ss:$16 sps:$4 sm:$0xff]   ;;  %v10057_v38 = vld [vmem:[%s15538_s1 + $0xd80] ss:$16 sps:$4 sm:$0xff]  }
  0xcd   :  { %6944 = vmatprep.subr.bf16.mxu1 %v10014_v39  ;;  %6917 = vmatprep.mubr.bf16.mxu0 %v12112_v40  ;;  %v10060_v39 = vld [vmem:[%s15538_s1 + $0xf80] ss:$16 sps:$4 sm:$0xff]  }
  0xce   :  { %6970 = vmatprep.mubr.bf16.mxu1 %v12116_v41 }
  0xcf   :  { %6892 = vmatpush1.bf16.msra.mxu0 %v10009_v44  ;;  %v10065_v44 = vld [vmem:[%s15538_s1 + $0xd64] ss:$16 sps:$4 sm:$0xff]  }
  0xd0   :  { %6945 = vmatpush1.bf16.msra.mxu1 %v10012_v45  ;;  %6893 = vmatprep.subr.bf16.mxu0 %v10017_v46  ;;  %v10068_v45 = vld [vmem:[%s15538_s1 + $0xf64] ss:$16 sps:$4 sm:$0xff]   ;;  %v10063_v46 = vld [vmem:[%s15538_s1 + $0xd60] ss:$16 sps:$4 sm:$0xff]  }
  0xd1   :  { %6946 = vmatprep.subr.bf16.mxu1 %v10020_v47  ;;  %v10066_v47 = vld [vmem:[%s15538_s1 + $0xf60] ss:$16 sps:$4 sm:$0xff]  }
  0xd3   :  { %6894 = vmatpush1.bf16.msra.mxu0 %v10015_v48  ;;  %v10071_v48 = vld [vmem:[%s15538_s1 + $0xd44] ss:$16 sps:$4 sm:$0xff]  }
  0xd4   :  { %6947 = vmatpush1.bf16.msra.mxu1 %v10018_v50  ;;  %6895 = vmatprep.subr.bf16.mxu0 %v10023_v60  ;;  %v10074_v50 = vld [vmem:[%s15538_s1 + $0xf44] ss:$16 sps:$4 sm:$0xff]   ;;  %v10069_v60 = vld [vmem:[%s15538_s1 + $0xd40] ss:$16 sps:$4 sm:$0xff]  }
  0xd5   :  { %6948 = vmatprep.subr.bf16.mxu1 %v10026_v61  ;;  %v10072_v61 = vld [vmem:[%s15538_s1 + $0xf40] ss:$16 sps:$4 sm:$0xff]  }
  0xd7   :  { %6896 = vmatpush1.bf16.msra.mxu0 %v10021_v0  ;;  %v1107_v0 = vlaneseq }
  0xd8   :  { %6949 = vmatpush1.bf16.msra.mxu1 %v10024_v1  ;;  %6897 = vmatprep.subr.bf16.mxu0 %v10029_v2  ;;  %v10077_v1 = vld [vmem:[%s15538_s1 + $0xd24] ss:$16 sps:$4 sm:$0xff]  }
  0xd9   :  { %6950 = vmatprep.subr.bf16.mxu1 %v10032_v3  ;;  %v10080_v2 = vld [vmem:[%s15538_s1 + $0xf24] ss:$16 sps:$4 sm:$0xff]   ;;  %v10075_v3 = vld [vmem:[%s15538_s1 + $0xd20] ss:$16 sps:$4 sm:$0xff]  }
  0xdb   :  { %6898 = vmatpush1.bf16.msra.mxu0 %v10027_v4  ;;  %v10078_v4 = vld [vmem:[%s15538_s1 + $0xf20] ss:$16 sps:$4 sm:$0xff]  }
  0xdc   :  { %6951 = vmatpush1.bf16.msra.mxu1 %v10030_v5  ;;  %6899 = vmatprep.subr.bf16.mxu0 %v10035_v6  ;;  %v12260_v5 = vshrl.u32 %v1107_v0, 7  ;;  %v10083_v6 = vld [vmem:[%s15538_s1 + $0xd04] ss:$16 sps:$4 sm:$0xff]  }
  0xdd   :  { %6952 = vmatprep.subr.bf16.mxu1 %v10038_v7  ;;  %v10086_v7 = vld [vmem:[%s15538_s1 + $0xf04] ss:$16 sps:$4 sm:$0xff]  }
  0xde   :  { %15576 = vst [vmem:[#allocation2_spill] sm:$0xff] %v12260_v5  ;;  %v12347_v0 = vld [vmem:[%s15539_s0 + $0x40] sm:$0xff] }
  0xdf   :  { %6900 = vmatpush1.bf16.msra.mxu0 %v10033_v10  ;;  %v10081_v10 = vld [vmem:[%s15538_s1 + $0xd00] ss:$16 sps:$4 sm:$0xff]  }
  0xe0   :  { %6953 = vmatpush1.bf16.msra.mxu1 %v10036_v11  ;;  %6901 = vmatprep.subr.bf16.mxu0 %v10041_v12  ;;  %v10084_v11 = vld [vmem:[%s15538_s1 + $0xf00] ss:$16 sps:$4 sm:$0xff]  }
  0xe1   :  { %6954 = vmatprep.subr.bf16.mxu1 %v10044_v13  ;;  %v1105_v12 = vld [vmem:[%s15540_s2] sm:$0xf]  ;;  %v15544_v13 = vsub.s32 0, %v12260_v5 }
  0xe3   :  { %6902 = vmatpush2.bf16.msra.mxu0 %v10039_v14  ;;  %v10089_v14 = vld [vmem:[%s15538_s1 + $0x10e4] ss:$16 sps:$4 sm:$0xff]  }
  0xe4   :  { %6955 = vmatpush2.bf16.msra.mxu1 %v10042_v15  ;;  %6903 = vmatprep.subr.bf16.mxu0 %v10047_v18  ;;  %v10092_v15 = vld [vmem:[%s15538_s1 + $0x12e4] ss:$16 sps:$4 sm:$0xff]  }
  0xe5   :  { %6956 = vmatprep.subr.bf16.mxu1 %v10050_v19  ;;  %v55_v18 = vld [vmem:[%s15539_s0 + $0x130] sm:$0xff] }
  0xe6   :  { %v10087_v19 = vld [vmem:[%s15538_s1 + $0x10e0] ss:$16 sps:$4 sm:$0xff]  }
  0xe7   :  { %6904 = vmatpush2.bf16.msra.mxu0 %v10045_v52  ;;  %v15543_v52 = vsub.s32 1, %v12260_v5 }
  0xe8   :  { %6957 = vmatpush2.bf16.msra.mxu1 %v10048_v54  ;;  %6905 = vmatprep.subr.bf16.mxu0 %v10053_v58  ;;  %v71_v54 = vld [vmem:[%s15539_s0 + $0x1b0] sm:$0xff]  ;;  %v56_v58 = vld [vmem:[%s15539_s0 + $0x138] sm:$0xff] }
  0xe9   :  { %6958 = vmatprep.subr.bf16.mxu1 %v10056_v21  ;;  %v12299_v21 = vcombine.low %v12075_v24, %v12085_v26  ;;  %v10095_v24 = vld [vmem:[%s15538_s1 + $0x10c4] ss:$16 sps:$4 sm:$0xff]  }
  0xea   :  { %v10098_v26 = vld [vmem:[%s15538_s1 + $0x12c4] ss:$16 sps:$4 sm:$0xff]  }
  0xeb   :  { %6906 = vmatpush2.bf16.msra.mxu0 %v10051_v22  ;;  %v12303_v22 = vcombine.low %v12090_v27, %v12099_v30  ;;  %v12323_v27 = vrot.slane %v1105_v12, %v15543_v52  ;;  %v10093_v30 = vld [vmem:[%s15538_s1 + $0x10c0] ss:$16 sps:$4 sm:$0xff]  }
  0xec   :  { %6959 = vmatpush2.bf16.msra.mxu1 %v10054_v23  ;;  %6907 = vmatprep.subr.bf16.mxu0 %v10059_v25  ;;  %v72_v23 = vld [vmem:[%s15539_s0 + $0x1b8] sm:$0xff]  ;;  %v12310_v25 = vrot.slane %v1105_v12, %v15544_v13  ;;  %v12374_v12 = vld [vmem:[%s15539_s0 + $0xc8] sm:$0xff] }
  0xed   :  { %6960 = vmatprep.subr.bf16.mxu1 %v10062_v31  ;;  %15577 = vst [vmem:[#allocation3_spill] sm:$0xff] %v12303_v22  ;;  %v10090_v31 = vld [vmem:[%s15538_s1 + $0x12e0] ss:$16 sps:$4 sm:$0xff]  }
  0xef   :  { %6908 = vmatpush2.bf16.msra.mxu0 %v10057_v38  ;;  %v12328_v38 = vcombine.high %v55_v18, %v71_v54 }
  0xf0   :  { %6961 = vmatpush2.bf16.msra.mxu1 %v10060_v39  ;;  %6909 = vmatprep.subr.bf16.mxu0 %v10065_v44  ;;  %v12330_v39 = vcombine.high %v56_v58, %v72_v23 }
  0xf1   :  { %6962 = vmatprep.subr.bf16.mxu1 %v10068_v45  ;;  %15578 = vst [vmem:[#allocation4_spill] sm:$0xff] %v12328_v38 }
  0xf2   :  { %15579 = vst [vmem:[#allocation5_spill] sm:$0xff] %v12330_v39 }
  0xf3   :  { %6910 = vmatpush2.bf16.msra.mxu0 %v10063_v46  ;;  %v10096_v46 = vld [vmem:[%s15538_s1 + $0x12c0] ss:$16 sps:$4 sm:$0xff]  }
  0xf4   :  { %6963 = vmatpush2.bf16.msra.mxu1 %v10066_v47  ;;  %6911 = vmatprep.subr.bf16.mxu0 %v10071_v48  ;;  %v10101_v48 = vld [vmem:[%s15538_s1 + $0x10a4] ss:$16 sps:$4 sm:$0xff]  }
  0xf5   :  { %6964 = vmatprep.subr.bf16.mxu1 %v10074_v50 }
  0xf7   :  { %6912 = vmatpush2.bf16.msra.mxu0 %v10069_v60 }
  0xf8   :  { %6965 = vmatpush2.bf16.msra.mxu1 %v10072_v61  ;;  %6913 = vmatprep.subr.bf16.mxu0 %v10077_v1  ;;  %v10104_v61 = vld [vmem:[%s15538_s1 + $0x12a4] ss:$16 sps:$4 sm:$0xff]  }
  0xf9   :  { %6966 = vmatprep.subr.bf16.mxu1 %v10080_v2 }
  0xfb   :  { %6914 = vmatpush2.bf16.msra.mxu0 %v10075_v3  ;;  %v10099_v3 = vld [vmem:[%s15538_s1 + $0x10a0] ss:$16 sps:$4 sm:$0xff]  }
  0xfc   :  { %6967 = vmatpush2.bf16.msra.mxu1 %v10078_v4  ;;  %6915 = vmatprep.subr.bf16.mxu0 %v10083_v6  ;;  %v12360_v4 = vld [vmem:[%s15539_s0 + $0xc0] sm:$0xff]  ;;  %v12365_v6 = vld [vmem:[%s15539_s0 + $0x48] sm:$0xff] }
  0xfd   :  { %6968 = vmatprep.subr.bf16.mxu1 %v10086_v7 }
  0xff   :  { %6916 = vmatpush2.bf16.msra.mxu0 %v10081_v10  ;;  %v12367_v10 = vcombine.low %v55_v18, %v71_v54  ;;  %v10107_v18 = vld [vmem:[%s15538_s1 + $0x1084] ss:$16 sps:$4 sm:$0xff]  }
 0x100   :  { %6969 = vmatpush2.bf16.msra.mxu1 %v10084_v11  ;;  %6991 = vmatprep.subr.bf16.mxu0 %v10089_v14  ;;  %v12369_v11 = vcombine.low %v56_v58, %v72_v23  ;;  %v10110_v54 = vld [vmem:[%s15538_s1 + $0x1284] ss:$16 sps:$4 sm:$0xff]   ;;  %v12392_v23 = vcombine.high %v12347_v0, %v12360_v4 }
 0x101   :  { %7044 = vmatprep.subr.bf16.mxu1 %v10092_v15  ;;  %15580 = vst [vmem:[#allocation6_spill] sm:$0xff] %v12367_v10 }
 0x102   :  { %v6601_v44 = vpop.f32.mrf.mxu0  ;;  %6918 = vmatmul.mubr.bf16.vlgmr.msra.gmra.mxu0 %v12299_v21  ;;  %15581 = vst [vmem:[#allocation7_spill] sm:$0xff] %v12369_v11  ;;  %15582 = vst [vmem:[#allocation8_spill] sm:$0xff] %v12392_v23 }
 0x103   :  { %v6654_v45 = vpop.f32.mrf.mxu1  ;;  %6971 = vmatmul.mubr.bf16.vlgmr.msra.gmra.mxu1 %v12303_v22  ;;  %v6602_v47 = vadd.f32 %v6601_v44, %v12310_v25  ;;  %6992 = vmatpush1.bf16.msra.mxu0 %v10087_v19  ;;  %v10102_v19 = vld [vmem:[%s15538_s1 + $0x12a0] ss:$16 sps:$4 sm:$0xff]   ;;  %v10113_v44 = vld [vmem:[%s15538_s1 + $0x1064] ss:$16 sps:$4 sm:$0xff]  }
 0x104   :  { %7045 = vmatpush1.bf16.msra.mxu1 %v10090_v31  ;;  %v6603_v50 = vpop.f32.mrf.mxu0  ;;  %6993 = vmatprep.subr.bf16.mxu0 %v10095_v24  ;;  %v12396_v24 = vcombine.high %v12365_v6, %v12374_v12  ;;  %v10293_v22 = vld [vmem:[%s15538_s1 + $0x18a4] ss:$16 sps:$4 sm:$0xff]  }
 0x105   :  { %v6656_v60 = vpop.f32.mrf.mxu1  ;;  %7046 = vmatprep.subr.bf16.mxu1 %v10098_v26  ;;  %v12349_v1 = vadd.f32 %v6654_v45, %v6602_v47  ;;  %v6604_v2 = vadd.f32 %v6603_v50, %v12323_v27  ;;  %6927 = vmatprep.mubr.bf16.mxu0 %v12328_v38  ;;  %v10105_v26 = vld [vmem:[%s15538_s1 + $0x1080] ss:$16 sps:$4 sm:$0xff]   ;;  %v10116_v45 = vld [vmem:[%s15538_s1 + $0x1264] ss:$16 sps:$4 sm:$0xff]  }
 0x106   :  { %6980 = vmatprep.mubr.bf16.mxu1 %v12330_v39  ;;  %v6605_v7 = vpop.f32.mrf.mxu0  ;;  %15583 = vst [vmem:[#allocation9_spill] sm:$0xff] %v12396_v24  ;;  %v10114_v47 = vld [vmem:[%s15538_s1 + $0x1260] ss:$16 sps:$4 sm:$0xff]   ;;  %v10212_v39 = vld [vmem:[%s15538_s1 + $0x1664] ss:$16 sps:$4 sm:$0xff]  }
 0x107   :  { %v12376_v14 = vadd.f32 %v6656_v60, %v6604_v2  ;;  %v6606_v15 = vadd.f32 %v6605_v7, %v12310_v25  ;;  %6994 = vmatpush1.bf16.msra.mxu0 %v10093_v30  ;;  %v6658_v31 = vpop.f32.mrf.mxu1  ;;  %v10108_v30 = vld [vmem:[%s15538_s1 + $0x1280] ss:$16 sps:$4 sm:$0xff]   ;;  %v10119_v60 = vld [vmem:[%s15538_s1 + $0x1044] ss:$16 sps:$4 sm:$0xff]  }
 0x108   :  { %7047 = vmatpush1.bf16.msra.mxu1 %v10096_v46  ;;  %6995 = vmatprep.subr.bf16.mxu0 %v10101_v48  ;;  %v10111_v46 = vld [vmem:[%s15538_s1 + $0x1060] ss:$16 sps:$4 sm:$0xff]   ;;  %v12420_v48 = vpop.f32.mrf.mxu0 }
 0x109   :  { %7048 = vmatprep.subr.bf16.mxu1 %v10104_v61  ;;  %v12388_v58 = vadd.f32 %v6658_v31, %v6606_v15  ;;  %v12422_v50 = vpop.f32.mrf.mxu1  ;;  %v10122_v61 = vld [vmem:[%s15538_s1 + $0x1244] ss:$16 sps:$4 sm:$0xff]   ;;  %v10117_v7 = vld [vmem:[%s15538_s1 + $0x1040] ss:$16 sps:$4 sm:$0xff]  }
 0x10a   :  { %6928 = vmatmul.mubr.bf16.gmra.mxu0 %v12367_v10  ;;  %v6611_v2 = vpop.f32.mrf.mxu0  ;;  %v10120_v15 = vld [vmem:[%s15538_s1 + $0x1240] ss:$16 sps:$4 sm:$0xff]  }
 0x10b   :  { %6981 = vmatmul.mubr.bf16.gmra.mxu1 %v12369_v11  ;;  %6996 = vmatpush1.bf16.msra.mxu0 %v10099_v3  ;;  %v6664_v3 = vpop.f32.mrf.mxu1  ;;  %v6612_v31 = vadd.f32 %v6611_v2, %v12310_v25  ;;  %v10131_v2 = vld [vmem:[%s15538_s1 + $0x1004] ss:$16 sps:$4 sm:$0xff]  }
 0x10c   :  { %7049 = vmatpush1.bf16.msra.mxu1 %v10102_v19  ;;  %6997 = vmatprep.subr.bf16.mxu0 %v10107_v18  ;;  %v10125_v19 = vld [vmem:[%s15538_s1 + $0x1024] ss:$16 sps:$4 sm:$0xff]  }
 0x10d   :  { %7050 = vmatprep.subr.bf16.mxu1 %v10110_v54  ;;  %7023 = vmatprep.mubr.bf16.mxu0 %v12392_v23  ;;  %v10128_v18 = vld [vmem:[%s15538_s1 + $0x1224] ss:$16 sps:$4 sm:$0xff]   ;;  %v6613_v54 = vpop.f32.mrf.mxu0 }
 0x10e   :  { %7076 = vmatprep.mubr.bf16.mxu1 %v12396_v24  ;;  %v10197_v23 = vld [vmem:[%s15538_s1 + $0x14a4] ss:$16 sps:$4 sm:$0xff]  }
 0x10f   :  { %6998 = vmatpush1.bf16.msra.mxu0 %v10105_v26  ;;  %v6666_v26 = vpop.f32.mrf.mxu1  ;;  %v10200_v11 = vld [vmem:[%s15538_s1 + $0x16a4] ss:$16 sps:$4 sm:$0xff]  }
 0x110   :  { %7051 = vmatpush1.bf16.msra.mxu1 %v10108_v30  ;;  %6999 = vmatprep.subr.bf16.mxu0 %v10113_v44  ;;  %v6614_v30 = vadd.f32 %v6613_v54, %v12323_v27  ;;  %v12444_v44 = vadd.f32 %v6664_v3, %v6612_v31  ;;  %v10134_v3 = vld [vmem:[%s15538_s1 + $0x1204] ss:$16 sps:$4 sm:$0xff]   ;;  %v10129_v31 = vld [vmem:[%s15538_s1 + $0x1000] ss:$16 sps:$4 sm:$0xff]  }
 0x111   :  { %7052 = vmatprep.subr.bf16.mxu1 %v10116_v45  ;;  %v10123_v45 = vld [vmem:[%s15538_s1 + $0x1020] ss:$16 sps:$4 sm:$0xff]  }
 0x112   :  { %v10135_v54 = vld [vmem:[%s15538_s1 + $0x11e0] ss:$16 sps:$4 sm:$0xff]  }
 0x113   :  { %7000 = vmatpush1.bf16.msra.mxu0 %v10111_v46  ;;  %v6615_v46 = vpop.f32.mrf.mxu0 }
 0x114   :  { %7053 = vmatpush1.bf16.msra.mxu1 %v10114_v47  ;;  %7001 = vmatprep.subr.bf16.mxu0 %v10119_v60  ;;  %v10126_v47 = vld [vmem:[%s15538_s1 + $0x1220] ss:$16 sps:$4 sm:$0xff]   ;;  %v6616_v60 = vadd.f32 %v6615_v46, %v12310_v25 }
 0x115   :  { %7054 = vmatprep.subr.bf16.mxu1 %v10122_v61  ;;  %v12453_v61 = vadd.f32 %v6666_v26, %v6614_v30  ;;  %v10132_v25 = vld [vmem:[%s15538_s1 + $0x1200] ss:$16 sps:$4 sm:$0xff]   ;;  %v10143_v30 = vld [vmem:[%s15538_s1 + $0x11c4] ss:$16 sps:$4 sm:$0xff]  }
 0x116   :  { %v10138_v26 = vld [vmem:[%s15538_s1 + $0x13e0] ss:$16 sps:$4 sm:$0xff]  }
 0x117   :  { %7002 = vmatpush1.bf16.msra.mxu0 %v10117_v7  ;;  %v6668_v7 = vpop.f32.mrf.mxu1  ;;  %v10141_v46 = vld [vmem:[%s15538_s1 + $0x11c0] ss:$16 sps:$4 sm:$0xff]  }
 0x118   :  { %7055 = vmatpush1.bf16.msra.mxu1 %v10120_v15  ;;  %7003 = vmatprep.subr.bf16.mxu0 %v10125_v19  ;;  %v12461_v15 = vadd.f32 %v6668_v7, %v6616_v60  ;;  %v10137_v19 = vld [vmem:[%s15538_s1 + $0x11e4] ss:$16 sps:$4 sm:$0xff]   ;;  %v10150_v7 = vld [vmem:[%s15538_s1 + $0x13a0] ss:$16 sps:$4 sm:$0xff]  }
 0x119   :  { %7056 = vmatprep.subr.bf16.mxu1 %v10128_v18  ;;  %v10140_v18 = vld [vmem:[%s15538_s1 + $0x13e4] ss:$16 sps:$4 sm:$0xff]  }
 0x11a   :  { %v10149_v60 = vld [vmem:[%s15538_s1 + $0x11a4] ss:$16 sps:$4 sm:$0xff]  }
 0x11b   :  { %7004 = vmatpush1.bf16.msra.mxu0 %v10123_v45  ;;  %v10146_v45 = vld [vmem:[%s15538_s1 + $0x13c4] ss:$16 sps:$4 sm:$0xff]  }
 0x11c   :  { %7057 = vmatpush1.bf16.msra.mxu1 %v10126_v47  ;;  %7005 = vmatprep.subr.bf16.mxu0 %v10131_v2  ;;  %v10144_v47 = vld [vmem:[%s15538_s1 + $0x13c0] ss:$16 sps:$4 sm:$0xff]   ;;  %v10152_v2 = vld [vmem:[%s15538_s1 + $0x13a4] ss:$16 sps:$4 sm:$0xff]  }
 0x11d   :  { %7058 = vmatprep.subr.bf16.mxu1 %v10134_v3  ;;  %v10147_v3 = vld [vmem:[%s15538_s1 + $0x11a0] ss:$16 sps:$4 sm:$0xff]  }
 0x11f   :  { %7006 = vmatpush1.bf16.msra.mxu0 %v10129_v31  ;;  %v10155_v31 = vld [vmem:[%s15538_s1 + $0x1184] ss:$16 sps:$4 sm:$0xff]  }
 0x120   :  { %7059 = vmatpush1.bf16.msra.mxu1 %v10132_v25  ;;  %7007 = vmatprep.subr.bf16.mxu0 %v10137_v19  ;;  %v10158_v25 = vld [vmem:[%s15538_s1 + $0x1384] ss:$16 sps:$4 sm:$0xff]   ;;  %v10153_v19 = vld [vmem:[%s15538_s1 + $0x1180] ss:$16 sps:$4 sm:$0xff]  }
 0x121   :  { %7060 = vmatprep.subr.bf16.mxu1 %v10140_v18  ;;  %v10156_v18 = vld [vmem:[%s15538_s1 + $0x1380] ss:$16 sps:$4 sm:$0xff]  }
 0x123   :  { %7008 = vmatpush2.bf16.msra.mxu0 %v10135_v54  ;;  %v10161_v54 = vld [vmem:[%s15538_s1 + $0x1164] ss:$16 sps:$4 sm:$0xff]  }
 0x124   :  { %7061 = vmatpush2.bf16.msra.mxu1 %v10138_v26  ;;  %7009 = vmatprep.subr.bf16.mxu0 %v10143_v30  ;;  %v10164_v26 = vld [vmem:[%s15538_s1 + $0x1364] ss:$16 sps:$4 sm:$0xff]   ;;  %v10159_v30 = vld [vmem:[%s15538_s1 + $0x1160] ss:$16 sps:$4 sm:$0xff]  }
 0x125   :  { %7062 = vmatprep.subr.bf16.mxu1 %v10146_v45  ;;  %v10162_v45 = vld [vmem:[%s15538_s1 + $0x1360] ss:$16 sps:$4 sm:$0xff]  }
 0x127   :  { %7010 = vmatpush2.bf16.msra.mxu0 %v10141_v46  ;;  %v10167_v46 = vld [vmem:[%s15538_s1 + $0x1144] ss:$16 sps:$4 sm:$0xff]  }
 0x128   :  { %7063 = vmatpush2.bf16.msra.mxu1 %v10144_v47  ;;  %7011 = vmatprep.subr.bf16.mxu0 %v10149_v60  ;;  %v10170_v47 = vld [vmem:[%s15538_s1 + $0x1344] ss:$16 sps:$4 sm:$0xff]   ;;  %v10165_v60 = vld [vmem:[%s15538_s1 + $0x1140] ss:$16 sps:$4 sm:$0xff]  }
 0x129   :  { %7064 = vmatprep.subr.bf16.mxu1 %v10152_v2  ;;  %v10168_v2 = vld [vmem:[%s15538_s1 + $0x1340] ss:$16 sps:$4 sm:$0xff]  }
 0x12b   :  { %7012 = vmatpush2.bf16.msra.mxu0 %v10147_v3  ;;  %v10173_v3 = vld [vmem:[%s15538_s1 + $0x1124] ss:$16 sps:$4 sm:$0xff]  }
 0x12c   :  { %7065 = vmatpush2.bf16.msra.mxu1 %v10150_v7  ;;  %7013 = vmatprep.subr.bf16.mxu0 %v10155_v31  ;;  %v10176_v7 = vld [vmem:[%s15538_s1 + $0x1324] ss:$16 sps:$4 sm:$0xff]   ;;  %v10171_v31 = vld [vmem:[%s15538_s1 + $0x1120] ss:$16 sps:$4 sm:$0xff]  }
 0x12d   :  { %7066 = vmatprep.subr.bf16.mxu1 %v10158_v25  ;;  %v10174_v25 = vld [vmem:[%s15538_s1 + $0x1320] ss:$16 sps:$4 sm:$0xff]  }
 0x12f   :  { %7014 = vmatpush2.bf16.msra.mxu0 %v10153_v19  ;;  %v10179_v19 = vld [vmem:[%s15538_s1 + $0x1104] ss:$16 sps:$4 sm:$0xff]  }
 0x130   :  { %7067 = vmatpush2.bf16.msra.mxu1 %v10156_v18  ;;  %7015 = vmatprep.subr.bf16.mxu0 %v10161_v54  ;;  %v10182_v18 = vld [vmem:[%s15538_s1 + $0x1304] ss:$16 sps:$4 sm:$0xff]   ;;  %v10177_v54 = vld [vmem:[%s15538_s1 + $0x1100] ss:$16 sps:$4 sm:$0xff]  }
 0x131   :  { %7068 = vmatprep.subr.bf16.mxu1 %v10164_v26  ;;  %v10180_v26 = vld [vmem:[%s15538_s1 + $0x1300] ss:$16 sps:$4 sm:$0xff]  }
 0x133   :  { %7016 = vmatpush2.bf16.msra.mxu0 %v10159_v30  ;;  %v10185_v30 = vld [vmem:[%s15538_s1 + $0x14e4] ss:$16 sps:$4 sm:$0xff]  }
 0x134   :  { %7069 = vmatpush2.bf16.msra.mxu1 %v10162_v45  ;;  %7017 = vmatprep.subr.bf16.mxu0 %v10167_v46  ;;  %v10188_v45 = vld [vmem:[%s15538_s1 + $0x16e4] ss:$16 sps:$4 sm:$0xff]  }
 0x135   :  { %7070 = vmatprep.subr.bf16.mxu1 %v10170_v47  ;;  %v57_v46 = vld [vmem:[%s15539_s0 + $0x140] sm:$0xff] }
 0x136   :  { %v10183_v47 = vld [vmem:[%s15538_s1 + $0x14e0] ss:$16 sps:$4 sm:$0xff]  }
 0x137   :  { %7018 = vmatpush2.bf16.msra.mxu0 %v10165_v60  ;;  %v12579_v60 = vcombine.low %v12347_v0, %v12360_v4  ;;  %v10186_v0 = vld [vmem:[%s15538_s1 + $0x16e0] ss:$16 sps:$4 sm:$0xff]   ;;  %v12597_v4 = vpop.f32.mrf.mxu0 }
 0x138   :  { %7071 = vmatpush2.bf16.msra.mxu1 %v10168_v2  ;;  %7019 = vmatprep.subr.bf16.mxu0 %v10173_v3  ;;  %v12583_v2 = vcombine.low %v12365_v6, %v12374_v12  ;;  %v73_v3 = vld [vmem:[%s15539_s0 + $0x1c0] sm:$0xff]  ;;  %v12599_v6 = vpop.f32.mrf.mxu1 }
 0x139   :  { %7072 = vmatprep.subr.bf16.mxu1 %v10176_v7  ;;  %15584 = vst [vmem:[#allocation10_spill] sm:$0xff] %v12579_v60  ;;  %v58_v7 = vld [vmem:[%s15539_s0 + $0x148] sm:$0xff]  ;;  %v10191_v12 = vld [vmem:[%s15538_s1 + $0x14c4] ss:$16 sps:$4 sm:$0xff]  }
 0x13a   :  { %15585 = vst [vmem:[#allocation11_spill] sm:$0xff] %v12583_v2 }
 0x13b   :  { %7020 = vmatpush2.bf16.msra.mxu0 %v10171_v31  ;;  %v74_v31 = vld [vmem:[%s15539_s0 + $0x1c8] sm:$0xff] }
 0x13c   :  { %7073 = vmatpush2.bf16.msra.mxu1 %v10174_v25  ;;  %7021 = vmatprep.subr.bf16.mxu0 %v10179_v19  ;;  %v10194_v25 = vld [vmem:[%s15538_s1 + $0x16c4] ss:$16 sps:$4 sm:$0xff]   ;;  %v10189_v19 = vld [vmem:[%s15538_s1 + $0x14c0] ss:$16 sps:$4 sm:$0xff]  }
 0x13d   :  { %7074 = vmatprep.subr.bf16.mxu1 %v10182_v18  ;;  %v10192_v18 = vld [vmem:[%s15538_s1 + $0x16c0] ss:$16 sps:$4 sm:$0xff]  }
 0x13f   :  { %7022 = vmatpush2.bf16.msra.mxu0 %v10177_v54  ;;  %v12613_v54 = vcombine.high %v57_v46, %v73_v3 }
 0x140   :  { %7075 = vmatpush2.bf16.msra.mxu1 %v10180_v26  ;;  %7097 = vmatprep.subr.bf16.mxu0 %v10185_v30  ;;  %v12615_v26 = vcombine.high %v58_v7, %v74_v31 }
 0x141   :  { %7150 = vmatprep.subr.bf16.mxu1 %v10188_v45  ;;  %15586 = vst [vmem:[#allocation12_spill] sm:$0xff] %v12613_v54 }
 0x142   :  { %15587 = vst [vmem:[#allocation13_spill] sm:$0xff] %v12615_v26  ;;  %v6707_v30 = vpop.f32.mrf.mxu0  ;;  %7024 = vmatmul.mubr.bf16.vlgmr.msra.gmra.mxu0 %v12579_v60  ;;  %v10209_v60 = vld [vmem:[%s15538_s1 + $0x1464] ss:$16 sps:$4 sm:$0xff]  }
 0x143   :  { %v6760_v45 = vpop.f32.mrf.mxu1  ;;  %7077 = vmatmul.mubr.bf16.vlgmr.msra.gmra.mxu1 %v12583_v2  ;;  %v6708_v52 = vadd.f32 %v6707_v30, %v12349_v1  ;;  %7098 = vmatpush1.bf16.msra.mxu0 %v10183_v47  ;;  %v10195_v1 = vld [vmem:[%s15538_s1 + $0x14a0] ss:$16 sps:$4 sm:$0xff]   ;;  %v12654_v30 = vld [vmem:[%s15539_s0 + $0x58] sm:$0xff] }
 0x144   :  { %7151 = vmatpush1.bf16.msra.mxu1 %v10186_v0  ;;  %v6709_v13 = vpop.f32.mrf.mxu0  ;;  %7099 = vmatprep.subr.bf16.mxu0 %v10191_v12  ;;  %v10198_v47 = vld [vmem:[%s15538_s1 + $0x16a0] ss:$16 sps:$4 sm:$0xff]   ;;  %v12647_v12 = vcombine.low %v57_v46, %v73_v3 }
 0x145   :  { %v6762_v24 = vpop.f32.mrf.mxu1  ;;  %7152 = vmatprep.subr.bf16.mxu1 %v10194_v25  ;;  %v12626_v10 = vadd.f32 %v6760_v45, %v6708_v52  ;;  %v6710_v2 = vadd.f32 %v6709_v13, %v12376_v14  ;;  %7033 = vmatprep.mubr.bf16.mxu0 %v12613_v54  ;;  %v12640_v0 = vld [vmem:[%s15539_s0 + $0x50] sm:$0xff]  ;;  %v12649_v25 = vcombine.low %v58_v7, %v74_v31  ;;  %v12659_v45 = vld [vmem:[%s15539_s0 + $0xd8] sm:$0xff] }
 0x146   :  { %7086 = vmatprep.mubr.bf16.mxu1 %v12615_v26  ;;  %v12645_v13 = vld [vmem:[%s15539_s0 + $0xd0] sm:$0xff]  ;;  %v6711_v52 = vpop.f32.mrf.mxu0  ;;  %15588 = vst [vmem:[#allocation14_spill] sm:$0xff] %v12647_v12 }
 0x147   :  { %v6764_v14 = vpop.f32.mrf.mxu1  ;;  %15589 = vst [vmem:[#allocation15_spill] sm:$0xff] %v12649_v25  ;;  %v12661_v26 = vadd.f32 %v6762_v24, %v6710_v2  ;;  %v6712_v54 = vadd.f32 %v6711_v52, %v12388_v58  ;;  %7100 = vmatpush1.bf16.msra.mxu0 %v10189_v19  ;;  %v10203_v7 = vld [vmem:[%s15538_s1 + $0x1484] ss:$16 sps:$4 sm:$0xff]   ;;  %v10201_v58 = vld [vmem:[%s15538_s1 + $0x1480] ss:$16 sps:$4 sm:$0xff]  }
 0x148   :  { %7153 = vmatpush1.bf16.msra.mxu1 %v10192_v18  ;;  %v12664_v46 = vpop.f32.mrf.mxu0  ;;  %7101 = vmatprep.subr.bf16.mxu0 %v10197_v23  ;;  %v10206_v31 = vld [vmem:[%s15538_s1 + $0x1684] ss:$16 sps:$4 sm:$0xff]   ;;  %v10204_v2 = vld [vmem:[%s15538_s1 + $0x1680] ss:$16 sps:$4 sm:$0xff]   ;;  %v12688_v23 = vcombine.high %v12654_v30, %v12659_v45 }
 0x149   :  { %v12666_v3 = vpop.f32.mrf.mxu1  ;;  %7154 = vmatprep.subr.bf16.mxu1 %v10200_v11  ;;  %v12674_v24 = vadd.f32 %v6764_v14, %v6712_v54  ;;  %v12684_v11 = vcombine.high %v12640_v0, %v12645_v13 }
 0x14a   :  { %15591 = vst [vmem:[#allocation17_spill] sm:$0xff] %v12688_v23  ;;  %v6717_v19 = vpop.f32.mrf.mxu0  ;;  %7034 = vmatmul.mubr.bf16.gmra.mxu0 %v12647_v12 }
 0x14b   :  { %15590 = vst [vmem:[#allocation16_spill] sm:$0xff] %v12684_v11  ;;  %v6770_v18 = vpop.f32.mrf.mxu1  ;;  %7087 = vmatmul.mubr.bf16.gmra.mxu1 %v12649_v25  ;;  %v6718_v54 = vadd.f32 %v6717_v19, %v12444_v44  ;;  %7102 = vmatpush1.bf16.msra.mxu0 %v10195_v1  ;;  %v10207_v44 = vld [vmem:[%s15538_s1 + $0x1460] ss:$16 sps:$4 sm:$0xff]  }
 0x14c   :  { %7155 = vmatpush1.bf16.msra.mxu1 %v10198_v47  ;;  %v6719_v52 = vpop.f32.mrf.mxu0  ;;  %7103 = vmatprep.subr.bf16.mxu0 %v10203_v7  ;;  %v10210_v1 = vld [vmem:[%s15538_s1 + $0x1660] ss:$16 sps:$4 sm:$0xff]  }
 0x14d   :  { %v6772_v14 = vpop.f32.mrf.mxu1  ;;  %7156 = vmatprep.subr.bf16.mxu1 %v10206_v31  ;;  %v6720_v12 = vadd.f32 %v6719_v52, %v12453_v61  ;;  %v12700_v38 = vadd.f32 %v6770_v18, %v6718_v54  ;;  %7129 = vmatprep.mubr.bf16.mxu0 %v12684_v11  ;;  %v10215_v61 = vld [vmem:[%s15538_s1 + $0x1444] ss:$16 sps:$4 sm:$0xff]  }
 0x14e   :  { %7182 = vmatprep.mubr.bf16.mxu1 %v12688_v23  ;;  %v6721_v47 = vpop.f32.mrf.mxu0  ;;  %v10218_v18 = vld [vmem:[%s15538_s1 + $0x1644] ss:$16 sps:$4 sm:$0xff]   ;;  %v6618_v23 = vadd.f32 %v12597_v4, %v12323_v27  ;;  %v10294_v4 = vld [vmem:[%s15538_s1 + $0x1aa0] ss:$16 sps:$4 sm:$0xff]  }
 0x14f   :  { %v6774_v7 = vpop.f32.mrf.mxu1  ;;  %v6722_v31 = vadd.f32 %v6721_v47, %v12461_v15  ;;  %v12711_v19 = vadd.f32 %v6772_v14, %v6720_v12  ;;  %7104 = vmatpush1.bf16.msra.mxu0 %v10201_v58  ;;  %v10213_v15 = vld [vmem:[%s15538_s1 + $0x1440] ss:$16 sps:$4 sm:$0xff]   ;;  %v10224_v12 = vld [vmem:[%s15538_s1 + $0x1624] ss:$16 sps:$4 sm:$0xff]  }
 0x150   :  { %7157 = vmatpush1.bf16.msra.mxu1 %v10204_v2  ;;  %7105 = vmatprep.subr.bf16.mxu0 %v10209_v60  ;;  %v10221_v60 = vld [vmem:[%s15538_s1 + $0x1424] ss:$16 sps:$4 sm:$0xff]   ;;  %v10219_v58 = vld [vmem:[%s15538_s1 + $0x1420] ss:$16 sps:$4 sm:$0xff]  }
 0x151   :  { %7158 = vmatprep.subr.bf16.mxu1 %v10212_v39  ;;  %v12719_v54 = vadd.f32 %v6774_v7, %v6722_v31  ;;  %v10216_v39 = vld [vmem:[%s15538_s1 + $0x1640] ss:$16 sps:$4 sm:$0xff]   ;;  %v10227_v52 = vld [vmem:[%s15538_s1 + $0x1404] ss:$16 sps:$4 sm:$0xff]  }
 0x152   :  { %v10222_v2 = vld [vmem:[%s15538_s1 + $0x1620] ss:$16 sps:$4 sm:$0xff]   ;;  %v10230_v14 = vld [vmem:[%s15538_s1 + $0x1604] ss:$16 sps:$4 sm:$0xff]  }
 0x153   :  { %7106 = vmatpush1.bf16.msra.mxu0 %v10207_v44  ;;  %v10225_v44 = vld [vmem:[%s15538_s1 + $0x1400] ss:$16 sps:$4 sm:$0xff]   ;;  %v10233_v47 = vld [vmem:[%s15538_s1 + $0x15e4] ss:$16 sps:$4 sm:$0xff]  }
 0x154   :  { %7159 = vmatpush1.bf16.msra.mxu1 %v10210_v1  ;;  %7107 = vmatprep.subr.bf16.mxu0 %v10215_v61  ;;  %v10228_v1 = vld [vmem:[%s15538_s1 + $0x1600] ss:$16 sps:$4 sm:$0xff]   ;;  %v10236_v7 = vld [vmem:[%s15538_s1 + $0x17e4] ss:$16 sps:$4 sm:$0xff]  }
 0x155   :  { %7160 = vmatprep.subr.bf16.mxu1 %v10218_v18  ;;  %v10231_v31 = vld [vmem:[%s15538_s1 + $0x15e0] ss:$16 sps:$4 sm:$0xff]   ;;  %v10239_v18 = vld [vmem:[%s15538_s1 + $0x15c4] ss:$16 sps:$4 sm:$0xff]  }
 0x156   :  { %v10234_v61 = vld [vmem:[%s15538_s1 + $0x17e0] ss:$16 sps:$4 sm:$0xff]  }
 0x157   :  { %7108 = vmatpush1.bf16.msra.mxu0 %v10213_v15  ;;  %v10242_v15 = vld [vmem:[%s15538_s1 + $0x17c4] ss:$16 sps:$4 sm:$0xff]  }
 0x158   :  { %7161 = vmatpush1.bf16.msra.mxu1 %v10216_v39  ;;  %7109 = vmatprep.subr.bf16.mxu0 %v10221_v60  ;;  %v10237_v39 = vld [vmem:[%s15538_s1 + $0x15c0] ss:$16 sps:$4 sm:$0xff]  }
 0x159   :  { %7162 = vmatprep.subr.bf16.mxu1 %v10224_v12  ;;  %v10240_v60 = vld [vmem:[%s15538_s1 + $0x17c0] ss:$16 sps:$4 sm:$0xff]   ;;  %v10245_v12 = vld [vmem:[%s15538_s1 + $0x15a4] ss:$16 sps:$4 sm:$0xff]  }
 0x15b   :  { %7110 = vmatpush1.bf16.msra.mxu0 %v10219_v58  ;;  %v10248_v58 = vld [vmem:[%s15538_s1 + $0x17a4] ss:$16 sps:$4 sm:$0xff]  }
 0x15c   :  { %7163 = vmatpush1.bf16.msra.mxu1 %v10222_v2  ;;  %7111 = vmatprep.subr.bf16.mxu0 %v10227_v52  ;;  %v10243_v2 = vld [vmem:[%s15538_s1 + $0x15a0] ss:$16 sps:$4 sm:$0xff]  }
 0x15d   :  { %7164 = vmatprep.subr.bf16.mxu1 %v10230_v14  ;;  %v10246_v52 = vld [vmem:[%s15538_s1 + $0x17a0] ss:$16 sps:$4 sm:$0xff]   ;;  %v10251_v14 = vld [vmem:[%s15538_s1 + $0x1584] ss:$16 sps:$4 sm:$0xff]  }
 0x15f   :  { %7112 = vmatpush1.bf16.msra.mxu0 %v10225_v44  ;;  %v10254_v44 = vld [vmem:[%s15538_s1 + $0x1784] ss:$16 sps:$4 sm:$0xff]  }
 0x160   :  { %7165 = vmatpush1.bf16.msra.mxu1 %v10228_v1  ;;  %7113 = vmatprep.subr.bf16.mxu0 %v10233_v47  ;;  %v10249_v1 = vld [vmem:[%s15538_s1 + $0x1580] ss:$16 sps:$4 sm:$0xff]  }
 0x161   :  { %7166 = vmatprep.subr.bf16.mxu1 %v10236_v7  ;;  %v10252_v47 = vld [vmem:[%s15538_s1 + $0x1780] ss:$16 sps:$4 sm:$0xff]   ;;  %v10257_v7 = vld [vmem:[%s15538_s1 + $0x1564] ss:$16 sps:$4 sm:$0xff]  }
 0x163   :  { %7114 = vmatpush2.bf16.msra.mxu0 %v10231_v31  ;;  %v10260_v31 = vld [vmem:[%s15538_s1 + $0x1764] ss:$16 sps:$4 sm:$0xff]  }
 0x164   :  { %7167 = vmatpush2.bf16.msra.mxu1 %v10234_v61  ;;  %7115 = vmatprep.subr.bf16.mxu0 %v10239_v18  ;;  %v10255_v61 = vld [vmem:[%s15538_s1 + $0x1560] ss:$16 sps:$4 sm:$0xff]  }
 0x165   :  { %7168 = vmatprep.subr.bf16.mxu1 %v10242_v15  ;;  %v10258_v18 = vld [vmem:[%s15538_s1 + $0x1760] ss:$16 sps:$4 sm:$0xff]   ;;  %v10263_v15 = vld [vmem:[%s15538_s1 + $0x1544] ss:$16 sps:$4 sm:$0xff]  }
 0x167   :  { %7116 = vmatpush2.bf16.msra.mxu0 %v10237_v39  ;;  %v10266_v39 = vld [vmem:[%s15538_s1 + $0x1744] ss:$16 sps:$4 sm:$0xff]  }
 0x168   :  { %7169 = vmatpush2.bf16.msra.mxu1 %v10240_v60  ;;  %7117 = vmatprep.subr.bf16.mxu0 %v10245_v12  ;;  %v10261_v60 = vld [vmem:[%s15538_s1 + $0x1540] ss:$16 sps:$4 sm:$0xff]  }
 0x169   :  { %7170 = vmatprep.subr.bf16.mxu1 %v10248_v58  ;;  %v10264_v12 = vld [vmem:[%s15538_s1 + $0x1740] ss:$16 sps:$4 sm:$0xff]   ;;  %v10269_v58 = vld [vmem:[%s15538_s1 + $0x1524] ss:$16 sps:$4 sm:$0xff]  }
 0x16b   :  { %7118 = vmatpush2.bf16.msra.mxu0 %v10243_v2  ;;  %v10272_v2 = vld [vmem:[%s15538_s1 + $0x1724] ss:$16 sps:$4 sm:$0xff]  }
 0x16c   :  { %7171 = vmatpush2.bf16.msra.mxu1 %v10246_v52  ;;  %7119 = vmatprep.subr.bf16.mxu0 %v10251_v14  ;;  %v10267_v52 = vld [vmem:[%s15538_s1 + $0x1520] ss:$16 sps:$4 sm:$0xff]  }
 0x16d   :  { %7172 = vmatprep.subr.bf16.mxu1 %v10254_v44  ;;  %v10270_v14 = vld [vmem:[%s15538_s1 + $0x1720] ss:$16 sps:$4 sm:$0xff]   ;;  %v10275_v44 = vld [vmem:[%s15538_s1 + $0x1504] ss:$16 sps:$4 sm:$0xff]  }
 0x16f   :  { %7120 = vmatpush2.bf16.msra.mxu0 %v10249_v1  ;;  %v10278_v1 = vld [vmem:[%s15538_s1 + $0x1704] ss:$16 sps:$4 sm:$0xff]  }
 0x170   :  { %7173 = vmatpush2.bf16.msra.mxu1 %v10252_v47  ;;  %7121 = vmatprep.subr.bf16.mxu0 %v10257_v7  ;;  %v10273_v47 = vld [vmem:[%s15538_s1 + $0x1500] ss:$16 sps:$4 sm:$0xff]  }
 0x171   :  { %7174 = vmatprep.subr.bf16.mxu1 %v10260_v31  ;;  %v10276_v7 = vld [vmem:[%s15538_s1 + $0x1700] ss:$16 sps:$4 sm:$0xff]   ;;  %v10281_v31 = vld [vmem:[%s15538_s1 + $0x18e4] ss:$16 sps:$4 sm:$0xff]  }
 0x173   :  { %7122 = vmatpush2.bf16.msra.mxu0 %v10255_v61  ;;  %v10284_v61 = vld [vmem:[%s15538_s1 + $0x1ae4] ss:$16 sps:$4 sm:$0xff]  }
 0x174   :  { %7175 = vmatpush2.bf16.msra.mxu1 %v10258_v18  ;;  %7123 = vmatprep.subr.bf16.mxu0 %v10263_v15  ;;  %v59_v18 = vld [vmem:[%s15539_s0 + $0x150] sm:$0xff]  ;;  %v6608_v15 = vadd.f32 %v12420_v48, %v12323_v27  ;;  %v60_v48 = vld [vmem:[%s15539_s0 + $0x158] sm:$0xff] }
 0x175   :  { %7176 = vmatprep.subr.bf16.mxu1 %v10266_v39  ;;  %v10279_v39 = vld [vmem:[%s15538_s1 + $0x18e0] ss:$16 sps:$4 sm:$0xff]  }
 0x176   :  { %v10291_v27 = vld [vmem:[%s15538_s1 + $0x18a0] ss:$16 sps:$4 sm:$0xff]  }
 0x177   :  { %7124 = vmatpush2.bf16.msra.mxu0 %v10261_v60  ;;  %v12863_v60 = vcombine.low %v12640_v0, %v12645_v13  ;;  %v10282_v0 = vld [vmem:[%s15538_s1 + $0x1ae0] ss:$16 sps:$4 sm:$0xff]   ;;  %v6723_v13 = vpop.f32.mrf.mxu0 }
 0x178   :  { %7177 = vmatpush2.bf16.msra.mxu1 %v10264_v12  ;;  %7125 = vmatprep.subr.bf16.mxu0 %v10269_v58  ;;  %v12867_v12 = vcombine.low %v12654_v30, %v12659_v45  ;;  %v75_v58 = vld [vmem:[%s15539_s0 + $0x1d0] sm:$0xff]  ;;  %v12881_v30 = vpop.f32.mrf.mxu1 }
 0x179   :  { %7178 = vmatprep.subr.bf16.mxu1 %v10272_v2  ;;  %v76_v2 = vld [vmem:[%s15539_s0 + $0x1d8] sm:$0xff]  ;;  %v10287_v45 = vld [vmem:[%s15538_s1 + $0x18c4] ss:$16 sps:$4 sm:$0xff]  }
 0x17a   :  { %15592 = vst [vmem:[#allocation18_spill] sm:$0xff] %v12867_v12 }
 0x17b   :  { %7126 = vmatpush2.bf16.msra.mxu0 %v10267_v52  ;;  %v10290_v52 = vld [vmem:[%s15538_s1 + $0x1ac4] ss:$16 sps:$4 sm:$0xff]  }
 0x17c   :  { %7179 = vmatpush2.bf16.msra.mxu1 %v10270_v14  ;;  %7127 = vmatprep.subr.bf16.mxu0 %v10275_v44  ;;  %v6661_v14 = vadd.f32 %v12422_v50, %v6608_v15  ;;  %v10285_v44 = vld [vmem:[%s15538_s1 + $0x18c0] ss:$16 sps:$4 sm:$0xff]  }
 0x17d   :  { %7180 = vmatprep.subr.bf16.mxu1 %v10278_v1  ;;  %v10288_v1 = vld [vmem:[%s15538_s1 + $0x1ac0] ss:$16 sps:$4 sm:$0xff]  }
 0x17e   :  { %v6714_v50 = vadd.f32 %v12664_v46, %v6661_v14  ;;  %v12940_v14 = vld [vmem:[%s15539_s0 + $0x68] sm:$0xff] }
 0x17f   :  { %7128 = vmatpush2.bf16.msra.mxu0 %v10273_v47  ;;  %v12896_v47 = vcombine.high %v59_v18, %v75_v58 }
 0x180   :  { %7181 = vmatpush2.bf16.msra.mxu1 %v10276_v7  ;;  %7203 = vmatprep.subr.bf16.mxu0 %v10281_v31  ;;  %v12898_v7 = vcombine.high %v60_v48, %v76_v2 }
 0x181   :  { %7256 = vmatprep.subr.bf16.mxu1 %v10284_v61 }
 0x182   :  { %15593 = vst [vmem:[#allocation19_spill] sm:$0xff] %v12898_v7  ;;  %v6813_v31 = vpop.f32.mrf.mxu0  ;;  %7130 = vmatmul.mubr.bf16.vlgmr.msra.gmra.mxu0 %v12863_v60 }
 0x183   :  { %v6866_v61 = vpop.f32.mrf.mxu1  ;;  %7183 = vmatmul.mubr.bf16.vlgmr.msra.gmra.mxu1 %v12867_v12  ;;  %v6814_v15 = vadd.f32 %v6813_v31, %v12626_v10  ;;  %7204 = vmatpush1.bf16.msra.mxu0 %v10279_v39  ;;  %v10296_v12 = vld [vmem:[%s15538_s1 + $0x1aa4] ss:$16 sps:$4 sm:$0xff]   ;;  %v12945_v31 = vld [vmem:[%s15539_s0 + $0xe8] sm:$0xff] }
 0x184   :  { %7257 = vmatpush1.bf16.msra.mxu1 %v10282_v0  ;;  %v6815_v11 = vpop.f32.mrf.mxu0  ;;  %7205 = vmatprep.subr.bf16.mxu0 %v10287_v45  ;;  %v12926_v39 = vld [vmem:[%s15539_s0 + $0x60] sm:$0xff]  ;;  %v12933_v45 = vcombine.low %v59_v18, %v75_v58  ;;  %v6671_v18 = vadd.f32 %v12599_v6, %v6618_v23  ;;  %v12972_v23 = vcombine.high %v12940_v14, %v12945_v31 }
 0x185   :  { %v6868_v25 = vpop.f32.mrf.mxu1  ;;  %7258 = vmatprep.subr.bf16.mxu1 %v10290_v52  ;;  %v12912_v46 = vadd.f32 %v6866_v61, %v6814_v15  ;;  %v6816_v10 = vadd.f32 %v6815_v11, %v12661_v26  ;;  %7139 = vmatprep.mubr.bf16.mxu0 %v12896_v47  ;;  %v12931_v26 = vld [vmem:[%s15539_s0 + $0xe0] sm:$0xff]  ;;  %v12935_v52 = vcombine.low %v60_v48, %v76_v2 }
 0x186   :  { %7192 = vmatprep.mubr.bf16.mxu1 %v12898_v7  ;;  %v6817_v11 = vpop.f32.mrf.mxu0  ;;  %v6767_v61 = vadd.f32 %v12666_v3, %v6714_v50  ;;  %v10299_v2 = vld [vmem:[%s15538_s1 + $0x1884] ss:$16 sps:$4 sm:$0xff]   ;;  %v12968_v6 = vcombine.high %v12926_v39, %v12931_v26  ;;  %15595 = vst [vmem:[#allocation21_spill] sm:$0xff] %v12972_v23 }
 0x187   :  { %v6870_v0 = vpop.f32.mrf.mxu1  ;;  %v12948_v15 = vadd.f32 %v6868_v25, %v6816_v10  ;;  %v6818_v7 = vadd.f32 %v6817_v11, %v12674_v24  ;;  %7206 = vmatpush1.bf16.msra.mxu0 %v10285_v44  ;;  %v10302_v3 = vld [vmem:[%s15538_s1 + $0x1a84] ss:$16 sps:$4 sm:$0xff]   ;;  %v10297_v24 = vld [vmem:[%s15538_s1 + $0x1880] ss:$16 sps:$4 sm:$0xff]  }
 0x188   :  { %7259 = vmatpush1.bf16.msra.mxu1 %v10288_v1  ;;  %v6819_v58 = vpop.f32.mrf.mxu0  ;;  %7207 = vmatprep.subr.bf16.mxu0 %v10293_v22  ;;  %v10300_v22 = vld [vmem:[%s15538_s1 + $0x1a80] ss:$16 sps:$4 sm:$0xff]   ;;  %15594 = vst [vmem:[#allocation20_spill] sm:$0xff] %v12968_v6  ;;  %v6724_v1 = vadd.f32 %v6723_v13, %v6671_v18 }
 0x189   :  { %v6872_v48 = vpop.f32.mrf.mxu1  ;;  %7260 = vmatprep.subr.bf16.mxu1 %v10296_v12  ;;  %v12958_v25 = vadd.f32 %v6870_v0, %v6818_v7  ;;  %v6820_v50 = vadd.f32 %v6819_v58, %v6767_v61  ;;  %v10305_v61 = vld [vmem:[%s15538_s1 + $0x1864] ss:$16 sps:$4 sm:$0xff]  }
 0x18a   :  { %v6823_v12 = vpop.f32.mrf.mxu0  ;;  %7140 = vmatmul.mubr.bf16.gmra.mxu0 %v12933_v45  ;;  %v10308_v58 = vld [vmem:[%s15538_s1 + $0x1a64] ss:$16 sps:$4 sm:$0xff]  }
 0x18b   :  { %v6876_v44 = vpop.f32.mrf.mxu1  ;;  %7193 = vmatmul.mubr.bf16.gmra.mxu1 %v12935_v52  ;;  %v12976_v7 = vadd.f32 %v6872_v48, %v6820_v50  ;;  %v6824_v10 = vadd.f32 %v6823_v12, %v12700_v38  ;;  %7208 = vmatpush1.bf16.msra.mxu0 %v10291_v27  ;;  %v10303_v38 = vld [vmem:[%s15538_s1 + $0x1860] ss:$16 sps:$4 sm:$0xff]  }
 0x18c   :  { %7261 = vmatpush1.bf16.msra.mxu1 %v10294_v4  ;;  %v6825_v11 = vpop.f32.mrf.mxu0  ;;  %7209 = vmatprep.subr.bf16.mxu0 %v10299_v2  ;;  %v10306_v27 = vld [vmem:[%s15538_s1 + $0x1a60] ss:$16 sps:$4 sm:$0xff]   ;;  %v6777_v2 = vadd.f32 %v12881_v30, %v6724_v1  ;;  %v10317_v1 = vld [vmem:[%s15538_s1 + $0x1824] ss:$16 sps:$4 sm:$0xff]  }
 0x18d   :  { %v6878_v0 = vpop.f32.mrf.mxu1  ;;  %7262 = vmatprep.subr.bf16.mxu1 %v10302_v3  ;;  %v6826_v13 = vadd.f32 %v6825_v11, %v12711_v19  ;;  %v12986_v18 = vadd.f32 %v6876_v44, %v6824_v10  ;;  %7235 = vmatprep.mubr.bf16.mxu0 %v12968_v6  ;;  %v10311_v44 = vld [vmem:[%s15538_s1 + $0x1844] ss:$16 sps:$4 sm:$0xff]  }
 0x18e   :  { %7288 = vmatprep.mubr.bf16.mxu1 %v12972_v23  ;;  %v6827_v4 = vpop.f32.mrf.mxu0  ;;  %v10314_v10 = vld [vmem:[%s15538_s1 + $0x1a44] ss:$16 sps:$4 sm:$0xff]  }
 0x18f   :  { %v6880_v48 = vpop.f32.mrf.mxu1  ;;  %v6828_v19 = vadd.f32 %v6827_v4, %v12719_v54  ;;  %v12998_v3 = vadd.f32 %v6878_v0, %v6826_v13  ;;  %7210 = vmatpush1.bf16.msra.mxu0 %v10297_v24  ;;  %v10309_v24 = vld [vmem:[%s15538_s1 + $0x1840] ss:$16 sps:$4 sm:$0xff]   ;;  %v10320_v0 = vld [vmem:[%s15538_s1 + $0x1a24] ss:$16 sps:$4 sm:$0xff]  }
 0x190   :  { %7263 = vmatpush1.bf16.msra.mxu1 %v10300_v22  ;;  %v6829_v50 = vpop.f32.mrf.mxu0  ;;  %7211 = vmatprep.subr.bf16.mxu0 %v10305_v61  ;;  %v10312_v22 = vld [vmem:[%s15538_s1 + $0x1a40] ss:$16 sps:$4 sm:$0xff]   ;;  %v10323_v13 = vld [vmem:[%s15538_s1 + $0x1804] ss:$16 sps:$4 sm:$0xff]  }
 0x191   :  { %v6882_v12 = vpop.f32.mrf.mxu1  ;;  %7264 = vmatprep.subr.bf16.mxu1 %v10308_v58  ;;  %v6830_v11 = vadd.f32 %v6829_v50, %v6777_v2  ;;  %v13006_v30 = vadd.f32 %v6880_v48, %v6828_v19  ;;  %v10315_v61 = vld [vmem:[%s15538_s1 + $0x1820] ss:$16 sps:$4 sm:$0xff]   ;;  %v10329_v48 = vld [vmem:[%s15538_s1 + $0x19e4] ss:$16 sps:$4 sm:$0xff]  }
 0x192   :  { %v10318_v58 = vld [vmem:[%s15538_s1 + $0x1a20] ss:$16 sps:$4 sm:$0xff]   ;;  %v10332_v2 = vld [vmem:[%s15538_s1 + $0x1be4] ss:$16 sps:$4 sm:$0xff]  }
 0x193   :  { %v13008_v54 = vadd.f32 %v6882_v12, %v6830_v11  ;;  %7212 = vmatpush1.bf16.msra.mxu0 %v10303_v38  ;;  %v10326_v38 = vld [vmem:[%s15538_s1 + $0x1a04] ss:$16 sps:$4 sm:$0xff]   ;;  %v10324_v4 = vld [vmem:[%s15538_s1 + $0x1a00] ss:$16 sps:$4 sm:$0xff]  }
 0x194   :  { %7265 = vmatpush1.bf16.msra.mxu1 %v10306_v27  ;;  %7213 = vmatprep.subr.bf16.mxu0 %v10311_v44  ;;  %v10321_v27 = vld [vmem:[%s15538_s1 + $0x1800] ss:$16 sps:$4 sm:$0xff]   ;;  %v10335_v12 = vld [vmem:[%s15538_s1 + $0x19c4] ss:$16 sps:$4 sm:$0xff]  }
 0x195   :  { %7266 = vmatprep.subr.bf16.mxu1 %v10314_v10  ;;  %v10327_v19 = vld [vmem:[%s15538_s1 + $0x19e0] ss:$16 sps:$4 sm:$0xff]   ;;  %v10338_v44 = vld [vmem:[%s15538_s1 + $0x1bc4] ss:$16 sps:$4 sm:$0xff]  }
 0x196   :  { %v10330_v50 = vld [vmem:[%s15538_s1 + $0x1be0] ss:$16 sps:$4 sm:$0xff]   ;;  %v10395_v6 = vld [vmem:[%s15538_s1 + $0x1c84] ss:$16 sps:$4 sm:$0xff]  }
 0x197   :  { %7214 = vmatpush1.bf16.msra.mxu0 %v10309_v24  ;;  %v10333_v10 = vld [vmem:[%s15538_s1 + $0x19c0] ss:$16 sps:$4 sm:$0xff]   ;;  %v10341_v24 = vld [vmem:[%s15538_s1 + $0x19a4] ss:$16 sps:$4 sm:$0xff]  }
 0x198   :  { %7267 = vmatpush1.bf16.msra.mxu1 %v10312_v22  ;;  %7215 = vmatprep.subr.bf16.mxu0 %v10317_v1  ;;  %v10336_v11 = vld [vmem:[%s15538_s1 + $0x1bc0] ss:$16 sps:$4 sm:$0xff]   ;;  %v10344_v22 = vld [vmem:[%s15538_s1 + $0x1ba4] ss:$16 sps:$4 sm:$0xff]  }
 0x199   :  { %7268 = vmatprep.subr.bf16.mxu1 %v10320_v0  ;;  %v10339_v1 = vld [vmem:[%s15538_s1 + $0x19a0] ss:$16 sps:$4 sm:$0xff]  }
 0x19a   :  { %v10342_v0 = vld [vmem:[%s15538_s1 + $0x1ba0] ss:$16 sps:$4 sm:$0xff]  }
 0x19b   :  { %7216 = vmatpush1.bf16.msra.mxu0 %v10315_v61  ;;  %v10347_v61 = vld [vmem:[%s15538_s1 + $0x1984] ss:$16 sps:$4 sm:$0xff]  }
 0x19c   :  { %7269 = vmatpush1.bf16.msra.mxu1 %v10318_v58  ;;  %7217 = vmatprep.subr.bf16.mxu0 %v10323_v13  ;;  %v10350_v58 = vld [vmem:[%s15538_s1 + $0x1b84] ss:$16 sps:$4 sm:$0xff]   ;;  %v10345_v13 = vld [vmem:[%s15538_s1 + $0x1980] ss:$16 sps:$4 sm:$0xff]  }
 0x19d   :  { %7270 = vmatprep.subr.bf16.mxu1 %v10326_v38  ;;  %v10348_v38 = vld [vmem:[%s15538_s1 + $0x1b80] ss:$16 sps:$4 sm:$0xff]  }
 0x19f   :  { %7218 = vmatpush1.bf16.msra.mxu0 %v10321_v27  ;;  %v10353_v27 = vld [vmem:[%s15538_s1 + $0x1964] ss:$16 sps:$4 sm:$0xff]  }
 0x1a0   :  { %7271 = vmatpush1.bf16.msra.mxu1 %v10324_v4  ;;  %7219 = vmatprep.subr.bf16.mxu0 %v10329_v48  ;;  %v10356_v4 = vld [vmem:[%s15538_s1 + $0x1b64] ss:$16 sps:$4 sm:$0xff]   ;;  %v10351_v48 = vld [vmem:[%s15538_s1 + $0x1960] ss:$16 sps:$4 sm:$0xff]  }
 0x1a1   :  { %7272 = vmatprep.subr.bf16.mxu1 %v10332_v2  ;;  %v10354_v2 = vld [vmem:[%s15538_s1 + $0x1b60] ss:$16 sps:$4 sm:$0xff]  }
 0x1a3   :  { %7220 = vmatpush2.bf16.msra.mxu0 %v10327_v19  ;;  %v10359_v19 = vld [vmem:[%s15538_s1 + $0x1944] ss:$16 sps:$4 sm:$0xff]  }
 0x1a4   :  { %7273 = vmatpush2.bf16.msra.mxu1 %v10330_v50  ;;  %7221 = vmatprep.subr.bf16.mxu0 %v10335_v12  ;;  %v10362_v50 = vld [vmem:[%s15538_s1 + $0x1b44] ss:$16 sps:$4 sm:$0xff]   ;;  %v10357_v12 = vld [vmem:[%s15538_s1 + $0x1940] ss:$16 sps:$4 sm:$0xff]  }
 0x1a5   :  { %7274 = vmatprep.subr.bf16.mxu1 %v10338_v44  ;;  %v10360_v44 = vld [vmem:[%s15538_s1 + $0x1b40] ss:$16 sps:$4 sm:$0xff]  }
 0x1a7   :  { %7222 = vmatpush2.bf16.msra.mxu0 %v10333_v10  ;;  %v10365_v10 = vld [vmem:[%s15538_s1 + $0x1924] ss:$16 sps:$4 sm:$0xff]  }
 0x1a8   :  { %7275 = vmatpush2.bf16.msra.mxu1 %v10336_v11  ;;  %7223 = vmatprep.subr.bf16.mxu0 %v10341_v24  ;;  %v10368_v11 = vld [vmem:[%s15538_s1 + $0x1b24] ss:$16 sps:$4 sm:$0xff]   ;;  %v10363_v24 = vld [vmem:[%s15538_s1 + $0x1920] ss:$16 sps:$4 sm:$0xff]  }
 0x1a9   :  { %7276 = vmatprep.subr.bf16.mxu1 %v10344_v22  ;;  %v10366_v22 = vld [vmem:[%s15538_s1 + $0x1b20] ss:$16 sps:$4 sm:$0xff]  }
 0x1ab   :  { %7224 = vmatpush2.bf16.msra.mxu0 %v10339_v1  ;;  %v10371_v1 = vld [vmem:[%s15538_s1 + $0x1904] ss:$16 sps:$4 sm:$0xff]  }
 0x1ac   :  { %7277 = vmatpush2.bf16.msra.mxu1 %v10342_v0  ;;  %7225 = vmatprep.subr.bf16.mxu0 %v10347_v61  ;;  %v10374_v0 = vld [vmem:[%s15538_s1 + $0x1b04] ss:$16 sps:$4 sm:$0xff]   ;;  %v10369_v61 = vld [vmem:[%s15538_s1 + $0x1900] ss:$16 sps:$4 sm:$0xff]  }
 0x1ad   :  { %7278 = vmatprep.subr.bf16.mxu1 %v10350_v58  ;;  %v10372_v58 = vld [vmem:[%s15538_s1 + $0x1b00] ss:$16 sps:$4 sm:$0xff]  }
 0x1af   :  { %7226 = vmatpush2.bf16.msra.mxu0 %v10345_v13  ;;  %v10377_v13 = vld [vmem:[%s15538_s1 + $0x1ce4] ss:$16 sps:$4 sm:$0xff]  }
 0x1b0   :  { %7279 = vmatpush2.bf16.msra.mxu1 %v10348_v38  ;;  %7227 = vmatprep.subr.bf16.mxu0 %v10353_v27  ;;  %v10380_v38 = vld [vmem:[%s15538_s1 + $0x1ee4] ss:$16 sps:$4 sm:$0xff]  }
 0x1b1   :  { %7280 = vmatprep.subr.bf16.mxu1 %v10356_v4  ;;  %v61_v27 = vld [vmem:[%s15539_s0 + $0x160] sm:$0xff] }
 0x1b2   :  { %v77_v4 = vld [vmem:[%s15539_s0 + $0x1e0] sm:$0xff] }
 0x1b3   :  { %7228 = vmatpush2.bf16.msra.mxu0 %v10351_v48  ;;  %v62_v48 = vld [vmem:[%s15539_s0 + $0x168] sm:$0xff] }
 0x1b4   :  { %7281 = vmatpush2.bf16.msra.mxu1 %v10354_v2  ;;  %7229 = vmatprep.subr.bf16.mxu0 %v10359_v19  ;;  %v78_v2 = vld [vmem:[%s15539_s0 + $0x1e8] sm:$0xff]  ;;  %v10375_v19 = vld [vmem:[%s15538_s1 + $0x1ce0] ss:$16 sps:$4 sm:$0xff]  }
 0x1b5   :  { %7282 = vmatprep.subr.bf16.mxu1 %v10362_v50  ;;  %v10378_v50 = vld [vmem:[%s15538_s1 + $0x1ee0] ss:$16 sps:$4 sm:$0xff]  }
 0x1b7   :  { %7230 = vmatpush2.bf16.msra.mxu0 %v10357_v12  ;;  %v13162_v12 = vcombine.low %v12926_v39, %v12931_v26  ;;  %v10381_v39 = vld [vmem:[%s15538_s1 + $0x1cc0] ss:$16 sps:$4 sm:$0xff]  }
 0x1b8   :  { %7283 = vmatpush2.bf16.msra.mxu1 %v10360_v44  ;;  %7231 = vmatprep.subr.bf16.mxu0 %v10365_v10  ;;  %v13166_v44 = vcombine.low %v12940_v14, %v12945_v31  ;;  %v10383_v10 = vld [vmem:[%s15538_s1 + $0x1cc4] ss:$16 sps:$4 sm:$0xff]   ;;  %v10384_v26 = vld [vmem:[%s15538_s1 + $0x1ec0] ss:$16 sps:$4 sm:$0xff]   ;;  %v13180_v14 = vcombine.high %v61_v27, %v77_v4  ;;  %v13182_v31 = vcombine.high %v62_v48, %v78_v2 }
 0x1b9   :  { %7284 = vmatprep.subr.bf16.mxu1 %v10368_v11  ;;  %15596 = vst [vmem:[#allocation22_spill] sm:$0xff] %v13162_v12  ;;  %v10386_v11 = vld [vmem:[%s15538_s1 + $0x1ec4] ss:$16 sps:$4 sm:$0xff]  }
 0x1ba   :  { %15597 = vst [vmem:[#allocation23_spill] sm:$0xff] %v13166_v44  ;;  %15598 = vst [vmem:[#allocation24_spill] sm:$0xff] %v13180_v14 }
 0x1bb   :  { %7232 = vmatpush2.bf16.msra.mxu0 %v10363_v24  ;;  %15599 = vst [vmem:[#allocation25_spill] sm:$0xff] %v13182_v31 }
 0x1bc   :  { %7285 = vmatpush2.bf16.msra.mxu1 %v10366_v22  ;;  %7233 = vmatprep.subr.bf16.mxu0 %v10371_v1  ;;  %v10389_v1 = vld [vmem:[%s15538_s1 + $0x1ca4] ss:$16 sps:$4 sm:$0xff]  }
 0x1bd   :  { %7286 = vmatprep.subr.bf16.mxu1 %v10374_v0  ;;  %v10392_v0 = vld [vmem:[%s15538_s1 + $0x1ea4] ss:$16 sps:$4 sm:$0xff]  }
 0x1bf   :  { %7234 = vmatpush2.bf16.msra.mxu0 %v10369_v61 }
 0x1c0   :  { %7287 = vmatpush2.bf16.msra.mxu1 %v10372_v58  ;;  %7309 = vmatprep.subr.bf16.mxu0 %v10377_v13 }
 0x1c1   :  { %7362 = vmatprep.subr.bf16.mxu1 %v10380_v38  ;;  %v13196_v38 = vld [vmem:[%s15539_s0 + $0x70] sm:$0xff] }
 0x1c2   :  { %v6919_v24 = vpop.f32.mrf.mxu0  ;;  %7236 = vmatmul.mubr.bf16.vlgmr.msra.gmra.mxu0 %v13162_v12 }
 0x1c3   :  { %v6972_v22 = vpop.f32.mrf.mxu1  ;;  %7289 = vmatmul.mubr.bf16.vlgmr.msra.gmra.mxu1 %v13166_v44  ;;  %v6920_v61 = vadd.f32 %v6919_v24, %v12912_v46  ;;  %7310 = vmatpush1.bf16.msra.mxu0 %v10375_v19  ;;  %v13201_v44 = vld [vmem:[%s15539_s0 + $0xf0] sm:$0xff] }
 0x1c4   :  { %7363 = vmatpush1.bf16.msra.mxu1 %v10378_v50  ;;  %v6921_v58 = vpop.f32.mrf.mxu0  ;;  %7311 = vmatprep.subr.bf16.mxu0 %v10383_v10  ;;  %v10387_v19 = vld [vmem:[%s15538_s1 + $0x1ca0] ss:$16 sps:$4 sm:$0xff]   ;;  %v13217_v10 = vld [vmem:[%s15539_s0 + $0x78] sm:$0xff] }
 0x1c5   :  { %v6974_v13 = vpop.f32.mrf.mxu1  ;;  %7364 = vmatprep.subr.bf16.mxu1 %v10386_v11  ;;  %v13203_v12 = vadd.f32 %v6972_v22, %v6920_v61  ;;  %v6922_v46 = vadd.f32 %v6921_v58, %v12948_v15  ;;  %7245 = vmatprep.mubr.bf16.mxu0 %v13180_v14  ;;  %v10390_v50 = vld [vmem:[%s15538_s1 + $0x1ea0] ss:$16 sps:$4 sm:$0xff]   ;;  %v13222_v15 = vld [vmem:[%s15539_s0 + $0xf8] sm:$0xff]  ;;  %v13224_v22 = vcombine.low %v61_v27, %v77_v4  ;;  %v10398_v27 = vld [vmem:[%s15538_s1 + $0x1e84] ss:$16 sps:$4 sm:$0xff]  }
 0x1c6   :  { %7298 = vmatprep.mubr.bf16.mxu1 %v13182_v31  ;;  %v6923_v11 = vpop.f32.mrf.mxu0  ;;  %v13226_v61 = vcombine.low %v62_v48, %v78_v2  ;;  %v10396_v2 = vld [vmem:[%s15538_s1 + $0x1e80] ss:$16 sps:$4 sm:$0xff]  }
 0x1c7   :  { %v6976_v24 = vpop.f32.mrf.mxu1  ;;  %v13228_v58 = vadd.f32 %v6974_v13, %v6922_v46  ;;  %v6924_v31 = vadd.f32 %v6923_v11, %v12958_v25  ;;  %7312 = vmatpush1.bf16.msra.mxu0 %v10381_v39  ;;  %v10393_v25 = vld [vmem:[%s15538_s1 + $0x1c80] ss:$16 sps:$4 sm:$0xff]   ;;  %v13248_v39 = vcombine.high %v13196_v38, %v13201_v44  ;;  %v10401_v46 = vld [vmem:[%s15538_s1 + $0x1c64] ss:$16 sps:$4 sm:$0xff]  }
 0x1c8   :  { %7365 = vmatpush1.bf16.msra.mxu1 %v10384_v26  ;;  %v6925_v14 = vpop.f32.mrf.mxu0  ;;  %7313 = vmatprep.subr.bf16.mxu0 %v10389_v1  ;;  %v13252_v26 = vcombine.high %v13217_v10, %v13222_v15  ;;  %v10404_v11 = vld [vmem:[%s15538_s1 + $0x1e64] ss:$16 sps:$4 sm:$0xff]  }
 0x1c9   :  { %v6978_v23 = vpop.f32.mrf.mxu1  ;;  %7366 = vmatprep.subr.bf16.mxu1 %v10392_v0  ;;  %v13237_v4 = vadd.f32 %v6976_v24, %v6924_v31  ;;  %v6926_v48 = vadd.f32 %v6925_v14, %v12976_v7  ;;  %15600 = vst [vmem:[#allocation26_spill] sm:$0xff] %v13248_v39 }
 0x1ca   :  { %15601 = vst [vmem:[#allocation27_spill] sm:$0xff] %v13252_v26  ;;  %v6929_v31 = vpop.f32.mrf.mxu0  ;;  %7246 = vmatmul.mubr.bf16.gmra.mxu0 %v13224_v22 }
 0x1cb   :  { %v6982_v7 = vpop.f32.mrf.mxu1  ;;  %7299 = vmatmul.mubr.bf16.gmra.mxu1 %v13226_v61  ;;  %v13256_v14 = vadd.f32 %v6978_v23, %v6926_v48  ;;  %v6930_v1 = vadd.f32 %v6929_v31, %v12986_v18  ;;  %7314 = vmatpush1.bf16.msra.mxu0 %v10387_v19  ;;  %v10399_v18 = vld [vmem:[%s15538_s1 + $0x1c60] ss:$16 sps:$4 sm:$0xff]  }
 0x1cc   :  { %7367 = vmatpush1.bf16.msra.mxu1 %v10390_v50  ;;  %v6931_v0 = vpop.f32.mrf.mxu0  ;;  %7315 = vmatprep.subr.bf16.mxu0 %v10395_v6  ;;  %v10402_v6 = vld [vmem:[%s15538_s1 + $0x1e60] ss:$16 sps:$4 sm:$0xff]  }
 0x1cd   :  { %v6984_v13 = vpop.f32.mrf.mxu1  ;;  %7368 = vmatprep.subr.bf16.mxu1 %v10398_v27  ;;  %v6932_v24 = vadd.f32 %v6931_v0, %v12998_v3  ;;  %v13266_v23 = vadd.f32 %v6982_v7, %v6930_v1  ;;  %7341 = vmatprep.mubr.bf16.mxu0 %v13248_v39  ;;  %v10407_v7 = vld [vmem:[%s15538_s1 + $0x1c44] ss:$16 sps:$4 sm:$0xff]  }
 0x1ce   :  { %7394 = vmatprep.mubr.bf16.mxu1 %v13252_v26  ;;  %v6933_v19 = vpop.f32.mrf.mxu0  ;;  %v10410_v1 = vld [vmem:[%s15538_s1 + $0x1e44] ss:$16 sps:$4 sm:$0xff]  }
 0x1cf   :  { %v6986_v50 = vpop.f32.mrf.mxu1  ;;  %v6934_v27 = vadd.f32 %v6933_v19, %v13006_v30  ;;  %v13277_v48 = vadd.f32 %v6984_v13, %v6932_v24  ;;  %7316 = vmatpush1.bf16.msra.mxu0 %v10393_v25  ;;  %v10405_v25 = vld [vmem:[%s15538_s1 + $0x1c40] ss:$16 sps:$4 sm:$0xff]   ;;  %v10416_v13 = vld [vmem:[%s15538_s1 + $0x1e24] ss:$16 sps:$4 sm:$0xff]  }
 0x1d0   :  { %7369 = vmatpush1.bf16.msra.mxu1 %v10396_v2  ;;  %v6935_v3 = vpop.f32.mrf.mxu0  ;;  %7317 = vmatprep.subr.bf16.mxu0 %v10401_v46  ;;  %v10408_v2 = vld [vmem:[%s15538_s1 + $0x1e40] ss:$16 sps:$4 sm:$0xff]   ;;  %v10419_v24 = vld [vmem:[%s15538_s1 + $0x1c04] ss:$16 sps:$4 sm:$0xff]  }
 0x1d1   :  { %v6988_v31 = vpop.f32.mrf.mxu1  ;;  %7370 = vmatprep.subr.bf16.mxu1 %v10404_v11  ;;  %v6936_v0 = vadd.f32 %v6935_v3, %v13008_v54  ;;  %v13286_v26 = vadd.f32 %v6986_v50, %v6934_v27  ;;  %v10413_v54 = vld [vmem:[%s15538_s1 + $0x1c24] ss:$16 sps:$4 sm:$0xff]   ;;  %v10411_v46 = vld [vmem:[%s15538_s1 + $0x1c20] ss:$16 sps:$4 sm:$0xff]  }
 0x1d2   :  { %v10414_v11 = vld [vmem:[%s15538_s1 + $0x1e20] ss:$16 sps:$4 sm:$0xff]   ;;  %v10425_v50 = vld [vmem:[%s15538_s1 + $0x1de4] ss:$16 sps:$4 sm:$0xff]  }
 0x1d3   :  { %v13288_v30 = vadd.f32 %v6988_v31, %v6936_v0  ;;  %7318 = vmatpush1.bf16.msra.mxu0 %v10399_v18  ;;  %v10422_v18 = vld [vmem:[%s15538_s1 + $0x1e04] ss:$16 sps:$4 sm:$0xff]   ;;  %v10420_v19 = vld [vmem:[%s15538_s1 + $0x1e00] ss:$16 sps:$4 sm:$0xff]  }
 0x1d4   :  { %7371 = vmatpush1.bf16.msra.mxu1 %v10402_v6  ;;  %7319 = vmatprep.subr.bf16.mxu0 %v10407_v7  ;;  %v10417_v6 = vld [vmem:[%s15538_s1 + $0x1c00] ss:$16 sps:$4 sm:$0xff]   ;;  %v10428_v27 = vld [vmem:[%s15538_s1 + $0x1fe4] ss:$16 sps:$4 sm:$0xff]  }
 0x1d5   :  { %7372 = vmatprep.subr.bf16.mxu1 %v10410_v1  ;;  %v10423_v3 = vld [vmem:[%s15538_s1 + $0x1de0] ss:$16 sps:$4 sm:$0xff]   ;;  %v10431_v7 = vld [vmem:[%s15538_s1 + $0x1dc4] ss:$16 sps:$4 sm:$0xff]  }
 0x1d6   :  { %v10426_v31 = vld [vmem:[%s15538_s1 + $0x1fe0] ss:$16 sps:$4 sm:$0xff]   ;;  %v10434_v1 = vld [vmem:[%s15538_s1 + $0x1fc4] ss:$16 sps:$4 sm:$0xff]  }
 0x1d7   :  { %7320 = vmatpush1.bf16.msra.mxu0 %v10405_v25  ;;  %v10429_v0 = vld [vmem:[%s15538_s1 + $0x1dc0] ss:$16 sps:$4 sm:$0xff]  }
 0x1d8   :  { %7373 = vmatpush1.bf16.msra.mxu1 %v10408_v2  ;;  %7321 = vmatprep.subr.bf16.mxu0 %v10413_v54  ;;  %v10432_v25 = vld [vmem:[%s15538_s1 + $0x1fc0] ss:$16 sps:$4 sm:$0xff]   ;;  %v10437_v2 = vld [vmem:[%s15538_s1 + $0x1da4] ss:$16 sps:$4 sm:$0xff]  }
 0x1d9   :  { %7374 = vmatprep.subr.bf16.mxu1 %v10416_v13  ;;  %v10440_v54 = vld [vmem:[%s15538_s1 + $0x1fa4] ss:$16 sps:$4 sm:$0xff]   ;;  %v10435_v13 = vld [vmem:[%s15538_s1 + $0x1da0] ss:$16 sps:$4 sm:$0xff]  }
 0x1db   :  { %7322 = vmatpush1.bf16.msra.mxu0 %v10411_v46  ;;  %v10438_v46 = vld [vmem:[%s15538_s1 + $0x1fa0] ss:$16 sps:$4 sm:$0xff]  }
 0x1dc   :  { %7375 = vmatpush1.bf16.msra.mxu1 %v10414_v11  ;;  %7323 = vmatprep.subr.bf16.mxu0 %v10419_v24  ;;  %v10443_v11 = vld [vmem:[%s15538_s1 + $0x1d84] ss:$16 sps:$4 sm:$0xff]  }
 0x1dd   :  { %7376 = vmatprep.subr.bf16.mxu1 %v10422_v18  ;;  %v10446_v24 = vld [vmem:[%s15538_s1 + $0x1f84] ss:$16 sps:$4 sm:$0xff]   ;;  %v10441_v18 = vld [vmem:[%s15538_s1 + $0x1d80] ss:$16 sps:$4 sm:$0xff]  }
 0x1df   :  { %7324 = vmatpush1.bf16.msra.mxu0 %v10417_v6  ;;  %v10444_v6 = vld [vmem:[%s15538_s1 + $0x1f80] ss:$16 sps:$4 sm:$0xff]  }
 0x1e0   :  { %7377 = vmatpush1.bf16.msra.mxu1 %v10420_v19  ;;  %7325 = vmatprep.subr.bf16.mxu0 %v10425_v50  ;;  %v10449_v19 = vld [vmem:[%s15538_s1 + $0x1d64] ss:$16 sps:$4 sm:$0xff]  }
 0x1e1   :  { %7378 = vmatprep.subr.bf16.mxu1 %v10428_v27  ;;  %v10452_v50 = vld [vmem:[%s15538_s1 + $0x1f64] ss:$16 sps:$4 sm:$0xff]   ;;  %v10447_v27 = vld [vmem:[%s15538_s1 + $0x1d60] ss:$16 sps:$4 sm:$0xff]  }
 0x1e3   :  { %7326 = vmatpush2.bf16.msra.mxu0 %v10423_v3  ;;  %v10450_v3 = vld [vmem:[%s15538_s1 + $0x1f60] ss:$16 sps:$4 sm:$0xff]  }
 0x1e4   :  { %7379 = vmatpush2.bf16.msra.mxu1 %v10426_v31  ;;  %7327 = vmatprep.subr.bf16.mxu0 %v10431_v7  ;;  %v10455_v31 = vld [vmem:[%s15538_s1 + $0x1d44] ss:$16 sps:$4 sm:$0xff]  }
 0x1e5   :  { %7380 = vmatprep.subr.bf16.mxu1 %v10434_v1  ;;  %v10458_v7 = vld [vmem:[%s15538_s1 + $0x1f44] ss:$16 sps:$4 sm:$0xff]   ;;  %v10453_v1 = vld [vmem:[%s15538_s1 + $0x1d40] ss:$16 sps:$4 sm:$0xff]  }
 0x1e7   :  { %7328 = vmatpush2.bf16.msra.mxu0 %v10429_v0  ;;  %v10456_v0 = vld [vmem:[%s15538_s1 + $0x1f40] ss:$16 sps:$4 sm:$0xff]  }
 0x1e8   :  { %7381 = vmatpush2.bf16.msra.mxu1 %v10432_v25  ;;  %7329 = vmatprep.subr.bf16.mxu0 %v10437_v2  ;;  %v10461_v25 = vld [vmem:[%s15538_s1 + $0x1d24] ss:$16 sps:$4 sm:$0xff]  }
 0x1e9   :  { %7382 = vmatprep.subr.bf16.mxu1 %v10440_v54  ;;  %v10464_v2 = vld [vmem:[%s15538_s1 + $0x1f24] ss:$16 sps:$4 sm:$0xff]   ;;  %v10459_v54 = vld [vmem:[%s15538_s1 + $0x1d20] ss:$16 sps:$4 sm:$0xff]  }
 0x1eb   :  { %7330 = vmatpush2.bf16.msra.mxu0 %v10435_v13  ;;  %v10462_v13 = vld [vmem:[%s15538_s1 + $0x1f20] ss:$16 sps:$4 sm:$0xff]  }
 0x1ec   :  { %7383 = vmatpush2.bf16.msra.mxu1 %v10438_v46  ;;  %7331 = vmatprep.subr.bf16.mxu0 %v10443_v11  ;;  %v10467_v46 = vld [vmem:[%s15538_s1 + $0x1d04] ss:$16 sps:$4 sm:$0xff]  }
 0x1ed   :  { %7384 = vmatprep.subr.bf16.mxu1 %v10446_v24  ;;  %v10470_v11 = vld [vmem:[%s15538_s1 + $0x1f04] ss:$16 sps:$4 sm:$0xff]   ;;  %v10465_v24 = vld [vmem:[%s15538_s1 + $0x1d00] ss:$16 sps:$4 sm:$0xff]  }
 0x1ef   :  { %7332 = vmatpush2.bf16.msra.mxu0 %v10441_v18  ;;  %v10468_v18 = vld [vmem:[%s15538_s1 + $0x1f00] ss:$16 sps:$4 sm:$0xff]  }
 0x1f0   :  { %7385 = vmatpush2.bf16.msra.mxu1 %v10444_v6  ;;  %7333 = vmatprep.subr.bf16.mxu0 %v10449_v19  ;;  %v10473_v6 = vld [vmem:[%s15538_s1 + $0xec] ss:$16 sps:$4 sm:$0xff]  }
 0x1f1   :  { %7386 = vmatprep.subr.bf16.mxu1 %v10452_v50  ;;  %v10476_v19 = vld [vmem:[%s15538_s1 + $0x2ec] ss:$16 sps:$4 sm:$0xff]   ;;  %v63_v50 = vld [vmem:[%s15539_s0 + $0x170] sm:$0xff] }
 0x1f3   :  { %7334 = vmatpush2.bf16.msra.mxu0 %v10447_v27  ;;  %v79_v27 = vld [vmem:[%s15539_s0 + $0x1f0] sm:$0xff] }
 0x1f4   :  { %7387 = vmatpush2.bf16.msra.mxu1 %v10450_v3  ;;  %7335 = vmatprep.subr.bf16.mxu0 %v10455_v31  ;;  %v64_v3 = vld [vmem:[%s15539_s0 + $0x178] sm:$0xff] }
 0x1f5   :  { %7388 = vmatprep.subr.bf16.mxu1 %v10458_v7  ;;  %v80_v31 = vld [vmem:[%s15539_s0 + $0x1f8] sm:$0xff] }
 0x1f6   :  { %v10471_v7 = vld [vmem:[%s15538_s1 + $0xe8] ss:$16 sps:$4 sm:$0xff]  }
 0x1f7   :  { %7336 = vmatpush2.bf16.msra.mxu0 %v10453_v1  ;;  %v10474_v1 = vld [vmem:[%s15538_s1 + $0x2e8] ss:$16 sps:$4 sm:$0xff]  }
 0x1f8   :  { %7389 = vmatpush2.bf16.msra.mxu1 %v10456_v0  ;;  %7337 = vmatprep.subr.bf16.mxu0 %v10461_v25  ;;  %v13442_v0 = vcombine.low %v13196_v38, %v13201_v44  ;;  %v13446_v25 = vcombine.low %v13217_v10, %v13222_v15  ;;  %v10477_v44 = vld [vmem:[%s15538_s1 + $0xc8] ss:$16 sps:$4 sm:$0xff]   ;;  %v13460_v10 = vcombine.high %v63_v50, %v79_v27 }
 0x1f9   :  { %7390 = vmatprep.subr.bf16.mxu1 %v10464_v2  ;;  %v10479_v2 = vld [vmem:[%s15538_s1 + $0xcc] ss:$16 sps:$4 sm:$0xff]   ;;  %v10480_v38 = vld [vmem:[%s15538_s1 + $0x2c8] ss:$16 sps:$4 sm:$0xff]   ;;  %v13462_v15 = vcombine.high %v64_v3, %v80_v31 }
 0x1fa   :  { %15602 = vst [vmem:[#allocation28_spill] sm:$0xff] %v13446_v25 }
 0x1fb   :  { %7338 = vmatpush2.bf16.msra.mxu0 %v10459_v54  ;;  %v10482_v54 = vld [vmem:[%s15538_s1 + $0x2cc] ss:$16 sps:$4 sm:$0xff]   ;;  %15603 = vst [vmem:[#allocation29_spill] sm:$0xff] %v13462_v15 }
 0x1fc   :  { %7391 = vmatpush2.bf16.msra.mxu1 %v10462_v13  ;;  %7339 = vmatprep.subr.bf16.mxu0 %v10467_v46 }
 0x1fd   :  { %7392 = vmatprep.subr.bf16.mxu1 %v10470_v11 }
 0x1ff   :  { %7340 = vmatpush2.bf16.msra.mxu0 %v10465_v24 }
 0x200   :  { %7393 = vmatpush2.bf16.msra.mxu1 %v10468_v18  ;;  %7415 = vmatprep.subr.bf16.mxu0 %v10473_v6  ;;  %v10485_v6 = vld [vmem:[%s15538_s1 + $0xac] ss:$16 sps:$4 sm:$0xff]  }
 0x201   :  { %7468 = vmatprep.subr.bf16.mxu1 %v10476_v19  ;;  %v10488_v19 = vld [vmem:[%s15538_s1 + $0x2ac] ss:$16 sps:$4 sm:$0xff]  }
 0x202   :  { %v7025_v13 = vpop.f32.mrf.mxu0  ;;  %7342 = vmatmul.mubr.bf16.vlgmr.msra.gmra.mxu0 %v13442_v0 }
 0x203   :  { %v7078_v46 = vpop.f32.mrf.mxu1  ;;  %7395 = vmatmul.mubr.bf16.vlgmr.msra.gmra.mxu1 %v13446_v25  ;;  %v7026_v11 = vadd.f32 %v7025_v13, %v13203_v12  ;;  %7416 = vmatpush1.bf16.msra.mxu0 %v10471_v7  ;;  %v10483_v12 = vld [vmem:[%s15538_s1 + $0xa8] ss:$16 sps:$4 sm:$0xff]   ;;  %v13486_v13 = vcombine.low %v64_v3, %v80_v31 }
 0x204   :  { %7469 = vmatpush1.bf16.msra.mxu1 %v10474_v1  ;;  %v7027_v24 = vpop.f32.mrf.mxu0  ;;  %7417 = vmatprep.subr.bf16.mxu0 %v10479_v2  ;;  %v10486_v7 = vld [vmem:[%s15538_s1 + $0x2a8] ss:$16 sps:$4 sm:$0xff]  }
 0x205   :  { %v7080_v18 = vpop.f32.mrf.mxu1  ;;  %7470 = vmatprep.subr.bf16.mxu1 %v10482_v54  ;;  %v13473_v39 = vadd.f32 %v7078_v46, %v7026_v11  ;;  %v7028_v25 = vadd.f32 %v7027_v24, %v13228_v58  ;;  %7351 = vmatprep.mubr.bf16.mxu0 %v13460_v10  ;;  %v13484_v54 = vcombine.low %v63_v50, %v79_v27  ;;  %v10494_v50 = vld [vmem:[%s15538_s1 + $0x28c] ss:$16 sps:$4 sm:$0xff]   ;;  %v10492_v31 = vld [vmem:[%s15538_s1 + $0x288] ss:$16 sps:$4 sm:$0xff]  }
 0x206   :  { %7404 = vmatprep.mubr.bf16.mxu1 %v13462_v15  ;;  %v7029_v1 = vpop.f32.mrf.mxu0  ;;  %v10491_v15 = vld [vmem:[%s15538_s1 + $0x8c] ss:$16 sps:$4 sm:$0xff]  }
 0x207   :  { %v7082_v2 = vpop.f32.mrf.mxu1  ;;  %v13488_v46 = vadd.f32 %v7080_v18, %v7028_v25  ;;  %v7030_v58 = vadd.f32 %v7029_v1, %v13237_v4  ;;  %7418 = vmatpush1.bf16.msra.mxu0 %v10477_v44  ;;  %v10489_v4 = vld [vmem:[%s15538_s1 + $0x88] ss:$16 sps:$4 sm:$0xff]   ;;  %v10500_v1 = vld [vmem:[%s15538_s1 + $0x26c] ss:$16 sps:$4 sm:$0xff]  }
 0x208   :  { %7471 = vmatpush1.bf16.msra.mxu1 %v10480_v38  ;;  %v7031_v11 = vpop.f32.mrf.mxu0  ;;  %7419 = vmatprep.subr.bf16.mxu0 %v10485_v6 }
 0x209   :  { %v7084_v24 = vpop.f32.mrf.mxu1  ;;  %7472 = vmatprep.subr.bf16.mxu1 %v10488_v19  ;;  %v13497_v27 = vadd.f32 %v7082_v2, %v7030_v58  ;;  %v7032_v3 = vadd.f32 %v7031_v11, %v13256_v14  ;;  %v10497_v19 = vld [vmem:[%s15538_s1 + $0x6c] ss:$16 sps:$4 sm:$0xff]  }
 0x20a   :  { %v7035_v25 = vpop.f32.mrf.mxu0  ;;  %7352 = vmatmul.mubr.bf16.gmra.mxu0 %v13484_v54 }
 0x20b   :  { %v7088_v44 = vpop.f32.mrf.mxu1  ;;  %7405 = vmatmul.mubr.bf16.gmra.mxu1 %v13486_v13  ;;  %v13508_v38 = vadd.f32 %v7084_v24, %v7032_v3  ;;  %v7036_v18 = vadd.f32 %v7035_v25, %v13266_v23  ;;  %7420 = vmatpush1.bf16.msra.mxu0 %v10483_v12  ;;  %v10495_v23 = vld [vmem:[%s15538_s1 + $0x68] ss:$16 sps:$4 sm:$0xff]   ;;  %v10503_v3 = vld [vmem:[%s15538_s1 + $0x4c] ss:$16 sps:$4 sm:$0xff]  }
 0x20c   :  { %7473 = vmatpush1.bf16.msra.mxu1 %v10486_v7  ;;  %v7037_v14 = vpop.f32.mrf.mxu0  ;;  %7421 = vmatprep.subr.bf16.mxu0 %v10491_v15  ;;  %v10498_v15 = vld [vmem:[%s15538_s1 + $0x268] ss:$16 sps:$4 sm:$0xff]  }
 0x20d   :  { %v7090_v6 = vpop.f32.mrf.mxu1  ;;  %7474 = vmatprep.subr.bf16.mxu1 %v10494_v50  ;;  %v7038_v2 = vadd.f32 %v7037_v14, %v13277_v48  ;;  %v13518_v58 = vadd.f32 %v7088_v44, %v7036_v18  ;;  %7447 = vmatprep.mubr.bf16.mxu0 %v11457_v53  ;;  %v10506_v53 = vld [vmem:[%s15538_s1 + $0x24c] ss:$16 sps:$4 sm:$0xff]   ;;  %v10507_v18 = vld [vmem:[%s15538_s1 + $0x28] ss:$16 sps:$4 sm:$0xff]  }
 0x20e   :  { %7500 = vmatprep.mubr.bf16.mxu1 %v11462_v55  ;;  %v7039_v12 = vpop.f32.mrf.mxu0  ;;  %v10512_v44 = vld [vmem:[%s15538_s1 + $0x22c] ss:$16 sps:$4 sm:$0xff]   ;;  %v10510_v14 = vld [vmem:[%s15538_s1 + $0x228] ss:$16 sps:$4 sm:$0xff]  }
 0x20f   :  { %v7092_v7 = vpop.f32.mrf.mxu1  ;;  %v7040_v11 = vadd.f32 %v7039_v12, %v13286_v26  ;;  %v13529_v24 = vadd.f32 %v7090_v6, %v7038_v2  ;;  %7422 = vmatpush1.bf16.msra.mxu0 %v10489_v4  ;;  %v10501_v4 = vld [vmem:[%s15538_s1 + $0x48] ss:$16 sps:$4 sm:$0xff]   ;;  %v10515_v6 = vld [vmem:[%s15538_s1 + $0xc] ss:$16 sps:$4 sm:$0xff]  }
 0x210   :  { %7475 = vmatpush1.bf16.msra.mxu1 %v10492_v31  ;;  %v7041_v48 = vpop.f32.mrf.mxu0  ;;  %7423 = vmatprep.subr.bf16.mxu0 %v10497_v19  ;;  %v10504_v31 = vld [vmem:[%s15538_s1 + $0x248] ss:$16 sps:$4 sm:$0xff]   ;;  %v10518_v19 = vld [vmem:[%s15538_s1 + $0x20c] ss:$16 sps:$4 sm:$0xff]  }
 0x211   :  { %v7094_v50 = vpop.f32.mrf.mxu1  ;;  %7476 = vmatprep.subr.bf16.mxu1 %v10500_v1  ;;  %v7042_v55 = vadd.f32 %v7041_v48, %v13288_v30  ;;  %v13538_v25 = vadd.f32 %v7092_v7, %v7040_v11  ;;  %v10509_v30 = vld [vmem:[%s15538_s1 + $0x2c] ss:$16 sps:$4 sm:$0xff]   ;;  %v10513_v1 = vld [vmem:[%s15538_s1 + $0x8] ss:$16 sps:$4 sm:$0xff]  }
 0x212   :  { %v10516_v2 = vld [vmem:[%s15538_s1 + $0x208] ss:$16 sps:$4 sm:$0xff]   ;;  %v10527_v11 = vld [vmem:[%s15538_s1 + $0x1cc] ss:$16 sps:$4 sm:$0xff]  }
 0x213   :  { %v13540_v26 = vadd.f32 %v7094_v50, %v7042_v55  ;;  %7424 = vmatpush1.bf16.msra.mxu0 %v10495_v23  ;;  %v10521_v23 = vld [vmem:[%s15538_s1 + $0x1ec] ss:$16 sps:$4 sm:$0xff]   ;;  %v10519_v12 = vld [vmem:[%s15538_s1 + $0x1e8] ss:$16 sps:$4 sm:$0xff]  }
 0x214   :  { %7477 = vmatpush1.bf16.msra.mxu1 %v10498_v15  ;;  %7425 = vmatprep.subr.bf16.mxu0 %v10503_v3  ;;  %v10524_v15 = vld [vmem:[%s15538_s1 + $0x3ec] ss:$16 sps:$4 sm:$0xff]   ;;  %v10522_v7 = vld [vmem:[%s15538_s1 + $0x3e8] ss:$16 sps:$4 sm:$0xff]  }
 0x215   :  { %7478 = vmatprep.subr.bf16.mxu1 %v10506_v53  ;;  %v10530_v48 = vld [vmem:[%s15538_s1 + $0x3cc] ss:$16 sps:$4 sm:$0xff]   ;;  %v10525_v50 = vld [vmem:[%s15538_s1 + $0x1c8] ss:$16 sps:$4 sm:$0xff]  }
 0x216   :  { %v10528_v3 = vld [vmem:[%s15538_s1 + $0x3c8] ss:$16 sps:$4 sm:$0xff]   ;;  %v10533_v53 = vld [vmem:[%s15538_s1 + $0x1ac] ss:$16 sps:$4 sm:$0xff]  }
 0x217   :  { %7426 = vmatpush1.bf16.msra.mxu0 %v10501_v4  ;;  %v10536_v55 = vld [vmem:[%s15538_s1 + $0x3ac] ss:$16 sps:$4 sm:$0xff]   ;;  %v10531_v4 = vld [vmem:[%s15538_s1 + $0x1a8] ss:$16 sps:$4 sm:$0xff]  }
 0x218   :  { %7479 = vmatpush1.bf16.msra.mxu1 %v10504_v31  ;;  %7427 = vmatprep.subr.bf16.mxu0 %v10509_v30  ;;  %v10534_v31 = vld [vmem:[%s15538_s1 + $0x3a8] ss:$16 sps:$4 sm:$0xff]   ;;  %v10539_v30 = vld [vmem:[%s15538_s1 + $0x18c] ss:$16 sps:$4 sm:$0xff]  }
 0x219   :  { %7480 = vmatprep.subr.bf16.mxu1 %v10512_v44  ;;  %v10542_v44 = vld [vmem:[%s15538_s1 + $0x38c] ss:$16 sps:$4 sm:$0xff]  }
 0x21b   :  { %7428 = vmatpush1.bf16.msra.mxu0 %v10507_v18  ;;  %v10537_v18 = vld [vmem:[%s15538_s1 + $0x188] ss:$16 sps:$4 sm:$0xff]  }
 0x21c   :  { %7481 = vmatpush1.bf16.msra.mxu1 %v10510_v14  ;;  %7429 = vmatprep.subr.bf16.mxu0 %v10515_v6  ;;  %v10540_v14 = vld [vmem:[%s15538_s1 + $0x388] ss:$16 sps:$4 sm:$0xff]   ;;  %v10545_v6 = vld [vmem:[%s15538_s1 + $0x16c] ss:$16 sps:$4 sm:$0xff]  }
 0x21d   :  { %7482 = vmatprep.subr.bf16.mxu1 %v10518_v19  ;;  %v10548_v19 = vld [vmem:[%s15538_s1 + $0x36c] ss:$16 sps:$4 sm:$0xff]  }
 0x21f   :  { %7430 = vmatpush1.bf16.msra.mxu0 %v10513_v1  ;;  %v10543_v1 = vld [vmem:[%s15538_s1 + $0x168] ss:$16 sps:$4 sm:$0xff]  }
 0x220   :  { %7483 = vmatpush1.bf16.msra.mxu1 %v10516_v2  ;;  %7431 = vmatprep.subr.bf16.mxu0 %v10521_v23  ;;  %v10546_v2 = vld [vmem:[%s15538_s1 + $0x368] ss:$16 sps:$4 sm:$0xff]   ;;  %v10551_v23 = vld [vmem:[%s15538_s1 + $0x14c] ss:$16 sps:$4 sm:$0xff]  }
 0x221   :  { %7484 = vmatprep.subr.bf16.mxu1 %v10524_v15  ;;  %v10554_v15 = vld [vmem:[%s15538_s1 + $0x34c] ss:$16 sps:$4 sm:$0xff]  }
 0x223   :  { %7432 = vmatpush2.bf16.msra.mxu0 %v10519_v12  ;;  %v10549_v12 = vld [vmem:[%s15538_s1 + $0x148] ss:$16 sps:$4 sm:$0xff]  }
 0x224   :  { %7485 = vmatpush2.bf16.msra.mxu1 %v10522_v7  ;;  %7433 = vmatprep.subr.bf16.mxu0 %v10527_v11  ;;  %v10552_v7 = vld [vmem:[%s15538_s1 + $0x348] ss:$16 sps:$4 sm:$0xff]   ;;  %v10557_v11 = vld [vmem:[%s15538_s1 + $0x12c] ss:$16 sps:$4 sm:$0xff]  }
 0x225   :  { %7486 = vmatprep.subr.bf16.mxu1 %v10530_v48  ;;  %v10560_v48 = vld [vmem:[%s15538_s1 + $0x32c] ss:$16 sps:$4 sm:$0xff]  }
 0x227   :  { %7434 = vmatpush2.bf16.msra.mxu0 %v10525_v50  ;;  %v10555_v50 = vld [vmem:[%s15538_s1 + $0x128] ss:$16 sps:$4 sm:$0xff]  }
 0x228   :  { %7487 = vmatpush2.bf16.msra.mxu1 %v10528_v3  ;;  %7435 = vmatprep.subr.bf16.mxu0 %v10533_v53  ;;  %v10558_v3 = vld [vmem:[%s15538_s1 + $0x328] ss:$16 sps:$4 sm:$0xff]   ;;  %v10563_v53 = vld [vmem:[%s15538_s1 + $0x10c] ss:$16 sps:$4 sm:$0xff]  }
 0x229   :  { %7488 = vmatprep.subr.bf16.mxu1 %v10536_v55  ;;  %v10566_v55 = vld [vmem:[%s15538_s1 + $0x30c] ss:$16 sps:$4 sm:$0xff]  }
 0x22b   :  { %7436 = vmatpush2.bf16.msra.mxu0 %v10531_v4  ;;  %v10561_v4 = vld [vmem:[%s15538_s1 + $0x108] ss:$16 sps:$4 sm:$0xff]  }
 0x22c   :  { %7489 = vmatpush2.bf16.msra.mxu1 %v10534_v31  ;;  %7437 = vmatprep.subr.bf16.mxu0 %v10539_v30  ;;  %v10564_v31 = vld [vmem:[%s15538_s1 + $0x308] ss:$16 sps:$4 sm:$0xff]   ;;  %v10569_v30 = vld [vmem:[%s15538_s1 + $0x4ec] ss:$16 sps:$4 sm:$0xff]  }
 0x22d   :  { %7490 = vmatprep.subr.bf16.mxu1 %v10542_v44  ;;  %v10572_v44 = vld [vmem:[%s15538_s1 + $0x6ec] ss:$16 sps:$4 sm:$0xff]  }
 0x22f   :  { %7438 = vmatpush2.bf16.msra.mxu0 %v10537_v18  ;;  %v10567_v18 = vld [vmem:[%s15538_s1 + $0x4e8] ss:$16 sps:$4 sm:$0xff]  }
 0x230   :  { %7491 = vmatpush2.bf16.msra.mxu1 %v10540_v14  ;;  %7439 = vmatprep.subr.bf16.mxu0 %v10545_v6  ;;  %v10570_v14 = vld [vmem:[%s15538_s1 + $0x6e8] ss:$16 sps:$4 sm:$0xff]   ;;  %v10575_v6 = vld [vmem:[%s15538_s1 + $0x4cc] ss:$16 sps:$4 sm:$0xff]  }
 0x231   :  { %7492 = vmatprep.subr.bf16.mxu1 %v10548_v19  ;;  %v10578_v19 = vld [vmem:[%s15538_s1 + $0x6cc] ss:$16 sps:$4 sm:$0xff]  }
 0x233   :  { %7440 = vmatpush2.bf16.msra.mxu0 %v10543_v1  ;;  %v10573_v1 = vld [vmem:[%s15538_s1 + $0x4c8] ss:$16 sps:$4 sm:$0xff]  }
 0x234   :  { %7493 = vmatpush2.bf16.msra.mxu1 %v10546_v2  ;;  %7441 = vmatprep.subr.bf16.mxu0 %v10551_v23  ;;  %v10576_v2 = vld [vmem:[%s15538_s1 + $0x6c8] ss:$16 sps:$4 sm:$0xff]  }
 0x235   :  { %7494 = vmatprep.subr.bf16.mxu1 %v10554_v15 }
 0x237   :  { %7442 = vmatpush2.bf16.msra.mxu0 %v10549_v12 }
 0x238   :  { %7495 = vmatpush2.bf16.msra.mxu1 %v10552_v7  ;;  %7443 = vmatprep.subr.bf16.mxu0 %v10557_v11 }
 0x239   :  { %7496 = vmatprep.subr.bf16.mxu1 %v10560_v48  ;;  %v10581_v48 = vld [vmem:[%s15538_s1 + $0x4ac] ss:$16 sps:$4 sm:$0xff]  }
 0x23b   :  { %7444 = vmatpush2.bf16.msra.mxu0 %v10555_v50  ;;  %v10584_v50 = vld [vmem:[%s15538_s1 + $0x6ac] ss:$16 sps:$4 sm:$0xff]  }
 0x23c   :  { %7497 = vmatpush2.bf16.msra.mxu1 %v10558_v3  ;;  %7445 = vmatprep.subr.bf16.mxu0 %v10563_v53 }
 0x23d   :  { %7498 = vmatprep.subr.bf16.mxu1 %v10566_v55 }
 0x23f   :  { %7446 = vmatpush2.bf16.msra.mxu0 %v10561_v4  ;;  %v10587_v4 = vld [vmem:[%s15538_s1 + $0x48c] ss:$16 sps:$4 sm:$0xff]  }
 0x240   :  { %7499 = vmatpush2.bf16.msra.mxu1 %v10564_v31  ;;  %7521 = vmatprep.subr.bf16.mxu0 %v10569_v30 }
 0x241   :  { %7574 = vmatprep.subr.bf16.mxu1 %v10572_v44 }
 0x242   :  { %v7131_v23 = vpop.f32.mrf.mxu0  ;;  %7448 = vmatmul.mubr.bf16.vlgmr.msra.gmra.mxu0 %v11514_v8 }
 0x243   :  { %v7184_v15 = vpop.f32.mrf.mxu1  ;;  %7501 = vmatmul.mubr.bf16.vlgmr.msra.gmra.mxu1 %v11516_v9  ;;  %v7132_v12 = vadd.f32 %v7131_v23, %v13473_v39  ;;  %7522 = vmatpush1.bf16.msra.mxu0 %v10567_v18  ;;  %v10579_v9 = vld [vmem:[%s15538_s1 + $0x4a8] ss:$16 sps:$4 sm:$0xff]  }
 0x244   :  { %7575 = vmatpush1.bf16.msra.mxu1 %v10570_v14  ;;  %v7133_v7 = vpop.f32.mrf.mxu0  ;;  %7523 = vmatprep.subr.bf16.mxu0 %v10575_v6  ;;  %v10582_v39 = vld [vmem:[%s15538_s1 + $0x6a8] ss:$16 sps:$4 sm:$0xff]  }
 0x245   :  { %v7186_v11 = vpop.f32.mrf.mxu1  ;;  %7576 = vmatprep.subr.bf16.mxu1 %v10578_v19  ;;  %v13701_v3 = vadd.f32 %v7184_v15, %v7132_v12  ;;  %v7134_v8 = vadd.f32 %v7133_v7, %v13488_v46  ;;  %7457 = vmatprep.mubr.bf16.mxu0 %v11589_v33  ;;  %v10590_v46 = vld [vmem:[%s15538_s1 + $0x68c] ss:$16 sps:$4 sm:$0xff]   ;;  %v10585_v14 = vld [vmem:[%s15538_s1 + $0x488] ss:$16 sps:$4 sm:$0xff]  }
 0x246   :  { %7510 = vmatprep.mubr.bf16.mxu1 %v11593_v35  ;;  %v7135_v53 = vpop.f32.mrf.mxu0  ;;  %v10588_v6 = vld [vmem:[%s15538_s1 + $0x688] ss:$16 sps:$4 sm:$0xff]  }
 0x247   :  { %v7188_v55 = vpop.f32.mrf.mxu1  ;;  %v13718_v31 = vadd.f32 %v7186_v11, %v7134_v8  ;;  %v7136_v30 = vadd.f32 %v7135_v53, %v13497_v27  ;;  %7524 = vmatpush1.bf16.msra.mxu0 %v10573_v1  ;;  %v10593_v1 = vld [vmem:[%s15538_s1 + $0x46c] ss:$16 sps:$4 sm:$0xff]  }
 0x248   :  { %7577 = vmatpush1.bf16.msra.mxu1 %v10576_v2  ;;  %v7137_v44 = vpop.f32.mrf.mxu0  ;;  %7525 = vmatprep.subr.bf16.mxu0 %v10581_v48  ;;  %v10596_v2 = vld [vmem:[%s15538_s1 + $0x66c] ss:$16 sps:$4 sm:$0xff]  }
 0x249   :  { %v7190_v33 = vpop.f32.mrf.mxu1  ;;  %7578 = vmatprep.subr.bf16.mxu1 %v10584_v50  ;;  %v13721_v35 = vadd.f32 %v7188_v55, %v7136_v30  ;;  %v7138_v18 = vadd.f32 %v7137_v44, %v13508_v38  ;;  %v10602_v50 = vld [vmem:[%s15538_s1 + $0x64c] ss:$16 sps:$4 sm:$0xff]   ;;  %v10597_v55 = vld [vmem:[%s15538_s1 + $0x448] ss:$16 sps:$4 sm:$0xff]  }
 0x24a   :  { %v7141_v19 = vpop.f32.mrf.mxu0  ;;  %7458 = vmatmul.mubr.bf16.gmra.mxu0 %v11591_v34  ;;  %v10591_v34 = vld [vmem:[%s15538_s1 + $0x468] ss:$16 sps:$4 sm:$0xff]  }
 0x24b   :  { %v7194_v27 = vpop.f32.mrf.mxu1  ;;  %7511 = vmatmul.mubr.bf16.gmra.mxu1 %v11598_v37  ;;  %v13738_v38 = vadd.f32 %v7190_v33, %v7138_v18  ;;  %v7142_v23 = vadd.f32 %v7141_v19, %v13518_v58  ;;  %7526 = vmatpush1.bf16.msra.mxu0 %v10579_v9  ;;  %v10594_v37 = vld [vmem:[%s15538_s1 + $0x668] ss:$16 sps:$4 sm:$0xff]   ;;  %v10611_v33 = vld [vmem:[%s15538_s1 + $0x40c] ss:$16 sps:$4 sm:$0xff]  }
 0x24c   :  { %7579 = vmatpush1.bf16.msra.mxu1 %v10582_v39  ;;  %v7143_v15 = vpop.f32.mrf.mxu0  ;;  %7527 = vmatprep.subr.bf16.mxu0 %v10587_v4  ;;  %v10603_v30 = vld [vmem:[%s15538_s1 + $0x428] ss:$16 sps:$4 sm:$0xff]   ;;  %v10614_v18 = vld [vmem:[%s15538_s1 + $0x60c] ss:$16 sps:$4 sm:$0xff]  }
 0x24d   :  { %v7196_v12 = vpop.f32.mrf.mxu1  ;;  %7580 = vmatprep.subr.bf16.mxu1 %v10590_v46  ;;  %v7144_v7 = vadd.f32 %v7143_v15, %v13529_v24  ;;  %v13742_v11 = vadd.f32 %v7194_v27, %v7142_v23  ;;  %7553 = vmatprep.mubr.bf16.mxu0 %v11645_v49  ;;  %v10599_v24 = vld [vmem:[%s15538_s1 + $0x44c] ss:$16 sps:$4 sm:$0xff]   ;;  %v10606_v44 = vld [vmem:[%s15538_s1 + $0x628] ss:$16 sps:$4 sm:$0xff]  }
 0x24e   :  { %7606 = vmatprep.mubr.bf16.mxu1 %v11654_v51  ;;  %v7145_v58 = vpop.f32.mrf.mxu0  ;;  %v10605_v46 = vld [vmem:[%s15538_s1 + $0x42c] ss:$16 sps:$4 sm:$0xff]  }
 0x24f   :  { %v7198_v48 = vpop.f32.mrf.mxu1  ;;  %v7146_v8 = vadd.f32 %v7145_v58, %v13538_v25  ;;  %v13759_v9 = vadd.f32 %v7196_v12, %v7144_v7  ;;  %7528 = vmatpush1.bf16.msra.mxu0 %v10585_v14  ;;  %v10600_v25 = vld [vmem:[%s15538_s1 + $0x648] ss:$16 sps:$4 sm:$0xff]   ;;  %v10617_v19 = vld [vmem:[%s15538_s1 + $0x5ec] ss:$16 sps:$4 sm:$0xff]  }
 0x250   :  { %7581 = vmatpush1.bf16.msra.mxu1 %v10588_v6  ;;  %v7147_v39 = vpop.f32.mrf.mxu0  ;;  %7529 = vmatprep.subr.bf16.mxu0 %v10593_v1  ;;  %v10609_v14 = vld [vmem:[%s15538_s1 + $0x408] ss:$16 sps:$4 sm:$0xff]   ;;  %v10620_v27 = vld [vmem:[%s15538_s1 + $0x7ec] ss:$16 sps:$4 sm:$0xff]  }
 0x251   :  { %v7200_v49 = vpop.f32.mrf.mxu1  ;;  %7582 = vmatprep.subr.bf16.mxu1 %v10596_v2  ;;  %v7148_v51 = vadd.f32 %v7147_v39, %v13540_v26  ;;  %v13762_v53 = vadd.f32 %v7198_v48, %v7146_v8  ;;  %v10608_v26 = vld [vmem:[%s15538_s1 + $0x62c] ss:$16 sps:$4 sm:$0xff]   ;;  %v10612_v6 = vld [vmem:[%s15538_s1 + $0x608] ss:$16 sps:$4 sm:$0xff]  }
 0x252   :  { %v10615_v1 = vld [vmem:[%s15538_s1 + $0x5e8] ss:$16 sps:$4 sm:$0xff]   ;;  %v10623_v23 = vld [vmem:[%s15538_s1 + $0x5cc] ss:$16 sps:$4 sm:$0xff]  }
 0x253   :  { %v13770_v4 = vadd.f32 %v7200_v49, %v7148_v51  ;;  %7530 = vmatpush1.bf16.msra.mxu0 %v10591_v34  ;;  %v10618_v2 = vld [vmem:[%s15538_s1 + $0x7e8] ss:$16 sps:$4 sm:$0xff]   ;;  %v10626_v15 = vld [vmem:[%s15538_s1 + $0x7cc] ss:$16 sps:$4 sm:$0xff]  }
 0x254   :  { %7583 = vmatpush1.bf16.msra.mxu1 %v10594_v37  ;;  %7531 = vmatprep.subr.bf16.mxu0 %v10599_v24  ;;  %v10621_v12 = vld [vmem:[%s15538_s1 + $0x5c8] ss:$16 sps:$4 sm:$0xff]   ;;  %v10629_v34 = vld [vmem:[%s15538_s1 + $0x5ac] ss:$16 sps:$4 sm:$0xff]  }
 0x255   :  { %7584 = vmatprep.subr.bf16.mxu1 %v10602_v50  ;;  %v10624_v7 = vld [vmem:[%s15538_s1 + $0x7c8] ss:$16 sps:$4 sm:$0xff]   ;;  %v10632_v37 = vld [vmem:[%s15538_s1 + $0x7ac] ss:$16 sps:$4 sm:$0xff]  }
 0x256   :  { %v10627_v58 = vld [vmem:[%s15538_s1 + $0x5a8] ss:$16 sps:$4 sm:$0xff]   ;;  %v10635_v24 = vld [vmem:[%s15538_s1 + $0x58c] ss:$16 sps:$4 sm:$0xff]  }
 0x257   :  { %7532 = vmatpush1.bf16.msra.mxu0 %v10597_v55  ;;  %v10630_v48 = vld [vmem:[%s15538_s1 + $0x7a8] ss:$16 sps:$4 sm:$0xff]   ;;  %v10638_v50 = vld [vmem:[%s15538_s1 + $0x78c] ss:$16 sps:$4 sm:$0xff]  }
 0x258   :  { %7585 = vmatpush1.bf16.msra.mxu1 %v10600_v25  ;;  %7533 = vmatprep.subr.bf16.mxu0 %v10605_v46  ;;  %v10633_v8 = vld [vmem:[%s15538_s1 + $0x588] ss:$16 sps:$4 sm:$0xff]   ;;  %v10641_v49 = vld [vmem:[%s15538_s1 + $0x56c] ss:$16 sps:$4 sm:$0xff]  }
 0x259   :  { %7586 = vmatprep.subr.bf16.mxu1 %v10608_v26  ;;  %v10636_v39 = vld [vmem:[%s15538_s1 + $0x788] ss:$16 sps:$4 sm:$0xff]   ;;  %v10644_v51 = vld [vmem:[%s15538_s1 + $0x76c] ss:$16 sps:$4 sm:$0xff]  }
 0x25a   :  { %v10639_v55 = vld [vmem:[%s15538_s1 + $0x568] ss:$16 sps:$4 sm:$0xff]   ;;  %v10647_v46 = vld [vmem:[%s15538_s1 + $0x54c] ss:$16 sps:$4 sm:$0xff]  }
 0x25b   :  { %7534 = vmatpush1.bf16.msra.mxu0 %v10603_v30  ;;  %v10642_v25 = vld [vmem:[%s15538_s1 + $0x768] ss:$16 sps:$4 sm:$0xff]   ;;  %v10650_v26 = vld [vmem:[%s15538_s1 + $0x74c] ss:$16 sps:$4 sm:$0xff]  }
 0x25c   :  { %7587 = vmatpush1.bf16.msra.mxu1 %v10606_v44  ;;  %7535 = vmatprep.subr.bf16.mxu0 %v10611_v33  ;;  %v10645_v30 = vld [vmem:[%s15538_s1 + $0x548] ss:$16 sps:$4 sm:$0xff]   ;;  %v10653_v33 = vld [vmem:[%s15538_s1 + $0x52c] ss:$16 sps:$4 sm:$0xff]  }
 0x25d   :  { %7588 = vmatprep.subr.bf16.mxu1 %v10614_v18  ;;  %v10648_v44 = vld [vmem:[%s15538_s1 + $0x748] ss:$16 sps:$4 sm:$0xff]   ;;  %v10656_v18 = vld [vmem:[%s15538_s1 + $0x72c] ss:$16 sps:$4 sm:$0xff]  }
 0x25f   :  { %7536 = vmatpush1.bf16.msra.mxu0 %v10609_v14  ;;  %v10651_v14 = vld [vmem:[%s15538_s1 + $0x528] ss:$16 sps:$4 sm:$0xff]  }
 0x260   :  { %7589 = vmatpush1.bf16.msra.mxu1 %v10612_v6  ;;  %7537 = vmatprep.subr.bf16.mxu0 %v10617_v19  ;;  %v10654_v6 = vld [vmem:[%s15538_s1 + $0x728] ss:$16 sps:$4 sm:$0xff]   ;;  %v10659_v19 = vld [vmem:[%s15538_s1 + $0x50c] ss:$16 sps:$4 sm:$0xff]  }
 0x261   :  { %7590 = vmatprep.subr.bf16.mxu1 %v10620_v27  ;;  %v10662_v27 = vld [vmem:[%s15538_s1 + $0x70c] ss:$16 sps:$4 sm:$0xff]  }
 0x263   :  { %7538 = vmatpush2.bf16.msra.mxu0 %v10615_v1  ;;  %v10657_v1 = vld [vmem:[%s15538_s1 + $0x508] ss:$16 sps:$4 sm:$0xff]  }
 0x264   :  { %7591 = vmatpush2.bf16.msra.mxu1 %v10618_v2  ;;  %7539 = vmatprep.subr.bf16.mxu0 %v10623_v23  ;;  %v10660_v2 = vld [vmem:[%s15538_s1 + $0x708] ss:$16 sps:$4 sm:$0xff]   ;;  %v10665_v23 = vld [vmem:[%s15538_s1 + $0x8ec] ss:$16 sps:$4 sm:$0xff]  }
 0x265   :  { %7592 = vmatprep.subr.bf16.mxu1 %v10626_v15  ;;  %v10668_v15 = vld [vmem:[%s15538_s1 + $0xaec] ss:$16 sps:$4 sm:$0xff]  }
 0x267   :  { %7540 = vmatpush2.bf16.msra.mxu0 %v10621_v12  ;;  %v10663_v12 = vld [vmem:[%s15538_s1 + $0x8e8] ss:$16 sps:$4 sm:$0xff]  }
 0x268   :  { %7593 = vmatpush2.bf16.msra.mxu1 %v10624_v7  ;;  %7541 = vmatprep.subr.bf16.mxu0 %v10629_v34  ;;  %v10666_v7 = vld [vmem:[%s15538_s1 + $0xae8] ss:$16 sps:$4 sm:$0xff]   ;;  %v10671_v34 = vld [vmem:[%s15538_s1 + $0x8cc] ss:$16 sps:$4 sm:$0xff]  }
 0x269   :  { %7594 = vmatprep.subr.bf16.mxu1 %v10632_v37  ;;  %v10674_v37 = vld [vmem:[%s15538_s1 + $0xacc] ss:$16 sps:$4 sm:$0xff]  }
 0x26b   :  { %7542 = vmatpush2.bf16.msra.mxu0 %v10627_v58 }
 0x26c   :  { %7595 = vmatpush2.bf16.msra.mxu1 %v10630_v48  ;;  %7543 = vmatprep.subr.bf16.mxu0 %v10635_v24 }
 0x26d   :  { %7596 = vmatprep.subr.bf16.mxu1 %v10638_v50  ;;  %v10669_v50 = vld [vmem:[%s15538_s1 + $0x8c8] ss:$16 sps:$4 sm:$0xff]  }
 0x26f   :  { %7544 = vmatpush2.bf16.msra.mxu0 %v10633_v8  ;;  %v10672_v8 = vld [vmem:[%s15538_s1 + $0xac8] ss:$16 sps:$4 sm:$0xff]  }
 0x270   :  { %7597 = vmatpush2.bf16.msra.mxu1 %v10636_v39  ;;  %7545 = vmatprep.subr.bf16.mxu0 %v10641_v49 }
 0x271   :  { %7598 = vmatprep.subr.bf16.mxu1 %v10644_v51 }
 0x273   :  { %7546 = vmatpush2.bf16.msra.mxu0 %v10639_v55 }
 0x274   :  { %7599 = vmatpush2.bf16.msra.mxu1 %v10642_v25  ;;  %7547 = vmatprep.subr.bf16.mxu0 %v10647_v46 }
 0x275   :  { %7600 = vmatprep.subr.bf16.mxu1 %v10650_v26 }
 0x277   :  { %7548 = vmatpush2.bf16.msra.mxu0 %v10645_v30  ;;  %v10675_v30 = vld [vmem:[%s15538_s1 + $0x8a8] ss:$16 sps:$4 sm:$0xff]  }
 0x278   :  { %7601 = vmatpush2.bf16.msra.mxu1 %v10648_v44  ;;  %7549 = vmatprep.subr.bf16.mxu0 %v10653_v33 }
 0x279   :  { %7602 = vmatprep.subr.bf16.mxu1 %v10656_v18 }
 0x27b   :  { %7550 = vmatpush2.bf16.msra.mxu0 %v10651_v14 }
 0x27c   :  { %7603 = vmatpush2.bf16.msra.mxu1 %v10654_v6  ;;  %7551 = vmatprep.subr.bf16.mxu0 %v10659_v19 }
 0x27d   :  { %7604 = vmatprep.subr.bf16.mxu1 %v10662_v27 }
 0x27f   :  { %7552 = vmatpush2.bf16.msra.mxu0 %v10657_v1  ;;  %v10681_v1 = vld [vmem:[%s15538_s1 + $0x888] ss:$16 sps:$4 sm:$0xff]  }
 0x280   :  { %7605 = vmatpush2.bf16.msra.mxu1 %v10660_v2  ;;  %7627 = vmatprep.subr.bf16.mxu0 %v10665_v23 }
 0x281   :  { %7680 = vmatprep.subr.bf16.mxu1 %v10668_v15 }
 0x282   :  { %v7237_v58 = vpop.f32.mrf.mxu0  ;;  %7554 = vmatmul.mubr.bf16.vlgmr.msra.gmra.mxu0 %v11780_v32  ;;  %v10677_v32 = vld [vmem:[%s15538_s1 + $0x8ac] ss:$16 sps:$4 sm:$0xff]  }
 0x283   :  { %v7290_v48 = vpop.f32.mrf.mxu1  ;;  %7607 = vmatmul.mubr.bf16.vlgmr.msra.gmra.mxu1 %v11784_v36  ;;  %v7238_v24 = vadd.f32 %v7237_v58, %v13701_v3  ;;  %7628 = vmatpush1.bf16.msra.mxu0 %v10663_v12  ;;  %v10680_v36 = vld [vmem:[%s15538_s1 + $0xaac] ss:$16 sps:$4 sm:$0xff]   ;;  %v10687_v58 = vld [vmem:[%s15538_s1 + $0x868] ss:$16 sps:$4 sm:$0xff]  }
 0x284   :  { %7681 = vmatpush1.bf16.msra.mxu1 %v10666_v7  ;;  %v7239_v39 = vpop.f32.mrf.mxu0  ;;  %7629 = vmatprep.subr.bf16.mxu0 %v10671_v34 }
 0x285   :  { %v7292_v49 = vpop.f32.mrf.mxu1  ;;  %7682 = vmatprep.subr.bf16.mxu1 %v10674_v37  ;;  %v13925_v3 = vadd.f32 %v7290_v48, %v7238_v24  ;;  %v7240_v51 = vadd.f32 %v7239_v39, %v13718_v31  ;;  %7563 = vmatprep.mubr.bf16.mxu0 %v11798_v42  ;;  %v10678_v31 = vld [vmem:[%s15538_s1 + $0xaa8] ss:$16 sps:$4 sm:$0xff]  }
 0x286   :  { %7616 = vmatprep.mubr.bf16.mxu1 %v11800_v43  ;;  %v7241_v55 = vpop.f32.mrf.mxu0  ;;  %v10683_v43 = vld [vmem:[%s15538_s1 + $0x88c] ss:$16 sps:$4 sm:$0xff]   ;;  %v10693_v39 = vld [vmem:[%s15538_s1 + $0x848] ss:$16 sps:$4 sm:$0xff]  }
 0x287   :  { %v7294_v25 = vpop.f32.mrf.mxu1  ;;  %v13930_v46 = vadd.f32 %v7292_v49, %v7240_v51  ;;  %v7242_v26 = vadd.f32 %v7241_v55, %v13721_v35  ;;  %7630 = vmatpush1.bf16.msra.mxu0 %v10669_v50  ;;  %v10686_v35 = vld [vmem:[%s15538_s1 + $0xa8c] ss:$16 sps:$4 sm:$0xff]   ;;  %v10696_v49 = vld [vmem:[%s15538_s1 + $0xa48] ss:$16 sps:$4 sm:$0xff]  }
 0x288   :  { %7683 = vmatpush1.bf16.msra.mxu1 %v10672_v8  ;;  %v7243_v44 = vpop.f32.mrf.mxu0  ;;  %7631 = vmatprep.subr.bf16.mxu0 %v10677_v32  ;;  %v10704_v32 = vld [vmem:[%s15538_s1 + $0xa2c] ss:$16 sps:$4 sm:$0xff]   ;;  %v10702_v51 = vld [vmem:[%s15538_s1 + $0xa28] ss:$16 sps:$4 sm:$0xff]  }
 0x289   :  { %v7296_v42 = vpop.f32.mrf.mxu1  ;;  %7684 = vmatprep.subr.bf16.mxu1 %v10680_v36  ;;  %v13945_v33 = vadd.f32 %v7294_v25, %v7242_v26  ;;  %v7244_v18 = vadd.f32 %v7243_v44, %v13738_v38  ;;  %v10684_v38 = vld [vmem:[%s15538_s1 + $0xa88] ss:$16 sps:$4 sm:$0xff]   ;;  %v10707_v55 = vld [vmem:[%s15538_s1 + $0x80c] ss:$16 sps:$4 sm:$0xff]  }
 0x28a   :  { %v7247_v14 = vpop.f32.mrf.mxu0  ;;  %7564 = vmatmul.mubr.bf16.gmra.mxu0 %v11834_v56  ;;  %v10689_v56 = vld [vmem:[%s15538_s1 + $0x86c] ss:$16 sps:$4 sm:$0xff]   ;;  %v10699_v36 = vld [vmem:[%s15538_s1 + $0x828] ss:$16 sps:$4 sm:$0xff]  }
 0x28b   :  { %v7300_v6 = vpop.f32.mrf.mxu1  ;;  %7617 = vmatmul.mubr.bf16.gmra.mxu1 %v11836_v57  ;;  %v13950_v19 = vadd.f32 %v7296_v42, %v7244_v18  ;;  %v7248_v27 = vadd.f32 %v7247_v14, %v13742_v11  ;;  %7632 = vmatpush1.bf16.msra.mxu0 %v10675_v30  ;;  %v10692_v57 = vld [vmem:[%s15538_s1 + $0xa6c] ss:$16 sps:$4 sm:$0xff]   ;;  %v10705_v26 = vld [vmem:[%s15538_s1 + $0x808] ss:$16 sps:$4 sm:$0xff]  }
 0x28c   :  { %7685 = vmatpush1.bf16.msra.mxu1 %v10678_v31  ;;  %v7249_v2 = vpop.f32.mrf.mxu0  ;;  %7633 = vmatprep.subr.bf16.mxu0 %v10683_v43  ;;  %v10710_v25 = vld [vmem:[%s15538_s1 + $0xa0c] ss:$16 sps:$4 sm:$0xff]   ;;  %v10708_v30 = vld [vmem:[%s15538_s1 + $0xa08] ss:$16 sps:$4 sm:$0xff]  }
 0x28d   :  { %v7302_v23 = vpop.f32.mrf.mxu1  ;;  %7686 = vmatprep.subr.bf16.mxu1 %v10686_v35  ;;  %v7250_v11 = vadd.f32 %v7249_v2, %v13759_v9  ;;  %v13966_v15 = vadd.f32 %v7300_v6, %v7248_v27  ;;  %7659 = vmatprep.mubr.bf16.mxu0 %v11856_v62  ;;  %v10690_v9 = vld [vmem:[%s15538_s1 + $0xa68] ss:$16 sps:$4 sm:$0xff]   ;;  %v10713_v31 = vld [vmem:[%s15538_s1 + $0x9ec] ss:$16 sps:$4 sm:$0xff]  }
 0x28e   :  { %7712 = vmatprep.mubr.bf16.mxu1 %v11860_v63  ;;  %v7251_v12 = vpop.f32.mrf.mxu0  ;;  %v10695_v63 = vld [vmem:[%s15538_s1 + $0x84c] ss:$16 sps:$4 sm:$0xff]   ;;  %v10711_v42 = vld [vmem:[%s15538_s1 + $0x9e8] ss:$16 sps:$4 sm:$0xff]  }
 0x28f   :  { %v7304_v7 = vpop.f32.mrf.mxu1  ;;  %v7252_v34 = vadd.f32 %v7251_v12, %v13762_v53  ;;  %v13971_v37 = vadd.f32 %v7302_v23, %v7250_v11  ;;  %7634 = vmatpush1.bf16.msra.mxu0 %v10681_v1  ;;  %v10698_v53 = vld [vmem:[%s15538_s1 + $0xa4c] ss:$16 sps:$4 sm:$0xff]   ;;  %v10714_v43 = vld [vmem:[%s15538_s1 + $0xbe8] ss:$16 sps:$4 sm:$0xff]  }
 0x290   :  { %7687 = vmatpush1.bf16.msra.mxu1 %v10684_v38  ;;  %v7253_v48 = vpop.f32.mrf.mxu0  ;;  %7635 = vmatprep.subr.bf16.mxu0 %v10689_v56  ;;  %v10716_v44 = vld [vmem:[%s15538_s1 + $0xbec] ss:$16 sps:$4 sm:$0xff]   ;;  %v10717_v14 = vld [vmem:[%s15538_s1 + $0x9c8] ss:$16 sps:$4 sm:$0xff]  }
 0x291   :  { %v7306_v62 = vpop.f32.mrf.mxu1  ;;  %7688 = vmatprep.subr.bf16.mxu1 %v10692_v57  ;;  %v7254_v24 = vadd.f32 %v7253_v48, %v13770_v4  ;;  %v13986_v50 = vadd.f32 %v7304_v7, %v7252_v34  ;;  %v10701_v4 = vld [vmem:[%s15538_s1 + $0x82c] ss:$16 sps:$4 sm:$0xff]   ;;  %v10720_v6 = vld [vmem:[%s15538_s1 + $0xbc8] ss:$16 sps:$4 sm:$0xff]  }
 0x292   :  { %v10719_v35 = vld [vmem:[%s15538_s1 + $0x9cc] ss:$16 sps:$4 sm:$0xff]   ;;  %v10723_v38 = vld [vmem:[%s15538_s1 + $0x9a8] ss:$16 sps:$4 sm:$0xff]  }
 0x293   :  { %v13988_v8 = vadd.f32 %v7306_v62, %v7254_v24  ;;  %7636 = vmatpush1.bf16.msra.mxu0 %v10687_v58  ;;  %v10722_v18 = vld [vmem:[%s15538_s1 + $0xbcc] ss:$16 sps:$4 sm:$0xff]   ;;  %v10726_v2 = vld [vmem:[%s15538_s1 + $0xba8] ss:$16 sps:$4 sm:$0xff]  }
 0x294   :  { %7689 = vmatpush1.bf16.msra.mxu1 %v10690_v9  ;;  %7637 = vmatprep.subr.bf16.mxu0 %v10695_v63  ;;  %v10725_v27 = vld [vmem:[%s15538_s1 + $0x9ac] ss:$16 sps:$4 sm:$0xff]   ;;  %v10729_v57 = vld [vmem:[%s15538_s1 + $0x988] ss:$16 sps:$4 sm:$0xff]  }
 0x295   :  { %7690 = vmatprep.subr.bf16.mxu1 %v10698_v53  ;;  %v10728_v1 = vld [vmem:[%s15538_s1 + $0xbac] ss:$16 sps:$4 sm:$0xff]   ;;  %v10732_v11 = vld [vmem:[%s15538_s1 + $0xb88] ss:$16 sps:$4 sm:$0xff]  }
 0x296   :  { %v10731_v23 = vld [vmem:[%s15538_s1 + $0x98c] ss:$16 sps:$4 sm:$0xff]   ;;  %v10735_v34 = vld [vmem:[%s15538_s1 + $0x968] ss:$16 sps:$4 sm:$0xff]  }
 0x297   :  { %7638 = vmatpush1.bf16.msra.mxu0 %v10693_v39  ;;  %v10734_v56 = vld [vmem:[%s15538_s1 + $0xb8c] ss:$16 sps:$4 sm:$0xff]   ;;  %v10738_v58 = vld [vmem:[%s15538_s1 + $0xb68] ss:$16 sps:$4 sm:$0xff]  }
 0x298   :  { %7691 = vmatpush1.bf16.msra.mxu1 %v10696_v49  ;;  %7639 = vmatprep.subr.bf16.mxu0 %v10701_v4  ;;  %v10737_v12 = vld [vmem:[%s15538_s1 + $0x96c] ss:$16 sps:$4 sm:$0xff]   ;;  %v10741_v62 = vld [vmem:[%s15538_s1 + $0x948] ss:$16 sps:$4 sm:$0xff]  }
 0x299   :  { %7692 = vmatprep.subr.bf16.mxu1 %v10704_v32  ;;  %v10740_v7 = vld [vmem:[%s15538_s1 + $0xb6c] ss:$16 sps:$4 sm:$0xff]   ;;  %v10744_v63 = vld [vmem:[%s15538_s1 + $0xb48] ss:$16 sps:$4 sm:$0xff]  }
 0x29a   :  { %v10743_v9 = vld [vmem:[%s15538_s1 + $0x94c] ss:$16 sps:$4 sm:$0xff]   ;;  %v10747_v39 = vld [vmem:[%s15538_s1 + $0x928] ss:$16 sps:$4 sm:$0xff]  }
 0x29b   :  { %7640 = vmatpush1.bf16.msra.mxu0 %v10699_v36  ;;  %v10746_v48 = vld [vmem:[%s15538_s1 + $0xb4c] ss:$16 sps:$4 sm:$0xff]   ;;  %v10750_v49 = vld [vmem:[%s15538_s1 + $0xb28] ss:$16 sps:$4 sm:$0xff]  }
 0x29c   :  { %7693 = vmatpush1.bf16.msra.mxu1 %v10702_v51  ;;  %7641 = vmatprep.subr.bf16.mxu0 %v10707_v55  ;;  %v10749_v53 = vld [vmem:[%s15538_s1 + $0x92c] ss:$16 sps:$4 sm:$0xff]   ;;  %v10753_v36 = vld [vmem:[%s15538_s1 + $0x908] ss:$16 sps:$4 sm:$0xff]  }
 0x29d   :  { %7694 = vmatprep.subr.bf16.mxu1 %v10710_v25  ;;  %v10752_v24 = vld [vmem:[%s15538_s1 + $0xb2c] ss:$16 sps:$4 sm:$0xff]   ;;  %v10756_v51 = vld [vmem:[%s15538_s1 + $0xb08] ss:$16 sps:$4 sm:$0xff]  }
 0x29e   :  { %v10755_v4 = vld [vmem:[%s15538_s1 + $0x90c] ss:$16 sps:$4 sm:$0xff]  }
 0x29f   :  { %7642 = vmatpush1.bf16.msra.mxu0 %v10705_v26  ;;  %v10758_v32 = vld [vmem:[%s15538_s1 + $0xb0c] ss:$16 sps:$4 sm:$0xff]   ;;  %v10759_v26 = vld [vmem:[%s15538_s1 + $0xce8] ss:$16 sps:$4 sm:$0xff]  }
 0x2a0   :  { %7695 = vmatpush1.bf16.msra.mxu1 %v10708_v30  ;;  %7643 = vmatprep.subr.bf16.mxu0 %v10713_v31  ;;  %v10761_v55 = vld [vmem:[%s15538_s1 + $0xcec] ss:$16 sps:$4 sm:$0xff]   ;;  %v10762_v30 = vld [vmem:[%s15538_s1 + $0xee8] ss:$16 sps:$4 sm:$0xff]  }
 0x2a1   :  { %7696 = vmatprep.subr.bf16.mxu1 %v10716_v44  ;;  %v10764_v25 = vld [vmem:[%s15538_s1 + $0xeec] ss:$16 sps:$4 sm:$0xff]  }
 0x2a2   :  { %v10767_v31 = vld [vmem:[%s15538_s1 + $0xccc] ss:$16 sps:$4 sm:$0xff]  }
 0x2a3   :  { %7644 = vmatpush2.bf16.msra.mxu0 %v10711_v42  ;;  %v10770_v44 = vld [vmem:[%s15538_s1 + $0xecc] ss:$16 sps:$4 sm:$0xff]  }
 0x2a4   :  { %7697 = vmatpush2.bf16.msra.mxu1 %v10714_v43  ;;  %7645 = vmatprep.subr.bf16.mxu0 %v10719_v35 }
 0x2a5   :  { %7698 = vmatprep.subr.bf16.mxu1 %v10722_v18  ;;  %v10765_v18 = vld [vmem:[%s15538_s1 + $0xcc8] ss:$16 sps:$4 sm:$0xff]  }
 0x2a7   :  { %7646 = vmatpush2.bf16.msra.mxu0 %v10717_v14  ;;  %v10768_v14 = vld [vmem:[%s15538_s1 + $0xec8] ss:$16 sps:$4 sm:$0xff]  }
 0x2a8   :  { %7699 = vmatpush2.bf16.msra.mxu1 %v10720_v6  ;;  %7647 = vmatprep.subr.bf16.mxu0 %v10725_v27 }
 0x2a9   :  { %7700 = vmatprep.subr.bf16.mxu1 %v10728_v1 }
 0x2ab   :  { %7648 = vmatpush2.bf16.msra.mxu0 %v10723_v38 }
 0x2ac   :  { %7701 = vmatpush2.bf16.msra.mxu1 %v10726_v2  ;;  %7649 = vmatprep.subr.bf16.mxu0 %v10731_v23 }
 0x2ad   :  { %7702 = vmatprep.subr.bf16.mxu1 %v10734_v56 }
 0x2af   :  { %7650 = vmatpush2.bf16.msra.mxu0 %v10729_v57  ;;  %v10771_v57 = vld [vmem:[%s15538_s1 + $0xca8] ss:$16 sps:$4 sm:$0xff]  }
 0x2b0   :  { %7703 = vmatpush2.bf16.msra.mxu1 %v10732_v11  ;;  %7651 = vmatprep.subr.bf16.mxu0 %v10737_v12 }
 0x2b1   :  { %7704 = vmatprep.subr.bf16.mxu1 %v10740_v7  ;;  %v10782_v7 = vld [vmem:[%s15538_s1 + $0xe8c] ss:$16 sps:$4 sm:$0xff]  }
 0x2b3   :  { %7652 = vmatpush2.bf16.msra.mxu0 %v10735_v34 }
 0x2b4   :  { %7705 = vmatpush2.bf16.msra.mxu1 %v10738_v58  ;;  %7653 = vmatprep.subr.bf16.mxu0 %v10743_v9 }
 0x2b5   :  { %7706 = vmatprep.subr.bf16.mxu1 %v10746_v48 }
 0x2b7   :  { %7654 = vmatpush2.bf16.msra.mxu0 %v10741_v62 }
 0x2b8   :  { %7707 = vmatpush2.bf16.msra.mxu1 %v10744_v63  ;;  %7655 = vmatprep.subr.bf16.mxu0 %v10749_v53  ;;  %v10777_v53 = vld [vmem:[%s15538_s1 + $0xc88] ss:$16 sps:$4 sm:$0xff]  }
 0x2b9   :  { %7708 = vmatprep.subr.bf16.mxu1 %v10752_v24 }
 0x2bb   :  { %7656 = vmatpush2.bf16.msra.mxu0 %v10747_v39  ;;  %v10780_v39 = vld [vmem:[%s15538_s1 + $0xe88] ss:$16 sps:$4 sm:$0xff]  }
 0x2bc   :  { %7709 = vmatpush2.bf16.msra.mxu1 %v10750_v49  ;;  %7657 = vmatprep.subr.bf16.mxu0 %v10755_v4 }
 0x2bd   :  { %7710 = vmatprep.subr.bf16.mxu1 %v10758_v32 }
 0x2bf   :  { %7658 = vmatpush2.bf16.msra.mxu0 %v10753_v36 }
 0x2c0   :  { %7711 = vmatpush2.bf16.msra.mxu1 %v10756_v51  ;;  %7733 = vmatprep.subr.bf16.mxu0 %v10761_v55  ;;  %v10788_v51 = vld [vmem:[%s15538_s1 + $0xe6c] ss:$16 sps:$4 sm:$0xff]  }
 0x2c1   :  { %7786 = vmatprep.subr.bf16.mxu1 %v10764_v25 }
 0x2c2   :  { %v7343_v42 = vpop.f32.mrf.mxu0  ;;  %7660 = vmatmul.mubr.bf16.vlgmr.msra.gmra.mxu0 %v12036_v16  ;;  %v10773_v16 = vld [vmem:[%s15538_s1 + $0xcac] ss:$16 sps:$4 sm:$0xff]  }
 0x2c3   :  { %v7396_v43 = vpop.f32.mrf.mxu1  ;;  %7713 = vmatmul.mubr.bf16.vlgmr.msra.gmra.mxu1 %v12040_v17  ;;  %v7344_v35 = vadd.f32 %v7343_v42, %v13925_v3  ;;  %7734 = vmatpush1.bf16.msra.mxu0 %v10759_v26  ;;  %v10776_v17 = vld [vmem:[%s15538_s1 + $0xeac] ss:$16 sps:$4 sm:$0xff]  }
 0x2c4   :  { %7787 = vmatpush1.bf16.msra.mxu1 %v10762_v30  ;;  %v7345_v6 = vpop.f32.mrf.mxu0  ;;  %7735 = vmatprep.subr.bf16.mxu0 %v10767_v31 }
 0x2c5   :  { %v7398_v27 = vpop.f32.mrf.mxu1  ;;  %7788 = vmatprep.subr.bf16.mxu1 %v10770_v44  ;;  %v14149_v3 = vadd.f32 %v7396_v43, %v7344_v35  ;;  %v7346_v1 = vadd.f32 %v7345_v6, %v13930_v46  ;;  %7669 = vmatprep.mubr.bf16.mxu0 %v12057_v59  ;;  %v10774_v59 = vld [vmem:[%s15538_s1 + $0xea8] ss:$16 sps:$4 sm:$0xff]  }
 0x2c6   :  { %7722 = vmatprep.mubr.bf16.mxu1 %v12059_v20  ;;  %v7347_v38 = vpop.f32.mrf.mxu0  ;;  %v10779_v20 = vld [vmem:[%s15538_s1 + $0xc8c] ss:$16 sps:$4 sm:$0xff]   ;;  %v10783_v35 = vld [vmem:[%s15538_s1 + $0xc68] ss:$16 sps:$4 sm:$0xff]  }
 0x2c7   :  { %v7400_v2 = vpop.f32.mrf.mxu1  ;;  %v14154_v23 = vadd.f32 %v7398_v27, %v7346_v1  ;;  %v7348_v56 = vadd.f32 %v7347_v38, %v13945_v33  ;;  %7736 = vmatpush1.bf16.msra.mxu0 %v10765_v18  ;;  %v8328_v34 = vmul.f32 %v14149_v3, %v14149_v3 }
 0x2c8   :  { %7789 = vmatpush1.bf16.msra.mxu1 %v10768_v14  ;;  %v7349_v11 = vpop.f32.mrf.mxu0  ;;  %7737 = vmatprep.subr.bf16.mxu0 %v10773_v16  ;;  %v10791_v14 = vld [vmem:[%s15538_s1 + $0xc4c] ss:$16 sps:$4 sm:$0xff]  }
 0x2c9   :  { %v7402_v12 = vpop.f32.mrf.mxu1  ;;  %7790 = vmatprep.subr.bf16.mxu1 %v10776_v17  ;;  %v14166_v46 = vadd.f32 %v7400_v2, %v7348_v56  ;;  %v7350_v33 = vadd.f32 %v7349_v11, %v13950_v19 }
 0x2ca   :  { %v7353_v58 = vpop.f32.mrf.mxu0  ;;  %7670 = vmatmul.mubr.bf16.gmra.mxu0 %v12092_v28  ;;  %v8329_v28 = vmul.f32 %v14154_v23, %v14154_v23 }
 0x2cb   :  { %v7406_v9 = vpop.f32.mrf.mxu1  ;;  %7723 = vmatmul.mubr.bf16.gmra.mxu1 %v12094_v29  ;;  %v8263_v48 = vadd.f32 %v14166_v46, %v14149_v3  ;;  %v8332_v62 = vmul.f32 %v14166_v46, %v14166_v46  ;;  %v14180_v19 = vadd.f32 %v7402_v12, %v7350_v33  ;;  %v7354_v63 = vadd.f32 %v7353_v58, %v13966_v15  ;;  %v10785_v15 = vld [vmem:[%s15538_s1 + $0xc6c] ss:$16 sps:$4 sm:$0xff]   ;;  %v10789_v33 = vld [vmem:[%s15538_s1 + $0xc48] ss:$16 sps:$4 sm:$0xff]  }
 0x2cc   :  { %7738 = vmatpush1.bf16.msra.mxu0 %v10771_v57  ;;  %7791 = vmatpush1.bf16.msra.mxu1 %v10774_v59  ;;  %v7355_v29 = vpop.f32.mrf.mxu0 }
 0x2cd   :  { %v7408_v24 = vpop.f32.mrf.mxu1  ;;  %7739 = vmatprep.subr.bf16.mxu0 %v10779_v20  ;;  %v8264_v49 = vrot.slane %v8263_v48, 4  ;;  %v8344_v4 = vadd.f32 %v8332_v62, %v8328_v34  ;;  %v8270_v32 = vadd.f32 %v14180_v19, %v14154_v23  ;;  %v8333_v36 = vmul.f32 %v14180_v19, %v14180_v19  ;;  %7792 = vmatprep.subr.bf16.mxu1 %v10782_v7 }
 0x2ce   :  { %7765 = vmatprep.mubr.bf16.mxu0 %v12112_v40  ;;  %v7356_v55 = vadd.f32 %v7355_v29, %v13971_v37  ;;  %v14203_v25 = vadd.f32 %v7406_v9, %v7354_v63  ;;  %v7357_v26 = vpop.f32.mrf.mxu0  ;;  %7818 = vmatprep.mubr.bf16.mxu1 %v12116_v41  ;;  %v10786_v41 = vld [vmem:[%s15538_s1 + $0xe68] ss:$16 sps:$4 sm:$0xff]   ;;  %v10797_v9 = vld [vmem:[%s15538_s1 + $0xc2c] ss:$16 sps:$4 sm:$0xff]  }
 0x2cf   :  { %v7410_v30 = vpop.f32.mrf.mxu1  ;;  %v8265_v31 = vadd.f32 %v8264_v49, %v8263_v48  ;;  %v8345_v44 = vrot.slane %v8344_v4, 4  ;;  %v8271_v42 = vrot.slane %v8270_v32, 4  ;;  %v8351_v43 = vadd.f32 %v8333_v36, %v8329_v28  ;;  %v10800_v28 = vld [vmem:[%s15538_s1 + $0xe2c] ss:$16 sps:$4 sm:$0xff]  }
 0x2d0   :  { %7740 = vmatpush1.bf16.msra.mxu0 %v10777_v53  ;;  %v7358_v18 = vadd.f32 %v7357_v26, %v13986_v50  ;;  %v14210_v40 = vadd.f32 %v7408_v24, %v7356_v55  ;;  %7793 = vmatpush1.bf16.msra.mxu1 %v10780_v39  ;;  %v7359_v37 = vpop.f32.mrf.mxu0  ;;  %v10794_v50 = vld [vmem:[%s15538_s1 + $0xe4c] ss:$16 sps:$4 sm:$0xff]   ;;  %v8336_v38 = vmul.f32 %v14203_v25, %v14203_v25 }
 0x2d1   :  { %7741 = vmatprep.subr.bf16.mxu0 %v10785_v15  ;;  %v8266_v6 = vrot.slane %v8265_v31, 2  ;;  %v8346_v27 = vadd.f32 %v8345_v44, %v8344_v4  ;;  %v8272_v16 = vadd.f32 %v8271_v42, %v8270_v32  ;;  %v8352_v17 = vrot.slane %v8351_v43, 4  ;;  %v7412_v1 = vpop.f32.mrf.mxu1  ;;  %7794 = vmatprep.subr.bf16.mxu1 %v10788_v51  ;;  %v10795_v51 = vld [vmem:[%s15538_s1 + $0xc28] ss:$16 sps:$4 sm:$0xff]   ;;  %v10803_v42 = vld [vmem:[%s15538_s1 + $0xc0c] ss:$16 sps:$4 sm:$0xff]  }
 0x2d2   :  { %v8337_v2 = vmul.f32 %v14210_v40, %v14210_v40  ;;  %v7360_v56 = vadd.f32 %v7359_v37, %v13988_v8  ;;  %v14226_v57 = vadd.f32 %v7410_v30, %v7358_v18  ;;  %v10792_v8 = vld [vmem:[%s15538_s1 + $0xe48] ss:$16 sps:$4 sm:$0xff]  }
 0x2d3   :  { %v8267_v11 = vadd.f32 %v8266_v6, %v8265_v31  ;;  %v8347_v12 = vrot.slane %v8346_v27, 2  ;;  %v8273_v59 = vrot.slane %v8272_v16, 2  ;;  %v8353_v20 = vadd.f32 %v8352_v17, %v8351_v43  ;;  %v10798_v44 = vld [vmem:[%s15538_s1 + $0xe28] ss:$16 sps:$4 sm:$0xff]  }
 0x2d4   :  { %7742 = vmatpush1.bf16.msra.mxu0 %v10783_v35  ;;  %v8291_v7 = vadd.f32 %v14226_v57, %v14203_v25  ;;  %v8340_v34 = vmul.f32 %v14226_v57, %v14226_v57  ;;  %v14235_v58 = vadd.f32 %v7412_v1, %v7360_v56  ;;  %7795 = vmatpush1.bf16.msra.mxu1 %v10786_v41  ;;  %v10806_v41 = vld [vmem:[%s15538_s1 + $0xe0c] ss:$16 sps:$4 sm:$0xff]  }
 0x2d5   :  { %7743 = vmatprep.subr.bf16.mxu0 %v10791_v14  ;;  %v8268_v48 = vrot.slane %v8267_v11, 1  ;;  %v8348_v62 = vadd.f32 %v8347_v12, %v8346_v27  ;;  %v8274_v63 = vadd.f32 %v8273_v59, %v8272_v16  ;;  %v8354_v53 = vrot.slane %v8353_v20, 2  ;;  %7796 = vmatprep.subr.bf16.mxu1 %v10794_v50 }
 0x2d6   :  { %v8292_v29 = vrot.slane %v8291_v7, 4  ;;  %v8372_v24 = vadd.f32 %v8340_v34, %v8336_v38  ;;  %v8298_v39 = vadd.f32 %v14235_v58, %v14210_v40  ;;  %v8341_v15 = vmul.f32 %v14235_v58, %v14235_v58 }
 0x2d7   :  { %v8269_v49 = vadd.f32 %v8268_v48, %v8267_v11  ;;  %v8349_v4 = vrot.slane %v8348_v62, 1  ;;  %v8275_v32 = vrot.slane %v8274_v63, 1  ;;  %v8355_v36 = vadd.f32 %v8354_v53, %v8353_v20  ;;  %v10804_v20 = vld [vmem:[%s15538_s1 + $0xe08] ss:$16 sps:$4 sm:$0xff]   ;;  %v10812_v48 = vld [vmem:[%s15538_s1 + $0xfec] ss:$16 sps:$4 sm:$0xff]  }
 0x2d8   :  { %7744 = vmatpush1.bf16.msra.mxu0 %v10789_v33  ;;  %v8293_v55 = vadd.f32 %v8292_v29, %v8291_v7  ;;  %v8373_v26 = vrot.slane %v8372_v24, 4  ;;  %v8299_v30 = vrot.slane %v8298_v39, 4  ;;  %v8379_v31 = vadd.f32 %v8341_v15, %v8337_v2  ;;  %7797 = vmatpush1.bf16.msra.mxu1 %v10792_v8  ;;  %v10801_v2 = vld [vmem:[%s15538_s1 + $0xc08] ss:$16 sps:$4 sm:$0xff]   ;;  %v10809_v33 = vld [vmem:[%s15538_s1 + $0xdec] ss:$16 sps:$4 sm:$0xff]  }
 0x2d9   :  { %7745 = vmatprep.subr.bf16.mxu0 %v10797_v9  ;;  %v14259_v43 = vmul.f32 0.0625, %v8269_v49  ;;  %v8350_v35 = vadd.f32 %v8349_v4, %v8348_v62  ;;  %v8276_v18 = vadd.f32 %v8275_v32, %v8274_v63  ;;  %v8356_v37 = vrot.slane %v8355_v36, 1  ;;  %7798 = vmatprep.subr.bf16.mxu1 %v10800_v28 }
 0x2da   :  { %v8294_v14 = vrot.slane %v8293_v55, 2  ;;  %v8374_v6 = vadd.f32 %v8373_v26, %v8372_v24  ;;  %v8300_v27 = vadd.f32 %v8299_v30, %v8298_v39  ;;  %v8380_v16 = vrot.slane %v8379_v31, 4  ;;  %v10807_v39 = vld [vmem:[%s15538_s1 + $0xde8] ss:$16 sps:$4 sm:$0xff]   ;;  %v10815_v26 = vld [vmem:[%s15538_s1 + $0xdcc] ss:$16 sps:$4 sm:$0xff]  }
 0x2db   :  { %v8400_v17 = vmul.f32 0.0625, %v8350_v35  ;;  %v8408_v1 = vmul.f32 %v14259_v43, %v14259_v43  ;;  %v8428_v50 = vsub.f32 %v14166_v46, %v14259_v43  ;;  %v14268_v38 = vmul.f32 0.0625, %v8276_v18  ;;  %v10839_v46 = vld [vmem:[%s15538_s1 + $0xd4c] ss:$16 sps:$4 sm:$0xff]  }
 0x2dc   :  { %7746 = vmatpush1.bf16.msra.mxu0 %v10795_v51  ;;  %v8357_v56 = vadd.f32 %v8356_v37, %v8355_v36  ;;  %v8295_v11 = vadd.f32 %v8294_v14, %v8293_v55  ;;  %v8375_v12 = vrot.slane %v8374_v6, 2  ;;  %v8301_v59 = vrot.slane %v8300_v27, 2  ;;  %7799 = vmatpush1.bf16.msra.mxu1 %v10798_v44  ;;  %v10810_v55 = vld [vmem:[%s15538_s1 + $0xfe8] ss:$16 sps:$4 sm:$0xff]  }
 0x2dd   :  { %7747 = vmatprep.subr.bf16.mxu0 %v10803_v42  ;;  %v8416_v7 = vsub.f32 %v8400_v17, %v8408_v1  ;;  %v8409_v34 = vmul.f32 %v14268_v38, %v14268_v38  ;;  %v8429_v8 = vsub.f32 %v14180_v19, %v14268_v38  ;;  %v8381_v9 = vadd.f32 %v8380_v16, %v8379_v31  ;;  %v10818_v31 = vld [vmem:[%s15538_s1 + $0xfcc] ss:$16 sps:$4 sm:$0xff]   ;;  %v10816_v16 = vld [vmem:[%s15538_s1 + $0xfc8] ss:$16 sps:$4 sm:$0xff]  }
 0x2de   :  { %7800 = vmatprep.subr.bf16.mxu1 %v10806_v41  ;;  %v8401_v62 = vmul.f32 0.0625, %v8357_v56  ;;  %v8296_v63 = vrot.slane %v8295_v11, 1  ;;  %v8376_v53 = vadd.f32 %v8375_v12, %v8374_v6  ;;  %v8302_v28 = vadd.f32 %v8301_v59, %v8300_v27  ;;  %v10813_v41 = vld [vmem:[%s15538_s1 + $0xdc8] ss:$16 sps:$4 sm:$0xff]   ;;  %v10821_v17 = vld [vmem:[%s15538_s1 + $0xdac] ss:$16 sps:$4 sm:$0xff]  }
 0x2df   :  { %v8440_v29 = vadd.f32 1e-05, %v8416_v7  ;;  %v8382_v24 = vrot.slane %v8381_v9, 2  ;;  %v8424_v15 = vsub.f32 %v14149_v3, %v14259_v43  ;;  %v8425_v49 = vsub.f32 %v14154_v23, %v14268_v38  ;;  %v10824_v56 = vld [vmem:[%s15538_s1 + $0xfac] ss:$16 sps:$4 sm:$0xff]  }
 0x2e0   :  { %7748 = vmatpush1.bf16.msra.mxu0 %v10801_v2  ;;  %v8417_v4 = vsub.f32 %v8401_v62, %v8409_v34  ;;  %v8297_v32 = vadd.f32 %v8296_v63, %v8295_v11  ;;  %v8377_v36 = vrot.slane %v8376_v53, 1  ;;  %v8303_v51 = vrot.slane %v8302_v28, 1  ;;  %7801 = vmatpush1.bf16.msra.mxu1 %v10804_v20  ;;  %v10819_v7 = vld [vmem:[%s15538_s1 + $0xda8] ss:$16 sps:$4 sm:$0xff]   ;;  %v10827_v62 = vld [vmem:[%s15538_s1 + $0xd8c] ss:$16 sps:$4 sm:$0xff]  }
 0x2e1   :  { %7749 = vmatprep.subr.bf16.mxu0 %v10809_v33  ;;  %11239 = vrsqrt.f32 %v8440_v29  ;;  %v8383_v30 = vadd.f32 %v8382_v24, %v8381_v9  ;;  %7802 = vmatprep.subr.bf16.mxu1 %v10812_v48  ;;  %v10822_v48 = vld [vmem:[%s15538_s1 + $0xfa8] ss:$16 sps:$4 sm:$0xff]   ;;  %v10842_v3 = vld [vmem:[%s15538_s1 + $0xf4c] ss:$16 sps:$4 sm:$0xff]  }
 0x2e2   :  { %v8441_v44 = vadd.f32 1e-05, %v8417_v4  ;;  %v14302_v42 = vmul.f32 0.0625, %v8297_v32  ;;  %v8378_v35 = vadd.f32 %v8377_v36, %v8376_v53  ;;  %v8304_v18 = vadd.f32 %v8303_v51, %v8302_v28  ;;  %v10830_v53 = vld [vmem:[%s15538_s1 + $0xf8c] ss:$16 sps:$4 sm:$0xff]  }
 0x2e3   :  { %v8384_v37 = vrot.slane %v8383_v30, 1  ;;  %v10825_v29 = vld [vmem:[%s15538_s1 + $0xd88] ss:$16 sps:$4 sm:$0xff]   ;;  %v10836_v4 = vld [vmem:[%s15538_s1 + $0xf6c] ss:$16 sps:$4 sm:$0xff]  }
 0x2e4   :  { %7750 = vmatpush2.bf16.msra.mxu0 %v10807_v39  ;;  %11241 = vrsqrt.f32 %v8441_v44  ;;  %v8404_v14 = vmul.f32 0.0625, %v8378_v35  ;;  %v8412_v6 = vmul.f32 %v14302_v42, %v14302_v42  ;;  %v8436_v27 = vsub.f32 %v14226_v57, %v14302_v42  ;;  %7803 = vmatpush2.bf16.msra.mxu1 %v10810_v55  ;;  %v10828_v24 = vld [vmem:[%s15538_s1 + $0xf88] ss:$16 sps:$4 sm:$0xff]   ;;  %v10833_v39 = vld [vmem:[%s15538_s1 + $0xd6c] ss:$16 sps:$4 sm:$0xff]  }
 0x2e5   :  { %7751 = vmatprep.subr.bf16.mxu0 %v10815_v26  ;;  %v14317_v1 = vmul.f32 0.0625, %v8304_v18  ;;  %v8385_v2 = vadd.f32 %v8384_v37, %v8383_v30  ;;  %7804 = vmatprep.subr.bf16.mxu1 %v10818_v31  ;;  %v8432_v11 = vsub.f32 %v14203_v25, %v14302_v42  ;;  %v10831_v51 = vld [vmem:[%s15538_s1 + $0xd68] ss:$16 sps:$4 sm:$0xff]   ;;  %v15604_v18 = vsub.s32 0, %v12260_v5  ;;  %v10845_v38 = vld [vmem:[%s15538_s1 + $0xd2c] ss:$16 sps:$4 sm:$0xff]  }
 0x2e6   :  { %v8420_v12 = vsub.f32 %v8404_v14, %v8412_v6  ;;  %v10834_v26 = vld [vmem:[%s15538_s1 + $0xf68] ss:$16 sps:$4 sm:$0xff]   ;;  %v10854_v57 = vld [vmem:[%s15538_s1 + $0xf0c] ss:$16 sps:$4 sm:$0xff]  }
 0x2e7   :  { %v8405_v59 = vmul.f32 0.0625, %v8385_v2  ;;  %v8413_v20 = vmul.f32 %v14317_v1, %v14317_v1  ;;  %v8437_v33 = vsub.f32 %v14235_v58, %v14317_v1  ;;  %v8433_v34 = vsub.f32 %v14210_v40, %v14317_v1  ;;  %v10837_v35 = vld [vmem:[%s15538_s1 + $0xd48] ss:$16 sps:$4 sm:$0xff]   ;;  %v10857_v58 = vld [vmem:[%s15538_s1 + $0x10ec] ss:$16 sps:$4 sm:$0xff]  }
 0x2e8   :  { %7752 = vmatpush2.bf16.msra.mxu0 %v10813_v41  ;;  %v8444_v9 = vadd.f32 1e-05, %v8420_v12  ;;  %7805 = vmatpush2.bf16.msra.mxu1 %v10816_v16  ;;  %v15605_v41 = vsub.s32 1, %v12260_v5  ;;  %v10840_v23 = vld [vmem:[%s15538_s1 + $0xf48] ss:$16 sps:$4 sm:$0xff]  }
 0x2e9   :  { %7753 = vmatprep.subr.bf16.mxu0 %v10821_v17  ;;  %v8421_v63 = vsub.f32 %v8405_v59, %v8413_v20  ;;  %7806 = vmatprep.subr.bf16.mxu1 %v10824_v56  ;;  %v10843_v56 = vld [vmem:[%s15538_s1 + $0xd28] ss:$16 sps:$4 sm:$0xff]   ;;  %v10860_v40 = vld [vmem:[%s15538_s1 + $0x12ec] ss:$16 sps:$4 sm:$0xff]  }
 0x2ea   :  { %11243 = vrsqrt.f32 %v8444_v9  ;;  %v10851_v9 = vld [vmem:[%s15538_s1 + $0xd0c] ss:$16 sps:$4 sm:$0xff]   ;;  %v10849_v42 = vld [vmem:[%s15538_s1 + $0xd08] ss:$16 sps:$4 sm:$0xff]  }
 0x2eb   :  { %v8445_v28 = vadd.f32 1e-05, %v8421_v63 }
 0x2ec   :  { %7754 = vmatpush2.bf16.msra.mxu0 %v10819_v7  ;;  %7807 = vmatpush2.bf16.msra.mxu1 %v10822_v48  ;;  %v10846_v7 = vld [vmem:[%s15538_s1 + $0xf28] ss:$16 sps:$4 sm:$0xff]  }
 0x2ed   :  { %7755 = vmatprep.subr.bf16.mxu0 %v10827_v62  ;;  %11245 = vrsqrt.f32 %v8445_v28  ;;  %7808 = vmatprep.subr.bf16.mxu1 %v10830_v53 }
 0x2ee   :  { %v11240_v32 = vpop.eup %11239 }
 0x2ef   :  { %v8460_v36 = vmul.f32 %v11240_v32, %v8428_v50  ;;  %v8456_v55 = vmul.f32 %v11240_v32, %v8424_v15  ;;  %v8520_v50 = vld [vmem:[%s15541_s3] sm:$0xf]  ;;  %v10852_v32 = vld [vmem:[%s15538_s1 + $0xf08] ss:$16 sps:$4 sm:$0xff]  }
 0x2f0   :  { %7756 = vmatpush2.bf16.msra.mxu0 %v10825_v29  ;;  %7809 = vmatpush2.bf16.msra.mxu1 %v10828_v24  ;;  %v14386_v37 = vrot.slane %v8520_v50, %v15604_v18  ;;  %v14390_v14 = vrot.slane %v8520_v50, %v15605_v41  ;;  %v15573_v24 = vsub.s32 2, %v12260_v5 }
 0x2f1   :  { %7757 = vmatprep.subr.bf16.mxu0 %v10833_v39  ;;  %v11242_v30 = vpop.eup %11241  ;;  %v8492_v31 = vmul.f32 0.2, %v8460_v36  ;;  %7810 = vmatprep.subr.bf16.mxu1 %v10836_v4  ;;  %vm8476_vm0 = vcmp.gt.f32.partialorder %v8460_v36, 0.0  ;;  %v8488_v44 = vmul.f32 0.2, %v8456_v55  ;;  %vm8472_vm1 = vcmp.gt.f32.partialorder %v8456_v55, 0.0 }
 0x2f2   :  { %v8461_v43 = vmul.f32 %v11242_v30, %v8429_v8  ;;  %v8457_v15 = vmul.f32 %v11242_v30, %v8425_v49  ;;  %v10848_v49 = vld [vmem:[%s15538_s1 + $0xf2c] ss:$16 sps:$4 sm:$0xff]   ;;  %v10858_v30 = vld [vmem:[%s15538_s1 + $0x12e8] ss:$16 sps:$4 sm:$0xff]  }
 0x2f3   :  { %v8508_v8 = vsel %vm8476_vm0, %v8460_v36, %v8492_v31  ;;  %v8504_v16 = vsel %vm8472_vm1, %v8456_v55, %v8488_v44  ;;  %v11271_v55 = vld [vmem:[%s15540_s2] sm:$0xf]  ;;  %v10863_v31 = vld [vmem:[%s15538_s1 + $0x10cc] ss:$16 sps:$4 sm:$0xff]   ;;  %vm8602_vm0 = vcmask 7168  }
 0x2f4   :  { %7758 = vmatpush2.bf16.msra.mxu0 %v10831_v51  ;;  %v8493_v19 = vmul.f32 0.2, %v8461_v43  ;;  %7811 = vmatpush2.bf16.msra.mxu1 %v10834_v26  ;;  %vm8473_vm2 = vcmp.gt.f32.partialorder %v8457_v15, 0.0  ;;  %vm8477_vm3 = vcmp.gt.f32.partialorder %v8461_v43, 0.0  ;;  %v8489_v6 = vmul.f32 0.2, %v8457_v15 }
 0x2f5   :  { %7759 = vmatprep.subr.bf16.mxu0 %v10839_v46  ;;  %7812 = vmatprep.subr.bf16.mxu1 %v10842_v3  ;;  %v8546_v12 = vmul.f32 %v14386_v37, %v8508_v8  ;;  %v14453_v26 = vrot.slane %v11271_v55, %v15573_v24  ;;  %v10855_v46 = vld [vmem:[%s15538_s1 + $0x10e8] ss:$16 sps:$4 sm:$0xff]  }
 0x2f6   :  { %v8509_v17 = vsel %vm8477_vm3, %v8461_v43, %v8493_v19  ;;  %v8505_v48 = vsel %vm8473_vm2, %v8457_v15, %v8489_v6  ;;  %v10861_v6 = vld [vmem:[%s15538_s1 + $0x10c8] ss:$16 sps:$4 sm:$0xff]  }
 0x2f7   :  { %v11244_v2 = vpop.eup %11243  ;;  %v8547_v59 = vmul.f32 %v14390_v14, %v8509_v17  ;;  %v8543_v63 = vmul.f32 %v14390_v14, %v8505_v48  ;;  %v10869_v17 = vld [vmem:[%s15538_s1 + $0x10ac] ss:$16 sps:$4 sm:$0xff]  }
 0x2f8   :  { %7760 = vmatpush2.bf16.msra.mxu0 %v10837_v35  ;;  %v8468_v20 = vmul.f32 %v11244_v2, %v8436_v27  ;;  %7813 = vmatpush2.bf16.msra.mxu1 %v10840_v23  ;;  %v8464_v62 = vmul.f32 %v11244_v2, %v8432_v11  ;;  %v8542_v27 = vmul.f32 %v14386_v37, %v8504_v16  ;;  %v10866_v35 = vld [vmem:[%s15538_s1 + $0x12cc] ss:$16 sps:$4 sm:$0xff]  }
 0x2f9   :  { %7761 = vmatprep.subr.bf16.mxu0 %v10845_v38  ;;  %7814 = vmatprep.subr.bf16.mxu1 %v10848_v49  ;;  %v14423_v53 = vadd.f32 %v8547_v59, %v8546_v12  ;;  %v15609_v49 = vld [vmem:[#allocation3_spill] sm:$0xff]  ;;  %v15611_v12 = vld [vmem:[#allocation4_spill] sm:$0xff] }
 0x2fa   :  { %v11246_v28 = vpop.eup %11245  ;;  %v8500_v29 = vmul.f32 0.2, %v8468_v20  ;;  %v8496_v39 = vmul.f32 0.2, %v8464_v62  ;;  %vm8484_vm4 = vcmp.gt.f32.partialorder %v8468_v20, 0.0  ;;  %v14432_v11 = vadd.f32 %v8543_v63, %v8542_v27 }
 0x2fb   :  { %15606 = vst [vmem:[#allocation30_spill] sm:$0xff] %v14423_v53  ;;  %v8469_v25 = vmul.f32 %v11246_v28, %v8437_v33  ;;  %v8465_v4 = vmul.f32 %v11246_v28, %v8433_v34  ;;  %vm8480_vm5 = vcmp.gt.f32.partialorder %v8464_v62, 0.0  ;;  %v15572_v33 = vsub.s32 3, %v12260_v5  ;;  %v10872_v59 = vld [vmem:[%s15538_s1 + $0x12ac] ss:$16 sps:$4 sm:$0xff]  }
 0x2fc   :  { %7762 = vmatpush2.bf16.msra.mxu0 %v10843_v56  ;;  %15607 = vst [vmem:[#allocation31_spill] sm:$0xff] %v14432_v11  ;;  %7815 = vmatpush2.bf16.msra.mxu1 %v10846_v7  ;;  %v8516_v1 = vsel %vm8484_vm4, %v8468_v20, %v8500_v29  ;;  %v8512_v51 = vsel %vm8480_vm5, %v8464_v62, %v8496_v39  ;;  %v10870_v28 = vld [vmem:[%s15538_s1 + $0x12a8] ss:$16 sps:$4 sm:$0xff]   ;;  %v10875_v29 = vld [vmem:[%s15538_s1 + $0x108c] ss:$16 sps:$4 sm:$0xff]  }
 0x2fd   :  { %7763 = vmatprep.subr.bf16.mxu0 %v10851_v9  ;;  %v8501_v36 = vmul.f32 0.2, %v8469_v25  ;;  %7816 = vmatprep.subr.bf16.mxu1 %v10854_v57  ;;  %vm8481_vm6 = vcmp.gt.f32.partialorder %v8465_v4, 0.0  ;;  %vm8485_vm7 = vcmp.gt.f32.partialorder %v8469_v25, 0.0  ;;  %v8497_v34 = vmul.f32 0.2, %v8465_v4 }
 0x2fe   :  { %v8554_v43 = vmul.f32 %v14386_v37, %v8516_v1  ;;  %v14468_v44 = vrot.slane %v11271_v55, %v15572_v33  ;;  %v8550_v18 = vmul.f32 %v14386_v37, %v8512_v51  ;;  %v15612_v9 = vld [vmem:[#allocation5_spill] sm:$0xff] }
 0x2ff   :  { %v8517_v50 = vsel %vm8485_vm7, %v8469_v25, %v8501_v36  ;;  %v8513_v3 = vsel %vm8481_vm6, %v8465_v4, %v8497_v34  ;;  %v10867_v57 = vld [vmem:[%s15538_s1 + $0x10a8] ss:$16 sps:$4 sm:$0xff]   ;;  %v15613_v4 = vld [vmem:[#allocation6_spill] sm:$0xff]  ;;  %v10881_v55 = vld [vmem:[%s15538_s1 + $0x106c] ss:$16 sps:$4 sm:$0xff]  }
 0x300   :  { %7764 = vmatpush2.bf16.msra.mxu0 %v10849_v42  ;;  %7817 = vmatpush2.bf16.msra.mxu1 %v10852_v32  ;;  %v8555_v15 = vmul.f32 %v14390_v14, %v8517_v50  ;;  %v8551_v41 = vmul.f32 %v14390_v14, %v8513_v3  ;;  %v10878_v42 = vld [vmem:[%s15538_s1 + $0x128c] ss:$16 sps:$4 sm:$0xff]   ;;  %v10873_v1 = vld [vmem:[%s15538_s1 + $0x1088] ss:$16 sps:$4 sm:$0xff]  }
 0x301   :  { %7839 = vmatprep.subr.bf16.mxu0 %v10857_v58  ;;  %7892 = vmatprep.subr.bf16.mxu1 %v10860_v40  ;;  %v15614_v40 = vld [vmem:[#allocation7_spill] sm:$0xff] }
 0x302   :  { %v7449_v19 = vpop.f32.mrf.mxu0  ;;  %v14476_v38 = vadd.f32 %v8555_v15, %v8554_v43  ;;  %v14483_v16 = vadd.f32 %v8551_v41, %v8550_v18  ;;  %v10876_v51 = vld [vmem:[%s15538_s1 + $0x1288] ss:$16 sps:$4 sm:$0xff]   ;;  %v15615_v43 = vld [vmem:[#allocation8_spill] sm:$0xff] }
 0x303   :  { %v7502_v23 = vpop.f32.mrf.mxu1  ;;  %7766 = vmatmul.mubr.bf16.vlgmr.msra.gmra.mxu0 %v12299_v21  ;;  %v7450_v8 = vadd.f32 %v7449_v19, %v14453_v26  ;;  %7819 = vmatmul.mubr.bf16.vlgmr.msra.gmra.mxu1 %v15609_v49  ;;  %v10864_v21 = vld [vmem:[%s15538_s1 + $0x12c8] ss:$16 sps:$4 sm:$0xff]   ;;  %v10887_v49 = vld [vmem:[%s15538_s1 + $0x104c] ss:$16 sps:$4 sm:$0xff]  }
 0x304   :  { %15608 = vst [vmem:[#allocation32_spill] sm:$0xff] %v14476_v38  ;;  %7840 = vmatpush1.bf16.msra.mxu0 %v10855_v46  ;;  %15610 = vst [vmem:[#allocation3_spill] sm:$0xff] %v14483_v16  ;;  %7893 = vmatpush1.bf16.msra.mxu1 %v10858_v30  ;;  %v7451_v37 = vpop.f32.mrf.mxu0  ;;  %v10884_v30 = vld [vmem:[%s15538_s1 + $0x126c] ss:$16 sps:$4 sm:$0xff]   ;;  %v10879_v41 = vld [vmem:[%s15538_s1 + $0x1068] ss:$16 sps:$4 sm:$0xff]  }
 0x305   :  { %v7504_v14 = vpop.f32.mrf.mxu1  ;;  %7841 = vmatprep.subr.bf16.mxu0 %v10863_v31  ;;  %v14491_v2 = vadd.f32 %v7502_v23, %v7450_v8  ;;  %v7452_v56 = vadd.f32 %v7451_v37, %v14468_v44  ;;  %7894 = vmatprep.subr.bf16.mxu1 %v10866_v35  ;;  %v15616_v18 = vld [vmem:[#allocation9_spill] sm:$0xff] }
 0x306   :  { %7775 = vmatprep.mubr.bf16.mxu0 %v15611_v12  ;;  %v7453_v20 = vpop.f32.mrf.mxu0  ;;  %7828 = vmatprep.mubr.bf16.mxu1 %v15612_v9  ;;  %v10882_v8 = vld [vmem:[%s15538_s1 + $0x1268] ss:$16 sps:$4 sm:$0xff]   ;;  %v10899_v9 = vld [vmem:[%s15538_s1 + $0x100c] ss:$16 sps:$4 sm:$0xff]  }
 0x307   :  { %v7506_v7 = vpop.f32.mrf.mxu1  ;;  %v14499_v48 = vadd.f32 %v7504_v14, %v7452_v56  ;;  %v7454_v62 = vadd.f32 %v7453_v20, %v14453_v26  ;;  %v10890_v14 = vld [vmem:[%s15538_s1 + $0x124c] ss:$16 sps:$4 sm:$0xff]   ;;  %v10888_v12 = vld [vmem:[%s15538_s1 + $0x1248] ss:$16 sps:$4 sm:$0xff]  }
 0x308   :  { %7842 = vmatpush1.bf16.msra.mxu0 %v10861_v6  ;;  %7895 = vmatpush1.bf16.msra.mxu1 %v10864_v21  ;;  %v7455_v27 = vpop.f32.mrf.mxu0  ;;  %v10891_v20 = vld [vmem:[%s15538_s1 + $0x1028] ss:$16 sps:$4 sm:$0xff]  }
 0x309   :  { %v7508_v63 = vpop.f32.mrf.mxu1  ;;  %7843 = vmatprep.subr.bf16.mxu0 %v10869_v17  ;;  %v14511_v39 = vadd.f32 %v7506_v7, %v7454_v62  ;;  %v7456_v25 = vadd.f32 %v7455_v27, %v14468_v44  ;;  %7896 = vmatprep.subr.bf16.mxu1 %v10872_v59  ;;  %v10885_v17 = vld [vmem:[%s15538_s1 + $0x1048] ss:$16 sps:$4 sm:$0xff]   ;;  %v10893_v59 = vld [vmem:[%s15538_s1 + $0x102c] ss:$16 sps:$4 sm:$0xff]  }
 0x30a   :  { %v7459_v32 = vpop.f32.mrf.mxu0  ;;  %v10894_v7 = vld [vmem:[%s15538_s1 + $0x1228] ss:$16 sps:$4 sm:$0xff]   ;;  %v10902_v62 = vld [vmem:[%s15538_s1 + $0x120c] ss:$16 sps:$4 sm:$0xff]  }
 0x30b   :  { %7776 = vmatmul.mubr.bf16.gmra.mxu0 %v15613_v4  ;;  %v7512_v58 = vpop.f32.mrf.mxu1  ;;  %v14518_v36 = vadd.f32 %v7508_v63, %v7456_v25  ;;  %7829 = vmatmul.mubr.bf16.gmra.mxu1 %v15614_v40  ;;  %v7460_v34 = vadd.f32 %v7459_v32, %v14453_v26  ;;  %v10900_v27 = vld [vmem:[%s15538_s1 + $0x1208] ss:$16 sps:$4 sm:$0xff]   ;;  %v10905_v63 = vld [vmem:[%s15538_s1 + $0x11ec] ss:$16 sps:$4 sm:$0xff]  }
 0x30c   :  { %7844 = vmatpush1.bf16.msra.mxu0 %v10867_v57  ;;  %7897 = vmatpush1.bf16.msra.mxu1 %v10870_v28  ;;  %v7461_v46 = vpop.f32.mrf.mxu0  ;;  %v10897_v57 = vld [vmem:[%s15538_s1 + $0x1008] ss:$16 sps:$4 sm:$0xff]   ;;  %v10908_v28 = vld [vmem:[%s15538_s1 + $0x13ec] ss:$16 sps:$4 sm:$0xff]  }
 0x30d   :  { %7845 = vmatprep.subr.bf16.mxu0 %v10875_v29  ;;  %v7514_v50 = vpop.f32.mrf.mxu1  ;;  %7898 = vmatprep.subr.bf16.mxu1 %v10878_v42  ;;  %v7462_v31 = vadd.f32 %v7461_v46, %v14468_v44  ;;  %v14535_v3 = vadd.f32 %v7512_v58, %v7460_v34  ;;  %v10903_v29 = vld [vmem:[%s15538_s1 + $0x11e8] ss:$16 sps:$4 sm:$0xff]   ;;  %v10911_v42 = vld [vmem:[%s15538_s1 + $0x11cc] ss:$16 sps:$4 sm:$0xff]  }
 0x30e   :  { %7871 = vmatprep.mubr.bf16.mxu0 %v15615_v43  ;;  %v7463_v15 = vpop.f32.mrf.mxu0  ;;  %7924 = vmatprep.mubr.bf16.mxu1 %v15616_v18  ;;  %v10906_v25 = vld [vmem:[%s15538_s1 + $0x13e8] ss:$16 sps:$4 sm:$0xff]   ;;  %v10914_v4 = vld [vmem:[%s15538_s1 + $0x13cc] ss:$16 sps:$4 sm:$0xff]  }
 0x30f   :  { %v7516_v35 = vpop.f32.mrf.mxu1  ;;  %v7464_v19 = vadd.f32 %v7463_v15, %v14453_v26  ;;  %v14543_v23 = vadd.f32 %v7514_v50, %v7462_v31  ;;  %v10909_v32 = vld [vmem:[%s15538_s1 + $0x11c8] ss:$16 sps:$4 sm:$0xff]   ;;  %v10917_v40 = vld [vmem:[%s15538_s1 + $0x11ac] ss:$16 sps:$4 sm:$0xff]  }
 0x310   :  { %7846 = vmatpush1.bf16.msra.mxu0 %v10873_v1  ;;  %7899 = vmatpush1.bf16.msra.mxu1 %v10876_v51  ;;  %v7465_v6 = vpop.f32.mrf.mxu0  ;;  %v10912_v58 = vld [vmem:[%s15538_s1 + $0x13c8] ss:$16 sps:$4 sm:$0xff]   ;;  %v10920_v1 = vld [vmem:[%s15538_s1 + $0x13ac] ss:$16 sps:$4 sm:$0xff]  }
 0x311   :  { %7847 = vmatprep.subr.bf16.mxu0 %v10881_v55  ;;  %v7518_v37 = vpop.f32.mrf.mxu1  ;;  %7900 = vmatprep.subr.bf16.mxu1 %v10884_v30  ;;  %v7466_v26 = vadd.f32 %v7465_v6, %v14468_v44  ;;  %v14555_v21 = vadd.f32 %v7516_v35, %v7464_v19  ;;  %v10896_v44 = vld [vmem:[%s15538_s1 + $0x122c] ss:$16 sps:$4 sm:$0xff]   ;;  %v10915_v34 = vld [vmem:[%s15538_s1 + $0x11a8] ss:$16 sps:$4 sm:$0xff]  }
 0x312   :  { %v10918_v51 = vld [vmem:[%s15538_s1 + $0x13a8] ss:$16 sps:$4 sm:$0xff]   ;;  %v10923_v55 = vld [vmem:[%s15538_s1 + $0x118c] ss:$16 sps:$4 sm:$0xff]  }
 0x313   :  { %v14560_v56 = vadd.f32 %v7518_v37, %v7466_v26  ;;  %v10926_v46 = vld [vmem:[%s15538_s1 + $0x138c] ss:$16 sps:$4 sm:$0xff]   ;;  %v10921_v50 = vld [vmem:[%s15538_s1 + $0x1188] ss:$16 sps:$4 sm:$0xff]  }
 0x314   :  { %7848 = vmatpush1.bf16.msra.mxu0 %v10879_v41  ;;  %7901 = vmatpush1.bf16.msra.mxu1 %v10882_v8  ;;  %v10924_v30 = vld [vmem:[%s15538_s1 + $0x1388] ss:$16 sps:$4 sm:$0xff]   ;;  %v10929_v31 = vld [vmem:[%s15538_s1 + $0x116c] ss:$16 sps:$4 sm:$0xff]  }
 0x315   :  { %7849 = vmatprep.subr.bf16.mxu0 %v10887_v49  ;;  %7902 = vmatprep.subr.bf16.mxu1 %v10890_v14  ;;  %v10932_v43 = vld [vmem:[%s15538_s1 + $0x136c] ss:$16 sps:$4 sm:$0xff]   ;;  %v10927_v15 = vld [vmem:[%s15538_s1 + $0x1168] ss:$16 sps:$4 sm:$0xff]  }
 0x316   :  { %v10930_v35 = vld [vmem:[%s15538_s1 + $0x1368] ss:$16 sps:$4 sm:$0xff]   ;;  %v10935_v18 = vld [vmem:[%s15538_s1 + $0x114c] ss:$16 sps:$4 sm:$0xff]  }
 0x317   :  { %v10938_v41 = vld [vmem:[%s15538_s1 + $0x134c] ss:$16 sps:$4 sm:$0xff]   ;;  %v10933_v19 = vld [vmem:[%s15538_s1 + $0x1148] ss:$16 sps:$4 sm:$0xff]  }
 0x318   :  { %7850 = vmatpush1.bf16.msra.mxu0 %v10885_v17  ;;  %7903 = vmatpush1.bf16.msra.mxu1 %v10888_v12  ;;  %v10936_v8 = vld [vmem:[%s15538_s1 + $0x1348] ss:$16 sps:$4 sm:$0xff]   ;;  %v10941_v49 = vld [vmem:[%s15538_s1 + $0x112c] ss:$16 sps:$4 sm:$0xff]  }
 0x319   :  { %7851 = vmatprep.subr.bf16.mxu0 %v10893_v59  ;;  %7904 = vmatprep.subr.bf16.mxu1 %v10896_v44  ;;  %v10944_v6 = vld [vmem:[%s15538_s1 + $0x132c] ss:$16 sps:$4 sm:$0xff]   ;;  %v10939_v37 = vld [vmem:[%s15538_s1 + $0x1128] ss:$16 sps:$4 sm:$0xff]  }
 0x31a   :  { %v10942_v14 = vld [vmem:[%s15538_s1 + $0x1328] ss:$16 sps:$4 sm:$0xff]   ;;  %v10947_v26 = vld [vmem:[%s15538_s1 + $0x110c] ss:$16 sps:$4 sm:$0xff]  }
 0x31b   :  { %v10950_v17 = vld [vmem:[%s15538_s1 + $0x130c] ss:$16 sps:$4 sm:$0xff]   ;;  %v10945_v12 = vld [vmem:[%s15538_s1 + $0x1108] ss:$16 sps:$4 sm:$0xff]  }
 0x31c   :  { %7852 = vmatpush1.bf16.msra.mxu0 %v10891_v20  ;;  %7905 = vmatpush1.bf16.msra.mxu1 %v10894_v7  ;;  %v10948_v59 = vld [vmem:[%s15538_s1 + $0x1308] ss:$16 sps:$4 sm:$0xff]   ;;  %v10953_v44 = vld [vmem:[%s15538_s1 + $0x14ec] ss:$16 sps:$4 sm:$0xff]  }
 0x31d   :  { %7853 = vmatprep.subr.bf16.mxu0 %v10899_v9  ;;  %7906 = vmatprep.subr.bf16.mxu1 %v10902_v62  ;;  %v10956_v20 = vld [vmem:[%s15538_s1 + $0x16ec] ss:$16 sps:$4 sm:$0xff]   ;;  %v10951_v7 = vld [vmem:[%s15538_s1 + $0x14e8] ss:$16 sps:$4 sm:$0xff]  }
 0x31e   :  { %v10954_v9 = vld [vmem:[%s15538_s1 + $0x16e8] ss:$16 sps:$4 sm:$0xff]   ;;  %v10959_v62 = vld [vmem:[%s15538_s1 + $0x14cc] ss:$16 sps:$4 sm:$0xff]  }
 0x320   :  { %7854 = vmatpush1.bf16.msra.mxu0 %v10897_v57  ;;  %7907 = vmatpush1.bf16.msra.mxu1 %v10900_v27  ;;  %v10962_v57 = vld [vmem:[%s15538_s1 + $0x16cc] ss:$16 sps:$4 sm:$0xff]  }
 0x321   :  { %7855 = vmatprep.subr.bf16.mxu0 %v10905_v63  ;;  %7908 = vmatprep.subr.bf16.mxu1 %v10908_v28  ;;  %v15617_v28 = vld [vmem:[#allocation10_spill] sm:$0xff] }
 0x324   :  { %7856 = vmatpush2.bf16.msra.mxu0 %v10903_v29  ;;  %7909 = vmatpush2.bf16.msra.mxu1 %v10906_v25  ;;  %v15618_v25 = vld [vmem:[#allocation11_spill] sm:$0xff] }
 0x325   :  { %7857 = vmatprep.subr.bf16.mxu0 %v10911_v42  ;;  %7910 = vmatprep.subr.bf16.mxu1 %v10914_v4  ;;  %v10957_v42 = vld [vmem:[%s15538_s1 + $0x14c8] ss:$16 sps:$4 sm:$0xff]  }
 0x328   :  { %7858 = vmatpush2.bf16.msra.mxu0 %v10909_v32  ;;  %7911 = vmatpush2.bf16.msra.mxu1 %v10912_v58  ;;  %v10960_v58 = vld [vmem:[%s15538_s1 + $0x16c8] ss:$16 sps:$4 sm:$0xff]  }
 0x329   :  { %7859 = vmatprep.subr.bf16.mxu0 %v10917_v40  ;;  %7912 = vmatprep.subr.bf16.mxu1 %v10920_v1  ;;  %v10965_v40 = vld [vmem:[%s15538_s1 + $0x14ac] ss:$16 sps:$4 sm:$0xff]  }
 0x32c   :  { %7860 = vmatpush2.bf16.msra.mxu0 %v10915_v34  ;;  %7913 = vmatpush2.bf16.msra.mxu1 %v10918_v51  ;;  %v15619_v34 = vld [vmem:[#allocation12_spill] sm:$0xff]  ;;  %v10968_v51 = vld [vmem:[%s15538_s1 + $0x16ac] ss:$16 sps:$4 sm:$0xff]  }
 0x32d   :  { %7861 = vmatprep.subr.bf16.mxu0 %v10923_v55  ;;  %7914 = vmatprep.subr.bf16.mxu1 %v10926_v46 }
 0x330   :  { %7862 = vmatpush2.bf16.msra.mxu0 %v10921_v50  ;;  %7915 = vmatpush2.bf16.msra.mxu1 %v10924_v30  ;;  %v15620_v50 = vld [vmem:[#allocation13_spill] sm:$0xff] }
 0x331   :  { %7863 = vmatprep.subr.bf16.mxu0 %v10929_v31  ;;  %7916 = vmatprep.subr.bf16.mxu1 %v10932_v43 }
 0x334   :  { %7864 = vmatpush2.bf16.msra.mxu0 %v10927_v15  ;;  %7917 = vmatpush2.bf16.msra.mxu1 %v10930_v35  ;;  %v10966_v35 = vld [vmem:[%s15538_s1 + $0x16a8] ss:$16 sps:$4 sm:$0xff]  }
 0x335   :  { %7865 = vmatprep.subr.bf16.mxu0 %v10935_v18  ;;  %7918 = vmatprep.subr.bf16.mxu1 %v10938_v41  ;;  %v10971_v18 = vld [vmem:[%s15538_s1 + $0x148c] ss:$16 sps:$4 sm:$0xff]  }
 0x338   :  { %7866 = vmatpush2.bf16.msra.mxu0 %v10933_v19  ;;  %7919 = vmatpush2.bf16.msra.mxu1 %v10936_v8  ;;  %v10974_v19 = vld [vmem:[%s15538_s1 + $0x168c] ss:$16 sps:$4 sm:$0xff]  }
 0x339   :  { %7867 = vmatprep.subr.bf16.mxu0 %v10941_v49  ;;  %7920 = vmatprep.subr.bf16.mxu1 %v10944_v6  ;;  %v15621_v49 = vld [vmem:[#allocation14_spill] sm:$0xff] }
 0x33c   :  { %7868 = vmatpush2.bf16.msra.mxu0 %v10939_v37  ;;  %7921 = vmatpush2.bf16.msra.mxu1 %v10942_v14 }
 0x33d   :  { %7869 = vmatprep.subr.bf16.mxu0 %v10947_v26  ;;  %7922 = vmatprep.subr.bf16.mxu1 %v10950_v17  ;;  %v15622_v26 = vld [vmem:[#allocation15_spill] sm:$0xff] }
 0x340   :  { %7870 = vmatpush2.bf16.msra.mxu0 %v10945_v12  ;;  %7923 = vmatpush2.bf16.msra.mxu1 %v10948_v59  ;;  %v10972_v59 = vld [vmem:[%s15538_s1 + $0x1688] ss:$16 sps:$4 sm:$0xff]  }
 0x341   :  { %7945 = vmatprep.subr.bf16.mxu0 %v10953_v44  ;;  %7998 = vmatprep.subr.bf16.mxu1 %v10956_v20  ;;  %v10977_v44 = vld [vmem:[%s15538_s1 + $0x146c] ss:$16 sps:$4 sm:$0xff]  }
 0x342   :  { %v7555_v27 = vpop.f32.mrf.mxu0 }
 0x343   :  { %v7608_v63 = vpop.f32.mrf.mxu1  ;;  %7872 = vmatmul.mubr.bf16.vlgmr.msra.gmra.mxu0 %v15617_v28  ;;  %v7556_v29 = vadd.f32 %v7555_v27, %v14491_v2  ;;  %7925 = vmatmul.mubr.bf16.vlgmr.msra.gmra.mxu1 %v15618_v25  ;;  %v15624_v27 = vld [vmem:[#allocation17_spill] sm:$0xff] }
 0x344   :  { %7946 = vmatpush1.bf16.msra.mxu0 %v10951_v7  ;;  %7999 = vmatpush1.bf16.msra.mxu1 %v10954_v9  ;;  %v7557_v4 = vpop.f32.mrf.mxu0  ;;  %v10980_v7 = vld [vmem:[%s15538_s1 + $0x166c] ss:$16 sps:$4 sm:$0xff]   ;;  %v15623_v9 = vld [vmem:[#allocation16_spill] sm:$0xff] }
 0x345   :  { %v7610_v32 = vpop.f32.mrf.mxu1  ;;  %7947 = vmatprep.subr.bf16.mxu0 %v10959_v62  ;;  %v14715_v2 = vadd.f32 %v7608_v63, %v7556_v29  ;;  %v7558_v1 = vadd.f32 %v7557_v4, %v14499_v48  ;;  %8000 = vmatprep.subr.bf16.mxu1 %v10962_v57  ;;  %v10963_v48 = vld [vmem:[%s15538_s1 + $0x14a8] ss:$16 sps:$4 sm:$0xff]   ;;  %v10983_v4 = vld [vmem:[%s15538_s1 + $0x144c] ss:$16 sps:$4 sm:$0xff]  }
 0x346   :  { %7881 = vmatprep.mubr.bf16.mxu0 %v15619_v34  ;;  %v7559_v55 = vpop.f32.mrf.mxu0  ;;  %7934 = vmatprep.mubr.bf16.mxu1 %v15620_v50  ;;  %v10989_v34 = vld [vmem:[%s15538_s1 + $0x142c] ss:$16 sps:$4 sm:$0xff]  }
 0x347   :  { %v7612_v46 = vpop.f32.mrf.mxu1  ;;  %v14723_v30 = vadd.f32 %v7610_v32, %v7558_v1  ;;  %v7560_v31 = vadd.f32 %v7559_v55, %v14511_v39  ;;  %v10981_v1 = vld [vmem:[%s15538_s1 + $0x1448] ss:$16 sps:$4 sm:$0xff]   ;;  %v10995_v50 = vld [vmem:[%s15538_s1 + $0x140c] ss:$16 sps:$4 sm:$0xff]  }
 0x348   :  { %7948 = vmatpush1.bf16.msra.mxu0 %v10957_v42  ;;  %8001 = vmatpush1.bf16.msra.mxu1 %v10960_v58  ;;  %v7561_v43 = vpop.f32.mrf.mxu0  ;;  %v10978_v42 = vld [vmem:[%s15538_s1 + $0x1668] ss:$16 sps:$4 sm:$0xff]   ;;  %v10986_v58 = vld [vmem:[%s15538_s1 + $0x164c] ss:$16 sps:$4 sm:$0xff]  }
 0x349   :  { %v7614_v15 = vpop.f32.mrf.mxu1  ;;  %7949 = vmatprep.subr.bf16.mxu0 %v10965_v40  ;;  %v14735_v41 = vadd.f32 %v7612_v46, %v7560_v31  ;;  %v7562_v39 = vadd.f32 %v7561_v43, %v14518_v36  ;;  %8002 = vmatprep.subr.bf16.mxu1 %v10968_v51  ;;  %v10969_v36 = vld [vmem:[%s15538_s1 + $0x1488] ss:$16 sps:$4 sm:$0xff]   ;;  %v10992_v51 = vld [vmem:[%s15538_s1 + $0x162c] ss:$16 sps:$4 sm:$0xff]  }
 0x34a   :  { %v7565_v8 = vpop.f32.mrf.mxu0  ;;  %v10987_v55 = vld [vmem:[%s15538_s1 + $0x1428] ss:$16 sps:$4 sm:$0xff]   ;;  %v10998_v31 = vld [vmem:[%s15538_s1 + $0x160c] ss:$16 sps:$4 sm:$0xff]  }
 0x34b   :  { %7882 = vmatmul.mubr.bf16.gmra.mxu0 %v15621_v49  ;;  %v7618_v6 = vpop.f32.mrf.mxu1  ;;  %v14742_v37 = vadd.f32 %v7614_v15, %v7562_v39  ;;  %v7566_v14 = vadd.f32 %v7565_v8, %v14535_v3  ;;  %7935 = vmatmul.mubr.bf16.gmra.mxu1 %v15622_v26  ;;  %v10990_v46 = vld [vmem:[%s15538_s1 + $0x1628] ss:$16 sps:$4 sm:$0xff]   ;;  %v11001_v15 = vld [vmem:[%s15538_s1 + $0x15ec] ss:$16 sps:$4 sm:$0xff]  }
 0x34c   :  { %7950 = vmatpush1.bf16.msra.mxu0 %v10963_v48  ;;  %8003 = vmatpush1.bf16.msra.mxu1 %v10966_v35  ;;  %v7567_v17 = vpop.f32.mrf.mxu0  ;;  %v10993_v48 = vld [vmem:[%s15538_s1 + $0x1408] ss:$16 sps:$4 sm:$0xff]   ;;  %v11004_v35 = vld [vmem:[%s15538_s1 + $0x17ec] ss:$16 sps:$4 sm:$0xff]  }
 0x34d   :  { %v7620_v12 = vpop.f32.mrf.mxu1  ;;  %7951 = vmatprep.subr.bf16.mxu0 %v10971_v18  ;;  %v7568_v3 = vadd.f32 %v7567_v17, %v14543_v23  ;;  %v14756_v20 = vadd.f32 %v7618_v6, %v7566_v14  ;;  %8004 = vmatprep.subr.bf16.mxu1 %v10974_v19  ;;  %v10975_v23 = vld [vmem:[%s15538_s1 + $0x1468] ss:$16 sps:$4 sm:$0xff]   ;;  %v11007_v19 = vld [vmem:[%s15538_s1 + $0x15cc] ss:$16 sps:$4 sm:$0xff]  }
 0x34e   :  { %7977 = vmatprep.mubr.bf16.mxu0 %v15623_v9  ;;  %v7569_v62 = vpop.f32.mrf.mxu0  ;;  %8030 = vmatprep.mubr.bf16.mxu1 %v15624_v27  ;;  %v10996_v43 = vld [vmem:[%s15538_s1 + $0x1608] ss:$16 sps:$4 sm:$0xff]   ;;  %v11010_v8 = vld [vmem:[%s15538_s1 + $0x17cc] ss:$16 sps:$4 sm:$0xff]  }
 0x34f   :  { %v7622_v57 = vpop.f32.mrf.mxu1  ;;  %v7570_v63 = vadd.f32 %v7569_v62, %v14555_v21  ;;  %v14764_v28 = vadd.f32 %v7620_v12, %v7568_v3  ;;  %v10999_v18 = vld [vmem:[%s15538_s1 + $0x15e8] ss:$16 sps:$4 sm:$0xff]   ;;  %v11013_v14 = vld [vmem:[%s15538_s1 + $0x15ac] ss:$16 sps:$4 sm:$0xff]  }
 0x350   :  { %7952 = vmatpush1.bf16.msra.mxu0 %v10969_v36  ;;  %8005 = vmatpush1.bf16.msra.mxu1 %v10972_v59  ;;  %v7571_v29 = vpop.f32.mrf.mxu0  ;;  %v11002_v39 = vld [vmem:[%s15538_s1 + $0x17e8] ss:$16 sps:$4 sm:$0xff]   ;;  %v11016_v26 = vld [vmem:[%s15538_s1 + $0x17ac] ss:$16 sps:$4 sm:$0xff]  }
 0x351   :  { %v7624_v25 = vpop.f32.mrf.mxu1  ;;  %7953 = vmatprep.subr.bf16.mxu0 %v10977_v44  ;;  %v7572_v21 = vadd.f32 %v7571_v29, %v14560_v56  ;;  %v14776_v32 = vadd.f32 %v7622_v57, %v7570_v63  ;;  %8006 = vmatprep.subr.bf16.mxu1 %v10980_v7  ;;  %v10984_v56 = vld [vmem:[%s15538_s1 + $0x1648] ss:$16 sps:$4 sm:$0xff]   ;;  %v11019_v12 = vld [vmem:[%s15538_s1 + $0x158c] ss:$16 sps:$4 sm:$0xff]  }
 0x352   :  { %v11005_v49 = vld [vmem:[%s15538_s1 + $0x15c8] ss:$16 sps:$4 sm:$0xff]   ;;  %v11022_v59 = vld [vmem:[%s15538_s1 + $0x178c] ss:$16 sps:$4 sm:$0xff]  }
 0x353   :  { %v14781_v40 = vadd.f32 %v7624_v25, %v7572_v21  ;;  %v11008_v6 = vld [vmem:[%s15538_s1 + $0x17c8] ss:$16 sps:$4 sm:$0xff]   ;;  %v11025_v7 = vld [vmem:[%s15538_s1 + $0x156c] ss:$16 sps:$4 sm:$0xff]  }
 0x354   :  { %7954 = vmatpush1.bf16.msra.mxu0 %v10975_v23  ;;  %8007 = vmatpush1.bf16.msra.mxu1 %v10978_v42  ;;  %v11011_v36 = vld [vmem:[%s15538_s1 + $0x15a8] ss:$16 sps:$4 sm:$0xff]   ;;  %v11028_v9 = vld [vmem:[%s15538_s1 + $0x176c] ss:$16 sps:$4 sm:$0xff]  }
 0x355   :  { %7955 = vmatprep.subr.bf16.mxu0 %v10983_v4  ;;  %8008 = vmatprep.subr.bf16.mxu1 %v10986_v58  ;;  %v11014_v17 = vld [vmem:[%s15538_s1 + $0x17a8] ss:$16 sps:$4 sm:$0xff]   ;;  %v11031_v27 = vld [vmem:[%s15538_s1 + $0x154c] ss:$16 sps:$4 sm:$0xff]  }
 0x356   :  { %v11017_v44 = vld [vmem:[%s15538_s1 + $0x1588] ss:$16 sps:$4 sm:$0xff]   ;;  %v11034_v63 = vld [vmem:[%s15538_s1 + $0x174c] ss:$16 sps:$4 sm:$0xff]  }
 0x357   :  { %v11020_v3 = vld [vmem:[%s15538_s1 + $0x1788] ss:$16 sps:$4 sm:$0xff]   ;;  %v11037_v25 = vld [vmem:[%s15538_s1 + $0x152c] ss:$16 sps:$4 sm:$0xff]  }
 0x358   :  { %7956 = vmatpush1.bf16.msra.mxu0 %v10981_v1  ;;  %8009 = vmatpush1.bf16.msra.mxu1 %v10984_v56  ;;  %v11023_v62 = vld [vmem:[%s15538_s1 + $0x1568] ss:$16 sps:$4 sm:$0xff]   ;;  %v11040_v42 = vld [vmem:[%s15538_s1 + $0x172c] ss:$16 sps:$4 sm:$0xff]  }
 0x359   :  { %7957 = vmatprep.subr.bf16.mxu0 %v10989_v34  ;;  %8010 = vmatprep.subr.bf16.mxu1 %v10992_v51  ;;  %v11026_v57 = vld [vmem:[%s15538_s1 + $0x1768] ss:$16 sps:$4 sm:$0xff]   ;;  %v11043_v58 = vld [vmem:[%s15538_s1 + $0x150c] ss:$16 sps:$4 sm:$0xff]  }
 0x35a   :  { %v11029_v23 = vld [vmem:[%s15538_s1 + $0x1548] ss:$16 sps:$4 sm:$0xff]   ;;  %v11046_v1 = vld [vmem:[%s15538_s1 + $0x170c] ss:$16 sps:$4 sm:$0xff]  }
 0x35b   :  { %v11032_v29 = vld [vmem:[%s15538_s1 + $0x1748] ss:$16 sps:$4 sm:$0xff]   ;;  %v11049_v51 = vld [vmem:[%s15538_s1 + $0x18ec] ss:$16 sps:$4 sm:$0xff]  }
 0x35c   :  { %7958 = vmatpush1.bf16.msra.mxu0 %v10987_v55  ;;  %8011 = vmatpush1.bf16.msra.mxu1 %v10990_v46  ;;  %v11035_v4 = vld [vmem:[%s15538_s1 + $0x1528] ss:$16 sps:$4 sm:$0xff]   ;;  %v11052_v55 = vld [vmem:[%s15538_s1 + $0x1aec] ss:$16 sps:$4 sm:$0xff]  }
 0x35d   :  { %7959 = vmatprep.subr.bf16.mxu0 %v10995_v50  ;;  %8012 = vmatprep.subr.bf16.mxu1 %v10998_v31  ;;  %v11038_v21 = vld [vmem:[%s15538_s1 + $0x1728] ss:$16 sps:$4 sm:$0xff]   ;;  %v11055_v31 = vld [vmem:[%s15538_s1 + $0x18cc] ss:$16 sps:$4 sm:$0xff]  }
 0x35e   :  { %v11041_v56 = vld [vmem:[%s15538_s1 + $0x1508] ss:$16 sps:$4 sm:$0xff]  }
 0x35f   :  { %v11044_v34 = vld [vmem:[%s15538_s1 + $0x1708] ss:$16 sps:$4 sm:$0xff]  }
 0x360   :  { %7960 = vmatpush1.bf16.msra.mxu0 %v10993_v48  ;;  %8013 = vmatpush1.bf16.msra.mxu1 %v10996_v43  ;;  %v11047_v46 = vld [vmem:[%s15538_s1 + $0x18e8] ss:$16 sps:$4 sm:$0xff]   ;;  %v11058_v48 = vld [vmem:[%s15538_s1 + $0x1acc] ss:$16 sps:$4 sm:$0xff]  }
 0x361   :  { %7961 = vmatprep.subr.bf16.mxu0 %v11001_v15  ;;  %8014 = vmatprep.subr.bf16.mxu1 %v11004_v35  ;;  %v11050_v50 = vld [vmem:[%s15538_s1 + $0x1ae8] ss:$16 sps:$4 sm:$0xff]  }
 0x364   :  { %7962 = vmatpush2.bf16.msra.mxu0 %v10999_v18  ;;  %8015 = vmatpush2.bf16.msra.mxu1 %v11002_v39  ;;  %v15625_v18 = vld [vmem:[#allocation18_spill] sm:$0xff]  ;;  %v11053_v39 = vld [vmem:[%s15538_s1 + $0x18c8] ss:$16 sps:$4 sm:$0xff]  }
 0x365   :  { %7963 = vmatprep.subr.bf16.mxu0 %v11007_v19  ;;  %8016 = vmatprep.subr.bf16.mxu1 %v11010_v8 }
 0x368   :  { %7964 = vmatpush2.bf16.msra.mxu0 %v11005_v49  ;;  %8017 = vmatpush2.bf16.msra.mxu1 %v11008_v6  ;;  %v11056_v49 = vld [vmem:[%s15538_s1 + $0x1ac8] ss:$16 sps:$4 sm:$0xff]  }
 0x369   :  { %7965 = vmatprep.subr.bf16.mxu0 %v11013_v14  ;;  %8018 = vmatprep.subr.bf16.mxu1 %v11016_v26  ;;  %v11064_v14 = vld [vmem:[%s15538_s1 + $0x1aac] ss:$16 sps:$4 sm:$0xff]  }
 0x36c   :  { %7966 = vmatpush2.bf16.msra.mxu0 %v11011_v36  ;;  %8019 = vmatpush2.bf16.msra.mxu1 %v11014_v17  ;;  %v15626_v17 = vld [vmem:[#allocation19_spill] sm:$0xff] }
 0x36d   :  { %7967 = vmatprep.subr.bf16.mxu0 %v11019_v12  ;;  %8020 = vmatprep.subr.bf16.mxu1 %v11022_v59 }
 0x370   :  { %7968 = vmatpush2.bf16.msra.mxu0 %v11017_v44  ;;  %8021 = vmatpush2.bf16.msra.mxu1 %v11020_v3  ;;  %v11062_v44 = vld [vmem:[%s15538_s1 + $0x1aa8] ss:$16 sps:$4 sm:$0xff]   ;;  %v11067_v3 = vld [vmem:[%s15538_s1 + $0x188c] ss:$16 sps:$4 sm:$0xff]  }
 0x371   :  { %7969 = vmatprep.subr.bf16.mxu0 %v11025_v7  ;;  %8022 = vmatprep.subr.bf16.mxu1 %v11028_v9  ;;  %v11070_v7 = vld [vmem:[%s15538_s1 + $0x1a8c] ss:$16 sps:$4 sm:$0xff]  }
 0x374   :  { %7970 = vmatpush2.bf16.msra.mxu0 %v11023_v62  ;;  %8023 = vmatpush2.bf16.msra.mxu1 %v11026_v57 }
 0x375   :  { %7971 = vmatprep.subr.bf16.mxu0 %v11031_v27  ;;  %8024 = vmatprep.subr.bf16.mxu1 %v11034_v63  ;;  %v11065_v27 = vld [vmem:[%s15538_s1 + $0x1888] ss:$16 sps:$4 sm:$0xff]  }
 0x378   :  { %7972 = vmatpush2.bf16.msra.mxu0 %v11029_v23  ;;  %8025 = vmatpush2.bf16.msra.mxu1 %v11032_v29  ;;  %v11068_v29 = vld [vmem:[%s15538_s1 + $0x1a88] ss:$16 sps:$4 sm:$0xff]  }
 0x379   :  { %7973 = vmatprep.subr.bf16.mxu0 %v11037_v25  ;;  %8026 = vmatprep.subr.bf16.mxu1 %v11040_v42  ;;  %v15627_v42 = vld [vmem:[#allocation20_spill] sm:$0xff] }
 0x37c   :  { %7974 = vmatpush2.bf16.msra.mxu0 %v11035_v4  ;;  %8027 = vmatpush2.bf16.msra.mxu1 %v11038_v21  ;;  %v15628_v4 = vld [vmem:[#allocation21_spill] sm:$0xff] }
 0x37d   :  { %7975 = vmatprep.subr.bf16.mxu0 %v11043_v58  ;;  %8028 = vmatprep.subr.bf16.mxu1 %v11046_v1  ;;  %v11071_v58 = vld [vmem:[%s15538_s1 + $0x1868] ss:$16 sps:$4 sm:$0xff]   ;;  %v11079_v1 = vld [vmem:[%s15538_s1 + $0x184c] ss:$16 sps:$4 sm:$0xff]  }
 0x380   :  { %7976 = vmatpush2.bf16.msra.mxu0 %v11041_v56  ;;  %8029 = vmatpush2.bf16.msra.mxu1 %v11044_v34  ;;  %v11082_v56 = vld [vmem:[%s15538_s1 + $0x1a4c] ss:$16 sps:$4 sm:$0xff]   ;;  %v11077_v34 = vld [vmem:[%s15538_s1 + $0x1848] ss:$16 sps:$4 sm:$0xff]  }
 0x381   :  { %8051 = vmatprep.subr.bf16.mxu0 %v11049_v51  ;;  %8104 = vmatprep.subr.bf16.mxu1 %v11052_v55  ;;  %v11080_v51 = vld [vmem:[%s15538_s1 + $0x1a48] ss:$16 sps:$4 sm:$0xff]   ;;  %v11085_v55 = vld [vmem:[%s15538_s1 + $0x182c] ss:$16 sps:$4 sm:$0xff]  }
 0x382   :  { %v7661_v43 = vpop.f32.mrf.mxu0 }
 0x383   :  { %v7714_v15 = vpop.f32.mrf.mxu1  ;;  %7978 = vmatmul.mubr.bf16.vlgmr.msra.gmra.mxu0 %v12863_v60  ;;  %v7662_v35 = vadd.f32 %v7661_v43, %v14715_v2  ;;  %8031 = vmatmul.mubr.bf16.vlgmr.msra.gmra.mxu1 %v15625_v18  ;;  %v11061_v60 = vld [vmem:[%s15538_s1 + $0x18ac] ss:$16 sps:$4 sm:$0xff]  }
 0x384   :  { %8052 = vmatpush1.bf16.msra.mxu0 %v11047_v46  ;;  %8105 = vmatpush1.bf16.msra.mxu1 %v11050_v50  ;;  %v7663_v19 = vpop.f32.mrf.mxu0  ;;  %v11088_v46 = vld [vmem:[%s15538_s1 + $0x1a2c] ss:$16 sps:$4 sm:$0xff]   ;;  %v11083_v50 = vld [vmem:[%s15538_s1 + $0x1828] ss:$16 sps:$4 sm:$0xff]  }
 0x385   :  { %v7716_v8 = vpop.f32.mrf.mxu1  ;;  %8053 = vmatprep.subr.bf16.mxu0 %v11055_v31  ;;  %v14939_v2 = vadd.f32 %v7714_v15, %v7662_v35  ;;  %v7664_v6 = vadd.f32 %v7663_v19, %v14723_v30  ;;  %8106 = vmatprep.subr.bf16.mxu1 %v11058_v48  ;;  %v11059_v30 = vld [vmem:[%s15538_s1 + $0x18a8] ss:$16 sps:$4 sm:$0xff]   ;;  %v11091_v48 = vld [vmem:[%s15538_s1 + $0x180c] ss:$16 sps:$4 sm:$0xff]  }
 0x386   :  { %7987 = vmatprep.mubr.bf16.mxu0 %v12896_v47  ;;  %v14946_v26 = vpop.f32.mrf.mxu0  ;;  %8040 = vmatprep.mubr.bf16.mxu1 %v15626_v17  ;;  %v11086_v31 = vld [vmem:[%s15538_s1 + $0x1a28] ss:$16 sps:$4 sm:$0xff]   ;;  %v11094_v43 = vld [vmem:[%s15538_s1 + $0x1a0c] ss:$16 sps:$4 sm:$0xff]  }
 0x387   :  { %v14948_v36 = vpop.f32.mrf.mxu1  ;;  %v14951_v12 = vadd.f32 %v7716_v8, %v7664_v6  ;;  %v11089_v15 = vld [vmem:[%s15538_s1 + $0x1808] ss:$16 sps:$4 sm:$0xff]   ;;  %v11097_v18 = vld [vmem:[%s15538_s1 + $0x19ec] ss:$16 sps:$4 sm:$0xff]  }
 0x388   :  { %8054 = vmatpush1.bf16.msra.mxu0 %v11053_v39  ;;  %8107 = vmatpush1.bf16.msra.mxu1 %v11056_v49  ;;  %v14956_v59 = vpop.f32.mrf.mxu0  ;;  %v11092_v35 = vld [vmem:[%s15538_s1 + $0x1a08] ss:$16 sps:$4 sm:$0xff]   ;;  %v11100_v39 = vld [vmem:[%s15538_s1 + $0x1bec] ss:$16 sps:$4 sm:$0xff]  }
 0x389   :  { %v14958_v47 = vpop.f32.mrf.mxu1  ;;  %8055 = vmatprep.subr.bf16.mxu0 %v11061_v60  ;;  %8108 = vmatprep.subr.bf16.mxu1 %v11064_v14  ;;  %v11095_v19 = vld [vmem:[%s15538_s1 + $0x19e8] ss:$16 sps:$4 sm:$0xff]   ;;  %v11103_v49 = vld [vmem:[%s15538_s1 + $0x19cc] ss:$16 sps:$4 sm:$0xff]  }
 0x38a   :  { %v7671_v9 = vpop.f32.mrf.mxu0  ;;  %v11098_v8 = vld [vmem:[%s15538_s1 + $0x1be8] ss:$16 sps:$4 sm:$0xff]   ;;  %v11106_v60 = vld [vmem:[%s15538_s1 + $0x1bcc] ss:$16 sps:$4 sm:$0xff]  }
 0x38b   :  { %7988 = vmatmul.mubr.bf16.gmra.mxu0 %v12933_v45  ;;  %v7724_v62 = vpop.f32.mrf.mxu1  ;;  %v7672_v57 = vadd.f32 %v7671_v9, %v14756_v20  ;;  %8041 = vmatmul.mubr.bf16.gmra.mxu1 %v12935_v52  ;;  %v11073_v45 = vld [vmem:[%s15538_s1 + $0x186c] ss:$16 sps:$4 sm:$0xff]   ;;  %v11101_v6 = vld [vmem:[%s15538_s1 + $0x19c8] ss:$16 sps:$4 sm:$0xff]  }
 0x38c   :  { %8056 = vmatpush1.bf16.msra.mxu0 %v11059_v30  ;;  %8109 = vmatpush1.bf16.msra.mxu1 %v11062_v44  ;;  %v7673_v63 = vpop.f32.mrf.mxu0  ;;  %v11076_v52 = vld [vmem:[%s15538_s1 + $0x1a6c] ss:$16 sps:$4 sm:$0xff]   ;;  %v11104_v14 = vld [vmem:[%s15538_s1 + $0x1bc8] ss:$16 sps:$4 sm:$0xff]  }
 0x38d   :  { %v7726_v23 = vpop.f32.mrf.mxu1  ;;  %8057 = vmatprep.subr.bf16.mxu0 %v11067_v3  ;;  %v7674_v20 = vadd.f32 %v7673_v63, %v14764_v28  ;;  %v14982_v25 = vadd.f32 %v7724_v62, %v7672_v57  ;;  %8110 = vmatprep.subr.bf16.mxu1 %v11070_v7  ;;  %v11074_v28 = vld [vmem:[%s15538_s1 + $0x1a68] ss:$16 sps:$4 sm:$0xff]   ;;  %v11109_v17 = vld [vmem:[%s15538_s1 + $0x19ac] ss:$16 sps:$4 sm:$0xff]  }
 0x38e   :  { %8083 = vmatprep.mubr.bf16.mxu0 %v15627_v42  ;;  %8136 = vmatprep.mubr.bf16.mxu1 %v15628_v4  ;;  %v11112_v30 = vld [vmem:[%s15538_s1 + $0x1bac] ss:$16 sps:$4 sm:$0xff]   ;;  %v11107_v44 = vld [vmem:[%s15538_s1 + $0x19a8] ss:$16 sps:$4 sm:$0xff]  }
 0x38f   :  { %v14989_v21 = vadd.f32 %v7726_v23, %v7674_v20  ;;  %v11110_v3 = vld [vmem:[%s15538_s1 + $0x1ba8] ss:$16 sps:$4 sm:$0xff]   ;;  %v11115_v7 = vld [vmem:[%s15538_s1 + $0x198c] ss:$16 sps:$4 sm:$0xff]  }
 0x390   :  { %8058 = vmatpush1.bf16.msra.mxu0 %v11065_v27  ;;  %8111 = vmatpush1.bf16.msra.mxu1 %v11068_v29  ;;  %v11118_v9 = vld [vmem:[%s15538_s1 + $0x1b8c] ss:$16 sps:$4 sm:$0xff]   ;;  %v11113_v62 = vld [vmem:[%s15538_s1 + $0x1988] ss:$16 sps:$4 sm:$0xff]  }
 0x391   :  { %8059 = vmatprep.subr.bf16.mxu0 %v11073_v45  ;;  %8112 = vmatprep.subr.bf16.mxu1 %v11076_v52  ;;  %v11116_v57 = vld [vmem:[%s15538_s1 + $0x1b88] ss:$16 sps:$4 sm:$0xff]   ;;  %v11121_v27 = vld [vmem:[%s15538_s1 + $0x196c] ss:$16 sps:$4 sm:$0xff]  }
 0x392   :  { %v11124_v63 = vld [vmem:[%s15538_s1 + $0x1b6c] ss:$16 sps:$4 sm:$0xff]   ;;  %v11119_v23 = vld [vmem:[%s15538_s1 + $0x1968] ss:$16 sps:$4 sm:$0xff]  }
 0x393   :  { %v11122_v29 = vld [vmem:[%s15538_s1 + $0x1b68] ss:$16 sps:$4 sm:$0xff]   ;;  %v11127_v45 = vld [vmem:[%s15538_s1 + $0x194c] ss:$16 sps:$4 sm:$0xff]  }
 0x394   :  { %8060 = vmatpush1.bf16.msra.mxu0 %v11071_v58  ;;  %8113 = vmatpush1.bf16.msra.mxu1 %v11074_v28  ;;  %v11130_v20 = vld [vmem:[%s15538_s1 + $0x1b4c] ss:$16 sps:$4 sm:$0xff]   ;;  %v11125_v52 = vld [vmem:[%s15538_s1 + $0x1948] ss:$16 sps:$4 sm:$0xff]  }
 0x395   :  { %8061 = vmatprep.subr.bf16.mxu0 %v11079_v1  ;;  %8114 = vmatprep.subr.bf16.mxu1 %v11082_v56  ;;  %v11128_v42 = vld [vmem:[%s15538_s1 + $0x1b48] ss:$16 sps:$4 sm:$0xff]   ;;  %v11133_v4 = vld [vmem:[%s15538_s1 + $0x192c] ss:$16 sps:$4 sm:$0xff]  }
 0x396   :  { %v11136_v58 = vld [vmem:[%s15538_s1 + $0x1b2c] ss:$16 sps:$4 sm:$0xff]   ;;  %v11131_v28 = vld [vmem:[%s15538_s1 + $0x1928] ss:$16 sps:$4 sm:$0xff]  }
 0x397   :  { %v11134_v1 = vld [vmem:[%s15538_s1 + $0x1b28] ss:$16 sps:$4 sm:$0xff]   ;;  %v11139_v56 = vld [vmem:[%s15538_s1 + $0x190c] ss:$16 sps:$4 sm:$0xff]  }
 0x398   :  { %8062 = vmatpush1.bf16.msra.mxu0 %v11077_v34  ;;  %8115 = vmatpush1.bf16.msra.mxu1 %v11080_v51  ;;  %v11142_v34 = vld [vmem:[%s15538_s1 + $0x1b0c] ss:$16 sps:$4 sm:$0xff]   ;;  %v11137_v51 = vld [vmem:[%s15538_s1 + $0x1908] ss:$16 sps:$4 sm:$0xff]  }
 0x399   :  { %8063 = vmatprep.subr.bf16.mxu0 %v11085_v55  ;;  %8116 = vmatprep.subr.bf16.mxu1 %v11088_v46  ;;  %v11140_v55 = vld [vmem:[%s15538_s1 + $0x1b08] ss:$16 sps:$4 sm:$0xff]   ;;  %v11145_v46 = vld [vmem:[%s15538_s1 + $0x1cec] ss:$16 sps:$4 sm:$0xff]  }
 0x39c   :  { %8064 = vmatpush1.bf16.msra.mxu0 %v11083_v50  ;;  %8117 = vmatpush1.bf16.msra.mxu1 %v11086_v31  ;;  %v11148_v50 = vld [vmem:[%s15538_s1 + $0x1eec] ss:$16 sps:$4 sm:$0xff]   ;;  %v11143_v31 = vld [vmem:[%s15538_s1 + $0x1ce8] ss:$16 sps:$4 sm:$0xff]  }
 0x39d   :  { %8065 = vmatprep.subr.bf16.mxu0 %v11091_v48  ;;  %8118 = vmatprep.subr.bf16.mxu1 %v11094_v43  ;;  %v11146_v48 = vld [vmem:[%s15538_s1 + $0x1ee8] ss:$16 sps:$4 sm:$0xff]   ;;  %v11151_v43 = vld [vmem:[%s15538_s1 + $0x1ccc] ss:$16 sps:$4 sm:$0xff]  }
 0x3a0   :  { %8066 = vmatpush1.bf16.msra.mxu0 %v11089_v15  ;;  %8119 = vmatpush1.bf16.msra.mxu1 %v11092_v35  ;;  %v11154_v15 = vld [vmem:[%s15538_s1 + $0x1ecc] ss:$16 sps:$4 sm:$0xff]   ;;  %v15629_v35 = vld [vmem:[#allocation22_spill] sm:$0xff] }
 0x3a1   :  { %8067 = vmatprep.subr.bf16.mxu0 %v11097_v18  ;;  %8120 = vmatprep.subr.bf16.mxu1 %v11100_v39  ;;  %v15630_v18 = vld [vmem:[#allocation23_spill] sm:$0xff] }
 0x3a2   :  { %v11149_v39 = vld [vmem:[%s15538_s1 + $0x1cc8] ss:$16 sps:$4 sm:$0xff]  }
 0x3a4   :  { %8068 = vmatpush2.bf16.msra.mxu0 %v11095_v19  ;;  %8121 = vmatpush2.bf16.msra.mxu1 %v11098_v8  ;;  %v11152_v19 = vld [vmem:[%s15538_s1 + $0x1ec8] ss:$16 sps:$4 sm:$0xff]   ;;  %v11157_v8 = vld [vmem:[%s15538_s1 + $0x1cac] ss:$16 sps:$4 sm:$0xff]  }
 0x3a5   :  { %8069 = vmatprep.subr.bf16.mxu0 %v11103_v49  ;;  %8122 = vmatprep.subr.bf16.mxu1 %v11106_v60  ;;  %v15631_v49 = vld [vmem:[#allocation24_spill] sm:$0xff]  ;;  %v11160_v60 = vld [vmem:[%s15538_s1 + $0x1eac] ss:$16 sps:$4 sm:$0xff]  }
 0x3a8   :  { %8070 = vmatpush2.bf16.msra.mxu0 %v11101_v6  ;;  %8123 = vmatpush2.bf16.msra.mxu1 %v11104_v14  ;;  %v15632_v6 = vld [vmem:[#allocation25_spill] sm:$0xff] }
 0x3a9   :  { %8071 = vmatprep.subr.bf16.mxu0 %v11109_v17  ;;  %8124 = vmatprep.subr.bf16.mxu1 %v11112_v30  ;;  %v11155_v14 = vld [vmem:[%s15538_s1 + $0x1ca8] ss:$16 sps:$4 sm:$0xff]   ;;  %v11163_v30 = vld [vmem:[%s15538_s1 + $0x1c8c] ss:$16 sps:$4 sm:$0xff]  }
 0x3aa   :  { %v11158_v17 = vld [vmem:[%s15538_s1 + $0x1ea8] ss:$16 sps:$4 sm:$0xff]  }
 0x3ac   :  { %8072 = vmatpush2.bf16.msra.mxu0 %v11107_v44  ;;  %8125 = vmatpush2.bf16.msra.mxu1 %v11110_v3  ;;  %v11166_v44 = vld [vmem:[%s15538_s1 + $0x1e8c] ss:$16 sps:$4 sm:$0xff]   ;;  %v11161_v3 = vld [vmem:[%s15538_s1 + $0x1c88] ss:$16 sps:$4 sm:$0xff]  }
 0x3ad   :  { %8073 = vmatprep.subr.bf16.mxu0 %v11115_v7  ;;  %8126 = vmatprep.subr.bf16.mxu1 %v11118_v9  ;;  %v11164_v7 = vld [vmem:[%s15538_s1 + $0x1e88] ss:$16 sps:$4 sm:$0xff]   ;;  %v11169_v9 = vld [vmem:[%s15538_s1 + $0x1c6c] ss:$16 sps:$4 sm:$0xff]  }
 0x3b0   :  { %8074 = vmatpush2.bf16.msra.mxu0 %v11113_v62  ;;  %8127 = vmatpush2.bf16.msra.mxu1 %v11116_v57  ;;  %v15634_v62 = vld [vmem:[#allocation27_spill] sm:$0xff] }
 0x3b1   :  { %8075 = vmatprep.subr.bf16.mxu0 %v11121_v27  ;;  %8128 = vmatprep.subr.bf16.mxu1 %v11124_v63  ;;  %v11167_v57 = vld [vmem:[%s15538_s1 + $0x1c68] ss:$16 sps:$4 sm:$0xff]   ;;  %v11175_v63 = vld [vmem:[%s15538_s1 + $0x1c4c] ss:$16 sps:$4 sm:$0xff]  }
 0x3b2   :  { %v11170_v27 = vld [vmem:[%s15538_s1 + $0x1e68] ss:$16 sps:$4 sm:$0xff]  }
 0x3b4   :  { %8076 = vmatpush2.bf16.msra.mxu0 %v11119_v23  ;;  %8129 = vmatpush2.bf16.msra.mxu1 %v11122_v29  ;;  %v11178_v23 = vld [vmem:[%s15538_s1 + $0x1e4c] ss:$16 sps:$4 sm:$0xff]   ;;  %v11173_v29 = vld [vmem:[%s15538_s1 + $0x1c48] ss:$16 sps:$4 sm:$0xff]  }
 0x3b5   :  { %8077 = vmatprep.subr.bf16.mxu0 %v11127_v45  ;;  %8130 = vmatprep.subr.bf16.mxu1 %v11130_v20  ;;  %v11176_v45 = vld [vmem:[%s15538_s1 + $0x1e48] ss:$16 sps:$4 sm:$0xff]   ;;  %v11181_v20 = vld [vmem:[%s15538_s1 + $0x1c2c] ss:$16 sps:$4 sm:$0xff]  }
 0x3b8   :  { %8078 = vmatpush2.bf16.msra.mxu0 %v11125_v52  ;;  %8131 = vmatpush2.bf16.msra.mxu1 %v11128_v42  ;;  %v11184_v52 = vld [vmem:[%s15538_s1 + $0x1e2c] ss:$16 sps:$4 sm:$0xff]   ;;  %v11179_v42 = vld [vmem:[%s15538_s1 + $0x1c28] ss:$16 sps:$4 sm:$0xff]  }
 0x3b9   :  { %8079 = vmatprep.subr.bf16.mxu0 %v11133_v4  ;;  %8132 = vmatprep.subr.bf16.mxu1 %v11136_v58  ;;  %v11182_v4 = vld [vmem:[%s15538_s1 + $0x1e28] ss:$16 sps:$4 sm:$0xff]   ;;  %v11187_v58 = vld [vmem:[%s15538_s1 + $0x1c0c] ss:$16 sps:$4 sm:$0xff]  }
 0x3bc   :  { %8080 = vmatpush2.bf16.msra.mxu0 %v11131_v28  ;;  %8133 = vmatpush2.bf16.msra.mxu1 %v11134_v1  ;;  %v11190_v28 = vld [vmem:[%s15538_s1 + $0x1e0c] ss:$16 sps:$4 sm:$0xff]   ;;  %v11185_v1 = vld [vmem:[%s15538_s1 + $0x1c08] ss:$16 sps:$4 sm:$0xff]  }
 0x3bd   :  { %8081 = vmatprep.subr.bf16.mxu0 %v11139_v56  ;;  %8134 = vmatprep.subr.bf16.mxu1 %v11142_v34  ;;  %v11188_v56 = vld [vmem:[%s15538_s1 + $0x1e08] ss:$16 sps:$4 sm:$0xff]   ;;  %v11193_v34 = vld [vmem:[%s15538_s1 + $0x1dec] ss:$16 sps:$4 sm:$0xff]  }
 0x3c0   :  { %8082 = vmatpush2.bf16.msra.mxu0 %v11137_v51  ;;  %8135 = vmatpush2.bf16.msra.mxu1 %v11140_v55  ;;  %v11196_v51 = vld [vmem:[%s15538_s1 + $0x1fec] ss:$16 sps:$4 sm:$0xff]   ;;  %v11191_v55 = vld [vmem:[%s15538_s1 + $0x1de8] ss:$16 sps:$4 sm:$0xff]  }
 0x3c1   :  { %8157 = vmatprep.subr.bf16.mxu0 %v11145_v46  ;;  %8210 = vmatprep.subr.bf16.mxu1 %v11148_v50  ;;  %v11194_v46 = vld [vmem:[%s15538_s1 + $0x1fe8] ss:$16 sps:$4 sm:$0xff]   ;;  %v11199_v50 = vld [vmem:[%s15538_s1 + $0x1dcc] ss:$16 sps:$4 sm:$0xff]  }
 0x3c3   :  { %8084 = vmatmul.mubr.bf16.vlgmr.msra.gmra.mxu0 %v15629_v35  ;;  %8137 = vmatmul.mubr.bf16.vlgmr.msra.gmra.mxu1 %v15630_v18  ;;  %v11208_v35 = vld [vmem:[%s15538_s1 + $0x1fac] ss:$16 sps:$4 sm:$0xff]   ;;  %v11203_v18 = vld [vmem:[%s15538_s1 + $0x1da8] ss:$16 sps:$4 sm:$0xff]  }
 0x3c4   :  { %8158 = vmatpush1.bf16.msra.mxu0 %v11143_v31  ;;  %8211 = vmatpush1.bf16.msra.mxu1 %v11146_v48  ;;  %v11202_v31 = vld [vmem:[%s15538_s1 + $0x1fcc] ss:$16 sps:$4 sm:$0xff]   ;;  %v11197_v48 = vld [vmem:[%s15538_s1 + $0x1dc8] ss:$16 sps:$4 sm:$0xff]  }
 0x3c5   :  { %8159 = vmatprep.subr.bf16.mxu0 %v11151_v43  ;;  %8212 = vmatprep.subr.bf16.mxu1 %v11154_v15  ;;  %v11200_v43 = vld [vmem:[%s15538_s1 + $0x1fc8] ss:$16 sps:$4 sm:$0xff]   ;;  %v11205_v15 = vld [vmem:[%s15538_s1 + $0x1dac] ss:$16 sps:$4 sm:$0xff]  }
 0x3c6   :  { %8093 = vmatprep.mubr.bf16.mxu0 %v15631_v49  ;;  %8146 = vmatprep.mubr.bf16.mxu1 %v15632_v6  ;;  %v11209_v49 = vld [vmem:[%s15538_s1 + $0x1d88] ss:$16 sps:$4 sm:$0xff]   ;;  %v11217_v6 = vld [vmem:[%s15538_s1 + $0x1d6c] ss:$16 sps:$4 sm:$0xff]  }
 0x3c8   :  { %8160 = vmatpush1.bf16.msra.mxu0 %v11149_v39  ;;  %8213 = vmatpush1.bf16.msra.mxu1 %v11152_v19  ;;  %v11206_v39 = vld [vmem:[%s15538_s1 + $0x1fa8] ss:$16 sps:$4 sm:$0xff]   ;;  %v11211_v19 = vld [vmem:[%s15538_s1 + $0x1d8c] ss:$16 sps:$4 sm:$0xff]  }
 0x3c9   :  { %8161 = vmatprep.subr.bf16.mxu0 %v11157_v8  ;;  %8214 = vmatprep.subr.bf16.mxu1 %v11160_v60  ;;  %v11214_v8 = vld [vmem:[%s15538_s1 + $0x1f8c] ss:$16 sps:$4 sm:$0xff]   ;;  %v11212_v60 = vld [vmem:[%s15538_s1 + $0x1f88] ss:$16 sps:$4 sm:$0xff]  }
 0x3cb   :  { %8094 = vmatmul.mubr.bf16.gmra.mxu0 %v13224_v22  ;;  %8147 = vmatmul.mubr.bf16.gmra.mxu1 %v13226_v61  ;;  %v11172_v22 = vld [vmem:[%s15538_s1 + $0x1e6c] ss:$16 sps:$4 sm:$0xff]   ;;  %v15633_v61 = vld [vmem:[#allocation26_spill] sm:$0xff] }
 0x3cc   :  { %8162 = vmatpush1.bf16.msra.mxu0 %v11155_v14  ;;  %8215 = vmatpush1.bf16.msra.mxu1 %v11158_v17  ;;  %v11220_v14 = vld [vmem:[%s15538_s1 + $0x1f6c] ss:$16 sps:$4 sm:$0xff]   ;;  %v11215_v17 = vld [vmem:[%s15538_s1 + $0x1d68] ss:$16 sps:$4 sm:$0xff]  }
 0x3cd   :  { %8163 = vmatprep.subr.bf16.mxu0 %v11163_v30  ;;  %8216 = vmatprep.subr.bf16.mxu1 %v11166_v44  ;;  %v11218_v30 = vld [vmem:[%s15538_s1 + $0x1f68] ss:$16 sps:$4 sm:$0xff]   ;;  %v11223_v44 = vld [vmem:[%s15538_s1 + $0x1d4c] ss:$16 sps:$4 sm:$0xff]  }
 0x3ce   :  { %8189 = vmatprep.mubr.bf16.mxu0 %v15633_v61  ;;  %8242 = vmatprep.mubr.bf16.mxu1 %v15634_v62  ;;  %v11232_v61 = vld [vmem:[%s15538_s1 + $0x1f2c] ss:$16 sps:$4 sm:$0xff]   ;;  %v11227_v62 = vld [vmem:[%s15538_s1 + $0x1d28] ss:$16 sps:$4 sm:$0xff]  }
 0x3d0   :  { %8164 = vmatpush1.bf16.msra.mxu0 %v11161_v3  ;;  %8217 = vmatpush1.bf16.msra.mxu1 %v11164_v7  ;;  %v11226_v3 = vld [vmem:[%s15538_s1 + $0x1f4c] ss:$16 sps:$4 sm:$0xff]   ;;  %v11221_v7 = vld [vmem:[%s15538_s1 + $0x1d48] ss:$16 sps:$4 sm:$0xff]  }
 0x3d1   :  { %8165 = vmatprep.subr.bf16.mxu0 %v11169_v9  ;;  %8218 = vmatprep.subr.bf16.mxu1 %v11172_v22  ;;  %v11224_v9 = vld [vmem:[%s15538_s1 + $0x1f48] ss:$16 sps:$4 sm:$0xff]   ;;  %v11229_v22 = vld [vmem:[%s15538_s1 + $0x1d2c] ss:$16 sps:$4 sm:$0xff]  }
 0x3d4   :  { %8166 = vmatpush1.bf16.msra.mxu0 %v11167_v57  ;;  %8219 = vmatpush1.bf16.msra.mxu1 %v11170_v27  ;;  %v11230_v57 = vld [vmem:[%s15538_s1 + $0x1f28] ss:$16 sps:$4 sm:$0xff]   ;;  %v11235_v27 = vld [vmem:[%s15538_s1 + $0x1d0c] ss:$16 sps:$4 sm:$0xff]  }
 0x3d5   :  { %8167 = vmatprep.subr.bf16.mxu0 %v11175_v63  ;;  %8220 = vmatprep.subr.bf16.mxu1 %v11178_v23  ;;  %v11238_v63 = vld [vmem:[%s15538_s1 + $0x1f0c] ss:$16 sps:$4 sm:$0xff]   ;;  %v11233_v23 = vld [vmem:[%s15538_s1 + $0x1d08] ss:$16 sps:$4 sm:$0xff]  }
 0x3d8   :  { %8168 = vmatpush1.bf16.msra.mxu0 %v11173_v29  ;;  %8221 = vmatpush1.bf16.msra.mxu1 %v11176_v45  ;;  %v11236_v29 = vld [vmem:[%s15538_s1 + $0x1f08] ss:$16 sps:$4 sm:$0xff]   ;;  %v15635_v45 = vld [vmem:[#allocation28_spill] sm:$0xff] }
 0x3d9   :  { %8169 = vmatprep.subr.bf16.mxu0 %v11181_v20  ;;  %8222 = vmatprep.subr.bf16.mxu1 %v11184_v52  ;;  %v15636_v20 = vld [vmem:[#allocation29_spill] sm:$0xff]  ;;  %v15335_v52 = vpop.f32.mrf.mxu0 }
 0x3dc   :  { %8170 = vmatpush1.bf16.msra.mxu0 %v11179_v42  ;;  %8223 = vmatpush1.bf16.msra.mxu1 %v11182_v4  ;;  %v15337_v42 = vpop.f32.mrf.mxu0 }
 0x3dd   :  { %8171 = vmatprep.subr.bf16.mxu0 %v11187_v58  ;;  %8224 = vmatprep.subr.bf16.mxu1 %v11190_v28  ;;  %v15339_v58 = vpop.f32.mrf.mxu1 }
 0x3de   :  { %v7767_v4 = vpop.f32.mrf.mxu0 }
 0x3e0   :  { %8172 = vmatpush1.bf16.msra.mxu0 %v11185_v1  ;;  %8225 = vmatpush1.bf16.msra.mxu1 %v11188_v56  ;;  %v7769_v28 = vpop.f32.mrf.mxu0  ;;  %v15341_v1 = vpop.f32.mrf.mxu1 }
 0x3e1   :  { %8173 = vmatprep.subr.bf16.mxu0 %v11193_v34  ;;  %8226 = vmatprep.subr.bf16.mxu1 %v11196_v51 }
 0x3e2   :  { %v7820_v56 = vpop.f32.mrf.mxu1 }
 0x3e4   :  { %8174 = vmatpush2.bf16.msra.mxu0 %v11191_v55  ;;  %8227 = vmatpush2.bf16.msra.mxu1 %v11194_v46 }
 0x3e5   :  { %8175 = vmatprep.subr.bf16.mxu0 %v11199_v50  ;;  %8228 = vmatprep.subr.bf16.mxu1 %v11202_v31 }
 0x3e8   :  { %8176 = vmatpush2.bf16.msra.mxu0 %v11197_v48  ;;  %8229 = vmatpush2.bf16.msra.mxu1 %v11200_v43 }
 0x3e9   :  { %8177 = vmatprep.subr.bf16.mxu0 %v11205_v15  ;;  %8230 = vmatprep.subr.bf16.mxu1 %v11208_v35 }
 0x3ec   :  { %8178 = vmatpush2.bf16.msra.mxu0 %v11203_v18  ;;  %8231 = vmatpush2.bf16.msra.mxu1 %v11206_v39 }
 0x3ed   :  { %8179 = vmatprep.subr.bf16.mxu0 %v11211_v19  ;;  %8232 = vmatprep.subr.bf16.mxu1 %v11214_v8 }
 0x3f0   :  { %8180 = vmatpush2.bf16.msra.mxu0 %v11209_v49  ;;  %8233 = vmatpush2.bf16.msra.mxu1 %v11212_v60 }
 0x3f1   :  { %8181 = vmatprep.subr.bf16.mxu0 %v11217_v6  ;;  %8234 = vmatprep.subr.bf16.mxu1 %v11220_v14 }
 0x3f4   :  { %8182 = vmatpush2.bf16.msra.mxu0 %v11215_v17  ;;  %8235 = vmatpush2.bf16.msra.mxu1 %v11218_v30 }
 0x3f5   :  { %8183 = vmatprep.subr.bf16.mxu0 %v11223_v44  ;;  %8236 = vmatprep.subr.bf16.mxu1 %v11226_v3 }
 0x3f8   :  { %8184 = vmatpush2.bf16.msra.mxu0 %v11221_v7  ;;  %8237 = vmatpush2.bf16.msra.mxu1 %v11224_v9 }
 0x3f9   :  { %8185 = vmatprep.subr.bf16.mxu0 %v11229_v22  ;;  %8238 = vmatprep.subr.bf16.mxu1 %v11232_v61 }
 0x3fc   :  { %8186 = vmatpush2.bf16.msra.mxu0 %v11227_v62  ;;  %8239 = vmatpush2.bf16.msra.mxu1 %v11230_v57 }
 0x3fd   :  { %8187 = vmatprep.subr.bf16.mxu0 %v11235_v27  ;;  %8240 = vmatprep.subr.bf16.mxu1 %v11238_v63 }
 0x400   :  { %8188 = vmatpush2.bf16.msra.mxu0 %v11233_v23  ;;  %8241 = vmatpush2.bf16.msra.mxu1 %v11236_v29 }
 0x403   :  { %8190 = vmatmul.mubr.bf16.vlgmr.msra.gmra.mxu0 %v13442_v0  ;;  %8243 = vmatmul.mubr.bf16.vlgmr.msra.gmra.mxu1 %v15635_v45  ;;  %v7771_v0 = vpop.f32.mrf.mxu0 }
 0x404   :  { %8199 = vmatprep.mubr.bf16.mxu0 %v13460_v10  ;;  %8252 = vmatprep.mubr.bf16.mxu1 %v15636_v20  ;;  %v7822_v10 = vpop.f32.mrf.mxu1 }
 0x405   :  { %v7773_v34 = vpop.f32.mrf.mxu0 }
 0x406   :  { %v7824_v55 = vpop.f32.mrf.mxu1 }
 0x407   :  { %v7777_v51 = vpop.f32.mrf.mxu0 }
 0x409   :  { %v15343_v46 = vpop.f32.mrf.mxu0 }
 0x40b   :  { %8200 = vmatmul.mubr.bf16.gmra.mxu0 %v13484_v54  ;;  %8253 = vmatmul.mubr.bf16.gmra.mxu1 %v13486_v13  ;;  %v15345_v54 = vpop.f32.mrf.mxu1  ;;  %v15349_v50 = vpop.f32.mrf.mxu0 }
 0x40d   :  { %v15347_v13 = vpop.f32.mrf.mxu1  ;;  %v15353_v48 = vpop.f32.mrf.mxu0 }
 0x40f   :  { %v15351_v31 = vpop.f32.mrf.mxu1  ;;  %v7873_v43 = vpop.f32.mrf.mxu0 }
 0x411   :  { %v15355_v15 = vpop.f32.mrf.mxu1  ;;  %v7875_v35 = vpop.f32.mrf.mxu0 }
 0x413   :  { %v15357_v18 = vpop.f32.mrf.mxu1  ;;  %v7877_v19 = vpop.f32.mrf.mxu0 }
 0x415   :  { %v7926_v39 = vpop.f32.mrf.mxu1  ;;  %v7879_v49 = vpop.f32.mrf.mxu0 }
 0x417   :  { %v7928_v8 = vpop.f32.mrf.mxu1  ;;  %v15361_v6 = vpop.f32.mrf.mxu0 }
 0x419   :  { %v15359_v60 = vpop.f32.mrf.mxu1  ;;  %v15365_v17 = vpop.f32.mrf.mxu0 }
 0x41b   :  { %v15363_v14 = vpop.f32.mrf.mxu1  ;;  %v15369_v44 = vpop.f32.mrf.mxu0 }
 0x41c   :  { %15637 = vst [vmem:[#allocation4_spill] sm:$0xff] %v15369_v44 }
 0x41d   :  { %v15367_v30 = vpop.f32.mrf.mxu1  ;;  %v15373_v7 = vpop.f32.mrf.mxu0 }
 0x41e   :  { %15639 = vst [vmem:[#allocation6_spill] sm:$0xff] %v15373_v7 }
 0x41f   :  { %v15371_v3 = vpop.f32.mrf.mxu1 }
 0x420   :  { %15638 = vst [vmem:[#allocation5_spill] sm:$0xff] %v15371_v3 }
 0x421   :  { %v15375_v9 = vpop.f32.mrf.mxu1 }
 0x422   :  { %15640 = vst [vmem:[#allocation7_spill] sm:$0xff] %v15375_v9 }
 0x423   :  { %v15377_v61 = vpop.f32.mrf.mxu1 }
 0x424   :  { %15641 = vst [vmem:[#allocation8_spill] sm:$0xff] %v15377_v61 }
 0x443   :  { %v7979_v22 = vpop.f32.mrf.mxu0  ;;  %v8032_v57 = vpop.f32.mrf.mxu1 }
 0x445   :  { %v7981_v62 = vpop.f32.mrf.mxu0  ;;  %v15379_v63 = vpop.f32.mrf.mxu1 }
 0x447   :  { %v7983_v27 = vpop.f32.mrf.mxu0  ;;  %v15383_v29 = vpop.f32.mrf.mxu1 }
 0x448   :  { %15642 = vst [vmem:[#allocation9_spill] sm:$0xff] %v15383_v29 }
 0x449   :  { %v15381_v23 = vpop.f32.mrf.mxu0  ;;  %v15387_v20 = vpop.f32.mrf.mxu1 }
 0x44a   :  { %15644 = vst [vmem:[#allocation11_spill] sm:$0xff] %v15387_v20  ;;  %v7666_v20 = vadd.f32 %v14946_v26, %v14735_v41 }
 0x44b   :  { %v15385_v45 = vpop.f32.mrf.mxu0  ;;  %v15389_v33 = vpop.f32.mrf.mxu1 }
 0x44c   :  { %15643 = vst [vmem:[#allocation10_spill] sm:$0xff] %v15385_v45  ;;  %15645 = vst [vmem:[#allocation12_spill] sm:$0xff] %v15389_v33  ;;  %v7668_v33 = vadd.f32 %v14956_v59, %v14742_v37  ;;  %v7676_v37 = vadd.f32 %v15335_v52, %v14776_v32  ;;  %v7778_v59 = vadd.f32 %v7777_v51, %v14982_v25 }
 0x44d   :  { %v15391_v24 = vpop.f32.mrf.mxu0  ;;  %v15393_v38 = vpop.f32.mrf.mxu1  ;;  %v7780_v32 = vadd.f32 %v15343_v46, %v14989_v21 }
 0x44e   :  { %15646 = vst [vmem:[#allocation13_spill] sm:$0xff] %v15391_v24  ;;  %15647 = vst [vmem:[#allocation14_spill] sm:$0xff] %v15393_v38  ;;  %v7768_v38 = vadd.f32 %v7767_v4, %v14939_v2  ;;  %v7831_v25 = vadd.f32 %v15347_v13, %v7778_v59 }
 0x44f   :  { %v15395_v16 = vpop.f32.mrf.mxu0  ;;  %v15397_v53 = vpop.f32.mrf.mxu1 }
 0x450   :  { %15648 = vst [vmem:[#allocation15_spill] sm:$0xff] %v15395_v16  ;;  %15649 = vst [vmem:[#allocation16_spill] sm:$0xff] %v15397_v53  ;;  %v7719_v53 = vadd.f32 %v14948_v36, %v7666_v20  ;;  %v7821_v3 = vadd.f32 %v7820_v56, %v7768_v38  ;;  %v7884_v51 = vadd.f32 %v15361_v6, %v7831_v25 }
 0x451   :  { %v15399_v11 = vpop.f32.mrf.mxu0  ;;  %v15401_v61 = vpop.f32.mrf.mxu1 }
 0x452   :  { %15650 = vst [vmem:[#allocation17_spill] sm:$0xff] %v15399_v11  ;;  %15651 = vst [vmem:[#allocation18_spill] sm:$0xff] %v15401_v61  ;;  %v7770_v11 = vadd.f32 %v7769_v28, %v14951_v12  ;;  %v7721_v61 = vadd.f32 %v14958_v47, %v7668_v33  ;;  %v7874_v44 = vadd.f32 %v7873_v43, %v7821_v3 }
 0x453   :  { %v7678_v33 = vadd.f32 %v15337_v42, %v14781_v40  ;;  %v7729_v28 = vadd.f32 %v15339_v58, %v7676_v37  ;;  %v7833_v58 = vadd.f32 %v15351_v31, %v7780_v32  ;;  %v15655_v3 = vld [vmem:[#allocation10_spill] sm:$0xff]  ;;  %v15662_v59 = vld [vmem:[#allocation12_spill] sm:$0xff] }
 0x454   :  { %v7823_v41 = vadd.f32 %v7822_v10, %v7770_v11  ;;  %v7774_v26 = vadd.f32 %v7773_v34, %v7721_v61  ;;  %v7927_v12 = vadd.f32 %v7926_v39, %v7874_v44  ;;  %v7937_v39 = vadd.f32 %v15367_v30, %v7884_v51  ;;  %v15657_v61 = vld [vmem:[#allocation6_spill] sm:$0xff] }
 0x455   :  { %v7731_v34 = vadd.f32 %v15341_v1, %v7678_v33  ;;  %v7782_v40 = vadd.f32 %v15349_v50, %v7729_v28  ;;  %v7886_v50 = vadd.f32 %v15365_v17, %v7833_v58 }
 0x456   :  { %v7876_v4 = vadd.f32 %v7875_v35, %v7823_v41  ;;  %v7980_v56 = vadd.f32 %v7979_v22, %v7927_v12  ;;  %v15656_v22 = vld [vmem:[#allocation5_spill] sm:$0xff]  ;;  %v15660_v41 = vld [vmem:[#allocation7_spill] sm:$0xff] }
 0x457   :  { %v7784_v21 = vadd.f32 %v15353_v48, %v7731_v34  ;;  %v7835_v1 = vadd.f32 %v15355_v15, %v7782_v40  ;;  %v15653_v48 = vld [vmem:[#allocation4_spill] sm:$0xff]  ;;  %v7939_v17 = vadd.f32 %v15656_v22, %v7886_v50  ;;  %v15664_v32 = vld [vmem:[#allocation15_spill] sm:$0xff]  ;;  %v15665_v40 = vld [vmem:[#allocation14_spill] sm:$0xff] }
 0x458   :  { %v7929_v52 = vadd.f32 %v7928_v8, %v7876_v4  ;;  %v8033_v13 = vadd.f32 %v8032_v57, %v7980_v56  ;;  %v15658_v57 = vld [vmem:[#allocation11_spill] sm:$0xff] }
 0x459   :  { %v7837_v31 = vadd.f32 %v15357_v18, %v7784_v21  ;;  %v7888_v6 = vadd.f32 %v15653_v48, %v7835_v1  ;;  %v15666_v51 = vld [vmem:[#allocation17_spill] sm:$0xff] }
 0x45b   :  { %v7941_v18 = vadd.f32 %v15660_v41, %v7888_v6 }
 0x45d   :  { %v7994_v25 = vadd.f32 %v15664_v32, %v7941_v18 }
 0x483   :  { %v8085_v5 = vpop.f32.mrf.mxu0  ;;  %v15403_v9 = vpop.f32.mrf.mxu1 }
 0x484   :  { %15652 = vst [vmem:[#allocation19_spill] sm:$0xff] %v15403_v9  ;;  %v7772_v9 = vadd.f32 %v7771_v0, %v7719_v53  ;;  %v7827_v53 = vadd.f32 %v15345_v54, %v7774_v26  ;;  %v15661_v26 = vld [vmem:[#allocation13_spill] sm:$0xff] }
 0x485   :  { %v8087_v7 = vpop.f32.mrf.mxu0  ;;  %v15410_v24 = vpop.f32.mrf.mxu1  ;;  %v7992_v37 = vadd.f32 %v15661_v26, %v7939_v17 }
 0x486   :  { %v7825_v2 = vadd.f32 %v7824_v55, %v7772_v9  ;;  %v7880_v0 = vadd.f32 %v7879_v49, %v7827_v53  ;;  %v7982_v55 = vadd.f32 %v7981_v62, %v7929_v52  ;;  %v8086_v49 = vadd.f32 %v8085_v5, %v8033_v13  ;;  %v15667_v13 = vld [vmem:[#allocation16_spill] sm:$0xff] }
 0x487   :  { %v8089_v16 = vpop.f32.mrf.mxu0  ;;  %v15415_v45 = vpop.f32.mrf.mxu1  ;;  %v7990_v9 = vadd.f32 %v15655_v3, %v7937_v39  ;;  %v7890_v62 = vadd.f32 %v15657_v61, %v7837_v31 }
 0x488   :  { %v7878_v47 = vadd.f32 %v7877_v19, %v7825_v2  ;;  %v7933_v46 = vadd.f32 %v15363_v14, %v7880_v0  ;;  %v8035_v19 = vadd.f32 %v15379_v63, %v7982_v55  ;;  %v15654_v14 = vld [vmem:[#allocation9_spill] sm:$0xff] }
 0x489   :  { %v8091_v29 = vpop.f32.mrf.mxu0  ;;  %v15420_v36 = vpop.f32.mrf.mxu1  ;;  %v8043_v4 = vadd.f32 %v15662_v59, %v7990_v9 }
 0x48a   :  { %v7931_v10 = vadd.f32 %v15359_v60, %v7878_v47  ;;  %v7986_v8 = vadd.f32 %v15381_v23, %v7933_v46  ;;  %v8088_v15 = vadd.f32 %v8087_v7, %v8035_v19  ;;  %v15663_v47 = vld [vmem:[#allocation8_spill] sm:$0xff] }
 0x48b   :  { %v8095_v38 = vpop.f32.mrf.mxu0  ;;  %v15425_v11 = vpop.f32.mrf.mxu1  ;;  %v15659_v63 = vld [vmem:[#allocation19_spill] sm:$0xff]  ;;  %v7943_v28 = vadd.f32 %v15663_v47, %v7890_v62 }
 0x48c   :  { %v7984_v43 = vadd.f32 %v7983_v27, %v7931_v10  ;;  %v8039_v27 = vadd.f32 %v15658_v57, %v7986_v8  ;;  %v8139_v23 = vadd.f32 %v15659_v63, %v8086_v49  ;;  %v8141_v7 = vadd.f32 %v15410_v24, %v8088_v15  ;;  %v15668_v49 = vld [vmem:[#allocation18_spill] sm:$0xff] }
 0x48d   :  { %v8097_v42 = vpop.f32.mrf.mxu0  ;;  %v15435_v54 = vpop.f32.mrf.mxu1  ;;  %v8096_v0 = vadd.f32 %v8095_v38, %v8043_v4  ;;  %v8045_v10 = vadd.f32 %v15665_v40, %v7992_v37  ;;  %v7996_v55 = vadd.f32 %v15666_v51, %v7943_v28 }
 0x48e   :  { %v8037_v44 = vadd.f32 %v15654_v14, %v7984_v43  ;;  %v8092_v33 = vadd.f32 %v8091_v29, %v8039_v27  ;;  %v8047_v43 = vadd.f32 %v15667_v13, %v7994_v25 }
 0x48f   :  { %v8099_v35 = vpop.f32.mrf.mxu0  ;;  %v8152_v60 = vpop.f32.mrf.mxu1  ;;  %v8098_v1 = vadd.f32 %v8097_v42, %v8045_v10  ;;  %v8149_v38 = vadd.f32 %v15425_v11, %v8096_v0  ;;  %v8049_v31 = vadd.f32 %v15668_v49, %v7996_v55 }
 0x490   :  { %v8090_v5 = vadd.f32 %v8089_v16, %v8037_v44  ;;  %v8145_v29 = vadd.f32 %v15420_v36, %v8092_v33  ;;  %v8100_v48 = vadd.f32 %v8099_v35, %v8047_v43 }
 0x491   :  { %v8101_v30 = vpop.f32.mrf.mxu0  ;;  %v8154_v20 = vpop.f32.mrf.mxu1  ;;  %v8151_v9 = vadd.f32 %v15435_v54, %v8098_v1 }
 0x492   :  { %v8143_v16 = vadd.f32 %v15415_v45, %v8090_v5  ;;  %v8102_v15 = vadd.f32 %v8101_v30, %v8049_v31  ;;  %v8153_v63 = vadd.f32 %v8152_v60, %v8100_v48 }
 0x4c3   :  { %v8191_v2 = vpop.f32.mrf.mxu0  ;;  %v8244_v12 = vpop.f32.mrf.mxu1 }
 0x4c4   :  { %v8192_v53 = vadd.f32 %v8191_v2, %v8139_v23  ;;  %v8155_v2 = vadd.f32 %v8154_v20, %v8102_v15 }
 0x4c5   :  { %v8193_v52 = vpop.f32.mrf.mxu0  ;;  %v8246_v34 = vpop.f32.mrf.mxu1 }
 0x4c6   :  { %v8194_v56 = vadd.f32 %v8193_v52, %v8141_v7  ;;  %v15462_v58 = vadd.f32 %v8244_v12, %v8192_v53 }
 0x4c7   :  { %v8195_v24 = vpop.f32.mrf.mxu0  ;;  %v8248_v46 = vpop.f32.mrf.mxu1 }
 0x4c8   :  { %v8196_v21 = vadd.f32 %v8195_v24, %v8143_v16  ;;  %v15466_v50 = vadd.f32 %v8246_v34, %v8194_v56  ;;  %v8330_v36 = vmul.f32 %v15462_v58, %v15462_v58 }
 0x4c9   :  { %v8197_v45 = vpop.f32.mrf.mxu0  ;;  %v8250_v8 = vpop.f32.mrf.mxu1 }
 0x4ca   :  { %v15469_v39 = vadd.f32 %v8248_v46, %v8196_v21  ;;  %v8198_v19 = vadd.f32 %v8197_v45, %v8145_v29  ;;  %v8331_v35 = vmul.f32 %v15466_v50, %v15466_v50 }
 0x4cb   :  { %v8201_v6 = vpop.f32.mrf.mxu0  ;;  %v8254_v3 = vpop.f32.mrf.mxu1 }
 0x4cc   :  { %v8277_v14 = vadd.f32 %v15469_v39, %v15462_v58  ;;  %v8334_v42 = vmul.f32 %v15469_v39, %v15469_v39  ;;  %v15478_v44 = vadd.f32 %v8250_v8, %v8198_v19  ;;  %v8202_v11 = vadd.f32 %v8201_v6, %v8149_v38 }
 0x4cd   :  { %v8203_v22 = vpop.f32.mrf.mxu0  ;;  %v8256_v27 = vpop.f32.mrf.mxu1 }
 0x4ce   :  { %v8278_v17 = vrot.slane %v8277_v14, 4  ;;  %v8358_v61 = vadd.f32 %v8334_v42, %v8330_v36  ;;  %v8284_v62 = vadd.f32 %v15478_v44, %v15466_v50  ;;  %v8335_v57 = vmul.f32 %v15478_v44, %v15478_v44 }
 0x4cf   :  { %v15487_v23 = vadd.f32 %v8254_v3, %v8202_v11  ;;  %v8204_v5 = vadd.f32 %v8203_v22, %v8151_v9  ;;  %v8205_v41 = vpop.f32.mrf.mxu0  ;;  %v8258_v37 = vpop.f32.mrf.mxu1 }
 0x4d0   :  { %v8279_v54 = vadd.f32 %v8278_v17, %v8277_v14  ;;  %v8359_v30 = vrot.slane %v8358_v61, 4  ;;  %v8285_v18 = vrot.slane %v8284_v62, 4  ;;  %v8365_v26 = vadd.f32 %v8335_v57, %v8331_v35 }
 0x4d1   :  { %v15489_v59 = vadd.f32 %v8256_v27, %v8204_v5  ;;  %v8206_v4 = vadd.f32 %v8205_v41, %v8153_v63  ;;  %v8207_v7 = vpop.f32.mrf.mxu0  ;;  %v8338_v60 = vmul.f32 %v15487_v23, %v15487_v23  ;;  %v8260_v56 = vpop.f32.mrf.mxu1 }
 0x4d2   :  { %v8280_v33 = vrot.slane %v8279_v54, 2  ;;  %v8360_v53 = vadd.f32 %v8359_v30, %v8358_v61  ;;  %v8286_v12 = vadd.f32 %v8285_v18, %v8284_v62  ;;  %v8366_v47 = vrot.slane %v8365_v26, 4 }
 0x4d3   :  { %v15493_v28 = vadd.f32 %v8258_v37, %v8206_v4  ;;  %v8208_v32 = vadd.f32 %v8207_v7, %v8155_v2  ;;  %v8339_v20 = vmul.f32 %v15489_v59, %v15489_v59 }
 0x4d4   :  { %v8281_v25 = vadd.f32 %v8280_v33, %v8279_v54  ;;  %v8361_v52 = vrot.slane %v8360_v53, 2  ;;  %v8287_v16 = vrot.slane %v8286_v12, 2  ;;  %v8367_v0 = vadd.f32 %v8366_v47, %v8365_v26 }
 0x4d5   :  { %v8305_v34 = vadd.f32 %v15493_v28, %v15487_v23  ;;  %v8342_v40 = vmul.f32 %v15493_v28, %v15493_v28  ;;  %v15501_v10 = vadd.f32 %v8260_v56, %v8208_v32 }
 0x4d6   :  { %v8282_v51 = vrot.slane %v8281_v25, 1  ;;  %v8362_v55 = vadd.f32 %v8361_v52, %v8360_v53  ;;  %v8288_v24 = vadd.f32 %v8287_v16, %v8286_v12  ;;  %v8368_v29 = vrot.slane %v8367_v0, 2 }
 0x4d7   :  { %v8306_v21 = vrot.slane %v8305_v34, 4  ;;  %v8386_v46 = vadd.f32 %v8342_v40, %v8338_v60  ;;  %v8312_v13 = vadd.f32 %v15501_v10, %v15489_v59  ;;  %v8343_v43 = vmul.f32 %v15501_v10, %v15501_v10 }
 0x4d8   :  { %v8283_v1 = vadd.f32 %v8282_v51, %v8281_v25  ;;  %v8363_v45 = vrot.slane %v8362_v55, 1  ;;  %v8289_v38 = vrot.slane %v8288_v24, 1  ;;  %v8369_v19 = vadd.f32 %v8368_v29, %v8367_v0 }
 0x4d9   :  { %v8307_v8 = vadd.f32 %v8306_v21, %v8305_v34  ;;  %v8387_v49 = vrot.slane %v8386_v46, 4  ;;  %v8313_v31 = vrot.slane %v8312_v13, 4  ;;  %v8393_v48 = vadd.f32 %v8343_v43, %v8339_v20 }
 0x4da   :  { %v8322_v36 = vmul.f32 0.0625, %v8283_v1  ;;  %v8364_v6 = vadd.f32 %v8363_v45, %v8362_v55  ;;  %v8290_v14 = vadd.f32 %v8289_v38, %v8288_v24  ;;  %v8370_v42 = vrot.slane %v8369_v19, 1 }
 0x4db   :  { %v8308_v11 = vrot.slane %v8307_v8, 2  ;;  %v8388_v3 = vadd.f32 %v8387_v49, %v8386_v46  ;;  %v8314_v9 = vadd.f32 %v8313_v31, %v8312_v13  ;;  %v8394_v15 = vrot.slane %v8393_v48, 4 }
 0x4dc   :  { %v8402_v35 = vmul.f32 0.0625, %v8364_v6  ;;  %v8410_v22 = vmul.f32 %v8322_v36, %v8322_v36  ;;  %v8430_v17 = vsub.f32 %v15469_v39, %v8322_v36  ;;  %v8323_v61 = vmul.f32 0.0625, %v8290_v14 }
 0x4dd   :  { %v8371_v62 = vadd.f32 %v8370_v42, %v8369_v19  ;;  %v8309_v57 = vadd.f32 %v8308_v11, %v8307_v8  ;;  %v8389_v27 = vrot.slane %v8388_v3, 2  ;;  %v8315_v63 = vrot.slane %v8314_v9, 2 }
 0x4de   :  { %v8418_v5 = vsub.f32 %v8402_v35, %v8410_v22  ;;  %v8411_v41 = vmul.f32 %v8323_v61, %v8323_v61  ;;  %v8431_v54 = vsub.f32 %v15478_v44, %v8323_v61  ;;  %v8395_v30 = vadd.f32 %v8394_v15, %v8393_v48  ;;  %v15672_v22 = vld [vmem:[#allocation31_spill] sm:$0xff] }
 0x4df   :  { %v8403_v18 = vmul.f32 0.0625, %v8371_v62  ;;  %v8310_v26 = vrot.slane %v8309_v57, 1  ;;  %v8390_v37 = vadd.f32 %v8389_v27, %v8388_v3  ;;  %v8316_v2 = vadd.f32 %v8315_v63, %v8314_v9  ;;  %v15673_v27 = vld [vmem:[#allocation30_spill] sm:$0xff] }
 0x4e0   :  { %v8442_v4 = vadd.f32 1e-05, %v8418_v5  ;;  %v8396_v7 = vrot.slane %v8395_v30, 2  ;;  %v8426_v33 = vsub.f32 %v15462_v58, %v8322_v36  ;;  %v8427_v39 = vsub.f32 %v15466_v50, %v8323_v61 }
 0x4e1   :  { %v8419_v53 = vsub.f32 %v8403_v18, %v8411_v41  ;;  %v8311_v12 = vadd.f32 %v8310_v26, %v8309_v57  ;;  %v8391_v47 = vrot.slane %v8390_v37, 1  ;;  %v8317_v60 = vrot.slane %v8316_v2, 1 }
 0x4e2   :  { %11247 = vrsqrt.f32 %v8442_v4  ;;  %v8397_v32 = vadd.f32 %v8396_v7, %v8395_v30 }
 0x4e3   :  { %v8443_v25 = vadd.f32 1e-05, %v8419_v53  ;;  %v8326_v52 = vmul.f32 0.0625, %v8311_v12  ;;  %v8392_v44 = vadd.f32 %v8391_v47, %v8390_v37  ;;  %v8318_v16 = vadd.f32 %v8317_v60, %v8316_v2 }
 0x4e4   :  { %v8398_v0 = vrot.slane %v8397_v32, 1 }
 0x4e5   :  { %11249 = vrsqrt.f32 %v8443_v25  ;;  %v8406_v56 = vmul.f32 0.0625, %v8392_v44  ;;  %v8414_v20 = vmul.f32 %v8326_v52, %v8326_v52  ;;  %v8438_v34 = vsub.f32 %v15493_v28, %v8326_v52  ;;  %v11272_v28 = vld [vmem:[%s15541_s3] sm:$0xf] }
 0x4e6   :  { %v8327_v40 = vmul.f32 0.0625, %v8318_v16  ;;  %v8399_v58 = vadd.f32 %v8398_v0, %v8397_v32  ;;  %v8434_v50 = vsub.f32 %v15487_v23, %v8326_v52  ;;  %v15669_v23 = vld [vmem:[#allocation2_spill] sm:$0xff]  ;;  %v15674_v32 = vld [vmem:[#allocation3_spill] sm:$0xff] }
 0x4e7   :  { %v8422_v51 = vsub.f32 %v8406_v56, %v8414_v20  ;;  %v15670_v19 = vsub.s32 2, %v15669_v23  ;;  %v15671_v6 = vsub.s32 3, %v15669_v23  ;;  %v15675_v56 = vld [vmem:[#allocation32_spill] sm:$0xff] }
 0x4e8   :  { %v8407_v55 = vmul.f32 0.0625, %v8399_v58  ;;  %v8415_v24 = vmul.f32 %v8327_v40, %v8327_v40  ;;  %v8439_v29 = vsub.f32 %v15501_v10, %v8327_v40  ;;  %v8435_v21 = vsub.f32 %v15489_v59, %v8327_v40 }
 0x4e9   :  { %v8446_v46 = vadd.f32 1e-05, %v8422_v51  ;;  %v8533_v8 = vrot.slane %v11272_v28, %v15670_v19  ;;  %v8537_v14 = vrot.slane %v11272_v28, %v15671_v6 }
 0x4ea   :  { %v8423_v13 = vsub.f32 %v8407_v55, %v8415_v24 }
 0x4eb   :  { %11251 = vrsqrt.f32 %v8446_v46 }
 0x4ec   :  { %v8447_v43 = vadd.f32 1e-05, %v8423_v13 }
 0x4ee   :  { %11253 = vrsqrt.f32 %v8447_v43 }
 0x4ef   :  { %v11248_v1 = vpop.eup %11247 }
 0x4f0   :  { %v8462_v45 = vmul.f32 %v11248_v1, %v8430_v17  ;;  %v8458_v38 = vmul.f32 %v11248_v1, %v8426_v33 }
 0x4f2   :  { %v11250_v49 = vpop.eup %11249  ;;  %vm8474_vm8 = vcmp.gt.f32.partialorder %v8458_v38, 0.0  ;;  %v8490_v10 = vmul.f32 0.2, %v8458_v38  ;;  %vm8478_vm9 = vcmp.gt.f32.partialorder %v8462_v45, 0.0  ;;  %v8494_v59 = vmul.f32 0.2, %v8462_v45 }
 0x4f3   :  { %v8463_v31 = vmul.f32 %v11250_v49, %v8431_v54  ;;  %v8459_v48 = vmul.f32 %v11250_v49, %v8427_v39 }
 0x4f4   :  { %v8506_v36 = vsel %vm8474_vm8, %v8458_v38, %v8490_v10  ;;  %v8510_v42 = vsel %vm8478_vm9, %v8462_v45, %v8494_v59 }
 0x4f5   :  { %vm8475_vm10 = vcmp.gt.f32.partialorder %v8459_v48, 0.0  ;;  %v8491_v11 = vmul.f32 0.2, %v8459_v48  ;;  %v8544_v3 = vmul.f32 %v8533_v8, %v8506_v36  ;;  %vm8479_vm11 = vcmp.gt.f32.partialorder %v8463_v31, 0.0 }
 0x4f6   :  { %v8495_v9 = vmul.f32 0.2, %v8463_v31  ;;  %v8548_v15 = vmul.f32 %v8533_v8, %v8510_v42 }
 0x4f7   :  { %v8507_v35 = vsel %vm8475_vm10, %v8459_v48, %v8491_v11  ;;  %v8559_v17 = vadd.f32 %v15672_v22, %v8544_v3 }
 0x4f8   :  { %v11252_v61 = vpop.eup %11251  ;;  %v8545_v62 = vmul.f32 %v8537_v14, %v8507_v35  ;;  %v8511_v57 = vsel %vm8479_vm11, %v8463_v31, %v8495_v9  ;;  %v8564_v63 = vadd.f32 %v15673_v27, %v8548_v15 }
 0x4f9   :  { %v8470_v5 = vmul.f32 %v11252_v61, %v8438_v34  ;;  %v8549_v41 = vmul.f32 %v8537_v14, %v8511_v57  ;;  %v8466_v54 = vmul.f32 %v11252_v61, %v8434_v50 }
 0x4fa   :  { %v8560_v30 = vadd.f32 %v8559_v17, %v8545_v62 }
 0x4fb   :  { %v11254_v18 = vpop.eup %11253  ;;  %v8565_v26 = vadd.f32 %v8564_v63, %v8549_v41  ;;  %vm8482_vm12 = vcmp.gt.f32.partialorder %v8466_v54, 0.0  ;;  %v8498_v37 = vmul.f32 0.2, %v8466_v54  ;;  %vm8486_vm13 = vcmp.gt.f32.partialorder %v8470_v5, 0.0 }
 0x4fc   :  { %v8471_v2 = vmul.f32 %v11254_v18, %v8439_v29  ;;  %8561 = vadd.xlane.f32.xlu0 %v8560_v30  ;;  %v8467_v4 = vmul.f32 %v11254_v18, %v8435_v21  ;;  %v8502_v7 = vmul.f32 0.2, %v8470_v5 }
 0x4fd   :  { %v8514_v33 = vsel %vm8482_vm12, %v8466_v54, %v8498_v37 }
 0x4fe   :  { %vm8483_vm14 = vcmp.gt.f32.partialorder %v8467_v4, 0.0  ;;  %v8499_v39 = vmul.f32 0.2, %v8467_v4  ;;  %v8552_v53 = vmul.f32 %v8533_v8, %v8514_v33  ;;  %vm8487_vm15 = vcmp.gt.f32.partialorder %v8471_v2, 0.0 }
 0x4ff   :  { %v8503_v12 = vmul.f32 0.2, %v8471_v2  ;;  %v8518_v47 = vsel %vm8486_vm13, %v8470_v5, %v8502_v7 }
 0x500   :  { %8566 = vadd.xlane.f32.xlu0 %v8565_v26  ;;  %v8515_v60 = vsel %vm8483_vm14, %v8467_v4, %v8499_v39  ;;  %v8569_v25 = vadd.f32 %v15674_v32, %v8552_v53  ;;  %v8556_v52 = vmul.f32 %v8533_v8, %v8518_v47 }
 0x501   :  { %v8553_v44 = vmul.f32 %v8537_v14, %v8515_v60  ;;  %v8519_v16 = vsel %vm8487_vm15, %v8471_v2, %v8503_v12 }
 0x502   :  { %v8557_v0 = vmul.f32 %v8537_v14, %v8519_v16  ;;  %v8574_v20 = vadd.f32 %v15675_v56, %v8556_v52 }
 0x503   :  { %v8570_v34 = vadd.f32 %v8569_v25, %v8553_v44 }
 0x504   :  { %v8575_v40 = vadd.f32 %v8574_v20, %v8557_v0 }
 0x505   :  { %8571 = vadd.xlane.f32.xlu1 %v8570_v34 }
 0x509   :  { %8576 = vadd.xlane.f32.xlu1 %v8575_v40 }
 0x585   :  { %v8562_v58 = vpop.xlane.xlu0 %8561 }
 0x586   :  { %v9699_v50 = vmul.f32 -1.442695, %v8562_v58 }
 0x588   :  { %11255 = vpow2.f32 %v9699_v50 }
 0x589   :  { %v8567_v51 = vpop.xlane.xlu0 %8566 }
 0x58a   :  { %v9700_v55 = vmul.f32 -1.442695, %v8567_v51 }
 0x58c   :  { %11257 = vpow2.f32 %v9700_v55 }
 0x58e   :  { %v8572_v24 = vpop.xlane.xlu1 %8571 }
 0x58f   :  { %v9701_v29 = vmul.f32 -1.442695, %v8572_v24 }
 0x591   :  { %11259 = vpow2.f32 %v9701_v29 }
 0x592   :  { %v8577_v21 = vpop.xlane.xlu1 %8576 }
 0x593   :  { %v9702_v46 = vmul.f32 -1.442695, %v8577_v21 }
 0x595   :  { %v11256_v13 = vpop.eup %11255  ;;  %11261 = vpow2.f32 %v9702_v46 }
 0x596   :  { %v8590_v43 = vadd.f32 1.0, %v11256_v13 }
 0x598   :  { %11263 = vrcp.f32 %v8590_v43 }
 0x599   :  { %v11258_v1 = vpop.eup %11257 }
 0x59a   :  { %v8591_v45 = vadd.f32 1.0, %v11258_v1 }
 0x59c   :  { %11265 = vrcp.f32 %v8591_v45 }
 0x59e   :  { %v11260_v38 = vpop.eup %11259 }
 0x59f   :  { %v8592_v28 = vadd.f32 1.0, %v11260_v38 }
 0x5a1   :  { %11267 = vrcp.f32 %v8592_v28 }
 0x5a2   :  { %v11262_v23 = vpop.eup %11261 }
 0x5a3   :  { %v8593_v19 = vadd.f32 1.0, %v11262_v23 }
 0x5a5   :  { %v11264_v8 = vpop.eup %11263  ;;  %11269 = vrcp.f32 %v8593_v19 }
 0x5a6   :  { %8603 = vst.msk [vmem:[%s15542_s4] sm:$0xff] %vm8602_vm0, %v11264_v8 }
 0x5a9   :  { %v11266_v49 = vpop.eup %11265 }
 0x5aa   :  { %8604 = vst.msk [vmem:[%s15542_s4 + $0x8] sm:$0xff] %vm8602_vm0, %v11266_v49 }
 0x5ae   :  { %v11268_v10 = vpop.eup %11267 }
 0x5af   :  { %8605 = vst.msk [vmem:[%s15542_s4 + $0x10] sm:$0xff] %vm8602_vm0, %v11268_v10 }
 0x5b2   :  { %v11270_v59 = vpop.eup %11269 }
 0x5b3   :  { %8606 = vst.msk [vmem:[%s15542_s4 + $0x18] sm:$0xff] %vm8602_vm0, %v11270_v59 }

</bundles_post_ra>
